<compile_context>
chip_gen: v6e
topology: v6e:2x2x1
jax: 0.10.0
libtpu: 0.0.40
codegen_flags: <defaults>
</compile_context>

<pallas_src>
import functools

import jax
import jax.numpy as jnp
from jax.experimental import pallas as pl
from jax.experimental.pallas import tpu as pltpu

_EPS = 1e-5
_VMEM_LIMIT = 32 * 1024 * 1024  # fits the scoped default on v5e..v7x with headroom


# ----------------------------- parameter folding ----------------------------

def _fold_bn(p):
    """Inference-mode BatchNorm -> per-channel (scale, bias)."""
    scale = p["gamma"] * jax.lax.rsqrt(p["var"] + _EPS)
    bias = p["beta"] - p["mean"] * scale
    return scale, bias


def _s2d_weights(w, stride):
    """(K, K, Cin, Cout) conv weights -> (Kq*Kq, stride^2*Cin, Cout) taps of the
    equivalent stride-1 conv on the space-to-depth rearranged input."""
    K, _, cin, cout = w.shape
    if stride == 1:
        return w.reshape(K * K, cin, cout)
    kq = -(-K // stride)
    zero = jnp.zeros((cin, cout), w.dtype)
    taps = []
    for qh in range(kq):
        for qw in range(kq):
            parts = []
            for rh in range(stride):
                for rw in range(stride):
                    kh, kw = stride * qh + rh, stride * qw + rw
                    parts.append(w[kh, kw] if (kh < K and kw < K) else zero)
            taps.append(jnp.concatenate(parts, axis=0))
    return jnp.stack(taps)


def _s2d_input(x, K, stride, pad, ho, wo):
    """Zero-pad x (like Conv2d) and, for stride>1, space-to-depth it so the conv
    becomes a stride-1 VALID conv.  Returns (B, HS, WS, stride^2*Cin)."""
    _, H, W, _ = x.shape
    kq = -(-K // stride)
    hs, ws = ho + kq - 1, wo + kq - 1
    eh = max(0, stride * hs - (H + 2 * pad))
    ew = max(0, stride * ws - (W + 2 * pad))
    xp = jnp.pad(x, ((0, 0), (pad, pad + eh), (pad, pad + ew), (0, 0)))
    if stride == 1:
        return xp
    phases = []
    for rh in range(stride):
        for rw in range(stride):
            phases.append(xp[:, rh:rh + stride * hs:stride,
                             rw:rw + stride * ws:stride, :])
    return jnp.concatenate(phases, axis=-1)


# ----------------------------- Pallas kernels -------------------------------

def _conv_kernel(*refs, kq, relu, has_res, has_ds):
    """Fused stride-1 conv + BN (+ReLU) (+post-activation residual) (+fused 1x1
    downsample second output).  One batch image per grid step; the Kq*Kq tap
    reduction runs as bf16 MXU matmuls per output row, accumulated in f32."""
    x_ref, w_ref, s_ref, b_ref = refs[:4]
    i = 4
    r_ref = None
    if has_res:
        r_ref = refs[i]
        i += 1
    o_ref = refs[i]
    i += 1
    ds_ref = refs[i] if has_ds else None

    ho, wo, c_main = o_ref.shape
    ct = w_ref.shape[-1]
    scale = s_ref[...]            # (1, Ct) f32
    bias = b_ref[...]             # (1, Ct) f32

    def row_body(oh, carry):
        acc = jnp.zeros((wo, ct), jnp.float32)
        for kh in range(kq):
            for kw in range(kq):
                patch = x_ref[oh + kh, kw:kw + wo, :]          # (WO, Cs) bf16
                acc = acc + jnp.dot(patch, w_ref[kh * kq + kw],
                                    preferred_element_type=jnp.float32)
        y = acc * scale + bias                                  # f32 epilogue
        if has_ds:
            # main channels get ReLU; fused downsample channels are BN only.
            o_ref[oh] = jnp.maximum(y[:, :c_main], 0.0).astype(o_ref.dtype)
            ds_ref[oh] = y[:, c_main:].astype(ds_ref.dtype)
        else:
            if relu:
                y = jnp.maximum(y, 0.0)
            if has_res:
                # residual is added AFTER the activation: net(x) + downsample(x)
                y = y + r_ref[oh]
            o_ref[oh] = y.astype(o_ref.dtype)
        return carry

    jax.lax.fori_loop(0, ho, row_body, 0)


def _maxpool_kernel(x_ref, o_ref):
    """2x2/stride-2 max pool.  The wrapper reshapes (H, W, C) -> (H, W/2, 2C)
    (metadata-only), so W-pooling is a lane slice and H-pooling a leading-dim
    split: one read, one write, no strided HBM copies."""
    h2, w2, c = o_ref.shape
    x = x_ref[...]                                  # (H, W/2, 2C)
    xw = jnp.maximum(x[..., :c], x[..., c:])        # pool along W -> (H, W/2, C)
    xw = xw.reshape(h2, 2, w2, c)                   # split leading dim (free)
    o_ref[...] = jnp.maximum(xw[:, 0], xw[:, 1]).astype(o_ref.dtype)


def _head_kernel(x_ref, w_ref, b_ref, o_ref):
    """Global spatial mean + Linear."""
    feat = jnp.mean(x_ref[...], axis=1)             # (B, C)
    o_ref[...] = (jnp.dot(feat, w_ref[...], preferred_element_type=jnp.float32)
                  + b_ref[...]).astype(o_ref.dtype)


# ----------------------------- wrappers --------------------------------------

def fused_conv(x, p, *, stride=1, relu=True, residual=None, ds=None):
    """Conv2d(bias=False, padding=K//2, stride) + BN (+ReLU) (+residual)
    (+fused 1x1 downsample+BN second output).  x: (B, H, W, Cin) f32 NHWC."""
    assert residual is None or ds is None
    B, H, W, cin = x.shape
    K = p["w"].shape[0]
    pad = K // 2
    ho = (H + 2 * pad - K) // stride + 1
    wo = (W + 2 * pad - K) // stride + 1
    kq = -(-K // stride)

    w = p["w"]
    scale, bias = _fold_bn(p)
    c_main = w.shape[-1]
    c_ds = 0
    if ds is not None:
        assert stride == 1, "fused downsample requires stride 1 (max_pooling=True)"
        c_ds = ds["w"].shape[-1]
        w_ds = jnp.zeros((K, K, cin, c_ds), w.dtype).at[pad, pad].set(ds["w"][0, 0])
        w = jnp.concatenate([w, w_ds], axis=-1)          # wider, lane-denser N
        s2, b2 = _fold_bn(ds)
        scale = jnp.concatenate([scale, s2])
        bias = jnp.concatenate([bias, b2])

    xs = _s2d_input(x.astype(jnp.bfloat16), K, stride, pad, ho, wo)
    wsq = _s2d_weights(w, stride).astype(jnp.bfloat16)
    scale = scale[None, :].astype(jnp.float32)
    bias = bias[None, :].astype(jnp.float32)

    _, hs, ws_, cs = xs.shape
    t, _, ct = wsq.shape

    args = [xs, wsq, scale, bias]
    in_specs = [
        pl.BlockSpec((None, hs, ws_, cs), lambda b: (b, 0, 0, 0)),
        pl.BlockSpec((t, cs, ct), lambda b: (0, 0, 0)),
        pl.BlockSpec((1, ct), lambda b: (0, 0)),
        pl.BlockSpec((1, ct), lambda b: (0, 0)),
    ]
    if residual is not None:
        args.append(residual.astype(jnp.float32))
        in_specs.append(pl.BlockSpec((None, ho, wo, c_main), lambda b: (b, 0, 0, 0)))

    out_shape = jax.ShapeDtypeStruct((B, ho, wo, c_main), jnp.float32)
    out_specs = pl.BlockSpec((None, ho, wo, c_main), lambda b: (b, 0, 0, 0))
    if ds is not None:
        out_shape = (out_shape, jax.ShapeDtypeStruct((B, ho, wo, c_ds), jnp.float32))
        out_specs = (out_specs,
                     pl.BlockSpec((None, ho, wo, c_ds), lambda b: (b, 0, 0, 0)))

    kernel = functools.partial(_conv_kernel, kq=kq, relu=relu,
                               has_res=residual is not None,
                               has_ds=ds is not None)
    flops = 2 * B * ho * wo * t * cs * ct
    bytes_accessed = (xs.size * 2 + wsq.size * 2 + B * ho * wo * ct * 4
                      + (residual.size * 4 if residual is not None else 0))

    return pl.pallas_call(
        kernel,
        grid=(B,),
        in_specs=in_specs,
        out_specs=out_specs,
        out_shape=out_shape,
        compiler_params=pltpu.CompilerParams(
            dimension_semantics=("parallel",),
            vmem_limit_bytes=_VMEM_LIMIT),
        cost_estimate=pl.CostEstimate(flops=flops, transcendentals=0,
                                      bytes_accessed=bytes_accessed),
    )(*args)


def maxpool2x2(x):
    """MaxPool2d(kernel=2, stride=2) on NHWC in one Pallas kernel."""
    B, H, W, C = x.shape
    h2, w2 = H // 2, W // 2
    xr = x.reshape(B, H, w2, 2 * C)       # metadata-only reshape in XLA
    return pl.pallas_call(
        _maxpool_kernel,
        grid=(B,),
        in_specs=[pl.BlockSpec((None, H, w2, 2 * C), lambda b: (b, 0, 0, 0))],
        out_specs=pl.BlockSpec((None, h2, w2, C), lambda b: (b, 0, 0, 0)),
        out_shape=jax.ShapeDtypeStruct((B, h2, w2, C), x.dtype),
        compiler_params=pltpu.CompilerParams(
            dimension_semantics=("parallel",),
            vmem_limit_bytes=_VMEM_LIMIT),
    )(xr)


def head(x, p):
    """Global spatial mean + Linear.  x: (B, H, W, C) -> (B, out_channels)."""
    B, H, W, C = x.shape
    out_c = p["w"].shape[1]
    vmem = pl.BlockSpec(memory_space=pltpu.MemorySpace.VMEM)
    return pl.pallas_call(
        _head_kernel,
        in_specs=[vmem, vmem, vmem],
        out_specs=vmem,
        out_shape=jax.ShapeDtypeStruct((B, out_c), jnp.float32),
        compiler_params=pltpu.CompilerParams(vmem_limit_bytes=_VMEM_LIMIT),
    )(x.reshape(B, H * W, C), p["w"], p["b"][None, :])


def forward(params, x_nchw):
    """CNNClassifier.forward.  x_nchw: (B, C_in, H, W) -> (B, out_channels)."""
    # NCHW (PyTorch) -> NHWC (channels on TPU lanes).
    x = jnp.transpose(x_nchw, (0, 2, 3, 1)).astype(jnp.float32)

    # Input BatchNorm (inference): per-channel affine folded into XLA glue that
    # fuses with the stem's padding / space-to-depth (no separate kernel).
    s_in, b_in = _fold_bn(params["norm"])
    x = x * s_in + b_in

    # Stem: Conv(K=7, stride=2, pad=3) + BN + ReLU; only strided outputs computed.
    x = fused_conv(x, params["stem"], stride=2, relu=True)

    # Blocks (stride 1 inside since max_pooling=True) + MaxPool2d(2, 2).
    for blk in params["blocks"]:
        if blk["downsample"] is not None:
            h, res = fused_conv(x, blk["conv1"], relu=True, ds=blk["downsample"])
        else:
            h, res = fused_conv(x, blk["conv1"], relu=True), x
        h = fused_conv(h, blk["conv2"], relu=True)
        x = fused_conv(h, blk["conv3"], relu=True, residual=res)
        x = maxpool2x2(x)

    # Classifier on the global spatial mean.
    return head(x, params["classifier"])


# ----------------------------- parameter init --------------------------------

def _bn_params(key, c):
    kg, kb, km, kv = jax.random.split(key, 4)
    return dict(
        gamma=jax.random.uniform(kg, (c,), jnp.float32, 0.5, 1.5),
        beta=jax.random.normal(kb, (c,), jnp.float32) * 0.1,
        mean=jax.random.normal(km, (c,), jnp.float32) * 0.1,
        var=jax.random.uniform(kv, (c,), jnp.float32, 0.5, 1.5),
    )


def _conv_bn_params(key, k, cin, cout):
    kw, kbn = jax.random.split(key)
    p = _bn_params(kbn, cout)
    p["w"] = jax.random.normal(kw, (k, k, cin, cout), jnp.float32) * ((k * k * cin) ** -0.5)
    return p


def init_params(key, dim_layers, in_channels, out_channels, in_kernel_size):
    keys = iter(jax.random.split(key, 64))
    params = {
        "norm": _bn_params(next(keys), in_channels),
        "stem": _conv_bn_params(next(keys), in_kernel_size, in_channels, dim_layers[0]),
    }
    blocks = []
    c = dim_layers[0]
    for l in dim_layers[1:]:
        blocks.append(dict(
            conv1=_conv_bn_params(next(keys), 3, c, l),
            conv2=_conv_bn_params(next(keys), 3, l, l),
            conv3=_conv_bn_params(next(keys), 3, l, l),
            downsample=(_conv_bn_params(next(keys), 1, c, l) if c != l else None),
        ))
        c = l
    params["blocks"] = blocks
    kw, kb = jax.random.split(next(keys))
    params["classifier"] = dict(
        w=jax.random.normal(kw, (c, out_channels), jnp.float32) * (c ** -0.5),
        b=jax.random.normal(kb, (out_channels,), jnp.float32) * 0.1,
    )
    return params


# --------------------------------- main ---------------------------------------

if __name__ == "__main__":
    key = jax.random.PRNGKey(0)
    kp, kx = jax.random.split(key)

    # Small config consistent with the module: dim_layers, in_channels=3,
    # out_channels=1, in_kernel_size=7, in_stride=2, max_pooling=True,
    # residual=True, block_conv_layers=3.
    dim_layers = [16, 32, 64, 64]
    in_channels, out_channels = 3, 1
    params = init_params(kp, dim_layers, in_channels, out_channels, in_kernel_size=7)

    # Input in PyTorch's NCHW convention: (B, C_in, H, W)
    x = jax.random.normal(kx, (2, in_channels, 32, 32), jnp.float32)

    y = jax.jit(forward)(params, x)
    jax.block_until_ready(y)
    assert y.shape == (2, out_channels) and y.dtype == jnp.float32

    print("KERNEL_OK")
</pallas_src>

<mosaic_0001>
module attributes {stable_mosaic.version = 11 : i64} {
  func.func @_conv_kernel(%arg0: i32, %arg1: memref<1x19x19x12xbf16, #tpu.memory_space<vmem>>, %arg2: memref<16x12x16xbf16, #tpu.memory_space<vmem>>, %arg3: memref<1x16xf32, #tpu.memory_space<vmem>>, %arg4: memref<1x16xf32, #tpu.memory_space<vmem>>, %arg5: memref<1x16x16x16xf32, #tpu.memory_space<vmem>>) attributes {dimension_semantics = [#tpu.dimension_semantics<parallel>], iteration_bounds = array<i64: 2>, scalar_prefetch = 0 : i64, scratch_operands = 0 : i64, tpu.core_type = #tpu.core_type<tc>, window_params = [{transform_indices = @transform_0, window_bounds = array<i64: 1, 19, 19, 12>}, {pipeline_mode = #tpu.pipeline_mode<synchronous>, transform_indices = @transform_1, window_bounds = array<i64: 16, 12, 16>}, {pipeline_mode = #tpu.pipeline_mode<synchronous>, transform_indices = @transform_2, window_bounds = array<i64: 1, 16>}, {pipeline_mode = #tpu.pipeline_mode<synchronous>, transform_indices = @transform_3, window_bounds = array<i64: 1, 16>}, {transform_indices = @transform_4, window_bounds = array<i64: 1, 16, 16, 16>}]} {
    %c0 = arith.constant 0 : index
    %c0_0 = arith.constant 0 : index
    %0 = vector.load %arg3[%c0, %c0_0] : memref<1x16xf32, #tpu.memory_space<vmem>>, vector<1x16xf32>
    %c0_1 = arith.constant 0 : index
    %c0_2 = arith.constant 0 : index
    %1 = vector.load %arg4[%c0_1, %c0_2] : memref<1x16xf32, #tpu.memory_space<vmem>>, vector<1x16xf32>
    %c0_i32 = arith.constant 0 : i32
    %c16_i32 = arith.constant 16 : i32
    %2 = arith.addi %c0_i32, %c16_i32 : i32
    %c1_i32 = arith.constant 1 : i32
    scf.for %arg6 = %c0_i32 to %2 step %c1_i32  : i32 {
      %cst = arith.constant 0.000000e+00 : f32
      %3 = vector.broadcast %cst : f32 to vector<16x16xf32>
      %c0_i32_4 = arith.constant 0 : i32
      %4 = arith.addi %arg6, %c0_i32_4 : i32
      %c0_5 = arith.constant 0 : index
      %5 = arith.index_cast %4 : i32 to index
      %c0_6 = arith.constant 0 : index
      %c0_7 = arith.constant 0 : index
      %6 = vector.load %arg1[%c0_5, %5, %c0_6, %c0_7] : memref<1x19x19x12xbf16, #tpu.memory_space<vmem>>, vector<1x1x16x12xbf16>
      %7 = vector.shape_cast %6 : vector<1x1x16x12xbf16> to vector<16x12xbf16>
      %c0_8 = arith.constant 0 : index
      %c0_9 = arith.constant 0 : index
      %c0_10 = arith.constant 0 : index
      %8 = vector.load %arg2[%c0_8, %c0_9, %c0_10] : memref<16x12x16xbf16, #tpu.memory_space<vmem>>, vector<1x12x16xbf16>
      %9 = vector.shape_cast %8 : vector<1x12x16xbf16> to vector<12x16xbf16>
      %cst_11 = arith.constant dense<0.000000e+00> : vector<16x16xf32>
      %10 = tpu.matmul %7, %9, %cst_11 {dimension_numbers = #tpu.dot_dimension_numbers<[1], [0], [0], [1], [0, 0, 1, 1], [], []>} : vector<16x12xbf16>, vector<12x16xbf16>, vector<16x16xf32> -> vector<16x16xf32>
      %11 = arith.addf %3, %10 : vector<16x16xf32>
      %c0_i32_12 = arith.constant 0 : i32
      %12 = arith.addi %arg6, %c0_i32_12 : i32
      %c0_13 = arith.constant 0 : index
      %13 = arith.index_cast %12 : i32 to index
      %c1 = arith.constant 1 : index
      %c0_14 = arith.constant 0 : index
      %14 = vector.load %arg1[%c0_13, %13, %c1, %c0_14] : memref<1x19x19x12xbf16, #tpu.memory_space<vmem>>, vector<1x1x16x12xbf16>
      %15 = vector.shape_cast %14 : vector<1x1x16x12xbf16> to vector<16x12xbf16>
      %c1_15 = arith.constant 1 : index
      %c0_16 = arith.constant 0 : index
      %c0_17 = arith.constant 0 : index
      %16 = vector.load %arg2[%c1_15, %c0_16, %c0_17] : memref<16x12x16xbf16, #tpu.memory_space<vmem>>, vector<1x12x16xbf16>
      %17 = vector.shape_cast %16 : vector<1x12x16xbf16> to vector<12x16xbf16>
      %cst_18 = arith.constant dense<0.000000e+00> : vector<16x16xf32>
      %18 = tpu.matmul %15, %17, %cst_18 {dimension_numbers = #tpu.dot_dimension_numbers<[1], [0], [0], [1], [0, 0, 1, 1], [], []>} : vector<16x12xbf16>, vector<12x16xbf16>, vector<16x16xf32> -> vector<16x16xf32>
      %19 = arith.addf %11, %18 : vector<16x16xf32>
      %c0_i32_19 = arith.constant 0 : i32
      %20 = arith.addi %arg6, %c0_i32_19 : i32
      %c0_20 = arith.constant 0 : index
      %21 = arith.index_cast %20 : i32 to index
      %c2 = arith.constant 2 : index
      %c0_21 = arith.constant 0 : index
      %22 = vector.load %arg1[%c0_20, %21, %c2, %c0_21] : memref<1x19x19x12xbf16, #tpu.memory_space<vmem>>, vector<1x1x16x12xbf16>
      %23 = vector.shape_cast %22 : vector<1x1x16x12xbf16> to vector<16x12xbf16>
      %c2_22 = arith.constant 2 : index
      %c0_23 = arith.constant 0 : index
      %c0_24 = arith.constant 0 : index
      %24 = vector.load %arg2[%c2_22, %c0_23, %c0_24] : memref<16x12x16xbf16, #tpu.memory_space<vmem>>, vector<1x12x16xbf16>
      %25 = vector.shape_cast %24 : vector<1x12x16xbf16> to vector<12x16xbf16>
      %cst_25 = arith.constant dense<0.000000e+00> : vector<16x16xf32>
      %26 = tpu.matmul %23, %25, %cst_25 {dimension_numbers = #tpu.dot_dimension_numbers<[1], [0], [0], [1], [0, 0, 1, 1], [], []>} : vector<16x12xbf16>, vector<12x16xbf16>, vector<16x16xf32> -> vector<16x16xf32>
      %27 = arith.addf %19, %26 : vector<16x16xf32>
      %c0_i32_26 = arith.constant 0 : i32
      %28 = arith.addi %arg6, %c0_i32_26 : i32
      %c0_27 = arith.constant 0 : index
      %29 = arith.index_cast %28 : i32 to index
      %c3 = arith.constant 3 : index
      %c0_28 = arith.constant 0 : index
      %30 = vector.load %arg1[%c0_27, %29, %c3, %c0_28] : memref<1x19x19x12xbf16, #tpu.memory_space<vmem>>, vector<1x1x16x12xbf16>
      %31 = vector.shape_cast %30 : vector<1x1x16x12xbf16> to vector<16x12xbf16>
      %c3_29 = arith.constant 3 : index
      %c0_30 = arith.constant 0 : index
      %c0_31 = arith.constant 0 : index
      %32 = vector.load %arg2[%c3_29, %c0_30, %c0_31] : memref<16x12x16xbf16, #tpu.memory_space<vmem>>, vector<1x12x16xbf16>
      %33 = vector.shape_cast %32 : vector<1x12x16xbf16> to vector<12x16xbf16>
      %cst_32 = arith.constant dense<0.000000e+00> : vector<16x16xf32>
      %34 = tpu.matmul %31, %33, %cst_32 {dimension_numbers = #tpu.dot_dimension_numbers<[1], [0], [0], [1], [0, 0, 1, 1], [], []>} : vector<16x12xbf16>, vector<12x16xbf16>, vector<16x16xf32> -> vector<16x16xf32>
      %35 = arith.addf %27, %34 : vector<16x16xf32>
      %c1_i32_33 = arith.constant 1 : i32
      %36 = arith.addi %arg6, %c1_i32_33 : i32
      %c0_34 = arith.constant 0 : index
      %37 = arith.index_cast %36 : i32 to index
      %c0_35 = arith.constant 0 : index
      %c0_36 = arith.constant 0 : index
      %38 = vector.load %arg1[%c0_34, %37, %c0_35, %c0_36] : memref<1x19x19x12xbf16, #tpu.memory_space<vmem>>, vector<1x1x16x12xbf16>
      %39 = vector.shape_cast %38 : vector<1x1x16x12xbf16> to vector<16x12xbf16>
      %c4 = arith.constant 4 : index
      %c0_37 = arith.constant 0 : index
      %c0_38 = arith.constant 0 : index
      %40 = vector.load %arg2[%c4, %c0_37, %c0_38] : memref<16x12x16xbf16, #tpu.memory_space<vmem>>, vector<1x12x16xbf16>
      %41 = vector.shape_cast %40 : vector<1x12x16xbf16> to vector<12x16xbf16>
      %cst_39 = arith.constant dense<0.000000e+00> : vector<16x16xf32>
      %42 = tpu.matmul %39, %41, %cst_39 {dimension_numbers = #tpu.dot_dimension_numbers<[1], [0], [0], [1], [0, 0, 1, 1], [], []>} : vector<16x12xbf16>, vector<12x16xbf16>, vector<16x16xf32> -> vector<16x16xf32>
      %43 = arith.addf %35, %42 : vector<16x16xf32>
      %c1_i32_40 = arith.constant 1 : i32
      %44 = arith.addi %arg6, %c1_i32_40 : i32
      %c0_41 = arith.constant 0 : index
      %45 = arith.index_cast %44 : i32 to index
      %c1_42 = arith.constant 1 : index
      %c0_43 = arith.constant 0 : index
      %46 = vector.load %arg1[%c0_41, %45, %c1_42, %c0_43] : memref<1x19x19x12xbf16, #tpu.memory_space<vmem>>, vector<1x1x16x12xbf16>
      %47 = vector.shape_cast %46 : vector<1x1x16x12xbf16> to vector<16x12xbf16>
      %c5 = arith.constant 5 : index
      %c0_44 = arith.constant 0 : index
      %c0_45 = arith.constant 0 : index
      %48 = vector.load %arg2[%c5, %c0_44, %c0_45] : memref<16x12x16xbf16, #tpu.memory_space<vmem>>, vector<1x12x16xbf16>
      %49 = vector.shape_cast %48 : vector<1x12x16xbf16> to vector<12x16xbf16>
      %cst_46 = arith.constant dense<0.000000e+00> : vector<16x16xf32>
      %50 = tpu.matmul %47, %49, %cst_46 {dimension_numbers = #tpu.dot_dimension_numbers<[1], [0], [0], [1], [0, 0, 1, 1], [], []>} : vector<16x12xbf16>, vector<12x16xbf16>, vector<16x16xf32> -> vector<16x16xf32>
      %51 = arith.addf %43, %50 : vector<16x16xf32>
      %c1_i32_47 = arith.constant 1 : i32
      %52 = arith.addi %arg6, %c1_i32_47 : i32
      %c0_48 = arith.constant 0 : index
      %53 = arith.index_cast %52 : i32 to index
      %c2_49 = arith.constant 2 : index
      %c0_50 = arith.constant 0 : index
      %54 = vector.load %arg1[%c0_48, %53, %c2_49, %c0_50] : memref<1x19x19x12xbf16, #tpu.memory_space<vmem>>, vector<1x1x16x12xbf16>
      %55 = vector.shape_cast %54 : vector<1x1x16x12xbf16> to vector<16x12xbf16>
      %c6 = arith.constant 6 : index
      %c0_51 = arith.constant 0 : index
      %c0_52 = arith.constant 0 : index
      %56 = vector.load %arg2[%c6, %c0_51, %c0_52] : memref<16x12x16xbf16, #tpu.memory_space<vmem>>, vector<1x12x16xbf16>
      %57 = vector.shape_cast %56 : vector<1x12x16xbf16> to vector<12x16xbf16>
      %cst_53 = arith.constant dense<0.000000e+00> : vector<16x16xf32>
      %58 = tpu.matmul %55, %57, %cst_53 {dimension_numbers = #tpu.dot_dimension_numbers<[1], [0], [0], [1], [0, 0, 1, 1], [], []>} : vector<16x12xbf16>, vector<12x16xbf16>, vector<16x16xf32> -> vector<16x16xf32>
      %59 = arith.addf %51, %58 : vector<16x16xf32>
      %c1_i32_54 = arith.constant 1 : i32
      %60 = arith.addi %arg6, %c1_i32_54 : i32
      %c0_55 = arith.constant 0 : index
      %61 = arith.index_cast %60 : i32 to index
      %c3_56 = arith.constant 3 : index
      %c0_57 = arith.constant 0 : index
      %62 = vector.load %arg1[%c0_55, %61, %c3_56, %c0_57] : memref<1x19x19x12xbf16, #tpu.memory_space<vmem>>, vector<1x1x16x12xbf16>
      %63 = vector.shape_cast %62 : vector<1x1x16x12xbf16> to vector<16x12xbf16>
      %c7 = arith.constant 7 : index
      %c0_58 = arith.constant 0 : index
      %c0_59 = arith.constant 0 : index
      %64 = vector.load %arg2[%c7, %c0_58, %c0_59] : memref<16x12x16xbf16, #tpu.memory_space<vmem>>, vector<1x12x16xbf16>
      %65 = vector.shape_cast %64 : vector<1x12x16xbf16> to vector<12x16xbf16>
      %cst_60 = arith.constant dense<0.000000e+00> : vector<16x16xf32>
      %66 = tpu.matmul %63, %65, %cst_60 {dimension_numbers = #tpu.dot_dimension_numbers<[1], [0], [0], [1], [0, 0, 1, 1], [], []>} : vector<16x12xbf16>, vector<12x16xbf16>, vector<16x16xf32> -> vector<16x16xf32>
      %67 = arith.addf %59, %66 : vector<16x16xf32>
      %c2_i32 = arith.constant 2 : i32
      %68 = arith.addi %arg6, %c2_i32 : i32
      %c0_61 = arith.constant 0 : index
      %69 = arith.index_cast %68 : i32 to index
      %c0_62 = arith.constant 0 : index
      %c0_63 = arith.constant 0 : index
      %70 = vector.load %arg1[%c0_61, %69, %c0_62, %c0_63] : memref<1x19x19x12xbf16, #tpu.memory_space<vmem>>, vector<1x1x16x12xbf16>
      %71 = vector.shape_cast %70 : vector<1x1x16x12xbf16> to vector<16x12xbf16>
      %c8 = arith.constant 8 : index
      %c0_64 = arith.constant 0 : index
      %c0_65 = arith.constant 0 : index
      %72 = vector.load %arg2[%c8, %c0_64, %c0_65] : memref<16x12x16xbf16, #tpu.memory_space<vmem>>, vector<1x12x16xbf16>
      %73 = vector.shape_cast %72 : vector<1x12x16xbf16> to vector<12x16xbf16>
      %cst_66 = arith.constant dense<0.000000e+00> : vector<16x16xf32>
      %74 = tpu.matmul %71, %73, %cst_66 {dimension_numbers = #tpu.dot_dimension_numbers<[1], [0], [0], [1], [0, 0, 1, 1], [], []>} : vector<16x12xbf16>, vector<12x16xbf16>, vector<16x16xf32> -> vector<16x16xf32>
      %75 = arith.addf %67, %74 : vector<16x16xf32>
      %c2_i32_67 = arith.constant 2 : i32
      %76 = arith.addi %arg6, %c2_i32_67 : i32
      %c0_68 = arith.constant 0 : index
      %77 = arith.index_cast %76 : i32 to index
      %c1_69 = arith.constant 1 : index
      %c0_70 = arith.constant 0 : index
      %78 = vector.load %arg1[%c0_68, %77, %c1_69, %c0_70] : memref<1x19x19x12xbf16, #tpu.memory_space<vmem>>, vector<1x1x16x12xbf16>
      %79 = vector.shape_cast %78 : vector<1x1x16x12xbf16> to vector<16x12xbf16>
      %c9 = arith.constant 9 : index
      %c0_71 = arith.constant 0 : index
      %c0_72 = arith.constant 0 : index
      %80 = vector.load %arg2[%c9, %c0_71, %c0_72] : memref<16x12x16xbf16, #tpu.memory_space<vmem>>, vector<1x12x16xbf16>
      %81 = vector.shape_cast %80 : vector<1x12x16xbf16> to vector<12x16xbf16>
      %cst_73 = arith.constant dense<0.000000e+00> : vector<16x16xf32>
      %82 = tpu.matmul %79, %81, %cst_73 {dimension_numbers = #tpu.dot_dimension_numbers<[1], [0], [0], [1], [0, 0, 1, 1], [], []>} : vector<16x12xbf16>, vector<12x16xbf16>, vector<16x16xf32> -> vector<16x16xf32>
      %83 = arith.addf %75, %82 : vector<16x16xf32>
      %c2_i32_74 = arith.constant 2 : i32
      %84 = arith.addi %arg6, %c2_i32_74 : i32
      %c0_75 = arith.constant 0 : index
      %85 = arith.index_cast %84 : i32 to index
      %c2_76 = arith.constant 2 : index
      %c0_77 = arith.constant 0 : index
      %86 = vector.load %arg1[%c0_75, %85, %c2_76, %c0_77] : memref<1x19x19x12xbf16, #tpu.memory_space<vmem>>, vector<1x1x16x12xbf16>
      %87 = vector.shape_cast %86 : vector<1x1x16x12xbf16> to vector<16x12xbf16>
      %c10 = arith.constant 10 : index
      %c0_78 = arith.constant 0 : index
      %c0_79 = arith.constant 0 : index
      %88 = vector.load %arg2[%c10, %c0_78, %c0_79] : memref<16x12x16xbf16, #tpu.memory_space<vmem>>, vector<1x12x16xbf16>
      %89 = vector.shape_cast %88 : vector<1x12x16xbf16> to vector<12x16xbf16>
      %cst_80 = arith.constant dense<0.000000e+00> : vector<16x16xf32>
      %90 = tpu.matmul %87, %89, %cst_80 {dimension_numbers = #tpu.dot_dimension_numbers<[1], [0], [0], [1], [0, 0, 1, 1], [], []>} : vector<16x12xbf16>, vector<12x16xbf16>, vector<16x16xf32> -> vector<16x16xf32>
      %91 = arith.addf %83, %90 : vector<16x16xf32>
      %c2_i32_81 = arith.constant 2 : i32
      %92 = arith.addi %arg6, %c2_i32_81 : i32
      %c0_82 = arith.constant 0 : index
      %93 = arith.index_cast %92 : i32 to index
      %c3_83 = arith.constant 3 : index
      %c0_84 = arith.constant 0 : index
      %94 = vector.load %arg1[%c0_82, %93, %c3_83, %c0_84] : memref<1x19x19x12xbf16, #tpu.memory_space<vmem>>, vector<1x1x16x12xbf16>
      %95 = vector.shape_cast %94 : vector<1x1x16x12xbf16> to vector<16x12xbf16>
      %c11 = arith.constant 11 : index
      %c0_85 = arith.constant 0 : index
      %c0_86 = arith.constant 0 : index
      %96 = vector.load %arg2[%c11, %c0_85, %c0_86] : memref<16x12x16xbf16, #tpu.memory_space<vmem>>, vector<1x12x16xbf16>
      %97 = vector.shape_cast %96 : vector<1x12x16xbf16> to vector<12x16xbf16>
      %cst_87 = arith.constant dense<0.000000e+00> : vector<16x16xf32>
      %98 = tpu.matmul %95, %97, %cst_87 {dimension_numbers = #tpu.dot_dimension_numbers<[1], [0], [0], [1], [0, 0, 1, 1], [], []>} : vector<16x12xbf16>, vector<12x16xbf16>, vector<16x16xf32> -> vector<16x16xf32>
      %99 = arith.addf %91, %98 : vector<16x16xf32>
      %c3_i32 = arith.constant 3 : i32
      %100 = arith.addi %arg6, %c3_i32 : i32
      %c0_88 = arith.constant 0 : index
      %101 = arith.index_cast %100 : i32 to index
      %c0_89 = arith.constant 0 : index
      %c0_90 = arith.constant 0 : index
      %102 = vector.load %arg1[%c0_88, %101, %c0_89, %c0_90] : memref<1x19x19x12xbf16, #tpu.memory_space<vmem>>, vector<1x1x16x12xbf16>
      %103 = vector.shape_cast %102 : vector<1x1x16x12xbf16> to vector<16x12xbf16>
      %c12 = arith.constant 12 : index
      %c0_91 = arith.constant 0 : index
      %c0_92 = arith.constant 0 : index
      %104 = vector.load %arg2[%c12, %c0_91, %c0_92] : memref<16x12x16xbf16, #tpu.memory_space<vmem>>, vector<1x12x16xbf16>
      %105 = vector.shape_cast %104 : vector<1x12x16xbf16> to vector<12x16xbf16>
      %cst_93 = arith.constant dense<0.000000e+00> : vector<16x16xf32>
      %106 = tpu.matmul %103, %105, %cst_93 {dimension_numbers = #tpu.dot_dimension_numbers<[1], [0], [0], [1], [0, 0, 1, 1], [], []>} : vector<16x12xbf16>, vector<12x16xbf16>, vector<16x16xf32> -> vector<16x16xf32>
      %107 = arith.addf %99, %106 : vector<16x16xf32>
      %c3_i32_94 = arith.constant 3 : i32
      %108 = arith.addi %arg6, %c3_i32_94 : i32
      %c0_95 = arith.constant 0 : index
      %109 = arith.index_cast %108 : i32 to index
      %c1_96 = arith.constant 1 : index
      %c0_97 = arith.constant 0 : index
      %110 = vector.load %arg1[%c0_95, %109, %c1_96, %c0_97] : memref<1x19x19x12xbf16, #tpu.memory_space<vmem>>, vector<1x1x16x12xbf16>
      %111 = vector.shape_cast %110 : vector<1x1x16x12xbf16> to vector<16x12xbf16>
      %c13 = arith.constant 13 : index
      %c0_98 = arith.constant 0 : index
      %c0_99 = arith.constant 0 : index
      %112 = vector.load %arg2[%c13, %c0_98, %c0_99] : memref<16x12x16xbf16, #tpu.memory_space<vmem>>, vector<1x12x16xbf16>
      %113 = vector.shape_cast %112 : vector<1x12x16xbf16> to vector<12x16xbf16>
      %cst_100 = arith.constant dense<0.000000e+00> : vector<16x16xf32>
      %114 = tpu.matmul %111, %113, %cst_100 {dimension_numbers = #tpu.dot_dimension_numbers<[1], [0], [0], [1], [0, 0, 1, 1], [], []>} : vector<16x12xbf16>, vector<12x16xbf16>, vector<16x16xf32> -> vector<16x16xf32>
      %115 = arith.addf %107, %114 : vector<16x16xf32>
      %c3_i32_101 = arith.constant 3 : i32
      %116 = arith.addi %arg6, %c3_i32_101 : i32
      %c0_102 = arith.constant 0 : index
      %117 = arith.index_cast %116 : i32 to index
      %c2_103 = arith.constant 2 : index
      %c0_104 = arith.constant 0 : index
      %118 = vector.load %arg1[%c0_102, %117, %c2_103, %c0_104] : memref<1x19x19x12xbf16, #tpu.memory_space<vmem>>, vector<1x1x16x12xbf16>
      %119 = vector.shape_cast %118 : vector<1x1x16x12xbf16> to vector<16x12xbf16>
      %c14 = arith.constant 14 : index
      %c0_105 = arith.constant 0 : index
      %c0_106 = arith.constant 0 : index
      %120 = vector.load %arg2[%c14, %c0_105, %c0_106] : memref<16x12x16xbf16, #tpu.memory_space<vmem>>, vector<1x12x16xbf16>
      %121 = vector.shape_cast %120 : vector<1x12x16xbf16> to vector<12x16xbf16>
      %cst_107 = arith.constant dense<0.000000e+00> : vector<16x16xf32>
      %122 = tpu.matmul %119, %121, %cst_107 {dimension_numbers = #tpu.dot_dimension_numbers<[1], [0], [0], [1], [0, 0, 1, 1], [], []>} : vector<16x12xbf16>, vector<12x16xbf16>, vector<16x16xf32> -> vector<16x16xf32>
      %123 = arith.addf %115, %122 : vector<16x16xf32>
      %c3_i32_108 = arith.constant 3 : i32
      %124 = arith.addi %arg6, %c3_i32_108 : i32
      %c0_109 = arith.constant 0 : index
      %125 = arith.index_cast %124 : i32 to index
      %c3_110 = arith.constant 3 : index
      %c0_111 = arith.constant 0 : index
      %126 = vector.load %arg1[%c0_109, %125, %c3_110, %c0_111] : memref<1x19x19x12xbf16, #tpu.memory_space<vmem>>, vector<1x1x16x12xbf16>
      %127 = vector.shape_cast %126 : vector<1x1x16x12xbf16> to vector<16x12xbf16>
      %c15 = arith.constant 15 : index
      %c0_112 = arith.constant 0 : index
      %c0_113 = arith.constant 0 : index
      %128 = vector.load %arg2[%c15, %c0_112, %c0_113] : memref<16x12x16xbf16, #tpu.memory_space<vmem>>, vector<1x12x16xbf16>
      %129 = vector.shape_cast %128 : vector<1x12x16xbf16> to vector<12x16xbf16>
      %cst_114 = arith.constant dense<0.000000e+00> : vector<16x16xf32>
      %130 = tpu.matmul %127, %129, %cst_114 {dimension_numbers = #tpu.dot_dimension_numbers<[1], [0], [0], [1], [0, 0, 1, 1], [], []>} : vector<16x12xbf16>, vector<12x16xbf16>, vector<16x16xf32> -> vector<16x16xf32>
      %131 = arith.addf %123, %130 : vector<16x16xf32>
      %132 = vector.broadcast %0 : vector<1x16xf32> to vector<16x16xf32>
      %133 = arith.mulf %131, %132 : vector<16x16xf32>
      %134 = vector.broadcast %1 : vector<1x16xf32> to vector<16x16xf32>
      %135 = arith.addf %133, %134 : vector<16x16xf32>
      %cst_115 = arith.constant 0.000000e+00 : f32
      %136 = vector.broadcast %cst_115 : f32 to vector<16x16xf32>
      %137 = arith.maximumf %135, %136 : vector<16x16xf32>
      %c0_116 = arith.constant 0 : index
      %138 = arith.index_cast %arg6 : i32 to index
      %c0_117 = arith.constant 0 : index
      %c0_118 = arith.constant 0 : index
      %139 = vector.load %arg5[%c0_116, %138, %c0_117, %c0_118] : memref<1x16x16x16xf32, #tpu.memory_space<vmem>>, vector<1x1x16x16xf32>
      %140 = vector.shape_cast %139 : vector<1x1x16x16xf32> to vector<16x16xf32>
      %141 = vector.shape_cast %137 : vector<16x16xf32> to vector<1x1x16x16xf32>
      tpu.vector_store %arg5[%c0_116, %138, %c0_117, %c0_118], %141 {strides = array<i32>} : memref<1x16x16x16xf32, #tpu.memory_space<vmem>>, vector<1x1x16x16xf32>,
    }
    %c16_i32_3 = arith.constant 16 : i32
    return
  }
  func.func @transform_0(%arg0: i32) -> (i32, i32, i32, i32) {
    %c0_i32 = arith.constant 0 : i32
    %c0_i32_0 = arith.constant 0 : i32
    %c0_i32_1 = arith.constant 0 : i32
    %c0_i32_2 = arith.constant 0 : i32
    return %arg0, %c0_i32, %c0_i32_0, %c0_i32_1 : i32, i32, i32, i32
  }
  func.func @transform_1(%arg0: i32) -> (i32, i32, i32) {
    %c0_i32 = arith.constant 0 : i32
    %c0_i32_0 = arith.constant 0 : i32
    %c0_i32_1 = arith.constant 0 : i32
    %c0_i32_2 = arith.constant 0 : i32
    return %c0_i32, %c0_i32_0, %c0_i32_1 : i32, i32, i32
  }
  func.func @transform_2(%arg0: i32) -> (i32, i32) {
    %c0_i32 = arith.constant 0 : i32
    %c0_i32_0 = arith.constant 0 : i32
    %c0_i32_1 = arith.constant 0 : i32
    return %c0_i32, %c0_i32_0 : i32, i32
  }
  func.func @transform_3(%arg0: i32) -> (i32, i32) {
    %c0_i32 = arith.constant 0 : i32
    %c0_i32_0 = arith.constant 0 : i32
    %c0_i32_1 = arith.constant 0 : i32
    return %c0_i32, %c0_i32_0 : i32, i32
  }
  func.func @transform_4(%arg0: i32) -> (i32, i32, i32, i32) {
    %c0_i32 = arith.constant 0 : i32
    %c0_i32_0 = arith.constant 0 : i32
    %c0_i32_1 = arith.constant 0 : i32
    %c0_i32_2 = arith.constant 0 : i32
    return %arg0, %c0_i32, %c0_i32_0, %c0_i32_1 : i32, i32, i32, i32
  }
}

module attributes {stable_mosaic.version = 11 : i64} {
  func.func @_conv_kernel(%arg0: i32, %arg1: memref<1x18x18x16xbf16, #tpu.memory_space<vmem>>, %arg2: memref<9x16x64xbf16, #tpu.memory_space<vmem>>, %arg3: memref<1x64xf32, #tpu.memory_space<vmem>>, %arg4: memref<1x64xf32, #tpu.memory_space<vmem>>, %arg5: memref<1x16x16x32xf32, #tpu.memory_space<vmem>>, %arg6: memref<1x16x16x32xf32, #tpu.memory_space<vmem>>) attributes {dimension_semantics = [#tpu.dimension_semantics<parallel>], iteration_bounds = array<i64: 2>, scalar_prefetch = 0 : i64, scratch_operands = 0 : i64, tpu.core_type = #tpu.core_type<tc>, window_params = [{transform_indices = @transform_0, window_bounds = array<i64: 1, 18, 18, 16>}, {pipeline_mode = #tpu.pipeline_mode<synchronous>, transform_indices = @transform_1, window_bounds = array<i64: 9, 16, 64>}, {pipeline_mode = #tpu.pipeline_mode<synchronous>, transform_indices = @transform_2, window_bounds = array<i64: 1, 64>}, {pipeline_mode = #tpu.pipeline_mode<synchronous>, transform_indices = @transform_3, window_bounds = array<i64: 1, 64>}, {transform_indices = @transform_4, window_bounds = array<i64: 1, 16, 16, 32>}, {transform_indices = @transform_5, window_bounds = array<i64: 1, 16, 16, 32>}]} {
    %c0 = arith.constant 0 : index
    %c0_0 = arith.constant 0 : index
    %0 = vector.load %arg3[%c0, %c0_0] : memref<1x64xf32, #tpu.memory_space<vmem>>, vector<1x64xf32>
    %c0_1 = arith.constant 0 : index
    %c0_2 = arith.constant 0 : index
    %1 = vector.load %arg4[%c0_1, %c0_2] : memref<1x64xf32, #tpu.memory_space<vmem>>, vector<1x64xf32>
    %c0_i32 = arith.constant 0 : i32
    %c16_i32 = arith.constant 16 : i32
    %2 = arith.addi %c0_i32, %c16_i32 : i32
    %c1_i32 = arith.constant 1 : i32
    scf.for %arg7 = %c0_i32 to %2 step %c1_i32  : i32 {
      %cst = arith.constant 0.000000e+00 : f32
      %3 = vector.broadcast %cst : f32 to vector<16x64xf32>
      %c0_i32_4 = arith.constant 0 : i32
      %4 = arith.addi %arg7, %c0_i32_4 : i32
      %c0_5 = arith.constant 0 : index
      %5 = arith.index_cast %4 : i32 to index
      %c0_6 = arith.constant 0 : index
      %c0_7 = arith.constant 0 : index
      %6 = vector.load %arg1[%c0_5, %5, %c0_6, %c0_7] : memref<1x18x18x16xbf16, #tpu.memory_space<vmem>>, vector<1x1x16x16xbf16>
      %7 = vector.shape_cast %6 : vector<1x1x16x16xbf16> to vector<16x16xbf16>
      %c0_8 = arith.constant 0 : index
      %c0_9 = arith.constant 0 : index
      %c0_10 = arith.constant 0 : index
      %8 = vector.load %arg2[%c0_8, %c0_9, %c0_10] : memref<9x16x64xbf16, #tpu.memory_space<vmem>>, vector<1x16x64xbf16>
      %9 = vector.shape_cast %8 : vector<1x16x64xbf16> to vector<16x64xbf16>
      %cst_11 = arith.constant dense<0.000000e+00> : vector<16x64xf32>
      %10 = tpu.matmul %7, %9, %cst_11 {dimension_numbers = #tpu.dot_dimension_numbers<[1], [0], [0], [1], [0, 0, 1, 1], [], []>} : vector<16x16xbf16>, vector<16x64xbf16>, vector<16x64xf32> -> vector<16x64xf32>
      %11 = arith.addf %3, %10 : vector<16x64xf32>
      %c0_i32_12 = arith.constant 0 : i32
      %12 = arith.addi %arg7, %c0_i32_12 : i32
      %c0_13 = arith.constant 0 : index
      %13 = arith.index_cast %12 : i32 to index
      %c1 = arith.constant 1 : index
      %c0_14 = arith.constant 0 : index
      %14 = vector.load %arg1[%c0_13, %13, %c1, %c0_14] : memref<1x18x18x16xbf16, #tpu.memory_space<vmem>>, vector<1x1x16x16xbf16>
      %15 = vector.shape_cast %14 : vector<1x1x16x16xbf16> to vector<16x16xbf16>
      %c1_15 = arith.constant 1 : index
      %c0_16 = arith.constant 0 : index
      %c0_17 = arith.constant 0 : index
      %16 = vector.load %arg2[%c1_15, %c0_16, %c0_17] : memref<9x16x64xbf16, #tpu.memory_space<vmem>>, vector<1x16x64xbf16>
      %17 = vector.shape_cast %16 : vector<1x16x64xbf16> to vector<16x64xbf16>
      %cst_18 = arith.constant dense<0.000000e+00> : vector<16x64xf32>
      %18 = tpu.matmul %15, %17, %cst_18 {dimension_numbers = #tpu.dot_dimension_numbers<[1], [0], [0], [1], [0, 0, 1, 1], [], []>} : vector<16x16xbf16>, vector<16x64xbf16>, vector<16x64xf32> -> vector<16x64xf32>
      %19 = arith.addf %11, %18 : vector<16x64xf32>
      %c0_i32_19 = arith.constant 0 : i32
      %20 = arith.addi %arg7, %c0_i32_19 : i32
      %c0_20 = arith.constant 0 : index
      %21 = arith.index_cast %20 : i32 to index
      %c2 = arith.constant 2 : index
      %c0_21 = arith.constant 0 : index
      %22 = vector.load %arg1[%c0_20, %21, %c2, %c0_21] : memref<1x18x18x16xbf16, #tpu.memory_space<vmem>>, vector<1x1x16x16xbf16>
      %23 = vector.shape_cast %22 : vector<1x1x16x16xbf16> to vector<16x16xbf16>
      %c2_22 = arith.constant 2 : index
      %c0_23 = arith.constant 0 : index
      %c0_24 = arith.constant 0 : index
      %24 = vector.load %arg2[%c2_22, %c0_23, %c0_24] : memref<9x16x64xbf16, #tpu.memory_space<vmem>>, vector<1x16x64xbf16>
      %25 = vector.shape_cast %24 : vector<1x16x64xbf16> to vector<16x64xbf16>
      %cst_25 = arith.constant dense<0.000000e+00> : vector<16x64xf32>
      %26 = tpu.matmul %23, %25, %cst_25 {dimension_numbers = #tpu.dot_dimension_numbers<[1], [0], [0], [1], [0, 0, 1, 1], [], []>} : vector<16x16xbf16>, vector<16x64xbf16>, vector<16x64xf32> -> vector<16x64xf32>
      %27 = arith.addf %19, %26 : vector<16x64xf32>
      %c1_i32_26 = arith.constant 1 : i32
      %28 = arith.addi %arg7, %c1_i32_26 : i32
      %c0_27 = arith.constant 0 : index
      %29 = arith.index_cast %28 : i32 to index
      %c0_28 = arith.constant 0 : index
      %c0_29 = arith.constant 0 : index
      %30 = vector.load %arg1[%c0_27, %29, %c0_28, %c0_29] : memref<1x18x18x16xbf16, #tpu.memory_space<vmem>>, vector<1x1x16x16xbf16>
      %31 = vector.shape_cast %30 : vector<1x1x16x16xbf16> to vector<16x16xbf16>
      %c3 = arith.constant 3 : index
      %c0_30 = arith.constant 0 : index
      %c0_31 = arith.constant 0 : index
      %32 = vector.load %arg2[%c3, %c0_30, %c0_31] : memref<9x16x64xbf16, #tpu.memory_space<vmem>>, vector<1x16x64xbf16>
      %33 = vector.shape_cast %32 : vector<1x16x64xbf16> to vector<16x64xbf16>
      %cst_32 = arith.constant dense<0.000000e+00> : vector<16x64xf32>
      %34 = tpu.matmul %31, %33, %cst_32 {dimension_numbers = #tpu.dot_dimension_numbers<[1], [0], [0], [1], [0, 0, 1, 1], [], []>} : vector<16x16xbf16>, vector<16x64xbf16>, vector<16x64xf32> -> vector<16x64xf32>
      %35 = arith.addf %27, %34 : vector<16x64xf32>
      %c1_i32_33 = arith.constant 1 : i32
      %36 = arith.addi %arg7, %c1_i32_33 : i32
      %c0_34 = arith.constant 0 : index
      %37 = arith.index_cast %36 : i32 to index
      %c1_35 = arith.constant 1 : index
      %c0_36 = arith.constant 0 : index
      %38 = vector.load %arg1[%c0_34, %37, %c1_35, %c0_36] : memref<1x18x18x16xbf16, #tpu.memory_space<vmem>>, vector<1x1x16x16xbf16>
      %39 = vector.shape_cast %38 : vector<1x1x16x16xbf16> to vector<16x16xbf16>
      %c4 = arith.constant 4 : index
      %c0_37 = arith.constant 0 : index
      %c0_38 = arith.constant 0 : index
      %40 = vector.load %arg2[%c4, %c0_37, %c0_38] : memref<9x16x64xbf16, #tpu.memory_space<vmem>>, vector<1x16x64xbf16>
      %41 = vector.shape_cast %40 : vector<1x16x64xbf16> to vector<16x64xbf16>
      %cst_39 = arith.constant dense<0.000000e+00> : vector<16x64xf32>
      %42 = tpu.matmul %39, %41, %cst_39 {dimension_numbers = #tpu.dot_dimension_numbers<[1], [0], [0], [1], [0, 0, 1, 1], [], []>} : vector<16x16xbf16>, vector<16x64xbf16>, vector<16x64xf32> -> vector<16x64xf32>
      %43 = arith.addf %35, %42 : vector<16x64xf32>
      %c1_i32_40 = arith.constant 1 : i32
      %44 = arith.addi %arg7, %c1_i32_40 : i32
      %c0_41 = arith.constant 0 : index
      %45 = arith.index_cast %44 : i32 to index
      %c2_42 = arith.constant 2 : index
      %c0_43 = arith.constant 0 : index
      %46 = vector.load %arg1[%c0_41, %45, %c2_42, %c0_43] : memref<1x18x18x16xbf16, #tpu.memory_space<vmem>>, vector<1x1x16x16xbf16>
      %47 = vector.shape_cast %46 : vector<1x1x16x16xbf16> to vector<16x16xbf16>
      %c5 = arith.constant 5 : index
      %c0_44 = arith.constant 0 : index
      %c0_45 = arith.constant 0 : index
      %48 = vector.load %arg2[%c5, %c0_44, %c0_45] : memref<9x16x64xbf16, #tpu.memory_space<vmem>>, vector<1x16x64xbf16>
      %49 = vector.shape_cast %48 : vector<1x16x64xbf16> to vector<16x64xbf16>
      %cst_46 = arith.constant dense<0.000000e+00> : vector<16x64xf32>
      %50 = tpu.matmul %47, %49, %cst_46 {dimension_numbers = #tpu.dot_dimension_numbers<[1], [0], [0], [1], [0, 0, 1, 1], [], []>} : vector<16x16xbf16>, vector<16x64xbf16>, vector<16x64xf32> -> vector<16x64xf32>
      %51 = arith.addf %43, %50 : vector<16x64xf32>
      %c2_i32 = arith.constant 2 : i32
      %52 = arith.addi %arg7, %c2_i32 : i32
      %c0_47 = arith.constant 0 : index
      %53 = arith.index_cast %52 : i32 to index
      %c0_48 = arith.constant 0 : index
      %c0_49 = arith.constant 0 : index
      %54 = vector.load %arg1[%c0_47, %53, %c0_48, %c0_49] : memref<1x18x18x16xbf16, #tpu.memory_space<vmem>>, vector<1x1x16x16xbf16>
      %55 = vector.shape_cast %54 : vector<1x1x16x16xbf16> to vector<16x16xbf16>
      %c6 = arith.constant 6 : index
      %c0_50 = arith.constant 0 : index
      %c0_51 = arith.constant 0 : index
      %56 = vector.load %arg2[%c6, %c0_50, %c0_51] : memref<9x16x64xbf16, #tpu.memory_space<vmem>>, vector<1x16x64xbf16>
      %57 = vector.shape_cast %56 : vector<1x16x64xbf16> to vector<16x64xbf16>
      %cst_52 = arith.constant dense<0.000000e+00> : vector<16x64xf32>
      %58 = tpu.matmul %55, %57, %cst_52 {dimension_numbers = #tpu.dot_dimension_numbers<[1], [0], [0], [1], [0, 0, 1, 1], [], []>} : vector<16x16xbf16>, vector<16x64xbf16>, vector<16x64xf32> -> vector<16x64xf32>
      %59 = arith.addf %51, %58 : vector<16x64xf32>
      %c2_i32_53 = arith.constant 2 : i32
      %60 = arith.addi %arg7, %c2_i32_53 : i32
      %c0_54 = arith.constant 0 : index
      %61 = arith.index_cast %60 : i32 to index
      %c1_55 = arith.constant 1 : index
      %c0_56 = arith.constant 0 : index
      %62 = vector.load %arg1[%c0_54, %61, %c1_55, %c0_56] : memref<1x18x18x16xbf16, #tpu.memory_space<vmem>>, vector<1x1x16x16xbf16>
      %63 = vector.shape_cast %62 : vector<1x1x16x16xbf16> to vector<16x16xbf16>
      %c7 = arith.constant 7 : index
      %c0_57 = arith.constant 0 : index
      %c0_58 = arith.constant 0 : index
      %64 = vector.load %arg2[%c7, %c0_57, %c0_58] : memref<9x16x64xbf16, #tpu.memory_space<vmem>>, vector<1x16x64xbf16>
      %65 = vector.shape_cast %64 : vector<1x16x64xbf16> to vector<16x64xbf16>
      %cst_59 = arith.constant dense<0.000000e+00> : vector<16x64xf32>
      %66 = tpu.matmul %63, %65, %cst_59 {dimension_numbers = #tpu.dot_dimension_numbers<[1], [0], [0], [1], [0, 0, 1, 1], [], []>} : vector<16x16xbf16>, vector<16x64xbf16>, vector<16x64xf32> -> vector<16x64xf32>
      %67 = arith.addf %59, %66 : vector<16x64xf32>
      %c2_i32_60 = arith.constant 2 : i32
      %68 = arith.addi %arg7, %c2_i32_60 : i32
      %c0_61 = arith.constant 0 : index
      %69 = arith.index_cast %68 : i32 to index
      %c2_62 = arith.constant 2 : index
      %c0_63 = arith.constant 0 : index
      %70 = vector.load %arg1[%c0_61, %69, %c2_62, %c0_63] : memref<1x18x18x16xbf16, #tpu.memory_space<vmem>>, vector<1x1x16x16xbf16>
      %71 = vector.shape_cast %70 : vector<1x1x16x16xbf16> to vector<16x16xbf16>
      %c8 = arith.constant 8 : index
      %c0_64 = arith.constant 0 : index
      %c0_65 = arith.constant 0 : index
      %72 = vector.load %arg2[%c8, %c0_64, %c0_65] : memref<9x16x64xbf16, #tpu.memory_space<vmem>>, vector<1x16x64xbf16>
      %73 = vector.shape_cast %72 : vector<1x16x64xbf16> to vector<16x64xbf16>
      %cst_66 = arith.constant dense<0.000000e+00> : vector<16x64xf32>
      %74 = tpu.matmul %71, %73, %cst_66 {dimension_numbers = #tpu.dot_dimension_numbers<[1], [0], [0], [1], [0, 0, 1, 1], [], []>} : vector<16x16xbf16>, vector<16x64xbf16>, vector<16x64xf32> -> vector<16x64xf32>
      %75 = arith.addf %67, %74 : vector<16x64xf32>
      %76 = vector.broadcast %0 : vector<1x64xf32> to vector<16x64xf32>
      %77 = arith.mulf %75, %76 : vector<16x64xf32>
      %78 = vector.broadcast %1 : vector<1x64xf32> to vector<16x64xf32>
      %79 = arith.addf %77, %78 : vector<16x64xf32>
      %80 = vector.extract_strided_slice %79 {offsets = [0, 0], sizes = [16, 32], strides = [1, 1]} : vector<16x64xf32> to vector<16x32xf32>
      %cst_67 = arith.constant 0.000000e+00 : f32
      %81 = vector.broadcast %cst_67 : f32 to vector<16x32xf32>
      %82 = arith.maximumf %80, %81 : vector<16x32xf32>
      %c0_68 = arith.constant 0 : index
      %83 = arith.index_cast %arg7 : i32 to index
      %c0_69 = arith.constant 0 : index
      %c0_70 = arith.constant 0 : index
      %84 = vector.load %arg5[%c0_68, %83, %c0_69, %c0_70] : memref<1x16x16x32xf32, #tpu.memory_space<vmem>>, vector<1x1x16x32xf32>
      %85 = vector.shape_cast %84 : vector<1x1x16x32xf32> to vector<16x32xf32>
      %86 = vector.shape_cast %82 : vector<16x32xf32> to vector<1x1x16x32xf32>
      tpu.vector_store %arg5[%c0_68, %83, %c0_69, %c0_70], %86 {strides = array<i32>} : memref<1x16x16x32xf32, #tpu.memory_space<vmem>>, vector<1x1x16x32xf32>,
      %87 = vector.extract_strided_slice %79 {offsets = [0, 32], sizes = [16, 32], strides = [1, 1]} : vector<16x64xf32> to vector<16x32xf32>
      %c0_71 = arith.constant 0 : index
      %88 = arith.index_cast %arg7 : i32 to index
      %c0_72 = arith.constant 0 : index
      %c0_73 = arith.constant 0 : index
      %89 = vector.load %arg6[%c0_71, %88, %c0_72, %c0_73] : memref<1x16x16x32xf32, #tpu.memory_space<vmem>>, vector<1x1x16x32xf32>
      %90 = vector.shape_cast %89 : vector<1x1x16x32xf32> to vector<16x32xf32>
      %91 = vector.shape_cast %87 : vector<16x32xf32> to vector<1x1x16x32xf32>
      tpu.vector_store %arg6[%c0_71, %88, %c0_72, %c0_73], %91 {strides = array<i32>} : memref<1x16x16x32xf32, #tpu.memory_space<vmem>>, vector<1x1x16x32xf32>,
    }
    %c16_i32_3 = arith.constant 16 : i32
    return
  }
  func.func @transform_0(%arg0: i32) -> (i32, i32, i32, i32) {
    %c0_i32 = arith.constant 0 : i32
    %c0_i32_0 = arith.constant 0 : i32
    %c0_i32_1 = arith.constant 0 : i32
    %c0_i32_2 = arith.constant 0 : i32
    return %arg0, %c0_i32, %c0_i32_0, %c0_i32_1 : i32, i32, i32, i32
  }
  func.func @transform_1(%arg0: i32) -> (i32, i32, i32) {
    %c0_i32 = arith.constant 0 : i32
    %c0_i32_0 = arith.constant 0 : i32
    %c0_i32_1 = arith.constant 0 : i32
    %c0_i32_2 = arith.constant 0 : i32
    return %c0_i32, %c0_i32_0, %c0_i32_1 : i32, i32, i32
  }
  func.func @transform_2(%arg0: i32) -> (i32, i32) {
    %c0_i32 = arith.constant 0 : i32
    %c0_i32_0 = arith.constant 0 : i32
    %c0_i32_1 = arith.constant 0 : i32
    return %c0_i32, %c0_i32_0 : i32, i32
  }
  func.func @transform_3(%arg0: i32) -> (i32, i32) {
    %c0_i32 = arith.constant 0 : i32
    %c0_i32_0 = arith.constant 0 : i32
    %c0_i32_1 = arith.constant 0 : i32
    return %c0_i32, %c0_i32_0 : i32, i32
  }
  func.func @transform_4(%arg0: i32) -> (i32, i32, i32, i32) {
    %c0_i32 = arith.constant 0 : i32
    %c0_i32_0 = arith.constant 0 : i32
    %c0_i32_1 = arith.constant 0 : i32
    %c0_i32_2 = arith.constant 0 : i32
    return %arg0, %c0_i32, %c0_i32_0, %c0_i32_1 : i32, i32, i32, i32
  }
  func.func @transform_5(%arg0: i32) -> (i32, i32, i32, i32) {
    %c0_i32 = arith.constant 0 : i32
    %c0_i32_0 = arith.constant 0 : i32
    %c0_i32_1 = arith.constant 0 : i32
    %c0_i32_2 = arith.constant 0 : i32
    return %arg0, %c0_i32, %c0_i32_0, %c0_i32_1 : i32, i32, i32, i32
  }
}

module attributes {stable_mosaic.version = 11 : i64} {
  func.func @_conv_kernel(%arg0: i32, %arg1: memref<1x18x18x32xbf16, #tpu.memory_space<vmem>>, %arg2: memref<9x32x32xbf16, #tpu.memory_space<vmem>>, %arg3: memref<1x32xf32, #tpu.memory_space<vmem>>, %arg4: memref<1x32xf32, #tpu.memory_space<vmem>>, %arg5: memref<1x16x16x32xf32, #tpu.memory_space<vmem>>, %arg6: memref<1x16x16x32xf32, #tpu.memory_space<vmem>>) attributes {dimension_semantics = [#tpu.dimension_semantics<parallel>], iteration_bounds = array<i64: 2>, scalar_prefetch = 0 : i64, scratch_operands = 0 : i64, tpu.core_type = #tpu.core_type<tc>, window_params = [{transform_indices = @transform_0, window_bounds = array<i64: 1, 18, 18, 32>}, {pipeline_mode = #tpu.pipeline_mode<synchronous>, transform_indices = @transform_1, window_bounds = array<i64: 9, 32, 32>}, {pipeline_mode = #tpu.pipeline_mode<synchronous>, transform_indices = @transform_2, window_bounds = array<i64: 1, 32>}, {pipeline_mode = #tpu.pipeline_mode<synchronous>, transform_indices = @transform_3, window_bounds = array<i64: 1, 32>}, {transform_indices = @transform_4, window_bounds = array<i64: 1, 16, 16, 32>}, {transform_indices = @transform_5, window_bounds = array<i64: 1, 16, 16, 32>}]} {
    %c0 = arith.constant 0 : index
    %c0_0 = arith.constant 0 : index
    %0 = vector.load %arg3[%c0, %c0_0] : memref<1x32xf32, #tpu.memory_space<vmem>>, vector<1x32xf32>
    %c0_1 = arith.constant 0 : index
    %c0_2 = arith.constant 0 : index
    %1 = vector.load %arg4[%c0_1, %c0_2] : memref<1x32xf32, #tpu.memory_space<vmem>>, vector<1x32xf32>
    %c0_i32 = arith.constant 0 : i32
    %c16_i32 = arith.constant 16 : i32
    %2 = arith.addi %c0_i32, %c16_i32 : i32
    %c1_i32 = arith.constant 1 : i32
    scf.for %arg7 = %c0_i32 to %2 step %c1_i32  : i32 {
      %cst = arith.constant 0.000000e+00 : f32
      %3 = vector.broadcast %cst : f32 to vector<16x32xf32>
      %c0_i32_4 = arith.constant 0 : i32
      %4 = arith.addi %arg7, %c0_i32_4 : i32
      %c0_5 = arith.constant 0 : index
      %5 = arith.index_cast %4 : i32 to index
      %c0_6 = arith.constant 0 : index
      %c0_7 = arith.constant 0 : index
      %6 = vector.load %arg1[%c0_5, %5, %c0_6, %c0_7] : memref<1x18x18x32xbf16, #tpu.memory_space<vmem>>, vector<1x1x16x32xbf16>
      %7 = vector.shape_cast %6 : vector<1x1x16x32xbf16> to vector<16x32xbf16>
      %c0_8 = arith.constant 0 : index
      %c0_9 = arith.constant 0 : index
      %c0_10 = arith.constant 0 : index
      %8 = vector.load %arg2[%c0_8, %c0_9, %c0_10] : memref<9x32x32xbf16, #tpu.memory_space<vmem>>, vector<1x32x32xbf16>
      %9 = vector.shape_cast %8 : vector<1x32x32xbf16> to vector<32x32xbf16>
      %cst_11 = arith.constant dense<0.000000e+00> : vector<16x32xf32>
      %10 = tpu.matmul %7, %9, %cst_11 {dimension_numbers = #tpu.dot_dimension_numbers<[1], [0], [0], [1], [0, 0, 1, 1], [], []>} : vector<16x32xbf16>, vector<32x32xbf16>, vector<16x32xf32> -> vector<16x32xf32>
      %11 = arith.addf %3, %10 : vector<16x32xf32>
      %c0_i32_12 = arith.constant 0 : i32
      %12 = arith.addi %arg7, %c0_i32_12 : i32
      %c0_13 = arith.constant 0 : index
      %13 = arith.index_cast %12 : i32 to index
      %c1 = arith.constant 1 : index
      %c0_14 = arith.constant 0 : index
      %14 = vector.load %arg1[%c0_13, %13, %c1, %c0_14] : memref<1x18x18x32xbf16, #tpu.memory_space<vmem>>, vector<1x1x16x32xbf16>
      %15 = vector.shape_cast %14 : vector<1x1x16x32xbf16> to vector<16x32xbf16>
      %c1_15 = arith.constant 1 : index
      %c0_16 = arith.constant 0 : index
      %c0_17 = arith.constant 0 : index
      %16 = vector.load %arg2[%c1_15, %c0_16, %c0_17] : memref<9x32x32xbf16, #tpu.memory_space<vmem>>, vector<1x32x32xbf16>
      %17 = vector.shape_cast %16 : vector<1x32x32xbf16> to vector<32x32xbf16>
      %cst_18 = arith.constant dense<0.000000e+00> : vector<16x32xf32>
      %18 = tpu.matmul %15, %17, %cst_18 {dimension_numbers = #tpu.dot_dimension_numbers<[1], [0], [0], [1], [0, 0, 1, 1], [], []>} : vector<16x32xbf16>, vector<32x32xbf16>, vector<16x32xf32> -> vector<16x32xf32>
      %19 = arith.addf %11, %18 : vector<16x32xf32>
      %c0_i32_19 = arith.constant 0 : i32
      %20 = arith.addi %arg7, %c0_i32_19 : i32
      %c0_20 = arith.constant 0 : index
      %21 = arith.index_cast %20 : i32 to index
      %c2 = arith.constant 2 : index
      %c0_21 = arith.constant 0 : index
      %22 = vector.load %arg1[%c0_20, %21, %c2, %c0_21] : memref<1x18x18x32xbf16, #tpu.memory_space<vmem>>, vector<1x1x16x32xbf16>
      %23 = vector.shape_cast %22 : vector<1x1x16x32xbf16> to vector<16x32xbf16>
      %c2_22 = arith.constant 2 : index
      %c0_23 = arith.constant 0 : index
      %c0_24 = arith.constant 0 : index
      %24 = vector.load %arg2[%c2_22, %c0_23, %c0_24] : memref<9x32x32xbf16, #tpu.memory_space<vmem>>, vector<1x32x32xbf16>
      %25 = vector.shape_cast %24 : vector<1x32x32xbf16> to vector<32x32xbf16>
      %cst_25 = arith.constant dense<0.000000e+00> : vector<16x32xf32>
      %26 = tpu.matmul %23, %25, %cst_25 {dimension_numbers = #tpu.dot_dimension_numbers<[1], [0], [0], [1], [0, 0, 1, 1], [], []>} : vector<16x32xbf16>, vector<32x32xbf16>, vector<16x32xf32> -> vector<16x32xf32>
      %27 = arith.addf %19, %26 : vector<16x32xf32>
      %c1_i32_26 = arith.constant 1 : i32
      %28 = arith.addi %arg7, %c1_i32_26 : i32
      %c0_27 = arith.constant 0 : index
      %29 = arith.index_cast %28 : i32 to index
      %c0_28 = arith.constant 0 : index
      %c0_29 = arith.constant 0 : index
      %30 = vector.load %arg1[%c0_27, %29, %c0_28, %c0_29] : memref<1x18x18x32xbf16, #tpu.memory_space<vmem>>, vector<1x1x16x32xbf16>
      %31 = vector.shape_cast %30 : vector<1x1x16x32xbf16> to vector<16x32xbf16>
      %c3 = arith.constant 3 : index
      %c0_30 = arith.constant 0 : index
      %c0_31 = arith.constant 0 : index
      %32 = vector.load %arg2[%c3, %c0_30, %c0_31] : memref<9x32x32xbf16, #tpu.memory_space<vmem>>, vector<1x32x32xbf16>
      %33 = vector.shape_cast %32 : vector<1x32x32xbf16> to vector<32x32xbf16>
      %cst_32 = arith.constant dense<0.000000e+00> : vector<16x32xf32>
      %34 = tpu.matmul %31, %33, %cst_32 {dimension_numbers = #tpu.dot_dimension_numbers<[1], [0], [0], [1], [0, 0, 1, 1], [], []>} : vector<16x32xbf16>, vector<32x32xbf16>, vector<16x32xf32> -> vector<16x32xf32>
      %35 = arith.addf %27, %34 : vector<16x32xf32>
      %c1_i32_33 = arith.constant 1 : i32
      %36 = arith.addi %arg7, %c1_i32_33 : i32
      %c0_34 = arith.constant 0 : index
      %37 = arith.index_cast %36 : i32 to index
      %c1_35 = arith.constant 1 : index
      %c0_36 = arith.constant 0 : index
      %38 = vector.load %arg1[%c0_34, %37, %c1_35, %c0_36] : memref<1x18x18x32xbf16, #tpu.memory_space<vmem>>, vector<1x1x16x32xbf16>
      %39 = vector.shape_cast %38 : vector<1x1x16x32xbf16> to vector<16x32xbf16>
      %c4 = arith.constant 4 : index
      %c0_37 = arith.constant 0 : index
      %c0_38 = arith.constant 0 : index
      %40 = vector.load %arg2[%c4, %c0_37, %c0_38] : memref<9x32x32xbf16, #tpu.memory_space<vmem>>, vector<1x32x32xbf16>
      %41 = vector.shape_cast %40 : vector<1x32x32xbf16> to vector<32x32xbf16>
      %cst_39 = arith.constant dense<0.000000e+00> : vector<16x32xf32>
      %42 = tpu.matmul %39, %41, %cst_39 {dimension_numbers = #tpu.dot_dimension_numbers<[1], [0], [0], [1], [0, 0, 1, 1], [], []>} : vector<16x32xbf16>, vector<32x32xbf16>, vector<16x32xf32> -> vector<16x32xf32>
      %43 = arith.addf %35, %42 : vector<16x32xf32>
      %c1_i32_40 = arith.constant 1 : i32
      %44 = arith.addi %arg7, %c1_i32_40 : i32
      %c0_41 = arith.constant 0 : index
      %45 = arith.index_cast %44 : i32 to index
      %c2_42 = arith.constant 2 : index
      %c0_43 = arith.constant 0 : index
      %46 = vector.load %arg1[%c0_41, %45, %c2_42, %c0_43] : memref<1x18x18x32xbf16, #tpu.memory_space<vmem>>, vector<1x1x16x32xbf16>
      %47 = vector.shape_cast %46 : vector<1x1x16x32xbf16> to vector<16x32xbf16>
      %c5 = arith.constant 5 : index
      %c0_44 = arith.constant 0 : index
      %c0_45 = arith.constant 0 : index
      %48 = vector.load %arg2[%c5, %c0_44, %c0_45] : memref<9x32x32xbf16, #tpu.memory_space<vmem>>, vector<1x32x32xbf16>
      %49 = vector.shape_cast %48 : vector<1x32x32xbf16> to vector<32x32xbf16>
      %cst_46 = arith.constant dense<0.000000e+00> : vector<16x32xf32>
      %50 = tpu.matmul %47, %49, %cst_46 {dimension_numbers = #tpu.dot_dimension_numbers<[1], [0], [0], [1], [0, 0, 1, 1], [], []>} : vector<16x32xbf16>, vector<32x32xbf16>, vector<16x32xf32> -> vector<16x32xf32>
      %51 = arith.addf %43, %50 : vector<16x32xf32>
      %c2_i32 = arith.constant 2 : i32
      %52 = arith.addi %arg7, %c2_i32 : i32
      %c0_47 = arith.constant 0 : index
      %53 = arith.index_cast %52 : i32 to index
      %c0_48 = arith.constant 0 : index
      %c0_49 = arith.constant 0 : index
      %54 = vector.load %arg1[%c0_47, %53, %c0_48, %c0_49] : memref<1x18x18x32xbf16, #tpu.memory_space<vmem>>, vector<1x1x16x32xbf16>
      %55 = vector.shape_cast %54 : vector<1x1x16x32xbf16> to vector<16x32xbf16>
      %c6 = arith.constant 6 : index
      %c0_50 = arith.constant 0 : index
      %c0_51 = arith.constant 0 : index
      %56 = vector.load %arg2[%c6, %c0_50, %c0_51] : memref<9x32x32xbf16, #tpu.memory_space<vmem>>, vector<1x32x32xbf16>
      %57 = vector.shape_cast %56 : vector<1x32x32xbf16> to vector<32x32xbf16>
      %cst_52 = arith.constant dense<0.000000e+00> : vector<16x32xf32>
      %58 = tpu.matmul %55, %57, %cst_52 {dimension_numbers = #tpu.dot_dimension_numbers<[1], [0], [0], [1], [0, 0, 1, 1], [], []>} : vector<16x32xbf16>, vector<32x32xbf16>, vector<16x32xf32> -> vector<16x32xf32>
      %59 = arith.addf %51, %58 : vector<16x32xf32>
      %c2_i32_53 = arith.constant 2 : i32
      %60 = arith.addi %arg7, %c2_i32_53 : i32
      %c0_54 = arith.constant 0 : index
      %61 = arith.index_cast %60 : i32 to index
      %c1_55 = arith.constant 1 : index
      %c0_56 = arith.constant 0 : index
      %62 = vector.load %arg1[%c0_54, %61, %c1_55, %c0_56] : memref<1x18x18x32xbf16, #tpu.memory_space<vmem>>, vector<1x1x16x32xbf16>
      %63 = vector.shape_cast %62 : vector<1x1x16x32xbf16> to vector<16x32xbf16>
      %c7 = arith.constant 7 : index
      %c0_57 = arith.constant 0 : index
      %c0_58 = arith.constant 0 : index
      %64 = vector.load %arg2[%c7, %c0_57, %c0_58] : memref<9x32x32xbf16, #tpu.memory_space<vmem>>, vector<1x32x32xbf16>
      %65 = vector.shape_cast %64 : vector<1x32x32xbf16> to vector<32x32xbf16>
      %cst_59 = arith.constant dense<0.000000e+00> : vector<16x32xf32>
      %66 = tpu.matmul %63, %65, %cst_59 {dimension_numbers = #tpu.dot_dimension_numbers<[1], [0], [0], [1], [0, 0, 1, 1], [], []>} : vector<16x32xbf16>, vector<32x32xbf16>, vector<16x32xf32> -> vector<16x32xf32>
      %67 = arith.addf %59, %66 : vector<16x32xf32>
      %c2_i32_60 = arith.constant 2 : i32
      %68 = arith.addi %arg7, %c2_i32_60 : i32
      %c0_61 = arith.constant 0 : index
      %69 = arith.index_cast %68 : i32 to index
      %c2_62 = arith.constant 2 : index
      %c0_63 = arith.constant 0 : index
      %70 = vector.load %arg1[%c0_61, %69, %c2_62, %c0_63] : memref<1x18x18x32xbf16, #tpu.memory_space<vmem>>, vector<1x1x16x32xbf16>
      %71 = vector.shape_cast %70 : vector<1x1x16x32xbf16> to vector<16x32xbf16>
      %c8 = arith.constant 8 : index
      %c0_64 = arith.constant 0 : index
      %c0_65 = arith.constant 0 : index
      %72 = vector.load %arg2[%c8, %c0_64, %c0_65] : memref<9x32x32xbf16, #tpu.memory_space<vmem>>, vector<1x32x32xbf16>
      %73 = vector.shape_cast %72 : vector<1x32x32xbf16> to vector<32x32xbf16>
      %cst_66 = arith.constant dense<0.000000e+00> : vector<16x32xf32>
      %74 = tpu.matmul %71, %73, %cst_66 {dimension_numbers = #tpu.dot_dimension_numbers<[1], [0], [0], [1], [0, 0, 1, 1], [], []>} : vector<16x32xbf16>, vector<32x32xbf16>, vector<16x32xf32> -> vector<16x32xf32>
      %75 = arith.addf %67, %74 : vector<16x32xf32>
      %76 = vector.broadcast %0 : vector<1x32xf32> to vector<16x32xf32>
      %77 = arith.mulf %75, %76 : vector<16x32xf32>
      %78 = vector.broadcast %1 : vector<1x32xf32> to vector<16x32xf32>
      %79 = arith.addf %77, %78 : vector<16x32xf32>
      %cst_67 = arith.constant 0.000000e+00 : f32
      %80 = vector.broadcast %cst_67 : f32 to vector<16x32xf32>
      %81 = arith.maximumf %79, %80 : vector<16x32xf32>
      %c0_68 = arith.constant 0 : index
      %82 = arith.index_cast %arg7 : i32 to index
      %c0_69 = arith.constant 0 : index
      %c0_70 = arith.constant 0 : index
      %83 = vector.load %arg5[%c0_68, %82, %c0_69, %c0_70] : memref<1x16x16x32xf32, #tpu.memory_space<vmem>>, vector<1x1x16x32xf32>
      %84 = vector.shape_cast %83 : vector<1x1x16x32xf32> to vector<16x32xf32>
      %85 = arith.addf %81, %84 : vector<16x32xf32>
      %c0_71 = arith.constant 0 : index
      %86 = arith.index_cast %arg7 : i32 to index
      %c0_72 = arith.constant 0 : index
      %c0_73 = arith.constant 0 : index
      %87 = vector.load %arg6[%c0_71, %86, %c0_72, %c0_73] : memref<1x16x16x32xf32, #tpu.memory_space<vmem>>, vector<1x1x16x32xf32>
      %88 = vector.shape_cast %87 : vector<1x1x16x32xf32> to vector<16x32xf32>
      %89 = vector.shape_cast %85 : vector<16x32xf32> to vector<1x1x16x32xf32>
      tpu.vector_store %arg6[%c0_71, %86, %c0_72, %c0_73], %89 {strides = array<i32>} : memref<1x16x16x32xf32, #tpu.memory_space<vmem>>, vector<1x1x16x32xf32>,
    }
    %c16_i32_3 = arith.constant 16 : i32
    return
  }
  func.func @transform_0(%arg0: i32) -> (i32, i32, i32, i32) {
    %c0_i32 = arith.constant 0 : i32
    %c0_i32_0 = arith.constant 0 : i32
    %c0_i32_1 = arith.constant 0 : i32
    %c0_i32_2 = arith.constant 0 : i32
    return %arg0, %c0_i32, %c0_i32_0, %c0_i32_1 : i32, i32, i32, i32
  }
  func.func @transform_1(%arg0: i32) -> (i32, i32, i32) {
    %c0_i32 = arith.constant 0 : i32
    %c0_i32_0 = arith.constant 0 : i32
    %c0_i32_1 = arith.constant 0 : i32
    %c0_i32_2 = arith.constant 0 : i32
    return %c0_i32, %c0_i32_0, %c0_i32_1 : i32, i32, i32
  }
  func.func @transform_2(%arg0: i32) -> (i32, i32) {
    %c0_i32 = arith.constant 0 : i32
    %c0_i32_0 = arith.constant 0 : i32
    %c0_i32_1 = arith.constant 0 : i32
    return %c0_i32, %c0_i32_0 : i32, i32
  }
  func.func @transform_3(%arg0: i32) -> (i32, i32) {
    %c0_i32 = arith.constant 0 : i32
    %c0_i32_0 = arith.constant 0 : i32
    %c0_i32_1 = arith.constant 0 : i32
    return %c0_i32, %c0_i32_0 : i32, i32
  }
  func.func @transform_4(%arg0: i32) -> (i32, i32, i32, i32) {
    %c0_i32 = arith.constant 0 : i32
    %c0_i32_0 = arith.constant 0 : i32
    %c0_i32_1 = arith.constant 0 : i32
    %c0_i32_2 = arith.constant 0 : i32
    return %arg0, %c0_i32, %c0_i32_0, %c0_i32_1 : i32, i32, i32, i32
  }
  func.func @transform_5(%arg0: i32) -> (i32, i32, i32, i32) {
    %c0_i32 = arith.constant 0 : i32
    %c0_i32_0 = arith.constant 0 : i32
    %c0_i32_1 = arith.constant 0 : i32
    %c0_i32_2 = arith.constant 0 : i32
    return %arg0, %c0_i32, %c0_i32_0, %c0_i32_1 : i32, i32, i32, i32
  }
}

module attributes {stable_mosaic.version = 11 : i64} {
  func.func @_conv_kernel(%arg0: i32, %arg1: memref<1x18x18x32xbf16, #tpu.memory_space<vmem>>, %arg2: memref<9x32x32xbf16, #tpu.memory_space<vmem>>, %arg3: memref<1x32xf32, #tpu.memory_space<vmem>>, %arg4: memref<1x32xf32, #tpu.memory_space<vmem>>, %arg5: memref<1x16x16x32xf32, #tpu.memory_space<vmem>>) attributes {dimension_semantics = [#tpu.dimension_semantics<parallel>], iteration_bounds = array<i64: 2>, scalar_prefetch = 0 : i64, scratch_operands = 0 : i64, tpu.core_type = #tpu.core_type<tc>, window_params = [{transform_indices = @transform_0, window_bounds = array<i64: 1, 18, 18, 32>}, {pipeline_mode = #tpu.pipeline_mode<synchronous>, transform_indices = @transform_1, window_bounds = array<i64: 9, 32, 32>}, {pipeline_mode = #tpu.pipeline_mode<synchronous>, transform_indices = @transform_2, window_bounds = array<i64: 1, 32>}, {pipeline_mode = #tpu.pipeline_mode<synchronous>, transform_indices = @transform_3, window_bounds = array<i64: 1, 32>}, {transform_indices = @transform_4, window_bounds = array<i64: 1, 16, 16, 32>}]} {
    %c0 = arith.constant 0 : index
    %c0_0 = arith.constant 0 : index
    %0 = vector.load %arg3[%c0, %c0_0] : memref<1x32xf32, #tpu.memory_space<vmem>>, vector<1x32xf32>
    %c0_1 = arith.constant 0 : index
    %c0_2 = arith.constant 0 : index
    %1 = vector.load %arg4[%c0_1, %c0_2] : memref<1x32xf32, #tpu.memory_space<vmem>>, vector<1x32xf32>
    %c0_i32 = arith.constant 0 : i32
    %c16_i32 = arith.constant 16 : i32
    %2 = arith.addi %c0_i32, %c16_i32 : i32
    %c1_i32 = arith.constant 1 : i32
    scf.for %arg6 = %c0_i32 to %2 step %c1_i32  : i32 {
      %cst = arith.constant 0.000000e+00 : f32
      %3 = vector.broadcast %cst : f32 to vector<16x32xf32>
      %c0_i32_4 = arith.constant 0 : i32
      %4 = arith.addi %arg6, %c0_i32_4 : i32
      %c0_5 = arith.constant 0 : index
      %5 = arith.index_cast %4 : i32 to index
      %c0_6 = arith.constant 0 : index
      %c0_7 = arith.constant 0 : index
      %6 = vector.load %arg1[%c0_5, %5, %c0_6, %c0_7] : memref<1x18x18x32xbf16, #tpu.memory_space<vmem>>, vector<1x1x16x32xbf16>
      %7 = vector.shape_cast %6 : vector<1x1x16x32xbf16> to vector<16x32xbf16>
      %c0_8 = arith.constant 0 : index
      %c0_9 = arith.constant 0 : index
      %c0_10 = arith.constant 0 : index
      %8 = vector.load %arg2[%c0_8, %c0_9, %c0_10] : memref<9x32x32xbf16, #tpu.memory_space<vmem>>, vector<1x32x32xbf16>
      %9 = vector.shape_cast %8 : vector<1x32x32xbf16> to vector<32x32xbf16>
      %cst_11 = arith.constant dense<0.000000e+00> : vector<16x32xf32>
      %10 = tpu.matmul %7, %9, %cst_11 {dimension_numbers = #tpu.dot_dimension_numbers<[1], [0], [0], [1], [0, 0, 1, 1], [], []>} : vector<16x32xbf16>, vector<32x32xbf16>, vector<16x32xf32> -> vector<16x32xf32>
      %11 = arith.addf %3, %10 : vector<16x32xf32>
      %c0_i32_12 = arith.constant 0 : i32
      %12 = arith.addi %arg6, %c0_i32_12 : i32
      %c0_13 = arith.constant 0 : index
      %13 = arith.index_cast %12 : i32 to index
      %c1 = arith.constant 1 : index
      %c0_14 = arith.constant 0 : index
      %14 = vector.load %arg1[%c0_13, %13, %c1, %c0_14] : memref<1x18x18x32xbf16, #tpu.memory_space<vmem>>, vector<1x1x16x32xbf16>
      %15 = vector.shape_cast %14 : vector<1x1x16x32xbf16> to vector<16x32xbf16>
      %c1_15 = arith.constant 1 : index
      %c0_16 = arith.constant 0 : index
      %c0_17 = arith.constant 0 : index
      %16 = vector.load %arg2[%c1_15, %c0_16, %c0_17] : memref<9x32x32xbf16, #tpu.memory_space<vmem>>, vector<1x32x32xbf16>
      %17 = vector.shape_cast %16 : vector<1x32x32xbf16> to vector<32x32xbf16>
      %cst_18 = arith.constant dense<0.000000e+00> : vector<16x32xf32>
      %18 = tpu.matmul %15, %17, %cst_18 {dimension_numbers = #tpu.dot_dimension_numbers<[1], [0], [0], [1], [0, 0, 1, 1], [], []>} : vector<16x32xbf16>, vector<32x32xbf16>, vector<16x32xf32> -> vector<16x32xf32>
      %19 = arith.addf %11, %18 : vector<16x32xf32>
      %c0_i32_19 = arith.constant 0 : i32
      %20 = arith.addi %arg6, %c0_i32_19 : i32
      %c0_20 = arith.constant 0 : index
      %21 = arith.index_cast %20 : i32 to index
      %c2 = arith.constant 2 : index
      %c0_21 = arith.constant 0 : index
      %22 = vector.load %arg1[%c0_20, %21, %c2, %c0_21] : memref<1x18x18x32xbf16, #tpu.memory_space<vmem>>, vector<1x1x16x32xbf16>
      %23 = vector.shape_cast %22 : vector<1x1x16x32xbf16> to vector<16x32xbf16>
      %c2_22 = arith.constant 2 : index
      %c0_23 = arith.constant 0 : index
      %c0_24 = arith.constant 0 : index
      %24 = vector.load %arg2[%c2_22, %c0_23, %c0_24] : memref<9x32x32xbf16, #tpu.memory_space<vmem>>, vector<1x32x32xbf16>
      %25 = vector.shape_cast %24 : vector<1x32x32xbf16> to vector<32x32xbf16>
      %cst_25 = arith.constant dense<0.000000e+00> : vector<16x32xf32>
      %26 = tpu.matmul %23, %25, %cst_25 {dimension_numbers = #tpu.dot_dimension_numbers<[1], [0], [0], [1], [0, 0, 1, 1], [], []>} : vector<16x32xbf16>, vector<32x32xbf16>, vector<16x32xf32> -> vector<16x32xf32>
      %27 = arith.addf %19, %26 : vector<16x32xf32>
      %c1_i32_26 = arith.constant 1 : i32
      %28 = arith.addi %arg6, %c1_i32_26 : i32
      %c0_27 = arith.constant 0 : index
      %29 = arith.index_cast %28 : i32 to index
      %c0_28 = arith.constant 0 : index
      %c0_29 = arith.constant 0 : index
      %30 = vector.load %arg1[%c0_27, %29, %c0_28, %c0_29] : memref<1x18x18x32xbf16, #tpu.memory_space<vmem>>, vector<1x1x16x32xbf16>
      %31 = vector.shape_cast %30 : vector<1x1x16x32xbf16> to vector<16x32xbf16>
      %c3 = arith.constant 3 : index
      %c0_30 = arith.constant 0 : index
      %c0_31 = arith.constant 0 : index
      %32 = vector.load %arg2[%c3, %c0_30, %c0_31] : memref<9x32x32xbf16, #tpu.memory_space<vmem>>, vector<1x32x32xbf16>
      %33 = vector.shape_cast %32 : vector<1x32x32xbf16> to vector<32x32xbf16>
      %cst_32 = arith.constant dense<0.000000e+00> : vector<16x32xf32>
      %34 = tpu.matmul %31, %33, %cst_32 {dimension_numbers = #tpu.dot_dimension_numbers<[1], [0], [0], [1], [0, 0, 1, 1], [], []>} : vector<16x32xbf16>, vector<32x32xbf16>, vector<16x32xf32> -> vector<16x32xf32>
      %35 = arith.addf %27, %34 : vector<16x32xf32>
      %c1_i32_33 = arith.constant 1 : i32
      %36 = arith.addi %arg6, %c1_i32_33 : i32
      %c0_34 = arith.constant 0 : index
      %37 = arith.index_cast %36 : i32 to index
      %c1_35 = arith.constant 1 : index
      %c0_36 = arith.constant 0 : index
      %38 = vector.load %arg1[%c0_34, %37, %c1_35, %c0_36] : memref<1x18x18x32xbf16, #tpu.memory_space<vmem>>, vector<1x1x16x32xbf16>
      %39 = vector.shape_cast %38 : vector<1x1x16x32xbf16> to vector<16x32xbf16>
      %c4 = arith.constant 4 : index
      %c0_37 = arith.constant 0 : index
      %c0_38 = arith.constant 0 : index
      %40 = vector.load %arg2[%c4, %c0_37, %c0_38] : memref<9x32x32xbf16, #tpu.memory_space<vmem>>, vector<1x32x32xbf16>
      %41 = vector.shape_cast %40 : vector<1x32x32xbf16> to vector<32x32xbf16>
      %cst_39 = arith.constant dense<0.000000e+00> : vector<16x32xf32>
      %42 = tpu.matmul %39, %41, %cst_39 {dimension_numbers = #tpu.dot_dimension_numbers<[1], [0], [0], [1], [0, 0, 1, 1], [], []>} : vector<16x32xbf16>, vector<32x32xbf16>, vector<16x32xf32> -> vector<16x32xf32>
      %43 = arith.addf %35, %42 : vector<16x32xf32>
      %c1_i32_40 = arith.constant 1 : i32
      %44 = arith.addi %arg6, %c1_i32_40 : i32
      %c0_41 = arith.constant 0 : index
      %45 = arith.index_cast %44 : i32 to index
      %c2_42 = arith.constant 2 : index
      %c0_43 = arith.constant 0 : index
      %46 = vector.load %arg1[%c0_41, %45, %c2_42, %c0_43] : memref<1x18x18x32xbf16, #tpu.memory_space<vmem>>, vector<1x1x16x32xbf16>
      %47 = vector.shape_cast %46 : vector<1x1x16x32xbf16> to vector<16x32xbf16>
      %c5 = arith.constant 5 : index
      %c0_44 = arith.constant 0 : index
      %c0_45 = arith.constant 0 : index
      %48 = vector.load %arg2[%c5, %c0_44, %c0_45] : memref<9x32x32xbf16, #tpu.memory_space<vmem>>, vector<1x32x32xbf16>
      %49 = vector.shape_cast %48 : vector<1x32x32xbf16> to vector<32x32xbf16>
      %cst_46 = arith.constant dense<0.000000e+00> : vector<16x32xf32>
      %50 = tpu.matmul %47, %49, %cst_46 {dimension_numbers = #tpu.dot_dimension_numbers<[1], [0], [0], [1], [0, 0, 1, 1], [], []>} : vector<16x32xbf16>, vector<32x32xbf16>, vector<16x32xf32> -> vector<16x32xf32>
      %51 = arith.addf %43, %50 : vector<16x32xf32>
      %c2_i32 = arith.constant 2 : i32
      %52 = arith.addi %arg6, %c2_i32 : i32
      %c0_47 = arith.constant 0 : index
      %53 = arith.index_cast %52 : i32 to index
      %c0_48 = arith.constant 0 : index
      %c0_49 = arith.constant 0 : index
      %54 = vector.load %arg1[%c0_47, %53, %c0_48, %c0_49] : memref<1x18x18x32xbf16, #tpu.memory_space<vmem>>, vector<1x1x16x32xbf16>
      %55 = vector.shape_cast %54 : vector<1x1x16x32xbf16> to vector<16x32xbf16>
      %c6 = arith.constant 6 : index
      %c0_50 = arith.constant 0 : index
      %c0_51 = arith.constant 0 : index
      %56 = vector.load %arg2[%c6, %c0_50, %c0_51] : memref<9x32x32xbf16, #tpu.memory_space<vmem>>, vector<1x32x32xbf16>
      %57 = vector.shape_cast %56 : vector<1x32x32xbf16> to vector<32x32xbf16>
      %cst_52 = arith.constant dense<0.000000e+00> : vector<16x32xf32>
      %58 = tpu.matmul %55, %57, %cst_52 {dimension_numbers = #tpu.dot_dimension_numbers<[1], [0], [0], [1], [0, 0, 1, 1], [], []>} : vector<16x32xbf16>, vector<32x32xbf16>, vector<16x32xf32> -> vector<16x32xf32>
      %59 = arith.addf %51, %58 : vector<16x32xf32>
      %c2_i32_53 = arith.constant 2 : i32
      %60 = arith.addi %arg6, %c2_i32_53 : i32
      %c0_54 = arith.constant 0 : index
      %61 = arith.index_cast %60 : i32 to index
      %c1_55 = arith.constant 1 : index
      %c0_56 = arith.constant 0 : index
      %62 = vector.load %arg1[%c0_54, %61, %c1_55, %c0_56] : memref<1x18x18x32xbf16, #tpu.memory_space<vmem>>, vector<1x1x16x32xbf16>
      %63 = vector.shape_cast %62 : vector<1x1x16x32xbf16> to vector<16x32xbf16>
      %c7 = arith.constant 7 : index
      %c0_57 = arith.constant 0 : index
      %c0_58 = arith.constant 0 : index
      %64 = vector.load %arg2[%c7, %c0_57, %c0_58] : memref<9x32x32xbf16, #tpu.memory_space<vmem>>, vector<1x32x32xbf16>
      %65 = vector.shape_cast %64 : vector<1x32x32xbf16> to vector<32x32xbf16>
      %cst_59 = arith.constant dense<0.000000e+00> : vector<16x32xf32>
      %66 = tpu.matmul %63, %65, %cst_59 {dimension_numbers = #tpu.dot_dimension_numbers<[1], [0], [0], [1], [0, 0, 1, 1], [], []>} : vector<16x32xbf16>, vector<32x32xbf16>, vector<16x32xf32> -> vector<16x32xf32>
      %67 = arith.addf %59, %66 : vector<16x32xf32>
      %c2_i32_60 = arith.constant 2 : i32
      %68 = arith.addi %arg6, %c2_i32_60 : i32
      %c0_61 = arith.constant 0 : index
      %69 = arith.index_cast %68 : i32 to index
      %c2_62 = arith.constant 2 : index
      %c0_63 = arith.constant 0 : index
      %70 = vector.load %arg1[%c0_61, %69, %c2_62, %c0_63] : memref<1x18x18x32xbf16, #tpu.memory_space<vmem>>, vector<1x1x16x32xbf16>
      %71 = vector.shape_cast %70 : vector<1x1x16x32xbf16> to vector<16x32xbf16>
      %c8 = arith.constant 8 : index
      %c0_64 = arith.constant 0 : index
      %c0_65 = arith.constant 0 : index
      %72 = vector.load %arg2[%c8, %c0_64, %c0_65] : memref<9x32x32xbf16, #tpu.memory_space<vmem>>, vector<1x32x32xbf16>
      %73 = vector.shape_cast %72 : vector<1x32x32xbf16> to vector<32x32xbf16>
      %cst_66 = arith.constant dense<0.000000e+00> : vector<16x32xf32>
      %74 = tpu.matmul %71, %73, %cst_66 {dimension_numbers = #tpu.dot_dimension_numbers<[1], [0], [0], [1], [0, 0, 1, 1], [], []>} : vector<16x32xbf16>, vector<32x32xbf16>, vector<16x32xf32> -> vector<16x32xf32>
      %75 = arith.addf %67, %74 : vector<16x32xf32>
      %76 = vector.broadcast %0 : vector<1x32xf32> to vector<16x32xf32>
      %77 = arith.mulf %75, %76 : vector<16x32xf32>
      %78 = vector.broadcast %1 : vector<1x32xf32> to vector<16x32xf32>
      %79 = arith.addf %77, %78 : vector<16x32xf32>
      %cst_67 = arith.constant 0.000000e+00 : f32
      %80 = vector.broadcast %cst_67 : f32 to vector<16x32xf32>
      %81 = arith.maximumf %79, %80 : vector<16x32xf32>
      %c0_68 = arith.constant 0 : index
      %82 = arith.index_cast %arg6 : i32 to index
      %c0_69 = arith.constant 0 : index
      %c0_70 = arith.constant 0 : index
      %83 = vector.load %arg5[%c0_68, %82, %c0_69, %c0_70] : memref<1x16x16x32xf32, #tpu.memory_space<vmem>>, vector<1x1x16x32xf32>
      %84 = vector.shape_cast %83 : vector<1x1x16x32xf32> to vector<16x32xf32>
      %85 = vector.shape_cast %81 : vector<16x32xf32> to vector<1x1x16x32xf32>
      tpu.vector_store %arg5[%c0_68, %82, %c0_69, %c0_70], %85 {strides = array<i32>} : memref<1x16x16x32xf32, #tpu.memory_space<vmem>>, vector<1x1x16x32xf32>,
    }
    %c16_i32_3 = arith.constant 16 : i32
    return
  }
  func.func @transform_0(%arg0: i32) -> (i32, i32, i32, i32) {
    %c0_i32 = arith.constant 0 : i32
    %c0_i32_0 = arith.constant 0 : i32
    %c0_i32_1 = arith.constant 0 : i32
    %c0_i32_2 = arith.constant 0 : i32
    return %arg0, %c0_i32, %c0_i32_0, %c0_i32_1 : i32, i32, i32, i32
  }
  func.func @transform_1(%arg0: i32) -> (i32, i32, i32) {
    %c0_i32 = arith.constant 0 : i32
    %c0_i32_0 = arith.constant 0 : i32
    %c0_i32_1 = arith.constant 0 : i32
    %c0_i32_2 = arith.constant 0 : i32
    return %c0_i32, %c0_i32_0, %c0_i32_1 : i32, i32, i32
  }
  func.func @transform_2(%arg0: i32) -> (i32, i32) {
    %c0_i32 = arith.constant 0 : i32
    %c0_i32_0 = arith.constant 0 : i32
    %c0_i32_1 = arith.constant 0 : i32
    return %c0_i32, %c0_i32_0 : i32, i32
  }
  func.func @transform_3(%arg0: i32) -> (i32, i32) {
    %c0_i32 = arith.constant 0 : i32
    %c0_i32_0 = arith.constant 0 : i32
    %c0_i32_1 = arith.constant 0 : i32
    return %c0_i32, %c0_i32_0 : i32, i32
  }
  func.func @transform_4(%arg0: i32) -> (i32, i32, i32, i32) {
    %c0_i32 = arith.constant 0 : i32
    %c0_i32_0 = arith.constant 0 : i32
    %c0_i32_1 = arith.constant 0 : i32
    %c0_i32_2 = arith.constant 0 : i32
    return %arg0, %c0_i32, %c0_i32_0, %c0_i32_1 : i32, i32, i32, i32
  }
}

module attributes {stable_mosaic.version = 11 : i64} {
  func.func @_maxpool_kernel(%arg0: i32, %arg1: memref<1x16x8x64xf32, #tpu.memory_space<vmem>>, %arg2: memref<1x8x8x32xf32, #tpu.memory_space<vmem>>) attributes {dimension_semantics = [#tpu.dimension_semantics<parallel>], iteration_bounds = array<i64: 2>, scalar_prefetch = 0 : i64, scratch_operands = 0 : i64, tpu.core_type = #tpu.core_type<tc>, window_params = [{transform_indices = @transform_0, window_bounds = array<i64: 1, 16, 8, 64>}, {transform_indices = @transform_1, window_bounds = array<i64: 1, 8, 8, 32>}]} {
    %c0 = arith.constant 0 : index
    %c0_0 = arith.constant 0 : index
    %c0_1 = arith.constant 0 : index
    %c0_2 = arith.constant 0 : index
    %0 = vector.load %arg1[%c0, %c0_0, %c0_1, %c0_2] : memref<1x16x8x64xf32, #tpu.memory_space<vmem>>, vector<1x16x8x64xf32>
    %1 = vector.shape_cast %0 : vector<1x16x8x64xf32> to vector<16x8x64xf32>
    %2 = vector.extract_strided_slice %1 {offsets = [0, 0, 0], sizes = [16, 8, 32], strides = [1, 1, 1]} : vector<16x8x64xf32> to vector<16x8x32xf32>
    %3 = vector.extract_strided_slice %1 {offsets = [0, 0, 32], sizes = [16, 8, 32], strides = [1, 1, 1]} : vector<16x8x64xf32> to vector<16x8x32xf32>
    %4 = arith.maximumf %2, %3 : vector<16x8x32xf32>
    %5 = vector.shape_cast %4 : vector<16x8x32xf32> to vector<8x2x8x32xf32>
    %6 = vector.extract_strided_slice %5 {offsets = [0, 0, 0, 0], sizes = [8, 1, 8, 32], strides = [1, 1, 1, 1]} : vector<8x2x8x32xf32> to vector<8x1x8x32xf32>
    %7 = vector.shape_cast %6 : vector<8x1x8x32xf32> to vector<8x8x32xf32>
    %8 = vector.extract_strided_slice %5 {offsets = [0, 1, 0, 0], sizes = [8, 1, 8, 32], strides = [1, 1, 1, 1]} : vector<8x2x8x32xf32> to vector<8x1x8x32xf32>
    %9 = vector.shape_cast %8 : vector<8x1x8x32xf32> to vector<8x8x32xf32>
    %10 = arith.maximumf %7, %9 : vector<8x8x32xf32>
    %c0_3 = arith.constant 0 : index
    %c0_4 = arith.constant 0 : index
    %c0_5 = arith.constant 0 : index
    %c0_6 = arith.constant 0 : index
    %11 = vector.load %arg2[%c0_3, %c0_4, %c0_5, %c0_6] : memref<1x8x8x32xf32, #tpu.memory_space<vmem>>, vector<1x8x8x32xf32>
    %12 = vector.shape_cast %11 : vector<1x8x8x32xf32> to vector<8x8x32xf32>
    %13 = vector.shape_cast %10 : vector<8x8x32xf32> to vector<1x8x8x32xf32>
    tpu.vector_store %arg2[%c0_3, %c0_4, %c0_5, %c0_6], %13 {strides = array<i32>} : memref<1x8x8x32xf32, #tpu.memory_space<vmem>>, vector<1x8x8x32xf32>,
    return
  }
  func.func @transform_0(%arg0: i32) -> (i32, i32, i32, i32) {
    %c0_i32 = arith.constant 0 : i32
    %c0_i32_0 = arith.constant 0 : i32
    %c0_i32_1 = arith.constant 0 : i32
    %c0_i32_2 = arith.constant 0 : i32
    return %arg0, %c0_i32, %c0_i32_0, %c0_i32_1 : i32, i32, i32, i32
  }
  func.func @transform_1(%arg0: i32) -> (i32, i32, i32, i32) {
    %c0_i32 = arith.constant 0 : i32
    %c0_i32_0 = arith.constant 0 : i32
    %c0_i32_1 = arith.constant 0 : i32
    %c0_i32_2 = arith.constant 0 : i32
    return %arg0, %c0_i32, %c0_i32_0, %c0_i32_1 : i32, i32, i32, i32
  }
}

module attributes {stable_mosaic.version = 11 : i64} {
  func.func @_conv_kernel(%arg0: i32, %arg1: memref<1x10x10x32xbf16, #tpu.memory_space<vmem>>, %arg2: memref<9x32x128xbf16, #tpu.memory_space<vmem>>, %arg3: memref<1x128xf32, #tpu.memory_space<vmem>>, %arg4: memref<1x128xf32, #tpu.memory_space<vmem>>, %arg5: memref<1x8x8x64xf32, #tpu.memory_space<vmem>>, %arg6: memref<1x8x8x64xf32, #tpu.memory_space<vmem>>) attributes {dimension_semantics = [#tpu.dimension_semantics<parallel>], iteration_bounds = array<i64: 2>, scalar_prefetch = 0 : i64, scratch_operands = 0 : i64, tpu.core_type = #tpu.core_type<tc>, window_params = [{transform_indices = @transform_0, window_bounds = array<i64: 1, 10, 10, 32>}, {pipeline_mode = #tpu.pipeline_mode<synchronous>, transform_indices = @transform_1, window_bounds = array<i64: 9, 32, 128>}, {pipeline_mode = #tpu.pipeline_mode<synchronous>, transform_indices = @transform_2, window_bounds = array<i64: 1, 128>}, {pipeline_mode = #tpu.pipeline_mode<synchronous>, transform_indices = @transform_3, window_bounds = array<i64: 1, 128>}, {transform_indices = @transform_4, window_bounds = array<i64: 1, 8, 8, 64>}, {transform_indices = @transform_5, window_bounds = array<i64: 1, 8, 8, 64>}]} {
    %c0 = arith.constant 0 : index
    %c0_0 = arith.constant 0 : index
    %0 = vector.load %arg3[%c0, %c0_0] : memref<1x128xf32, #tpu.memory_space<vmem>>, vector<1x128xf32>
    %c0_1 = arith.constant 0 : index
    %c0_2 = arith.constant 0 : index
    %1 = vector.load %arg4[%c0_1, %c0_2] : memref<1x128xf32, #tpu.memory_space<vmem>>, vector<1x128xf32>
    %c0_i32 = arith.constant 0 : i32
    %c8_i32 = arith.constant 8 : i32
    %2 = arith.addi %c0_i32, %c8_i32 : i32
    %c1_i32 = arith.constant 1 : i32
    scf.for %arg7 = %c0_i32 to %2 step %c1_i32  : i32 {
      %cst = arith.constant 0.000000e+00 : f32
      %3 = vector.broadcast %cst : f32 to vector<8x128xf32>
      %c0_i32_4 = arith.constant 0 : i32
      %4 = arith.addi %arg7, %c0_i32_4 : i32
      %c0_5 = arith.constant 0 : index
      %5 = arith.index_cast %4 : i32 to index
      %c0_6 = arith.constant 0 : index
      %c0_7 = arith.constant 0 : index
      %6 = vector.load %arg1[%c0_5, %5, %c0_6, %c0_7] : memref<1x10x10x32xbf16, #tpu.memory_space<vmem>>, vector<1x1x8x32xbf16>
      %7 = vector.shape_cast %6 : vector<1x1x8x32xbf16> to vector<8x32xbf16>
      %c0_8 = arith.constant 0 : index
      %c0_9 = arith.constant 0 : index
      %c0_10 = arith.constant 0 : index
      %8 = vector.load %arg2[%c0_8, %c0_9, %c0_10] : memref<9x32x128xbf16, #tpu.memory_space<vmem>>, vector<1x32x128xbf16>
      %9 = vector.shape_cast %8 : vector<1x32x128xbf16> to vector<32x128xbf16>
      %cst_11 = arith.constant dense<0.000000e+00> : vector<8x128xf32>
      %10 = tpu.matmul %7, %9, %cst_11 {dimension_numbers = #tpu.dot_dimension_numbers<[1], [0], [0], [1], [0, 0, 1, 1], [], []>} : vector<8x32xbf16>, vector<32x128xbf16>, vector<8x128xf32> -> vector<8x128xf32>
      %11 = arith.addf %3, %10 : vector<8x128xf32>
      %c0_i32_12 = arith.constant 0 : i32
      %12 = arith.addi %arg7, %c0_i32_12 : i32
      %c0_13 = arith.constant 0 : index
      %13 = arith.index_cast %12 : i32 to index
      %c1 = arith.constant 1 : index
      %c0_14 = arith.constant 0 : index
      %14 = vector.load %arg1[%c0_13, %13, %c1, %c0_14] : memref<1x10x10x32xbf16, #tpu.memory_space<vmem>>, vector<1x1x8x32xbf16>
      %15 = vector.shape_cast %14 : vector<1x1x8x32xbf16> to vector<8x32xbf16>
      %c1_15 = arith.constant 1 : index
      %c0_16 = arith.constant 0 : index
      %c0_17 = arith.constant 0 : index
      %16 = vector.load %arg2[%c1_15, %c0_16, %c0_17] : memref<9x32x128xbf16, #tpu.memory_space<vmem>>, vector<1x32x128xbf16>
      %17 = vector.shape_cast %16 : vector<1x32x128xbf16> to vector<32x128xbf16>
      %cst_18 = arith.constant dense<0.000000e+00> : vector<8x128xf32>
      %18 = tpu.matmul %15, %17, %cst_18 {dimension_numbers = #tpu.dot_dimension_numbers<[1], [0], [0], [1], [0, 0, 1, 1], [], []>} : vector<8x32xbf16>, vector<32x128xbf16>, vector<8x128xf32> -> vector<8x128xf32>
      %19 = arith.addf %11, %18 : vector<8x128xf32>
      %c0_i32_19 = arith.constant 0 : i32
      %20 = arith.addi %arg7, %c0_i32_19 : i32
      %c0_20 = arith.constant 0 : index
      %21 = arith.index_cast %20 : i32 to index
      %c2 = arith.constant 2 : index
      %c0_21 = arith.constant 0 : index
      %22 = vector.load %arg1[%c0_20, %21, %c2, %c0_21] : memref<1x10x10x32xbf16, #tpu.memory_space<vmem>>, vector<1x1x8x32xbf16>
      %23 = vector.shape_cast %22 : vector<1x1x8x32xbf16> to vector<8x32xbf16>
      %c2_22 = arith.constant 2 : index
      %c0_23 = arith.constant 0 : index
      %c0_24 = arith.constant 0 : index
      %24 = vector.load %arg2[%c2_22, %c0_23, %c0_24] : memref<9x32x128xbf16, #tpu.memory_space<vmem>>, vector<1x32x128xbf16>
      %25 = vector.shape_cast %24 : vector<1x32x128xbf16> to vector<32x128xbf16>
      %cst_25 = arith.constant dense<0.000000e+00> : vector<8x128xf32>
      %26 = tpu.matmul %23, %25, %cst_25 {dimension_numbers = #tpu.dot_dimension_numbers<[1], [0], [0], [1], [0, 0, 1, 1], [], []>} : vector<8x32xbf16>, vector<32x128xbf16>, vector<8x128xf32> -> vector<8x128xf32>
      %27 = arith.addf %19, %26 : vector<8x128xf32>
      %c1_i32_26 = arith.constant 1 : i32
      %28 = arith.addi %arg7, %c1_i32_26 : i32
      %c0_27 = arith.constant 0 : index
      %29 = arith.index_cast %28 : i32 to index
      %c0_28 = arith.constant 0 : index
      %c0_29 = arith.constant 0 : index
      %30 = vector.load %arg1[%c0_27, %29, %c0_28, %c0_29] : memref<1x10x10x32xbf16, #tpu.memory_space<vmem>>, vector<1x1x8x32xbf16>
      %31 = vector.shape_cast %30 : vector<1x1x8x32xbf16> to vector<8x32xbf16>
      %c3 = arith.constant 3 : index
      %c0_30 = arith.constant 0 : index
      %c0_31 = arith.constant 0 : index
      %32 = vector.load %arg2[%c3, %c0_30, %c0_31] : memref<9x32x128xbf16, #tpu.memory_space<vmem>>, vector<1x32x128xbf16>
      %33 = vector.shape_cast %32 : vector<1x32x128xbf16> to vector<32x128xbf16>
      %cst_32 = arith.constant dense<0.000000e+00> : vector<8x128xf32>
      %34 = tpu.matmul %31, %33, %cst_32 {dimension_numbers = #tpu.dot_dimension_numbers<[1], [0], [0], [1], [0, 0, 1, 1], [], []>} : vector<8x32xbf16>, vector<32x128xbf16>, vector<8x128xf32> -> vector<8x128xf32>
      %35 = arith.addf %27, %34 : vector<8x128xf32>
      %c1_i32_33 = arith.constant 1 : i32
      %36 = arith.addi %arg7, %c1_i32_33 : i32
      %c0_34 = arith.constant 0 : index
      %37 = arith.index_cast %36 : i32 to index
      %c1_35 = arith.constant 1 : index
      %c0_36 = arith.constant 0 : index
      %38 = vector.load %arg1[%c0_34, %37, %c1_35, %c0_36] : memref<1x10x10x32xbf16, #tpu.memory_space<vmem>>, vector<1x1x8x32xbf16>
      %39 = vector.shape_cast %38 : vector<1x1x8x32xbf16> to vector<8x32xbf16>
      %c4 = arith.constant 4 : index
      %c0_37 = arith.constant 0 : index
      %c0_38 = arith.constant 0 : index
      %40 = vector.load %arg2[%c4, %c0_37, %c0_38] : memref<9x32x128xbf16, #tpu.memory_space<vmem>>, vector<1x32x128xbf16>
      %41 = vector.shape_cast %40 : vector<1x32x128xbf16> to vector<32x128xbf16>
      %cst_39 = arith.constant dense<0.000000e+00> : vector<8x128xf32>
      %42 = tpu.matmul %39, %41, %cst_39 {dimension_numbers = #tpu.dot_dimension_numbers<[1], [0], [0], [1], [0, 0, 1, 1], [], []>} : vector<8x32xbf16>, vector<32x128xbf16>, vector<8x128xf32> -> vector<8x128xf32>
      %43 = arith.addf %35, %42 : vector<8x128xf32>
      %c1_i32_40 = arith.constant 1 : i32
      %44 = arith.addi %arg7, %c1_i32_40 : i32
      %c0_41 = arith.constant 0 : index
      %45 = arith.index_cast %44 : i32 to index
      %c2_42 = arith.constant 2 : index
      %c0_43 = arith.constant 0 : index
      %46 = vector.load %arg1[%c0_41, %45, %c2_42, %c0_43] : memref<1x10x10x32xbf16, #tpu.memory_space<vmem>>, vector<1x1x8x32xbf16>
      %47 = vector.shape_cast %46 : vector<1x1x8x32xbf16> to vector<8x32xbf16>
      %c5 = arith.constant 5 : index
      %c0_44 = arith.constant 0 : index
      %c0_45 = arith.constant 0 : index
      %48 = vector.load %arg2[%c5, %c0_44, %c0_45] : memref<9x32x128xbf16, #tpu.memory_space<vmem>>, vector<1x32x128xbf16>
      %49 = vector.shape_cast %48 : vector<1x32x128xbf16> to vector<32x128xbf16>
      %cst_46 = arith.constant dense<0.000000e+00> : vector<8x128xf32>
      %50 = tpu.matmul %47, %49, %cst_46 {dimension_numbers = #tpu.dot_dimension_numbers<[1], [0], [0], [1], [0, 0, 1, 1], [], []>} : vector<8x32xbf16>, vector<32x128xbf16>, vector<8x128xf32> -> vector<8x128xf32>
      %51 = arith.addf %43, %50 : vector<8x128xf32>
      %c2_i32 = arith.constant 2 : i32
      %52 = arith.addi %arg7, %c2_i32 : i32
      %c0_47 = arith.constant 0 : index
      %53 = arith.index_cast %52 : i32 to index
      %c0_48 = arith.constant 0 : index
      %c0_49 = arith.constant 0 : index
      %54 = vector.load %arg1[%c0_47, %53, %c0_48, %c0_49] : memref<1x10x10x32xbf16, #tpu.memory_space<vmem>>, vector<1x1x8x32xbf16>
      %55 = vector.shape_cast %54 : vector<1x1x8x32xbf16> to vector<8x32xbf16>
      %c6 = arith.constant 6 : index
      %c0_50 = arith.constant 0 : index
      %c0_51 = arith.constant 0 : index
      %56 = vector.load %arg2[%c6, %c0_50, %c0_51] : memref<9x32x128xbf16, #tpu.memory_space<vmem>>, vector<1x32x128xbf16>
      %57 = vector.shape_cast %56 : vector<1x32x128xbf16> to vector<32x128xbf16>
      %cst_52 = arith.constant dense<0.000000e+00> : vector<8x128xf32>
      %58 = tpu.matmul %55, %57, %cst_52 {dimension_numbers = #tpu.dot_dimension_numbers<[1], [0], [0], [1], [0, 0, 1, 1], [], []>} : vector<8x32xbf16>, vector<32x128xbf16>, vector<8x128xf32> -> vector<8x128xf32>
      %59 = arith.addf %51, %58 : vector<8x128xf32>
      %c2_i32_53 = arith.constant 2 : i32
      %60 = arith.addi %arg7, %c2_i32_53 : i32
      %c0_54 = arith.constant 0 : index
      %61 = arith.index_cast %60 : i32 to index
      %c1_55 = arith.constant 1 : index
      %c0_56 = arith.constant 0 : index
      %62 = vector.load %arg1[%c0_54, %61, %c1_55, %c0_56] : memref<1x10x10x32xbf16, #tpu.memory_space<vmem>>, vector<1x1x8x32xbf16>
      %63 = vector.shape_cast %62 : vector<1x1x8x32xbf16> to vector<8x32xbf16>
      %c7 = arith.constant 7 : index
      %c0_57 = arith.constant 0 : index
      %c0_58 = arith.constant 0 : index
      %64 = vector.load %arg2[%c7, %c0_57, %c0_58] : memref<9x32x128xbf16, #tpu.memory_space<vmem>>, vector<1x32x128xbf16>
      %65 = vector.shape_cast %64 : vector<1x32x128xbf16> to vector<32x128xbf16>
      %cst_59 = arith.constant dense<0.000000e+00> : vector<8x128xf32>
      %66 = tpu.matmul %63, %65, %cst_59 {dimension_numbers = #tpu.dot_dimension_numbers<[1], [0], [0], [1], [0, 0, 1, 1], [], []>} : vector<8x32xbf16>, vector<32x128xbf16>, vector<8x128xf32> -> vector<8x128xf32>
      %67 = arith.addf %59, %66 : vector<8x128xf32>
      %c2_i32_60 = arith.constant 2 : i32
      %68 = arith.addi %arg7, %c2_i32_60 : i32
      %c0_61 = arith.constant 0 : index
      %69 = arith.index_cast %68 : i32 to index
      %c2_62 = arith.constant 2 : index
      %c0_63 = arith.constant 0 : index
      %70 = vector.load %arg1[%c0_61, %69, %c2_62, %c0_63] : memref<1x10x10x32xbf16, #tpu.memory_space<vmem>>, vector<1x1x8x32xbf16>
      %71 = vector.shape_cast %70 : vector<1x1x8x32xbf16> to vector<8x32xbf16>
      %c8 = arith.constant 8 : index
      %c0_64 = arith.constant 0 : index
      %c0_65 = arith.constant 0 : index
      %72 = vector.load %arg2[%c8, %c0_64, %c0_65] : memref<9x32x128xbf16, #tpu.memory_space<vmem>>, vector<1x32x128xbf16>
      %73 = vector.shape_cast %72 : vector<1x32x128xbf16> to vector<32x128xbf16>
      %cst_66 = arith.constant dense<0.000000e+00> : vector<8x128xf32>
      %74 = tpu.matmul %71, %73, %cst_66 {dimension_numbers = #tpu.dot_dimension_numbers<[1], [0], [0], [1], [0, 0, 1, 1], [], []>} : vector<8x32xbf16>, vector<32x128xbf16>, vector<8x128xf32> -> vector<8x128xf32>
      %75 = arith.addf %67, %74 : vector<8x128xf32>
      %76 = vector.broadcast %0 : vector<1x128xf32> to vector<8x128xf32>
      %77 = arith.mulf %75, %76 : vector<8x128xf32>
      %78 = vector.broadcast %1 : vector<1x128xf32> to vector<8x128xf32>
      %79 = arith.addf %77, %78 : vector<8x128xf32>
      %80 = vector.extract_strided_slice %79 {offsets = [0, 0], sizes = [8, 64], strides = [1, 1]} : vector<8x128xf32> to vector<8x64xf32>
      %cst_67 = arith.constant 0.000000e+00 : f32
      %81 = vector.broadcast %cst_67 : f32 to vector<8x64xf32>
      %82 = arith.maximumf %80, %81 : vector<8x64xf32>
      %c0_68 = arith.constant 0 : index
      %83 = arith.index_cast %arg7 : i32 to index
      %c0_69 = arith.constant 0 : index
      %c0_70 = arith.constant 0 : index
      %84 = vector.load %arg5[%c0_68, %83, %c0_69, %c0_70] : memref<1x8x8x64xf32, #tpu.memory_space<vmem>>, vector<1x1x8x64xf32>
      %85 = vector.shape_cast %84 : vector<1x1x8x64xf32> to vector<8x64xf32>
      %86 = vector.shape_cast %82 : vector<8x64xf32> to vector<1x1x8x64xf32>
      tpu.vector_store %arg5[%c0_68, %83, %c0_69, %c0_70], %86 {strides = array<i32>} : memref<1x8x8x64xf32, #tpu.memory_space<vmem>>, vector<1x1x8x64xf32>,
      %87 = vector.extract_strided_slice %79 {offsets = [0, 64], sizes = [8, 64], strides = [1, 1]} : vector<8x128xf32> to vector<8x64xf32>
      %c0_71 = arith.constant 0 : index
      %88 = arith.index_cast %arg7 : i32 to index
      %c0_72 = arith.constant 0 : index
      %c0_73 = arith.constant 0 : index
      %89 = vector.load %arg6[%c0_71, %88, %c0_72, %c0_73] : memref<1x8x8x64xf32, #tpu.memory_space<vmem>>, vector<1x1x8x64xf32>
      %90 = vector.shape_cast %89 : vector<1x1x8x64xf32> to vector<8x64xf32>
      %91 = vector.shape_cast %87 : vector<8x64xf32> to vector<1x1x8x64xf32>
      tpu.vector_store %arg6[%c0_71, %88, %c0_72, %c0_73], %91 {strides = array<i32>} : memref<1x8x8x64xf32, #tpu.memory_space<vmem>>, vector<1x1x8x64xf32>,
    }
    %c8_i32_3 = arith.constant 8 : i32
    return
  }
  func.func @transform_0(%arg0: i32) -> (i32, i32, i32, i32) {
    %c0_i32 = arith.constant 0 : i32
    %c0_i32_0 = arith.constant 0 : i32
    %c0_i32_1 = arith.constant 0 : i32
    %c0_i32_2 = arith.constant 0 : i32
    return %arg0, %c0_i32, %c0_i32_0, %c0_i32_1 : i32, i32, i32, i32
  }
  func.func @transform_1(%arg0: i32) -> (i32, i32, i32) {
    %c0_i32 = arith.constant 0 : i32
    %c0_i32_0 = arith.constant 0 : i32
    %c0_i32_1 = arith.constant 0 : i32
    %c0_i32_2 = arith.constant 0 : i32
    return %c0_i32, %c0_i32_0, %c0_i32_1 : i32, i32, i32
  }
  func.func @transform_2(%arg0: i32) -> (i32, i32) {
    %c0_i32 = arith.constant 0 : i32
    %c0_i32_0 = arith.constant 0 : i32
    %c0_i32_1 = arith.constant 0 : i32
    return %c0_i32, %c0_i32_0 : i32, i32
  }
  func.func @transform_3(%arg0: i32) -> (i32, i32) {
    %c0_i32 = arith.constant 0 : i32
    %c0_i32_0 = arith.constant 0 : i32
    %c0_i32_1 = arith.constant 0 : i32
    return %c0_i32, %c0_i32_0 : i32, i32
  }
  func.func @transform_4(%arg0: i32) -> (i32, i32, i32, i32) {
    %c0_i32 = arith.constant 0 : i32
    %c0_i32_0 = arith.constant 0 : i32
    %c0_i32_1 = arith.constant 0 : i32
    %c0_i32_2 = arith.constant 0 : i32
    return %arg0, %c0_i32, %c0_i32_0, %c0_i32_1 : i32, i32, i32, i32
  }
  func.func @transform_5(%arg0: i32) -> (i32, i32, i32, i32) {
    %c0_i32 = arith.constant 0 : i32
    %c0_i32_0 = arith.constant 0 : i32
    %c0_i32_1 = arith.constant 0 : i32
    %c0_i32_2 = arith.constant 0 : i32
    return %arg0, %c0_i32, %c0_i32_0, %c0_i32_1 : i32, i32, i32, i32
  }
}

module attributes {stable_mosaic.version = 11 : i64} {
  func.func @_conv_kernel(%arg0: i32, %arg1: memref<1x10x10x64xbf16, #tpu.memory_space<vmem>>, %arg2: memref<9x64x64xbf16, #tpu.memory_space<vmem>>, %arg3: memref<1x64xf32, #tpu.memory_space<vmem>>, %arg4: memref<1x64xf32, #tpu.memory_space<vmem>>, %arg5: memref<1x8x8x64xf32, #tpu.memory_space<vmem>>) attributes {dimension_semantics = [#tpu.dimension_semantics<parallel>], iteration_bounds = array<i64: 2>, scalar_prefetch = 0 : i64, scratch_operands = 0 : i64, tpu.core_type = #tpu.core_type<tc>, window_params = [{transform_indices = @transform_0, window_bounds = array<i64: 1, 10, 10, 64>}, {pipeline_mode = #tpu.pipeline_mode<synchronous>, transform_indices = @transform_1, window_bounds = array<i64: 9, 64, 64>}, {pipeline_mode = #tpu.pipeline_mode<synchronous>, transform_indices = @transform_2, window_bounds = array<i64: 1, 64>}, {pipeline_mode = #tpu.pipeline_mode<synchronous>, transform_indices = @transform_3, window_bounds = array<i64: 1, 64>}, {transform_indices = @transform_4, window_bounds = array<i64: 1, 8, 8, 64>}]} {
    %c0 = arith.constant 0 : index
    %c0_0 = arith.constant 0 : index
    %0 = vector.load %arg3[%c0, %c0_0] : memref<1x64xf32, #tpu.memory_space<vmem>>, vector<1x64xf32>
    %c0_1 = arith.constant 0 : index
    %c0_2 = arith.constant 0 : index
    %1 = vector.load %arg4[%c0_1, %c0_2] : memref<1x64xf32, #tpu.memory_space<vmem>>, vector<1x64xf32>
    %c0_i32 = arith.constant 0 : i32
    %c8_i32 = arith.constant 8 : i32
    %2 = arith.addi %c0_i32, %c8_i32 : i32
    %c1_i32 = arith.constant 1 : i32
    scf.for %arg6 = %c0_i32 to %2 step %c1_i32  : i32 {
      %cst = arith.constant 0.000000e+00 : f32
      %3 = vector.broadcast %cst : f32 to vector<8x64xf32>
      %c0_i32_4 = arith.constant 0 : i32
      %4 = arith.addi %arg6, %c0_i32_4 : i32
      %c0_5 = arith.constant 0 : index
      %5 = arith.index_cast %4 : i32 to index
      %c0_6 = arith.constant 0 : index
      %c0_7 = arith.constant 0 : index
      %6 = vector.load %arg1[%c0_5, %5, %c0_6, %c0_7] : memref<1x10x10x64xbf16, #tpu.memory_space<vmem>>, vector<1x1x8x64xbf16>
      %7 = vector.shape_cast %6 : vector<1x1x8x64xbf16> to vector<8x64xbf16>
      %c0_8 = arith.constant 0 : index
      %c0_9 = arith.constant 0 : index
      %c0_10 = arith.constant 0 : index
      %8 = vector.load %arg2[%c0_8, %c0_9, %c0_10] : memref<9x64x64xbf16, #tpu.memory_space<vmem>>, vector<1x64x64xbf16>
      %9 = vector.shape_cast %8 : vector<1x64x64xbf16> to vector<64x64xbf16>
      %cst_11 = arith.constant dense<0.000000e+00> : vector<8x64xf32>
      %10 = tpu.matmul %7, %9, %cst_11 {dimension_numbers = #tpu.dot_dimension_numbers<[1], [0], [0], [1], [0, 0, 1, 1], [], []>} : vector<8x64xbf16>, vector<64x64xbf16>, vector<8x64xf32> -> vector<8x64xf32>
      %11 = arith.addf %3, %10 : vector<8x64xf32>
      %c0_i32_12 = arith.constant 0 : i32
      %12 = arith.addi %arg6, %c0_i32_12 : i32
      %c0_13 = arith.constant 0 : index
      %13 = arith.index_cast %12 : i32 to index
      %c1 = arith.constant 1 : index
      %c0_14 = arith.constant 0 : index
      %14 = vector.load %arg1[%c0_13, %13, %c1, %c0_14] : memref<1x10x10x64xbf16, #tpu.memory_space<vmem>>, vector<1x1x8x64xbf16>
      %15 = vector.shape_cast %14 : vector<1x1x8x64xbf16> to vector<8x64xbf16>
      %c1_15 = arith.constant 1 : index
      %c0_16 = arith.constant 0 : index
      %c0_17 = arith.constant 0 : index
      %16 = vector.load %arg2[%c1_15, %c0_16, %c0_17] : memref<9x64x64xbf16, #tpu.memory_space<vmem>>, vector<1x64x64xbf16>
      %17 = vector.shape_cast %16 : vector<1x64x64xbf16> to vector<64x64xbf16>
      %cst_18 = arith.constant dense<0.000000e+00> : vector<8x64xf32>
      %18 = tpu.matmul %15, %17, %cst_18 {dimension_numbers = #tpu.dot_dimension_numbers<[1], [0], [0], [1], [0, 0, 1, 1], [], []>} : vector<8x64xbf16>, vector<64x64xbf16>, vector<8x64xf32> -> vector<8x64xf32>
      %19 = arith.addf %11, %18 : vector<8x64xf32>
      %c0_i32_19 = arith.constant 0 : i32
      %20 = arith.addi %arg6, %c0_i32_19 : i32
      %c0_20 = arith.constant 0 : index
      %21 = arith.index_cast %20 : i32 to index
      %c2 = arith.constant 2 : index
      %c0_21 = arith.constant 0 : index
      %22 = vector.load %arg1[%c0_20, %21, %c2, %c0_21] : memref<1x10x10x64xbf16, #tpu.memory_space<vmem>>, vector<1x1x8x64xbf16>
      %23 = vector.shape_cast %22 : vector<1x1x8x64xbf16> to vector<8x64xbf16>
      %c2_22 = arith.constant 2 : index
      %c0_23 = arith.constant 0 : index
      %c0_24 = arith.constant 0 : index
      %24 = vector.load %arg2[%c2_22, %c0_23, %c0_24] : memref<9x64x64xbf16, #tpu.memory_space<vmem>>, vector<1x64x64xbf16>
      %25 = vector.shape_cast %24 : vector<1x64x64xbf16> to vector<64x64xbf16>
      %cst_25 = arith.constant dense<0.000000e+00> : vector<8x64xf32>
      %26 = tpu.matmul %23, %25, %cst_25 {dimension_numbers = #tpu.dot_dimension_numbers<[1], [0], [0], [1], [0, 0, 1, 1], [], []>} : vector<8x64xbf16>, vector<64x64xbf16>, vector<8x64xf32> -> vector<8x64xf32>
      %27 = arith.addf %19, %26 : vector<8x64xf32>
      %c1_i32_26 = arith.constant 1 : i32
      %28 = arith.addi %arg6, %c1_i32_26 : i32
      %c0_27 = arith.constant 0 : index
      %29 = arith.index_cast %28 : i32 to index
      %c0_28 = arith.constant 0 : index
      %c0_29 = arith.constant 0 : index
      %30 = vector.load %arg1[%c0_27, %29, %c0_28, %c0_29] : memref<1x10x10x64xbf16, #tpu.memory_space<vmem>>, vector<1x1x8x64xbf16>
      %31 = vector.shape_cast %30 : vector<1x1x8x64xbf16> to vector<8x64xbf16>
      %c3 = arith.constant 3 : index
      %c0_30 = arith.constant 0 : index
      %c0_31 = arith.constant 0 : index
      %32 = vector.load %arg2[%c3, %c0_30, %c0_31] : memref<9x64x64xbf16, #tpu.memory_space<vmem>>, vector<1x64x64xbf16>
      %33 = vector.shape_cast %32 : vector<1x64x64xbf16> to vector<64x64xbf16>
      %cst_32 = arith.constant dense<0.000000e+00> : vector<8x64xf32>
      %34 = tpu.matmul %31, %33, %cst_32 {dimension_numbers = #tpu.dot_dimension_numbers<[1], [0], [0], [1], [0, 0, 1, 1], [], []>} : vector<8x64xbf16>, vector<64x64xbf16>, vector<8x64xf32> -> vector<8x64xf32>
      %35 = arith.addf %27, %34 : vector<8x64xf32>
      %c1_i32_33 = arith.constant 1 : i32
      %36 = arith.addi %arg6, %c1_i32_33 : i32
      %c0_34 = arith.constant 0 : index
      %37 = arith.index_cast %36 : i32 to index
      %c1_35 = arith.constant 1 : index
      %c0_36 = arith.constant 0 : index
      %38 = vector.load %arg1[%c0_34, %37, %c1_35, %c0_36] : memref<1x10x10x64xbf16, #tpu.memory_space<vmem>>, vector<1x1x8x64xbf16>
      %39 = vector.shape_cast %38 : vector<1x1x8x64xbf16> to vector<8x64xbf16>
      %c4 = arith.constant 4 : index
      %c0_37 = arith.constant 0 : index
      %c0_38 = arith.constant 0 : index
      %40 = vector.load %arg2[%c4, %c0_37, %c0_38] : memref<9x64x64xbf16, #tpu.memory_space<vmem>>, vector<1x64x64xbf16>
      %41 = vector.shape_cast %40 : vector<1x64x64xbf16> to vector<64x64xbf16>
      %cst_39 = arith.constant dense<0.000000e+00> : vector<8x64xf32>
      %42 = tpu.matmul %39, %41, %cst_39 {dimension_numbers = #tpu.dot_dimension_numbers<[1], [0], [0], [1], [0, 0, 1, 1], [], []>} : vector<8x64xbf16>, vector<64x64xbf16>, vector<8x64xf32> -> vector<8x64xf32>
      %43 = arith.addf %35, %42 : vector<8x64xf32>
      %c1_i32_40 = arith.constant 1 : i32
      %44 = arith.addi %arg6, %c1_i32_40 : i32
      %c0_41 = arith.constant 0 : index
      %45 = arith.index_cast %44 : i32 to index
      %c2_42 = arith.constant 2 : index
      %c0_43 = arith.constant 0 : index
      %46 = vector.load %arg1[%c0_41, %45, %c2_42, %c0_43] : memref<1x10x10x64xbf16, #tpu.memory_space<vmem>>, vector<1x1x8x64xbf16>
      %47 = vector.shape_cast %46 : vector<1x1x8x64xbf16> to vector<8x64xbf16>
      %c5 = arith.constant 5 : index
      %c0_44 = arith.constant 0 : index
      %c0_45 = arith.constant 0 : index
      %48 = vector.load %arg2[%c5, %c0_44, %c0_45] : memref<9x64x64xbf16, #tpu.memory_space<vmem>>, vector<1x64x64xbf16>
      %49 = vector.shape_cast %48 : vector<1x64x64xbf16> to vector<64x64xbf16>
      %cst_46 = arith.constant dense<0.000000e+00> : vector<8x64xf32>
      %50 = tpu.matmul %47, %49, %cst_46 {dimension_numbers = #tpu.dot_dimension_numbers<[1], [0], [0], [1], [0, 0, 1, 1], [], []>} : vector<8x64xbf16>, vector<64x64xbf16>, vector<8x64xf32> -> vector<8x64xf32>
      %51 = arith.addf %43, %50 : vector<8x64xf32>
      %c2_i32 = arith.constant 2 : i32
      %52 = arith.addi %arg6, %c2_i32 : i32
      %c0_47 = arith.constant 0 : index
      %53 = arith.index_cast %52 : i32 to index
      %c0_48 = arith.constant 0 : index
      %c0_49 = arith.constant 0 : index
      %54 = vector.load %arg1[%c0_47, %53, %c0_48, %c0_49] : memref<1x10x10x64xbf16, #tpu.memory_space<vmem>>, vector<1x1x8x64xbf16>
      %55 = vector.shape_cast %54 : vector<1x1x8x64xbf16> to vector<8x64xbf16>
      %c6 = arith.constant 6 : index
      %c0_50 = arith.constant 0 : index
      %c0_51 = arith.constant 0 : index
      %56 = vector.load %arg2[%c6, %c0_50, %c0_51] : memref<9x64x64xbf16, #tpu.memory_space<vmem>>, vector<1x64x64xbf16>
      %57 = vector.shape_cast %56 : vector<1x64x64xbf16> to vector<64x64xbf16>
      %cst_52 = arith.constant dense<0.000000e+00> : vector<8x64xf32>
      %58 = tpu.matmul %55, %57, %cst_52 {dimension_numbers = #tpu.dot_dimension_numbers<[1], [0], [0], [1], [0, 0, 1, 1], [], []>} : vector<8x64xbf16>, vector<64x64xbf16>, vector<8x64xf32> -> vector<8x64xf32>
      %59 = arith.addf %51, %58 : vector<8x64xf32>
      %c2_i32_53 = arith.constant 2 : i32
      %60 = arith.addi %arg6, %c2_i32_53 : i32
      %c0_54 = arith.constant 0 : index
      %61 = arith.index_cast %60 : i32 to index
      %c1_55 = arith.constant 1 : index
      %c0_56 = arith.constant 0 : index
      %62 = vector.load %arg1[%c0_54, %61, %c1_55, %c0_56] : memref<1x10x10x64xbf16, #tpu.memory_space<vmem>>, vector<1x1x8x64xbf16>
      %63 = vector.shape_cast %62 : vector<1x1x8x64xbf16> to vector<8x64xbf16>
      %c7 = arith.constant 7 : index
      %c0_57 = arith.constant 0 : index
      %c0_58 = arith.constant 0 : index
      %64 = vector.load %arg2[%c7, %c0_57, %c0_58] : memref<9x64x64xbf16, #tpu.memory_space<vmem>>, vector<1x64x64xbf16>
      %65 = vector.shape_cast %64 : vector<1x64x64xbf16> to vector<64x64xbf16>
      %cst_59 = arith.constant dense<0.000000e+00> : vector<8x64xf32>
      %66 = tpu.matmul %63, %65, %cst_59 {dimension_numbers = #tpu.dot_dimension_numbers<[1], [0], [0], [1], [0, 0, 1, 1], [], []>} : vector<8x64xbf16>, vector<64x64xbf16>, vector<8x64xf32> -> vector<8x64xf32>
      %67 = arith.addf %59, %66 : vector<8x64xf32>
      %c2_i32_60 = arith.constant 2 : i32
      %68 = arith.addi %arg6, %c2_i32_60 : i32
      %c0_61 = arith.constant 0 : index
      %69 = arith.index_cast %68 : i32 to index
      %c2_62 = arith.constant 2 : index
      %c0_63 = arith.constant 0 : index
      %70 = vector.load %arg1[%c0_61, %69, %c2_62, %c0_63] : memref<1x10x10x64xbf16, #tpu.memory_space<vmem>>, vector<1x1x8x64xbf16>
      %71 = vector.shape_cast %70 : vector<1x1x8x64xbf16> to vector<8x64xbf16>
      %c8 = arith.constant 8 : index
      %c0_64 = arith.constant 0 : index
      %c0_65 = arith.constant 0 : index
      %72 = vector.load %arg2[%c8, %c0_64, %c0_65] : memref<9x64x64xbf16, #tpu.memory_space<vmem>>, vector<1x64x64xbf16>
      %73 = vector.shape_cast %72 : vector<1x64x64xbf16> to vector<64x64xbf16>
      %cst_66 = arith.constant dense<0.000000e+00> : vector<8x64xf32>
      %74 = tpu.matmul %71, %73, %cst_66 {dimension_numbers = #tpu.dot_dimension_numbers<[1], [0], [0], [1], [0, 0, 1, 1], [], []>} : vector<8x64xbf16>, vector<64x64xbf16>, vector<8x64xf32> -> vector<8x64xf32>
      %75 = arith.addf %67, %74 : vector<8x64xf32>
      %76 = vector.broadcast %0 : vector<1x64xf32> to vector<8x64xf32>
      %77 = arith.mulf %75, %76 : vector<8x64xf32>
      %78 = vector.broadcast %1 : vector<1x64xf32> to vector<8x64xf32>
      %79 = arith.addf %77, %78 : vector<8x64xf32>
      %cst_67 = arith.constant 0.000000e+00 : f32
      %80 = vector.broadcast %cst_67 : f32 to vector<8x64xf32>
      %81 = arith.maximumf %79, %80 : vector<8x64xf32>
      %c0_68 = arith.constant 0 : index
      %82 = arith.index_cast %arg6 : i32 to index
      %c0_69 = arith.constant 0 : index
      %c0_70 = arith.constant 0 : index
      %83 = vector.load %arg5[%c0_68, %82, %c0_69, %c0_70] : memref<1x8x8x64xf32, #tpu.memory_space<vmem>>, vector<1x1x8x64xf32>
      %84 = vector.shape_cast %83 : vector<1x1x8x64xf32> to vector<8x64xf32>
      %85 = vector.shape_cast %81 : vector<8x64xf32> to vector<1x1x8x64xf32>
      tpu.vector_store %arg5[%c0_68, %82, %c0_69, %c0_70], %85 {strides = array<i32>} : memref<1x8x8x64xf32, #tpu.memory_space<vmem>>, vector<1x1x8x64xf32>,
    }
    %c8_i32_3 = arith.constant 8 : i32
    return
  }
  func.func @transform_0(%arg0: i32) -> (i32, i32, i32, i32) {
    %c0_i32 = arith.constant 0 : i32
    %c0_i32_0 = arith.constant 0 : i32
    %c0_i32_1 = arith.constant 0 : i32
    %c0_i32_2 = arith.constant 0 : i32
    return %arg0, %c0_i32, %c0_i32_0, %c0_i32_1 : i32, i32, i32, i32
  }
  func.func @transform_1(%arg0: i32) -> (i32, i32, i32) {
    %c0_i32 = arith.constant 0 : i32
    %c0_i32_0 = arith.constant 0 : i32
    %c0_i32_1 = arith.constant 0 : i32
    %c0_i32_2 = arith.constant 0 : i32
    return %c0_i32, %c0_i32_0, %c0_i32_1 : i32, i32, i32
  }
  func.func @transform_2(%arg0: i32) -> (i32, i32) {
    %c0_i32 = arith.constant 0 : i32
    %c0_i32_0 = arith.constant 0 : i32
    %c0_i32_1 = arith.constant 0 : i32
    return %c0_i32, %c0_i32_0 : i32, i32
  }
  func.func @transform_3(%arg0: i32) -> (i32, i32) {
    %c0_i32 = arith.constant 0 : i32
    %c0_i32_0 = arith.constant 0 : i32
    %c0_i32_1 = arith.constant 0 : i32
    return %c0_i32, %c0_i32_0 : i32, i32
  }
  func.func @transform_4(%arg0: i32) -> (i32, i32, i32, i32) {
    %c0_i32 = arith.constant 0 : i32
    %c0_i32_0 = arith.constant 0 : i32
    %c0_i32_1 = arith.constant 0 : i32
    %c0_i32_2 = arith.constant 0 : i32
    return %arg0, %c0_i32, %c0_i32_0, %c0_i32_1 : i32, i32, i32, i32
  }
}

module attributes {stable_mosaic.version = 11 : i64} {
  func.func @_maxpool_kernel(%arg0: i32, %arg1: memref<1x8x4x128xf32, #tpu.memory_space<vmem>>, %arg2: memref<1x4x4x64xf32, #tpu.memory_space<vmem>>) attributes {dimension_semantics = [#tpu.dimension_semantics<parallel>], iteration_bounds = array<i64: 2>, scalar_prefetch = 0 : i64, scratch_operands = 0 : i64, tpu.core_type = #tpu.core_type<tc>, window_params = [{transform_indices = @transform_0, window_bounds = array<i64: 1, 8, 4, 128>}, {transform_indices = @transform_1, window_bounds = array<i64: 1, 4, 4, 64>}]} {
    %c0 = arith.constant 0 : index
    %c0_0 = arith.constant 0 : index
    %c0_1 = arith.constant 0 : index
    %c0_2 = arith.constant 0 : index
    %0 = vector.load %arg1[%c0, %c0_0, %c0_1, %c0_2] : memref<1x8x4x128xf32, #tpu.memory_space<vmem>>, vector<1x8x4x128xf32>
    %1 = vector.shape_cast %0 : vector<1x8x4x128xf32> to vector<8x4x128xf32>
    %2 = vector.extract_strided_slice %1 {offsets = [0, 0, 0], sizes = [8, 4, 64], strides = [1, 1, 1]} : vector<8x4x128xf32> to vector<8x4x64xf32>
    %3 = vector.extract_strided_slice %1 {offsets = [0, 0, 64], sizes = [8, 4, 64], strides = [1, 1, 1]} : vector<8x4x128xf32> to vector<8x4x64xf32>
    %4 = arith.maximumf %2, %3 : vector<8x4x64xf32>
    %5 = vector.shape_cast %4 : vector<8x4x64xf32> to vector<4x2x4x64xf32>
    %6 = vector.extract_strided_slice %5 {offsets = [0, 0, 0, 0], sizes = [4, 1, 4, 64], strides = [1, 1, 1, 1]} : vector<4x2x4x64xf32> to vector<4x1x4x64xf32>
    %7 = vector.shape_cast %6 : vector<4x1x4x64xf32> to vector<4x4x64xf32>
    %8 = vector.extract_strided_slice %5 {offsets = [0, 1, 0, 0], sizes = [4, 1, 4, 64], strides = [1, 1, 1, 1]} : vector<4x2x4x64xf32> to vector<4x1x4x64xf32>
    %9 = vector.shape_cast %8 : vector<4x1x4x64xf32> to vector<4x4x64xf32>
    %10 = arith.maximumf %7, %9 : vector<4x4x64xf32>
    %c0_3 = arith.constant 0 : index
    %c0_4 = arith.constant 0 : index
    %c0_5 = arith.constant 0 : index
    %c0_6 = arith.constant 0 : index
    %11 = vector.load %arg2[%c0_3, %c0_4, %c0_5, %c0_6] : memref<1x4x4x64xf32, #tpu.memory_space<vmem>>, vector<1x4x4x64xf32>
    %12 = vector.shape_cast %11 : vector<1x4x4x64xf32> to vector<4x4x64xf32>
    %13 = vector.shape_cast %10 : vector<4x4x64xf32> to vector<1x4x4x64xf32>
    tpu.vector_store %arg2[%c0_3, %c0_4, %c0_5, %c0_6], %13 {strides = array<i32>} : memref<1x4x4x64xf32, #tpu.memory_space<vmem>>, vector<1x4x4x64xf32>,
    return
  }
  func.func @transform_0(%arg0: i32) -> (i32, i32, i32, i32) {
    %c0_i32 = arith.constant 0 : i32
    %c0_i32_0 = arith.constant 0 : i32
    %c0_i32_1 = arith.constant 0 : i32
    %c0_i32_2 = arith.constant 0 : i32
    return %arg0, %c0_i32, %c0_i32_0, %c0_i32_1 : i32, i32, i32, i32
  }
  func.func @transform_1(%arg0: i32) -> (i32, i32, i32, i32) {
    %c0_i32 = arith.constant 0 : i32
    %c0_i32_0 = arith.constant 0 : i32
    %c0_i32_1 = arith.constant 0 : i32
    %c0_i32_2 = arith.constant 0 : i32
    return %arg0, %c0_i32, %c0_i32_0, %c0_i32_1 : i32, i32, i32, i32
  }
}

module attributes {stable_mosaic.version = 11 : i64} {
  func.func @_conv_kernel(%arg0: i32, %arg1: memref<1x10x10x64xbf16, #tpu.memory_space<vmem>>, %arg2: memref<9x64x64xbf16, #tpu.memory_space<vmem>>, %arg3: memref<1x64xf32, #tpu.memory_space<vmem>>, %arg4: memref<1x64xf32, #tpu.memory_space<vmem>>, %arg5: memref<1x8x8x64xf32, #tpu.memory_space<vmem>>, %arg6: memref<1x8x8x64xf32, #tpu.memory_space<vmem>>) attributes {dimension_semantics = [#tpu.dimension_semantics<parallel>], iteration_bounds = array<i64: 2>, scalar_prefetch = 0 : i64, scratch_operands = 0 : i64, tpu.core_type = #tpu.core_type<tc>, window_params = [{transform_indices = @transform_0, window_bounds = array<i64: 1, 10, 10, 64>}, {pipeline_mode = #tpu.pipeline_mode<synchronous>, transform_indices = @transform_1, window_bounds = array<i64: 9, 64, 64>}, {pipeline_mode = #tpu.pipeline_mode<synchronous>, transform_indices = @transform_2, window_bounds = array<i64: 1, 64>}, {pipeline_mode = #tpu.pipeline_mode<synchronous>, transform_indices = @transform_3, window_bounds = array<i64: 1, 64>}, {transform_indices = @transform_4, window_bounds = array<i64: 1, 8, 8, 64>}, {transform_indices = @transform_5, window_bounds = array<i64: 1, 8, 8, 64>}]} {
    %c0 = arith.constant 0 : index
    %c0_0 = arith.constant 0 : index
    %0 = vector.load %arg3[%c0, %c0_0] : memref<1x64xf32, #tpu.memory_space<vmem>>, vector<1x64xf32>
    %c0_1 = arith.constant 0 : index
    %c0_2 = arith.constant 0 : index
    %1 = vector.load %arg4[%c0_1, %c0_2] : memref<1x64xf32, #tpu.memory_space<vmem>>, vector<1x64xf32>
    %c0_i32 = arith.constant 0 : i32
    %c8_i32 = arith.constant 8 : i32
    %2 = arith.addi %c0_i32, %c8_i32 : i32
    %c1_i32 = arith.constant 1 : i32
    scf.for %arg7 = %c0_i32 to %2 step %c1_i32  : i32 {
      %cst = arith.constant 0.000000e+00 : f32
      %3 = vector.broadcast %cst : f32 to vector<8x64xf32>
      %c0_i32_4 = arith.constant 0 : i32
      %4 = arith.addi %arg7, %c0_i32_4 : i32
      %c0_5 = arith.constant 0 : index
      %5 = arith.index_cast %4 : i32 to index
      %c0_6 = arith.constant 0 : index
      %c0_7 = arith.constant 0 : index
      %6 = vector.load %arg1[%c0_5, %5, %c0_6, %c0_7] : memref<1x10x10x64xbf16, #tpu.memory_space<vmem>>, vector<1x1x8x64xbf16>
      %7 = vector.shape_cast %6 : vector<1x1x8x64xbf16> to vector<8x64xbf16>
      %c0_8 = arith.constant 0 : index
      %c0_9 = arith.constant 0 : index
      %c0_10 = arith.constant 0 : index
      %8 = vector.load %arg2[%c0_8, %c0_9, %c0_10] : memref<9x64x64xbf16, #tpu.memory_space<vmem>>, vector<1x64x64xbf16>
      %9 = vector.shape_cast %8 : vector<1x64x64xbf16> to vector<64x64xbf16>
      %cst_11 = arith.constant dense<0.000000e+00> : vector<8x64xf32>
      %10 = tpu.matmul %7, %9, %cst_11 {dimension_numbers = #tpu.dot_dimension_numbers<[1], [0], [0], [1], [0, 0, 1, 1], [], []>} : vector<8x64xbf16>, vector<64x64xbf16>, vector<8x64xf32> -> vector<8x64xf32>
      %11 = arith.addf %3, %10 : vector<8x64xf32>
      %c0_i32_12 = arith.constant 0 : i32
      %12 = arith.addi %arg7, %c0_i32_12 : i32
      %c0_13 = arith.constant 0 : index
      %13 = arith.index_cast %12 : i32 to index
      %c1 = arith.constant 1 : index
      %c0_14 = arith.constant 0 : index
      %14 = vector.load %arg1[%c0_13, %13, %c1, %c0_14] : memref<1x10x10x64xbf16, #tpu.memory_space<vmem>>, vector<1x1x8x64xbf16>
      %15 = vector.shape_cast %14 : vector<1x1x8x64xbf16> to vector<8x64xbf16>
      %c1_15 = arith.constant 1 : index
      %c0_16 = arith.constant 0 : index
      %c0_17 = arith.constant 0 : index
      %16 = vector.load %arg2[%c1_15, %c0_16, %c0_17] : memref<9x64x64xbf16, #tpu.memory_space<vmem>>, vector<1x64x64xbf16>
      %17 = vector.shape_cast %16 : vector<1x64x64xbf16> to vector<64x64xbf16>
      %cst_18 = arith.constant dense<0.000000e+00> : vector<8x64xf32>
      %18 = tpu.matmul %15, %17, %cst_18 {dimension_numbers = #tpu.dot_dimension_numbers<[1], [0], [0], [1], [0, 0, 1, 1], [], []>} : vector<8x64xbf16>, vector<64x64xbf16>, vector<8x64xf32> -> vector<8x64xf32>
      %19 = arith.addf %11, %18 : vector<8x64xf32>
      %c0_i32_19 = arith.constant 0 : i32
      %20 = arith.addi %arg7, %c0_i32_19 : i32
      %c0_20 = arith.constant 0 : index
      %21 = arith.index_cast %20 : i32 to index
      %c2 = arith.constant 2 : index
      %c0_21 = arith.constant 0 : index
      %22 = vector.load %arg1[%c0_20, %21, %c2, %c0_21] : memref<1x10x10x64xbf16, #tpu.memory_space<vmem>>, vector<1x1x8x64xbf16>
      %23 = vector.shape_cast %22 : vector<1x1x8x64xbf16> to vector<8x64xbf16>
      %c2_22 = arith.constant 2 : index
      %c0_23 = arith.constant 0 : index
      %c0_24 = arith.constant 0 : index
      %24 = vector.load %arg2[%c2_22, %c0_23, %c0_24] : memref<9x64x64xbf16, #tpu.memory_space<vmem>>, vector<1x64x64xbf16>
      %25 = vector.shape_cast %24 : vector<1x64x64xbf16> to vector<64x64xbf16>
      %cst_25 = arith.constant dense<0.000000e+00> : vector<8x64xf32>
      %26 = tpu.matmul %23, %25, %cst_25 {dimension_numbers = #tpu.dot_dimension_numbers<[1], [0], [0], [1], [0, 0, 1, 1], [], []>} : vector<8x64xbf16>, vector<64x64xbf16>, vector<8x64xf32> -> vector<8x64xf32>
      %27 = arith.addf %19, %26 : vector<8x64xf32>
      %c1_i32_26 = arith.constant 1 : i32
      %28 = arith.addi %arg7, %c1_i32_26 : i32
      %c0_27 = arith.constant 0 : index
      %29 = arith.index_cast %28 : i32 to index
      %c0_28 = arith.constant 0 : index
      %c0_29 = arith.constant 0 : index
      %30 = vector.load %arg1[%c0_27, %29, %c0_28, %c0_29] : memref<1x10x10x64xbf16, #tpu.memory_space<vmem>>, vector<1x1x8x64xbf16>
      %31 = vector.shape_cast %30 : vector<1x1x8x64xbf16> to vector<8x64xbf16>
      %c3 = arith.constant 3 : index
      %c0_30 = arith.constant 0 : index
      %c0_31 = arith.constant 0 : index
      %32 = vector.load %arg2[%c3, %c0_30, %c0_31] : memref<9x64x64xbf16, #tpu.memory_space<vmem>>, vector<1x64x64xbf16>
      %33 = vector.shape_cast %32 : vector<1x64x64xbf16> to vector<64x64xbf16>
      %cst_32 = arith.constant dense<0.000000e+00> : vector<8x64xf32>
      %34 = tpu.matmul %31, %33, %cst_32 {dimension_numbers = #tpu.dot_dimension_numbers<[1], [0], [0], [1], [0, 0, 1, 1], [], []>} : vector<8x64xbf16>, vector<64x64xbf16>, vector<8x64xf32> -> vector<8x64xf32>
      %35 = arith.addf %27, %34 : vector<8x64xf32>
      %c1_i32_33 = arith.constant 1 : i32
      %36 = arith.addi %arg7, %c1_i32_33 : i32
      %c0_34 = arith.constant 0 : index
      %37 = arith.index_cast %36 : i32 to index
      %c1_35 = arith.constant 1 : index
      %c0_36 = arith.constant 0 : index
      %38 = vector.load %arg1[%c0_34, %37, %c1_35, %c0_36] : memref<1x10x10x64xbf16, #tpu.memory_space<vmem>>, vector<1x1x8x64xbf16>
      %39 = vector.shape_cast %38 : vector<1x1x8x64xbf16> to vector<8x64xbf16>
      %c4 = arith.constant 4 : index
      %c0_37 = arith.constant 0 : index
      %c0_38 = arith.constant 0 : index
      %40 = vector.load %arg2[%c4, %c0_37, %c0_38] : memref<9x64x64xbf16, #tpu.memory_space<vmem>>, vector<1x64x64xbf16>
      %41 = vector.shape_cast %40 : vector<1x64x64xbf16> to vector<64x64xbf16>
      %cst_39 = arith.constant dense<0.000000e+00> : vector<8x64xf32>
      %42 = tpu.matmul %39, %41, %cst_39 {dimension_numbers = #tpu.dot_dimension_numbers<[1], [0], [0], [1], [0, 0, 1, 1], [], []>} : vector<8x64xbf16>, vector<64x64xbf16>, vector<8x64xf32> -> vector<8x64xf32>
      %43 = arith.addf %35, %42 : vector<8x64xf32>
      %c1_i32_40 = arith.constant 1 : i32
      %44 = arith.addi %arg7, %c1_i32_40 : i32
      %c0_41 = arith.constant 0 : index
      %45 = arith.index_cast %44 : i32 to index
      %c2_42 = arith.constant 2 : index
      %c0_43 = arith.constant 0 : index
      %46 = vector.load %arg1[%c0_41, %45, %c2_42, %c0_43] : memref<1x10x10x64xbf16, #tpu.memory_space<vmem>>, vector<1x1x8x64xbf16>
      %47 = vector.shape_cast %46 : vector<1x1x8x64xbf16> to vector<8x64xbf16>
      %c5 = arith.constant 5 : index
      %c0_44 = arith.constant 0 : index
      %c0_45 = arith.constant 0 : index
      %48 = vector.load %arg2[%c5, %c0_44, %c0_45] : memref<9x64x64xbf16, #tpu.memory_space<vmem>>, vector<1x64x64xbf16>
      %49 = vector.shape_cast %48 : vector<1x64x64xbf16> to vector<64x64xbf16>
      %cst_46 = arith.constant dense<0.000000e+00> : vector<8x64xf32>
      %50 = tpu.matmul %47, %49, %cst_46 {dimension_numbers = #tpu.dot_dimension_numbers<[1], [0], [0], [1], [0, 0, 1, 1], [], []>} : vector<8x64xbf16>, vector<64x64xbf16>, vector<8x64xf32> -> vector<8x64xf32>
      %51 = arith.addf %43, %50 : vector<8x64xf32>
      %c2_i32 = arith.constant 2 : i32
      %52 = arith.addi %arg7, %c2_i32 : i32
      %c0_47 = arith.constant 0 : index
      %53 = arith.index_cast %52 : i32 to index
      %c0_48 = arith.constant 0 : index
      %c0_49 = arith.constant 0 : index
      %54 = vector.load %arg1[%c0_47, %53, %c0_48, %c0_49] : memref<1x10x10x64xbf16, #tpu.memory_space<vmem>>, vector<1x1x8x64xbf16>
      %55 = vector.shape_cast %54 : vector<1x1x8x64xbf16> to vector<8x64xbf16>
      %c6 = arith.constant 6 : index
      %c0_50 = arith.constant 0 : index
      %c0_51 = arith.constant 0 : index
      %56 = vector.load %arg2[%c6, %c0_50, %c0_51] : memref<9x64x64xbf16, #tpu.memory_space<vmem>>, vector<1x64x64xbf16>
      %57 = vector.shape_cast %56 : vector<1x64x64xbf16> to vector<64x64xbf16>
      %cst_52 = arith.constant dense<0.000000e+00> : vector<8x64xf32>
      %58 = tpu.matmul %55, %57, %cst_52 {dimension_numbers = #tpu.dot_dimension_numbers<[1], [0], [0], [1], [0, 0, 1, 1], [], []>} : vector<8x64xbf16>, vector<64x64xbf16>, vector<8x64xf32> -> vector<8x64xf32>
      %59 = arith.addf %51, %58 : vector<8x64xf32>
      %c2_i32_53 = arith.constant 2 : i32
      %60 = arith.addi %arg7, %c2_i32_53 : i32
      %c0_54 = arith.constant 0 : index
      %61 = arith.index_cast %60 : i32 to index
      %c1_55 = arith.constant 1 : index
      %c0_56 = arith.constant 0 : index
      %62 = vector.load %arg1[%c0_54, %61, %c1_55, %c0_56] : memref<1x10x10x64xbf16, #tpu.memory_space<vmem>>, vector<1x1x8x64xbf16>
      %63 = vector.shape_cast %62 : vector<1x1x8x64xbf16> to vector<8x64xbf16>
      %c7 = arith.constant 7 : index
      %c0_57 = arith.constant 0 : index
      %c0_58 = arith.constant 0 : index
      %64 = vector.load %arg2[%c7, %c0_57, %c0_58] : memref<9x64x64xbf16, #tpu.memory_space<vmem>>, vector<1x64x64xbf16>
      %65 = vector.shape_cast %64 : vector<1x64x64xbf16> to vector<64x64xbf16>
      %cst_59 = arith.constant dense<0.000000e+00> : vector<8x64xf32>
      %66 = tpu.matmul %63, %65, %cst_59 {dimension_numbers = #tpu.dot_dimension_numbers<[1], [0], [0], [1], [0, 0, 1, 1], [], []>} : vector<8x64xbf16>, vector<64x64xbf16>, vector<8x64xf32> -> vector<8x64xf32>
      %67 = arith.addf %59, %66 : vector<8x64xf32>
      %c2_i32_60 = arith.constant 2 : i32
      %68 = arith.addi %arg7, %c2_i32_60 : i32
      %c0_61 = arith.constant 0 : index
      %69 = arith.index_cast %68 : i32 to index
      %c2_62 = arith.constant 2 : index
      %c0_63 = arith.constant 0 : index
      %70 = vector.load %arg1[%c0_61, %69, %c2_62, %c0_63] : memref<1x10x10x64xbf16, #tpu.memory_space<vmem>>, vector<1x1x8x64xbf16>
      %71 = vector.shape_cast %70 : vector<1x1x8x64xbf16> to vector<8x64xbf16>
      %c8 = arith.constant 8 : index
      %c0_64 = arith.constant 0 : index
      %c0_65 = arith.constant 0 : index
      %72 = vector.load %arg2[%c8, %c0_64, %c0_65] : memref<9x64x64xbf16, #tpu.memory_space<vmem>>, vector<1x64x64xbf16>
      %73 = vector.shape_cast %72 : vector<1x64x64xbf16> to vector<64x64xbf16>
      %cst_66 = arith.constant dense<0.000000e+00> : vector<8x64xf32>
      %74 = tpu.matmul %71, %73, %cst_66 {dimension_numbers = #tpu.dot_dimension_numbers<[1], [0], [0], [1], [0, 0, 1, 1], [], []>} : vector<8x64xbf16>, vector<64x64xbf16>, vector<8x64xf32> -> vector<8x64xf32>
      %75 = arith.addf %67, %74 : vector<8x64xf32>
      %76 = vector.broadcast %0 : vector<1x64xf32> to vector<8x64xf32>
      %77 = arith.mulf %75, %76 : vector<8x64xf32>
      %78 = vector.broadcast %1 : vector<1x64xf32> to vector<8x64xf32>
      %79 = arith.addf %77, %78 : vector<8x64xf32>
      %cst_67 = arith.constant 0.000000e+00 : f32
      %80 = vector.broadcast %cst_67 : f32 to vector<8x64xf32>
      %81 = arith.maximumf %79, %80 : vector<8x64xf32>
      %c0_68 = arith.constant 0 : index
      %82 = arith.index_cast %arg7 : i32 to index
      %c0_69 = arith.constant 0 : index
      %c0_70 = arith.constant 0 : index
      %83 = vector.load %arg5[%c0_68, %82, %c0_69, %c0_70] : memref<1x8x8x64xf32, #tpu.memory_space<vmem>>, vector<1x1x8x64xf32>
      %84 = vector.shape_cast %83 : vector<1x1x8x64xf32> to vector<8x64xf32>
      %85 = arith.addf %81, %84 : vector<8x64xf32>
      %c0_71 = arith.constant 0 : index
      %86 = arith.index_cast %arg7 : i32 to index
      %c0_72 = arith.constant 0 : index
      %c0_73 = arith.constant 0 : index
      %87 = vector.load %arg6[%c0_71, %86, %c0_72, %c0_73] : memref<1x8x8x64xf32, #tpu.memory_space<vmem>>, vector<1x1x8x64xf32>
      %88 = vector.shape_cast %87 : vector<1x1x8x64xf32> to vector<8x64xf32>
      %89 = vector.shape_cast %85 : vector<8x64xf32> to vector<1x1x8x64xf32>
      tpu.vector_store %arg6[%c0_71, %86, %c0_72, %c0_73], %89 {strides = array<i32>} : memref<1x8x8x64xf32, #tpu.memory_space<vmem>>, vector<1x1x8x64xf32>,
    }
    %c8_i32_3 = arith.constant 8 : i32
    return
  }
  func.func @transform_0(%arg0: i32) -> (i32, i32, i32, i32) {
    %c0_i32 = arith.constant 0 : i32
    %c0_i32_0 = arith.constant 0 : i32
    %c0_i32_1 = arith.constant 0 : i32
    %c0_i32_2 = arith.constant 0 : i32
    return %arg0, %c0_i32, %c0_i32_0, %c0_i32_1 : i32, i32, i32, i32
  }
  func.func @transform_1(%arg0: i32) -> (i32, i32, i32) {
    %c0_i32 = arith.constant 0 : i32
    %c0_i32_0 = arith.constant 0 : i32
    %c0_i32_1 = arith.constant 0 : i32
    %c0_i32_2 = arith.constant 0 : i32
    return %c0_i32, %c0_i32_0, %c0_i32_1 : i32, i32, i32
  }
  func.func @transform_2(%arg0: i32) -> (i32, i32) {
    %c0_i32 = arith.constant 0 : i32
    %c0_i32_0 = arith.constant 0 : i32
    %c0_i32_1 = arith.constant 0 : i32
    return %c0_i32, %c0_i32_0 : i32, i32
  }
  func.func @transform_3(%arg0: i32) -> (i32, i32) {
    %c0_i32 = arith.constant 0 : i32
    %c0_i32_0 = arith.constant 0 : i32
    %c0_i32_1 = arith.constant 0 : i32
    return %c0_i32, %c0_i32_0 : i32, i32
  }
  func.func @transform_4(%arg0: i32) -> (i32, i32, i32, i32) {
    %c0_i32 = arith.constant 0 : i32
    %c0_i32_0 = arith.constant 0 : i32
    %c0_i32_1 = arith.constant 0 : i32
    %c0_i32_2 = arith.constant 0 : i32
    return %arg0, %c0_i32, %c0_i32_0, %c0_i32_1 : i32, i32, i32, i32
  }
  func.func @transform_5(%arg0: i32) -> (i32, i32, i32, i32) {
    %c0_i32 = arith.constant 0 : i32
    %c0_i32_0 = arith.constant 0 : i32
    %c0_i32_1 = arith.constant 0 : i32
    %c0_i32_2 = arith.constant 0 : i32
    return %arg0, %c0_i32, %c0_i32_0, %c0_i32_1 : i32, i32, i32, i32
  }
}

module attributes {stable_mosaic.version = 11 : i64} {
  func.func @_conv_kernel(%arg0: i32, %arg1: memref<1x6x6x64xbf16, #tpu.memory_space<vmem>>, %arg2: memref<9x64x64xbf16, #tpu.memory_space<vmem>>, %arg3: memref<1x64xf32, #tpu.memory_space<vmem>>, %arg4: memref<1x64xf32, #tpu.memory_space<vmem>>, %arg5: memref<1x4x4x64xf32, #tpu.memory_space<vmem>>) attributes {dimension_semantics = [#tpu.dimension_semantics<parallel>], iteration_bounds = array<i64: 2>, scalar_prefetch = 0 : i64, scratch_operands = 0 : i64, tpu.core_type = #tpu.core_type<tc>, window_params = [{transform_indices = @transform_0, window_bounds = array<i64: 1, 6, 6, 64>}, {pipeline_mode = #tpu.pipeline_mode<synchronous>, transform_indices = @transform_1, window_bounds = array<i64: 9, 64, 64>}, {pipeline_mode = #tpu.pipeline_mode<synchronous>, transform_indices = @transform_2, window_bounds = array<i64: 1, 64>}, {pipeline_mode = #tpu.pipeline_mode<synchronous>, transform_indices = @transform_3, window_bounds = array<i64: 1, 64>}, {transform_indices = @transform_4, window_bounds = array<i64: 1, 4, 4, 64>}]} {
    %c0 = arith.constant 0 : index
    %c0_0 = arith.constant 0 : index
    %0 = vector.load %arg3[%c0, %c0_0] : memref<1x64xf32, #tpu.memory_space<vmem>>, vector<1x64xf32>
    %c0_1 = arith.constant 0 : index
    %c0_2 = arith.constant 0 : index
    %1 = vector.load %arg4[%c0_1, %c0_2] : memref<1x64xf32, #tpu.memory_space<vmem>>, vector<1x64xf32>
    %c0_i32 = arith.constant 0 : i32
    %c4_i32 = arith.constant 4 : i32
    %2 = arith.addi %c0_i32, %c4_i32 : i32
    %c1_i32 = arith.constant 1 : i32
    scf.for %arg6 = %c0_i32 to %2 step %c1_i32  : i32 {
      %cst = arith.constant 0.000000e+00 : f32
      %3 = vector.broadcast %cst : f32 to vector<4x64xf32>
      %c0_i32_4 = arith.constant 0 : i32
      %4 = arith.addi %arg6, %c0_i32_4 : i32
      %c0_5 = arith.constant 0 : index
      %5 = arith.index_cast %4 : i32 to index
      %c0_6 = arith.constant 0 : index
      %c0_7 = arith.constant 0 : index
      %6 = vector.load %arg1[%c0_5, %5, %c0_6, %c0_7] : memref<1x6x6x64xbf16, #tpu.memory_space<vmem>>, vector<1x1x4x64xbf16>
      %7 = vector.shape_cast %6 : vector<1x1x4x64xbf16> to vector<4x64xbf16>
      %c0_8 = arith.constant 0 : index
      %c0_9 = arith.constant 0 : index
      %c0_10 = arith.constant 0 : index
      %8 = vector.load %arg2[%c0_8, %c0_9, %c0_10] : memref<9x64x64xbf16, #tpu.memory_space<vmem>>, vector<1x64x64xbf16>
      %9 = vector.shape_cast %8 : vector<1x64x64xbf16> to vector<64x64xbf16>
      %cst_11 = arith.constant dense<0.000000e+00> : vector<4x64xf32>
      %10 = tpu.matmul %7, %9, %cst_11 {dimension_numbers = #tpu.dot_dimension_numbers<[1], [0], [0], [1], [0, 0, 1, 1], [], []>} : vector<4x64xbf16>, vector<64x64xbf16>, vector<4x64xf32> -> vector<4x64xf32>
      %11 = arith.addf %3, %10 : vector<4x64xf32>
      %c0_i32_12 = arith.constant 0 : i32
      %12 = arith.addi %arg6, %c0_i32_12 : i32
      %c0_13 = arith.constant 0 : index
      %13 = arith.index_cast %12 : i32 to index
      %c1 = arith.constant 1 : index
      %c0_14 = arith.constant 0 : index
      %14 = vector.load %arg1[%c0_13, %13, %c1, %c0_14] : memref<1x6x6x64xbf16, #tpu.memory_space<vmem>>, vector<1x1x4x64xbf16>
      %15 = vector.shape_cast %14 : vector<1x1x4x64xbf16> to vector<4x64xbf16>
      %c1_15 = arith.constant 1 : index
      %c0_16 = arith.constant 0 : index
      %c0_17 = arith.constant 0 : index
      %16 = vector.load %arg2[%c1_15, %c0_16, %c0_17] : memref<9x64x64xbf16, #tpu.memory_space<vmem>>, vector<1x64x64xbf16>
      %17 = vector.shape_cast %16 : vector<1x64x64xbf16> to vector<64x64xbf16>
      %cst_18 = arith.constant dense<0.000000e+00> : vector<4x64xf32>
      %18 = tpu.matmul %15, %17, %cst_18 {dimension_numbers = #tpu.dot_dimension_numbers<[1], [0], [0], [1], [0, 0, 1, 1], [], []>} : vector<4x64xbf16>, vector<64x64xbf16>, vector<4x64xf32> -> vector<4x64xf32>
      %19 = arith.addf %11, %18 : vector<4x64xf32>
      %c0_i32_19 = arith.constant 0 : i32
      %20 = arith.addi %arg6, %c0_i32_19 : i32
      %c0_20 = arith.constant 0 : index
      %21 = arith.index_cast %20 : i32 to index
      %c2 = arith.constant 2 : index
      %c0_21 = arith.constant 0 : index
      %22 = vector.load %arg1[%c0_20, %21, %c2, %c0_21] : memref<1x6x6x64xbf16, #tpu.memory_space<vmem>>, vector<1x1x4x64xbf16>
      %23 = vector.shape_cast %22 : vector<1x1x4x64xbf16> to vector<4x64xbf16>
      %c2_22 = arith.constant 2 : index
      %c0_23 = arith.constant 0 : index
      %c0_24 = arith.constant 0 : index
      %24 = vector.load %arg2[%c2_22, %c0_23, %c0_24] : memref<9x64x64xbf16, #tpu.memory_space<vmem>>, vector<1x64x64xbf16>
      %25 = vector.shape_cast %24 : vector<1x64x64xbf16> to vector<64x64xbf16>
      %cst_25 = arith.constant dense<0.000000e+00> : vector<4x64xf32>
      %26 = tpu.matmul %23, %25, %cst_25 {dimension_numbers = #tpu.dot_dimension_numbers<[1], [0], [0], [1], [0, 0, 1, 1], [], []>} : vector<4x64xbf16>, vector<64x64xbf16>, vector<4x64xf32> -> vector<4x64xf32>
      %27 = arith.addf %19, %26 : vector<4x64xf32>
      %c1_i32_26 = arith.constant 1 : i32
      %28 = arith.addi %arg6, %c1_i32_26 : i32
      %c0_27 = arith.constant 0 : index
      %29 = arith.index_cast %28 : i32 to index
      %c0_28 = arith.constant 0 : index
      %c0_29 = arith.constant 0 : index
      %30 = vector.load %arg1[%c0_27, %29, %c0_28, %c0_29] : memref<1x6x6x64xbf16, #tpu.memory_space<vmem>>, vector<1x1x4x64xbf16>
      %31 = vector.shape_cast %30 : vector<1x1x4x64xbf16> to vector<4x64xbf16>
      %c3 = arith.constant 3 : index
      %c0_30 = arith.constant 0 : index
      %c0_31 = arith.constant 0 : index
      %32 = vector.load %arg2[%c3, %c0_30, %c0_31] : memref<9x64x64xbf16, #tpu.memory_space<vmem>>, vector<1x64x64xbf16>
      %33 = vector.shape_cast %32 : vector<1x64x64xbf16> to vector<64x64xbf16>
      %cst_32 = arith.constant dense<0.000000e+00> : vector<4x64xf32>
      %34 = tpu.matmul %31, %33, %cst_32 {dimension_numbers = #tpu.dot_dimension_numbers<[1], [0], [0], [1], [0, 0, 1, 1], [], []>} : vector<4x64xbf16>, vector<64x64xbf16>, vector<4x64xf32> -> vector<4x64xf32>
      %35 = arith.addf %27, %34 : vector<4x64xf32>
      %c1_i32_33 = arith.constant 1 : i32
      %36 = arith.addi %arg6, %c1_i32_33 : i32
      %c0_34 = arith.constant 0 : index
      %37 = arith.index_cast %36 : i32 to index
      %c1_35 = arith.constant 1 : index
      %c0_36 = arith.constant 0 : index
      %38 = vector.load %arg1[%c0_34, %37, %c1_35, %c0_36] : memref<1x6x6x64xbf16, #tpu.memory_space<vmem>>, vector<1x1x4x64xbf16>
      %39 = vector.shape_cast %38 : vector<1x1x4x64xbf16> to vector<4x64xbf16>
      %c4 = arith.constant 4 : index
      %c0_37 = arith.constant 0 : index
      %c0_38 = arith.constant 0 : index
      %40 = vector.load %arg2[%c4, %c0_37, %c0_38] : memref<9x64x64xbf16, #tpu.memory_space<vmem>>, vector<1x64x64xbf16>
      %41 = vector.shape_cast %40 : vector<1x64x64xbf16> to vector<64x64xbf16>
      %cst_39 = arith.constant dense<0.000000e+00> : vector<4x64xf32>
      %42 = tpu.matmul %39, %41, %cst_39 {dimension_numbers = #tpu.dot_dimension_numbers<[1], [0], [0], [1], [0, 0, 1, 1], [], []>} : vector<4x64xbf16>, vector<64x64xbf16>, vector<4x64xf32> -> vector<4x64xf32>
      %43 = arith.addf %35, %42 : vector<4x64xf32>
      %c1_i32_40 = arith.constant 1 : i32
      %44 = arith.addi %arg6, %c1_i32_40 : i32
      %c0_41 = arith.constant 0 : index
      %45 = arith.index_cast %44 : i32 to index
      %c2_42 = arith.constant 2 : index
      %c0_43 = arith.constant 0 : index
      %46 = vector.load %arg1[%c0_41, %45, %c2_42, %c0_43] : memref<1x6x6x64xbf16, #tpu.memory_space<vmem>>, vector<1x1x4x64xbf16>
      %47 = vector.shape_cast %46 : vector<1x1x4x64xbf16> to vector<4x64xbf16>
      %c5 = arith.constant 5 : index
      %c0_44 = arith.constant 0 : index
      %c0_45 = arith.constant 0 : index
      %48 = vector.load %arg2[%c5, %c0_44, %c0_45] : memref<9x64x64xbf16, #tpu.memory_space<vmem>>, vector<1x64x64xbf16>
      %49 = vector.shape_cast %48 : vector<1x64x64xbf16> to vector<64x64xbf16>
      %cst_46 = arith.constant dense<0.000000e+00> : vector<4x64xf32>
      %50 = tpu.matmul %47, %49, %cst_46 {dimension_numbers = #tpu.dot_dimension_numbers<[1], [0], [0], [1], [0, 0, 1, 1], [], []>} : vector<4x64xbf16>, vector<64x64xbf16>, vector<4x64xf32> -> vector<4x64xf32>
      %51 = arith.addf %43, %50 : vector<4x64xf32>
      %c2_i32 = arith.constant 2 : i32
      %52 = arith.addi %arg6, %c2_i32 : i32
      %c0_47 = arith.constant 0 : index
      %53 = arith.index_cast %52 : i32 to index
      %c0_48 = arith.constant 0 : index
      %c0_49 = arith.constant 0 : index
      %54 = vector.load %arg1[%c0_47, %53, %c0_48, %c0_49] : memref<1x6x6x64xbf16, #tpu.memory_space<vmem>>, vector<1x1x4x64xbf16>
      %55 = vector.shape_cast %54 : vector<1x1x4x64xbf16> to vector<4x64xbf16>
      %c6 = arith.constant 6 : index
      %c0_50 = arith.constant 0 : index
      %c0_51 = arith.constant 0 : index
      %56 = vector.load %arg2[%c6, %c0_50, %c0_51] : memref<9x64x64xbf16, #tpu.memory_space<vmem>>, vector<1x64x64xbf16>
      %57 = vector.shape_cast %56 : vector<1x64x64xbf16> to vector<64x64xbf16>
      %cst_52 = arith.constant dense<0.000000e+00> : vector<4x64xf32>
      %58 = tpu.matmul %55, %57, %cst_52 {dimension_numbers = #tpu.dot_dimension_numbers<[1], [0], [0], [1], [0, 0, 1, 1], [], []>} : vector<4x64xbf16>, vector<64x64xbf16>, vector<4x64xf32> -> vector<4x64xf32>
      %59 = arith.addf %51, %58 : vector<4x64xf32>
      %c2_i32_53 = arith.constant 2 : i32
      %60 = arith.addi %arg6, %c2_i32_53 : i32
      %c0_54 = arith.constant 0 : index
      %61 = arith.index_cast %60 : i32 to index
      %c1_55 = arith.constant 1 : index
      %c0_56 = arith.constant 0 : index
      %62 = vector.load %arg1[%c0_54, %61, %c1_55, %c0_56] : memref<1x6x6x64xbf16, #tpu.memory_space<vmem>>, vector<1x1x4x64xbf16>
      %63 = vector.shape_cast %62 : vector<1x1x4x64xbf16> to vector<4x64xbf16>
      %c7 = arith.constant 7 : index
      %c0_57 = arith.constant 0 : index
      %c0_58 = arith.constant 0 : index
      %64 = vector.load %arg2[%c7, %c0_57, %c0_58] : memref<9x64x64xbf16, #tpu.memory_space<vmem>>, vector<1x64x64xbf16>
      %65 = vector.shape_cast %64 : vector<1x64x64xbf16> to vector<64x64xbf16>
      %cst_59 = arith.constant dense<0.000000e+00> : vector<4x64xf32>
      %66 = tpu.matmul %63, %65, %cst_59 {dimension_numbers = #tpu.dot_dimension_numbers<[1], [0], [0], [1], [0, 0, 1, 1], [], []>} : vector<4x64xbf16>, vector<64x64xbf16>, vector<4x64xf32> -> vector<4x64xf32>
      %67 = arith.addf %59, %66 : vector<4x64xf32>
      %c2_i32_60 = arith.constant 2 : i32
      %68 = arith.addi %arg6, %c2_i32_60 : i32
      %c0_61 = arith.constant 0 : index
      %69 = arith.index_cast %68 : i32 to index
      %c2_62 = arith.constant 2 : index
      %c0_63 = arith.constant 0 : index
      %70 = vector.load %arg1[%c0_61, %69, %c2_62, %c0_63] : memref<1x6x6x64xbf16, #tpu.memory_space<vmem>>, vector<1x1x4x64xbf16>
      %71 = vector.shape_cast %70 : vector<1x1x4x64xbf16> to vector<4x64xbf16>
      %c8 = arith.constant 8 : index
      %c0_64 = arith.constant 0 : index
      %c0_65 = arith.constant 0 : index
      %72 = vector.load %arg2[%c8, %c0_64, %c0_65] : memref<9x64x64xbf16, #tpu.memory_space<vmem>>, vector<1x64x64xbf16>
      %73 = vector.shape_cast %72 : vector<1x64x64xbf16> to vector<64x64xbf16>
      %cst_66 = arith.constant dense<0.000000e+00> : vector<4x64xf32>
      %74 = tpu.matmul %71, %73, %cst_66 {dimension_numbers = #tpu.dot_dimension_numbers<[1], [0], [0], [1], [0, 0, 1, 1], [], []>} : vector<4x64xbf16>, vector<64x64xbf16>, vector<4x64xf32> -> vector<4x64xf32>
      %75 = arith.addf %67, %74 : vector<4x64xf32>
      %76 = vector.broadcast %0 : vector<1x64xf32> to vector<4x64xf32>
      %77 = arith.mulf %75, %76 : vector<4x64xf32>
      %78 = vector.broadcast %1 : vector<1x64xf32> to vector<4x64xf32>
      %79 = arith.addf %77, %78 : vector<4x64xf32>
      %cst_67 = arith.constant 0.000000e+00 : f32
      %80 = vector.broadcast %cst_67 : f32 to vector<4x64xf32>
      %81 = arith.maximumf %79, %80 : vector<4x64xf32>
      %c0_68 = arith.constant 0 : index
      %82 = arith.index_cast %arg6 : i32 to index
      %c0_69 = arith.constant 0 : index
      %c0_70 = arith.constant 0 : index
      %83 = vector.load %arg5[%c0_68, %82, %c0_69, %c0_70] : memref<1x4x4x64xf32, #tpu.memory_space<vmem>>, vector<1x1x4x64xf32>
      %84 = vector.shape_cast %83 : vector<1x1x4x64xf32> to vector<4x64xf32>
      %85 = vector.shape_cast %81 : vector<4x64xf32> to vector<1x1x4x64xf32>
      tpu.vector_store %arg5[%c0_68, %82, %c0_69, %c0_70], %85 {strides = array<i32>} : memref<1x4x4x64xf32, #tpu.memory_space<vmem>>, vector<1x1x4x64xf32>,
    }
    %c4_i32_3 = arith.constant 4 : i32
    return
  }
  func.func @transform_0(%arg0: i32) -> (i32, i32, i32, i32) {
    %c0_i32 = arith.constant 0 : i32
    %c0_i32_0 = arith.constant 0 : i32
    %c0_i32_1 = arith.constant 0 : i32
    %c0_i32_2 = arith.constant 0 : i32
    return %arg0, %c0_i32, %c0_i32_0, %c0_i32_1 : i32, i32, i32, i32
  }
  func.func @transform_1(%arg0: i32) -> (i32, i32, i32) {
    %c0_i32 = arith.constant 0 : i32
    %c0_i32_0 = arith.constant 0 : i32
    %c0_i32_1 = arith.constant 0 : i32
    %c0_i32_2 = arith.constant 0 : i32
    return %c0_i32, %c0_i32_0, %c0_i32_1 : i32, i32, i32
  }
  func.func @transform_2(%arg0: i32) -> (i32, i32) {
    %c0_i32 = arith.constant 0 : i32
    %c0_i32_0 = arith.constant 0 : i32
    %c0_i32_1 = arith.constant 0 : i32
    return %c0_i32, %c0_i32_0 : i32, i32
  }
  func.func @transform_3(%arg0: i32) -> (i32, i32) {
    %c0_i32 = arith.constant 0 : i32
    %c0_i32_0 = arith.constant 0 : i32
    %c0_i32_1 = arith.constant 0 : i32
    return %c0_i32, %c0_i32_0 : i32, i32
  }
  func.func @transform_4(%arg0: i32) -> (i32, i32, i32, i32) {
    %c0_i32 = arith.constant 0 : i32
    %c0_i32_0 = arith.constant 0 : i32
    %c0_i32_1 = arith.constant 0 : i32
    %c0_i32_2 = arith.constant 0 : i32
    return %arg0, %c0_i32, %c0_i32_0, %c0_i32_1 : i32, i32, i32, i32
  }
}

module attributes {stable_mosaic.version = 11 : i64} {
  func.func @_conv_kernel(%arg0: i32, %arg1: memref<1x6x6x64xbf16, #tpu.memory_space<vmem>>, %arg2: memref<9x64x64xbf16, #tpu.memory_space<vmem>>, %arg3: memref<1x64xf32, #tpu.memory_space<vmem>>, %arg4: memref<1x64xf32, #tpu.memory_space<vmem>>, %arg5: memref<1x4x4x64xf32, #tpu.memory_space<vmem>>, %arg6: memref<1x4x4x64xf32, #tpu.memory_space<vmem>>) attributes {dimension_semantics = [#tpu.dimension_semantics<parallel>], iteration_bounds = array<i64: 2>, scalar_prefetch = 0 : i64, scratch_operands = 0 : i64, tpu.core_type = #tpu.core_type<tc>, window_params = [{transform_indices = @transform_0, window_bounds = array<i64: 1, 6, 6, 64>}, {pipeline_mode = #tpu.pipeline_mode<synchronous>, transform_indices = @transform_1, window_bounds = array<i64: 9, 64, 64>}, {pipeline_mode = #tpu.pipeline_mode<synchronous>, transform_indices = @transform_2, window_bounds = array<i64: 1, 64>}, {pipeline_mode = #tpu.pipeline_mode<synchronous>, transform_indices = @transform_3, window_bounds = array<i64: 1, 64>}, {transform_indices = @transform_4, window_bounds = array<i64: 1, 4, 4, 64>}, {transform_indices = @transform_5, window_bounds = array<i64: 1, 4, 4, 64>}]} {
    %c0 = arith.constant 0 : index
    %c0_0 = arith.constant 0 : index
    %0 = vector.load %arg3[%c0, %c0_0] : memref<1x64xf32, #tpu.memory_space<vmem>>, vector<1x64xf32>
    %c0_1 = arith.constant 0 : index
    %c0_2 = arith.constant 0 : index
    %1 = vector.load %arg4[%c0_1, %c0_2] : memref<1x64xf32, #tpu.memory_space<vmem>>, vector<1x64xf32>
    %c0_i32 = arith.constant 0 : i32
    %c4_i32 = arith.constant 4 : i32
    %2 = arith.addi %c0_i32, %c4_i32 : i32
    %c1_i32 = arith.constant 1 : i32
    scf.for %arg7 = %c0_i32 to %2 step %c1_i32  : i32 {
      %cst = arith.constant 0.000000e+00 : f32
      %3 = vector.broadcast %cst : f32 to vector<4x64xf32>
      %c0_i32_4 = arith.constant 0 : i32
      %4 = arith.addi %arg7, %c0_i32_4 : i32
      %c0_5 = arith.constant 0 : index
      %5 = arith.index_cast %4 : i32 to index
      %c0_6 = arith.constant 0 : index
      %c0_7 = arith.constant 0 : index
      %6 = vector.load %arg1[%c0_5, %5, %c0_6, %c0_7] : memref<1x6x6x64xbf16, #tpu.memory_space<vmem>>, vector<1x1x4x64xbf16>
      %7 = vector.shape_cast %6 : vector<1x1x4x64xbf16> to vector<4x64xbf16>
      %c0_8 = arith.constant 0 : index
      %c0_9 = arith.constant 0 : index
      %c0_10 = arith.constant 0 : index
      %8 = vector.load %arg2[%c0_8, %c0_9, %c0_10] : memref<9x64x64xbf16, #tpu.memory_space<vmem>>, vector<1x64x64xbf16>
      %9 = vector.shape_cast %8 : vector<1x64x64xbf16> to vector<64x64xbf16>
      %cst_11 = arith.constant dense<0.000000e+00> : vector<4x64xf32>
      %10 = tpu.matmul %7, %9, %cst_11 {dimension_numbers = #tpu.dot_dimension_numbers<[1], [0], [0], [1], [0, 0, 1, 1], [], []>} : vector<4x64xbf16>, vector<64x64xbf16>, vector<4x64xf32> -> vector<4x64xf32>
      %11 = arith.addf %3, %10 : vector<4x64xf32>
      %c0_i32_12 = arith.constant 0 : i32
      %12 = arith.addi %arg7, %c0_i32_12 : i32
      %c0_13 = arith.constant 0 : index
      %13 = arith.index_cast %12 : i32 to index
      %c1 = arith.constant 1 : index
      %c0_14 = arith.constant 0 : index
      %14 = vector.load %arg1[%c0_13, %13, %c1, %c0_14] : memref<1x6x6x64xbf16, #tpu.memory_space<vmem>>, vector<1x1x4x64xbf16>
      %15 = vector.shape_cast %14 : vector<1x1x4x64xbf16> to vector<4x64xbf16>
      %c1_15 = arith.constant 1 : index
      %c0_16 = arith.constant 0 : index
      %c0_17 = arith.constant 0 : index
      %16 = vector.load %arg2[%c1_15, %c0_16, %c0_17] : memref<9x64x64xbf16, #tpu.memory_space<vmem>>, vector<1x64x64xbf16>
      %17 = vector.shape_cast %16 : vector<1x64x64xbf16> to vector<64x64xbf16>
      %cst_18 = arith.constant dense<0.000000e+00> : vector<4x64xf32>
      %18 = tpu.matmul %15, %17, %cst_18 {dimension_numbers = #tpu.dot_dimension_numbers<[1], [0], [0], [1], [0, 0, 1, 1], [], []>} : vector<4x64xbf16>, vector<64x64xbf16>, vector<4x64xf32> -> vector<4x64xf32>
      %19 = arith.addf %11, %18 : vector<4x64xf32>
      %c0_i32_19 = arith.constant 0 : i32
      %20 = arith.addi %arg7, %c0_i32_19 : i32
      %c0_20 = arith.constant 0 : index
      %21 = arith.index_cast %20 : i32 to index
      %c2 = arith.constant 2 : index
      %c0_21 = arith.constant 0 : index
      %22 = vector.load %arg1[%c0_20, %21, %c2, %c0_21] : memref<1x6x6x64xbf16, #tpu.memory_space<vmem>>, vector<1x1x4x64xbf16>
      %23 = vector.shape_cast %22 : vector<1x1x4x64xbf16> to vector<4x64xbf16>
      %c2_22 = arith.constant 2 : index
      %c0_23 = arith.constant 0 : index
      %c0_24 = arith.constant 0 : index
      %24 = vector.load %arg2[%c2_22, %c0_23, %c0_24] : memref<9x64x64xbf16, #tpu.memory_space<vmem>>, vector<1x64x64xbf16>
      %25 = vector.shape_cast %24 : vector<1x64x64xbf16> to vector<64x64xbf16>
      %cst_25 = arith.constant dense<0.000000e+00> : vector<4x64xf32>
      %26 = tpu.matmul %23, %25, %cst_25 {dimension_numbers = #tpu.dot_dimension_numbers<[1], [0], [0], [1], [0, 0, 1, 1], [], []>} : vector<4x64xbf16>, vector<64x64xbf16>, vector<4x64xf32> -> vector<4x64xf32>
      %27 = arith.addf %19, %26 : vector<4x64xf32>
      %c1_i32_26 = arith.constant 1 : i32
      %28 = arith.addi %arg7, %c1_i32_26 : i32
      %c0_27 = arith.constant 0 : index
      %29 = arith.index_cast %28 : i32 to index
      %c0_28 = arith.constant 0 : index
      %c0_29 = arith.constant 0 : index
      %30 = vector.load %arg1[%c0_27, %29, %c0_28, %c0_29] : memref<1x6x6x64xbf16, #tpu.memory_space<vmem>>, vector<1x1x4x64xbf16>
      %31 = vector.shape_cast %30 : vector<1x1x4x64xbf16> to vector<4x64xbf16>
      %c3 = arith.constant 3 : index
      %c0_30 = arith.constant 0 : index
      %c0_31 = arith.constant 0 : index
      %32 = vector.load %arg2[%c3, %c0_30, %c0_31] : memref<9x64x64xbf16, #tpu.memory_space<vmem>>, vector<1x64x64xbf16>
      %33 = vector.shape_cast %32 : vector<1x64x64xbf16> to vector<64x64xbf16>
      %cst_32 = arith.constant dense<0.000000e+00> : vector<4x64xf32>
      %34 = tpu.matmul %31, %33, %cst_32 {dimension_numbers = #tpu.dot_dimension_numbers<[1], [0], [0], [1], [0, 0, 1, 1], [], []>} : vector<4x64xbf16>, vector<64x64xbf16>, vector<4x64xf32> -> vector<4x64xf32>
      %35 = arith.addf %27, %34 : vector<4x64xf32>
      %c1_i32_33 = arith.constant 1 : i32
      %36 = arith.addi %arg7, %c1_i32_33 : i32
      %c0_34 = arith.constant 0 : index
      %37 = arith.index_cast %36 : i32 to index
      %c1_35 = arith.constant 1 : index
      %c0_36 = arith.constant 0 : index
      %38 = vector.load %arg1[%c0_34, %37, %c1_35, %c0_36] : memref<1x6x6x64xbf16, #tpu.memory_space<vmem>>, vector<1x1x4x64xbf16>
      %39 = vector.shape_cast %38 : vector<1x1x4x64xbf16> to vector<4x64xbf16>
      %c4 = arith.constant 4 : index
      %c0_37 = arith.constant 0 : index
      %c0_38 = arith.constant 0 : index
      %40 = vector.load %arg2[%c4, %c0_37, %c0_38] : memref<9x64x64xbf16, #tpu.memory_space<vmem>>, vector<1x64x64xbf16>
      %41 = vector.shape_cast %40 : vector<1x64x64xbf16> to vector<64x64xbf16>
      %cst_39 = arith.constant dense<0.000000e+00> : vector<4x64xf32>
      %42 = tpu.matmul %39, %41, %cst_39 {dimension_numbers = #tpu.dot_dimension_numbers<[1], [0], [0], [1], [0, 0, 1, 1], [], []>} : vector<4x64xbf16>, vector<64x64xbf16>, vector<4x64xf32> -> vector<4x64xf32>
      %43 = arith.addf %35, %42 : vector<4x64xf32>
      %c1_i32_40 = arith.constant 1 : i32
      %44 = arith.addi %arg7, %c1_i32_40 : i32
      %c0_41 = arith.constant 0 : index
      %45 = arith.index_cast %44 : i32 to index
      %c2_42 = arith.constant 2 : index
      %c0_43 = arith.constant 0 : index
      %46 = vector.load %arg1[%c0_41, %45, %c2_42, %c0_43] : memref<1x6x6x64xbf16, #tpu.memory_space<vmem>>, vector<1x1x4x64xbf16>
      %47 = vector.shape_cast %46 : vector<1x1x4x64xbf16> to vector<4x64xbf16>
      %c5 = arith.constant 5 : index
      %c0_44 = arith.constant 0 : index
      %c0_45 = arith.constant 0 : index
      %48 = vector.load %arg2[%c5, %c0_44, %c0_45] : memref<9x64x64xbf16, #tpu.memory_space<vmem>>, vector<1x64x64xbf16>
      %49 = vector.shape_cast %48 : vector<1x64x64xbf16> to vector<64x64xbf16>
      %cst_46 = arith.constant dense<0.000000e+00> : vector<4x64xf32>
      %50 = tpu.matmul %47, %49, %cst_46 {dimension_numbers = #tpu.dot_dimension_numbers<[1], [0], [0], [1], [0, 0, 1, 1], [], []>} : vector<4x64xbf16>, vector<64x64xbf16>, vector<4x64xf32> -> vector<4x64xf32>
      %51 = arith.addf %43, %50 : vector<4x64xf32>
      %c2_i32 = arith.constant 2 : i32
      %52 = arith.addi %arg7, %c2_i32 : i32
      %c0_47 = arith.constant 0 : index
      %53 = arith.index_cast %52 : i32 to index
      %c0_48 = arith.constant 0 : index
      %c0_49 = arith.constant 0 : index
      %54 = vector.load %arg1[%c0_47, %53, %c0_48, %c0_49] : memref<1x6x6x64xbf16, #tpu.memory_space<vmem>>, vector<1x1x4x64xbf16>
      %55 = vector.shape_cast %54 : vector<1x1x4x64xbf16> to vector<4x64xbf16>
      %c6 = arith.constant 6 : index
      %c0_50 = arith.constant 0 : index
      %c0_51 = arith.constant 0 : index
      %56 = vector.load %arg2[%c6, %c0_50, %c0_51] : memref<9x64x64xbf16, #tpu.memory_space<vmem>>, vector<1x64x64xbf16>
      %57 = vector.shape_cast %56 : vector<1x64x64xbf16> to vector<64x64xbf16>
      %cst_52 = arith.constant dense<0.000000e+00> : vector<4x64xf32>
      %58 = tpu.matmul %55, %57, %cst_52 {dimension_numbers = #tpu.dot_dimension_numbers<[1], [0], [0], [1], [0, 0, 1, 1], [], []>} : vector<4x64xbf16>, vector<64x64xbf16>, vector<4x64xf32> -> vector<4x64xf32>
      %59 = arith.addf %51, %58 : vector<4x64xf32>
      %c2_i32_53 = arith.constant 2 : i32
      %60 = arith.addi %arg7, %c2_i32_53 : i32
      %c0_54 = arith.constant 0 : index
      %61 = arith.index_cast %60 : i32 to index
      %c1_55 = arith.constant 1 : index
      %c0_56 = arith.constant 0 : index
      %62 = vector.load %arg1[%c0_54, %61, %c1_55, %c0_56] : memref<1x6x6x64xbf16, #tpu.memory_space<vmem>>, vector<1x1x4x64xbf16>
      %63 = vector.shape_cast %62 : vector<1x1x4x64xbf16> to vector<4x64xbf16>
      %c7 = arith.constant 7 : index
      %c0_57 = arith.constant 0 : index
      %c0_58 = arith.constant 0 : index
      %64 = vector.load %arg2[%c7, %c0_57, %c0_58] : memref<9x64x64xbf16, #tpu.memory_space<vmem>>, vector<1x64x64xbf16>
      %65 = vector.shape_cast %64 : vector<1x64x64xbf16> to vector<64x64xbf16>
      %cst_59 = arith.constant dense<0.000000e+00> : vector<4x64xf32>
      %66 = tpu.matmul %63, %65, %cst_59 {dimension_numbers = #tpu.dot_dimension_numbers<[1], [0], [0], [1], [0, 0, 1, 1], [], []>} : vector<4x64xbf16>, vector<64x64xbf16>, vector<4x64xf32> -> vector<4x64xf32>
      %67 = arith.addf %59, %66 : vector<4x64xf32>
      %c2_i32_60 = arith.constant 2 : i32
      %68 = arith.addi %arg7, %c2_i32_60 : i32
      %c0_61 = arith.constant 0 : index
      %69 = arith.index_cast %68 : i32 to index
      %c2_62 = arith.constant 2 : index
      %c0_63 = arith.constant 0 : index
      %70 = vector.load %arg1[%c0_61, %69, %c2_62, %c0_63] : memref<1x6x6x64xbf16, #tpu.memory_space<vmem>>, vector<1x1x4x64xbf16>
      %71 = vector.shape_cast %70 : vector<1x1x4x64xbf16> to vector<4x64xbf16>
      %c8 = arith.constant 8 : index
      %c0_64 = arith.constant 0 : index
      %c0_65 = arith.constant 0 : index
      %72 = vector.load %arg2[%c8, %c0_64, %c0_65] : memref<9x64x64xbf16, #tpu.memory_space<vmem>>, vector<1x64x64xbf16>
      %73 = vector.shape_cast %72 : vector<1x64x64xbf16> to vector<64x64xbf16>
      %cst_66 = arith.constant dense<0.000000e+00> : vector<4x64xf32>
      %74 = tpu.matmul %71, %73, %cst_66 {dimension_numbers = #tpu.dot_dimension_numbers<[1], [0], [0], [1], [0, 0, 1, 1], [], []>} : vector<4x64xbf16>, vector<64x64xbf16>, vector<4x64xf32> -> vector<4x64xf32>
      %75 = arith.addf %67, %74 : vector<4x64xf32>
      %76 = vector.broadcast %0 : vector<1x64xf32> to vector<4x64xf32>
      %77 = arith.mulf %75, %76 : vector<4x64xf32>
      %78 = vector.broadcast %1 : vector<1x64xf32> to vector<4x64xf32>
      %79 = arith.addf %77, %78 : vector<4x64xf32>
      %cst_67 = arith.constant 0.000000e+00 : f32
      %80 = vector.broadcast %cst_67 : f32 to vector<4x64xf32>
      %81 = arith.maximumf %79, %80 : vector<4x64xf32>
      %c0_68 = arith.constant 0 : index
      %82 = arith.index_cast %arg7 : i32 to index
      %c0_69 = arith.constant 0 : index
      %c0_70 = arith.constant 0 : index
      %83 = vector.load %arg5[%c0_68, %82, %c0_69, %c0_70] : memref<1x4x4x64xf32, #tpu.memory_space<vmem>>, vector<1x1x4x64xf32>
      %84 = vector.shape_cast %83 : vector<1x1x4x64xf32> to vector<4x64xf32>
      %85 = arith.addf %81, %84 : vector<4x64xf32>
      %c0_71 = arith.constant 0 : index
      %86 = arith.index_cast %arg7 : i32 to index
      %c0_72 = arith.constant 0 : index
      %c0_73 = arith.constant 0 : index
      %87 = vector.load %arg6[%c0_71, %86, %c0_72, %c0_73] : memref<1x4x4x64xf32, #tpu.memory_space<vmem>>, vector<1x1x4x64xf32>
      %88 = vector.shape_cast %87 : vector<1x1x4x64xf32> to vector<4x64xf32>
      %89 = vector.shape_cast %85 : vector<4x64xf32> to vector<1x1x4x64xf32>
      tpu.vector_store %arg6[%c0_71, %86, %c0_72, %c0_73], %89 {strides = array<i32>} : memref<1x4x4x64xf32, #tpu.memory_space<vmem>>, vector<1x1x4x64xf32>,
    }
    %c4_i32_3 = arith.constant 4 : i32
    return
  }
  func.func @transform_0(%arg0: i32) -> (i32, i32, i32, i32) {
    %c0_i32 = arith.constant 0 : i32
    %c0_i32_0 = arith.constant 0 : i32
    %c0_i32_1 = arith.constant 0 : i32
    %c0_i32_2 = arith.constant 0 : i32
    return %arg0, %c0_i32, %c0_i32_0, %c0_i32_1 : i32, i32, i32, i32
  }
  func.func @transform_1(%arg0: i32) -> (i32, i32, i32) {
    %c0_i32 = arith.constant 0 : i32
    %c0_i32_0 = arith.constant 0 : i32
    %c0_i32_1 = arith.constant 0 : i32
    %c0_i32_2 = arith.constant 0 : i32
    return %c0_i32, %c0_i32_0, %c0_i32_1 : i32, i32, i32
  }
  func.func @transform_2(%arg0: i32) -> (i32, i32) {
    %c0_i32 = arith.constant 0 : i32
    %c0_i32_0 = arith.constant 0 : i32
    %c0_i32_1 = arith.constant 0 : i32
    return %c0_i32, %c0_i32_0 : i32, i32
  }
  func.func @transform_3(%arg0: i32) -> (i32, i32) {
    %c0_i32 = arith.constant 0 : i32
    %c0_i32_0 = arith.constant 0 : i32
    %c0_i32_1 = arith.constant 0 : i32
    return %c0_i32, %c0_i32_0 : i32, i32
  }
  func.func @transform_4(%arg0: i32) -> (i32, i32, i32, i32) {
    %c0_i32 = arith.constant 0 : i32
    %c0_i32_0 = arith.constant 0 : i32
    %c0_i32_1 = arith.constant 0 : i32
    %c0_i32_2 = arith.constant 0 : i32
    return %arg0, %c0_i32, %c0_i32_0, %c0_i32_1 : i32, i32, i32, i32
  }
  func.func @transform_5(%arg0: i32) -> (i32, i32, i32, i32) {
    %c0_i32 = arith.constant 0 : i32
    %c0_i32_0 = arith.constant 0 : i32
    %c0_i32_1 = arith.constant 0 : i32
    %c0_i32_2 = arith.constant 0 : i32
    return %arg0, %c0_i32, %c0_i32_0, %c0_i32_1 : i32, i32, i32, i32
  }
}

module attributes {stable_mosaic.version = 11 : i64} {
  func.func @_maxpool_kernel(%arg0: i32, %arg1: memref<1x4x2x128xf32, #tpu.memory_space<vmem>>, %arg2: memref<1x2x2x64xf32, #tpu.memory_space<vmem>>) attributes {dimension_semantics = [#tpu.dimension_semantics<parallel>], iteration_bounds = array<i64: 2>, scalar_prefetch = 0 : i64, scratch_operands = 0 : i64, tpu.core_type = #tpu.core_type<tc>, window_params = [{transform_indices = @transform_0, window_bounds = array<i64: 1, 4, 2, 128>}, {transform_indices = @transform_1, window_bounds = array<i64: 1, 2, 2, 64>}]} {
    %c0 = arith.constant 0 : index
    %c0_0 = arith.constant 0 : index
    %c0_1 = arith.constant 0 : index
    %c0_2 = arith.constant 0 : index
    %0 = vector.load %arg1[%c0, %c0_0, %c0_1, %c0_2] : memref<1x4x2x128xf32, #tpu.memory_space<vmem>>, vector<1x4x2x128xf32>
    %1 = vector.shape_cast %0 : vector<1x4x2x128xf32> to vector<4x2x128xf32>
    %2 = vector.extract_strided_slice %1 {offsets = [0, 0, 0], sizes = [4, 2, 64], strides = [1, 1, 1]} : vector<4x2x128xf32> to vector<4x2x64xf32>
    %3 = vector.extract_strided_slice %1 {offsets = [0, 0, 64], sizes = [4, 2, 64], strides = [1, 1, 1]} : vector<4x2x128xf32> to vector<4x2x64xf32>
    %4 = arith.maximumf %2, %3 : vector<4x2x64xf32>
    %5 = vector.shape_cast %4 : vector<4x2x64xf32> to vector<2x2x2x64xf32>
    %6 = vector.extract_strided_slice %5 {offsets = [0, 0, 0, 0], sizes = [2, 1, 2, 64], strides = [1, 1, 1, 1]} : vector<2x2x2x64xf32> to vector<2x1x2x64xf32>
    %7 = vector.shape_cast %6 : vector<2x1x2x64xf32> to vector<2x2x64xf32>
    %8 = vector.extract_strided_slice %5 {offsets = [0, 1, 0, 0], sizes = [2, 1, 2, 64], strides = [1, 1, 1, 1]} : vector<2x2x2x64xf32> to vector<2x1x2x64xf32>
    %9 = vector.shape_cast %8 : vector<2x1x2x64xf32> to vector<2x2x64xf32>
    %10 = arith.maximumf %7, %9 : vector<2x2x64xf32>
    %c0_3 = arith.constant 0 : index
    %c0_4 = arith.constant 0 : index
    %c0_5 = arith.constant 0 : index
    %c0_6 = arith.constant 0 : index
    %11 = vector.load %arg2[%c0_3, %c0_4, %c0_5, %c0_6] : memref<1x2x2x64xf32, #tpu.memory_space<vmem>>, vector<1x2x2x64xf32>
    %12 = vector.shape_cast %11 : vector<1x2x2x64xf32> to vector<2x2x64xf32>
    %13 = vector.shape_cast %10 : vector<2x2x64xf32> to vector<1x2x2x64xf32>
    tpu.vector_store %arg2[%c0_3, %c0_4, %c0_5, %c0_6], %13 {strides = array<i32>} : memref<1x2x2x64xf32, #tpu.memory_space<vmem>>, vector<1x2x2x64xf32>,
    return
  }
  func.func @transform_0(%arg0: i32) -> (i32, i32, i32, i32) {
    %c0_i32 = arith.constant 0 : i32
    %c0_i32_0 = arith.constant 0 : i32
    %c0_i32_1 = arith.constant 0 : i32
    %c0_i32_2 = arith.constant 0 : i32
    return %arg0, %c0_i32, %c0_i32_0, %c0_i32_1 : i32, i32, i32, i32
  }
  func.func @transform_1(%arg0: i32) -> (i32, i32, i32, i32) {
    %c0_i32 = arith.constant 0 : i32
    %c0_i32_0 = arith.constant 0 : i32
    %c0_i32_1 = arith.constant 0 : i32
    %c0_i32_2 = arith.constant 0 : i32
    return %arg0, %c0_i32, %c0_i32_0, %c0_i32_1 : i32, i32, i32, i32
  }
}

module attributes {stable_mosaic.version = 11 : i64} {
  func.func @_head_kernel(%arg0: memref<2x4x64xf32, #tpu.memory_space<vmem>>, %arg1: memref<64x1xf32, #tpu.memory_space<vmem>>, %arg2: memref<1x1xf32, #tpu.memory_space<vmem>>, %arg3: memref<2x1xf32, #tpu.memory_space<vmem>>) attributes {dimension_semantics = [], scalar_prefetch = 0 : i64, scratch_operands = 0 : i64, tpu.core_type = #tpu.core_type<tc>} {
    %c0 = arith.constant 0 : index
    %c0_0 = arith.constant 0 : index
    %c0_1 = arith.constant 0 : index
    %0 = vector.load %arg0[%c0, %c0_0, %c0_1] : memref<2x4x64xf32, #tpu.memory_space<vmem>>, vector<2x4x64xf32>
    %cst = arith.constant dense<0.000000e+00> : vector<2x64xf32>
    %1 = vector.multi_reduction <add>, %0, %cst [1] : vector<2x4x64xf32> to vector<2x64xf32>
    %cst_2 = arith.constant 4.000000e+00 : f32
    %2 = vector.broadcast %cst_2 : f32 to vector<2x64xf32>
    %3 = arith.divf %1, %2 : vector<2x64xf32>
    %c0_3 = arith.constant 0 : index
    %c0_4 = arith.constant 0 : index
    %4 = vector.load %arg1[%c0_3, %c0_4] : memref<64x1xf32, #tpu.memory_space<vmem>>, vector<64x1xf32>
    %cst_5 = arith.constant dense<0.000000e+00> : vector<2x1xf32>
    %5 = tpu.matmul %3, %4, %cst_5 {dimension_numbers = #tpu.dot_dimension_numbers<[1], [0], [0], [1], [0, 0, 1, 1], [], []>} : vector<2x64xf32>, vector<64x1xf32>, vector<2x1xf32> -> vector<2x1xf32>
    %c0_6 = arith.constant 0 : index
    %c0_7 = arith.constant 0 : index
    %6 = vector.load %arg2[%c0_6, %c0_7] : memref<1x1xf32, #tpu.memory_space<vmem>>, vector<1x1xf32>
    %7 = vector.broadcast %6 : vector<1x1xf32> to vector<2x1xf32>
    %8 = arith.addf %5, %7 : vector<2x1xf32>
    %c0_8 = arith.constant 0 : index
    %c0_9 = arith.constant 0 : index
    %9 = vector.load %arg3[%c0_8, %c0_9] : memref<2x1xf32, #tpu.memory_space<vmem>>, vector<2x1xf32>
    tpu.vector_store %arg3[%c0_8, %c0_9], %8 {strides = array<i32>} : memref<2x1xf32, #tpu.memory_space<vmem>>, vector<2x1xf32>,
    return
  }
}

</mosaic_0001>

<bundles_post_ra>
// kernel: forward.15
= control target key start
LH: loop header
LB: loop body
LE: loop exit
PB: predicated region body
PF: predicated region fallthrough
CT: control target
= control target key end

     0   :  { %s1230_s18 = smov 0   ;;  %s1368_s0 = inlined_call_operand.vmem [shape: bf16[2,18,18,16], index: 0, kind: input, shape index: {}]   ;;  %s1369_s1 = inlined_call_operand.vmem [shape: bf16[9,16,64], index: 1, kind: input, shape index: {}]   ;;  %s1370_s2 = inlined_call_operand.vmem [shape: f32[1,64], index: 2, kind: input, shape index: {}]   ;;  %s1371_s3 = inlined_call_operand.vmem [shape: f32[1,64], index: 3, kind: input, shape index: {}]   ;;  %s1372_s4 = inlined_call_operand.vmem [shape: f32[2,16,16,32], index: 4, kind: output, shape index: {0}]   ;;  %s1373_s5 = inlined_call_operand.vmem [shape: f32[2,16,16,32], index: 5, kind: output, shape index: {1}]  }
   0x1 LB: > { %s993_s19 = sadd.s32 4294967295, %s1191_s18   ;;  %p997_p0 = scmp.ge.s32.totalorder %s1191_s18, 1  ;;  %s1191_s18 = sphi %s1230_s18, %s16_s18  }
   0x2   : > { %p190_p1 = scmp.lt.s32.totalorder %s1191_s18, 3 }
   0x4   : > { %p191_p2 = pnand %p997_p0, %p190_p1 }
   0x5   : > { %p223_p3 = scmp.lt.s32.totalorder (!%p191_p2), %s993_s19, 1  ;;  %s1263_s10 = smov (!%p191_p2), 0  }
   0x6   : > { %194 = sbr.rel (%p191_p2) target bundleno = 379 (0x17b), region = 36 }
   0xb   : > { %v1241_v0 = vld [vmem:[%s1370_s2] ss:$0 sm:$0xff]  ;;  %s1375_s19 = smov (!%p223_p3, %s993_s19), 1 }
   0xc   : > { %v1246_v1 = vld [vmem:[%s1371_s3] ss:$0 sm:$0xff]  ;;  %s1141_s24 = smul.u32 216, %s1375_s19  ;;  %s1066_s25 = sshll.u32 %s1375_s19, 8 }
   0xd   : > { %s1251_s28 = scalar_lea.vmem %s1372_s4, %s1066_s25  ;;  %s1256_s6 = scalar_lea.vmem %s1373_s5, %s1066_s25 }
   0xe   : > { %s1261_s9 = scalar_lea.vmem %s1368_s0, %s1141_s24 }
   0xf LB: >> { %v1161_v2 = vld [vmem:[%s1369_s1 + $0x8] sm:$0xff]   ;;  %v1197_v3 = vmov 0.0   ;;  %v1162_v4 = vld [vmem:[%s1369_s1] sm:$0xff]   ;;  %vm1198_vm0 = vmmov 0   ;;  %s1068_s15 = smul.u32 12, %s1195_s10  ;;  %vm285_vm1 = vcmask 130048   ;;  %s1195_s10 = sphi %s1263_s10, %s246_s10  }
  0x10   : >> { %1087 = vmatprep.subr.bf16.mxu0 %v1197_v3  ;;  %1093 = vmatprep.subr.bf16.mxu1 %v1197_v3  ;;  %v1166_v5 = vld [vmem:[%s1369_s1 + $0x18] sm:$0xff]   ;;  %vm266_vm2 = vsmask.f32 7424  ;;  %v1165_v19 = vld [vmem:[%s1369_s1 + $0x10] sm:$0xff]   ;;  %v1170_v27 = vld [vmem:[%s1369_s1 + $0x28] sm:$0xff]   ;;  %vm386_vm3 = vcmask 1046528  }
  0x11   : >> { %1088 = vmatpush3.bf16.msra.mxu0 %v1161_v2  ;;  %1089 = vmatprep.mubr.msk.bf16.mxu0 %vm1198_vm0, %v1197_v3  ;;  %s1283_s16 = scalar_lea.vmem %s1261_s9, %s1068_s15  ;;  %v1169_v39 = vld [vmem:[%s1369_s1 + $0x20] sm:$0xff]   ;;  %v1175_v44 = vld [vmem:[%s1369_s1 + $0x38] sm:$0xff]   ;;  %v1174_v53 = vld [vmem:[%s1369_s1 + $0x30] sm:$0xff]   ;;  %s1063_s11 = sshll.u32 %s1195_s10, 4  ;;  %vm874_vm4 = vcmask 261120  }
  0x12   : >> { %1094 = vmatpush3.bf16.msra.mxu1 %v1162_v4  ;;  %1095 = vmatprep.mubr.msk.bf16.mxu1 %vm1198_vm0, %v1197_v3  ;;  %v250_v6 = vld [vmem:[%s1283_s16] sm:$0xf]  ;;  %v251_v7 = vld [vmem:[%s1283_s16 + $0x4] sm:$0xf]  ;;  %v1024_v17 = vld [vmem:[%s1283_s16 + $0xc] sm:$0xf]  ;;  %s873_s12 = scalar_lea.vmem %s1251_s28, %s1063_s11  ;;  %s885_s14 = scalar_lea.vmem %s1256_s6, %s1063_s11 }
  0x13   : >> { %1099 = vmatprep.subr.bf16.mxu0 %v1197_v3  ;;  %1105 = vmatprep.subr.bf16.mxu1 %v1197_v3  ;;  %v1006_v8 = vcombine.low %v250_v6, %v251_v7  ;;  %v1164_v9 = vld [vmem:[%s1283_s16 + $0x8] ss:$0 sps:$4 sm:$0x11]   ;;  %v379_v10 = vld [vmem:[%s1283_s16] sm:$0xe]  ;;  %v1168_v24 = vld [vmem:[%s1283_s16 + $0xc] sm:$0xff]  }
  0x14   : >> { %v275_v13 = vshll.u32 %v1164_v9, 16  ;;  %v1014_v16 = vcombine.low %v379_v10, %v251_v7  ;;  %v1025_v18 = vld [vmem:[%s1283_s16 + $0x10] sm:$0xf]  ;;  %v1033_v22 = vld [vmem:[%s1283_s16 + $0xc] sm:$0xe]  ;;  %v388_v23 = vrot.slane %v1164_v9, 1 }
  0x15   : >> { %v268_v11 = vshrl.u32 %v1006_v8, 16  ;;  %v270_v12 = vshll.u32 %v1006_v8, 16  ;;  %1096 = vmatmul.mubr.msk.bf16.vlgmr.msra.gmra.mxu1 %vm285_vm1, %v1006_v8  ;;  %v1029_v20 = vcombine.low %v1024_v17, %v1025_v18  ;;  %v1036_v28 = vcombine.low %v1033_v22, %v1025_v18  ;;  %v1172_v29 = vld [vmem:[%s1283_s16 + $0x14] ss:$0 sps:$4 sm:$0x11]   ;;  %v1176_v56 = vld [vmem:[%s1283_s16 + $0x18] sm:$0xff]  }
  0x16   : >> { %1106 = vmatpush3.bf16.msra.mxu1 %v1166_v5  ;;  %1107 = vmatprep.mubr.msk.bf16.mxu1 %vm1198_vm0, %v1197_v3  ;;  %v277_v15 = vrot.slane %v275_v13, 1  ;;  %v387_v26 = vrot.slane %v1014_v16, 1  ;;  %v1046_v31 = vld [vmem:[%s1283_s16 + $0x18] sm:$0xf]  ;;  %v1047_v32 = vld [vmem:[%s1283_s16 + $0x1c] sm:$0xf] }
  0x17   : >> { %v272_v14 = vrot.slane %v270_v12, 1  ;;  %1117 = vmatprep.subr.bf16.mxu1 %v1197_v3  ;;  %v525_v30 = vshll.u32 %v1029_v20, 16  ;;  %v594_v33 = vrot.slane %v1172_v29, 1  ;;  %v1051_v34 = vcombine.low %v1046_v31, %v1047_v32  ;;  %v1178_v36 = vld [vmem:[%s1283_s16 + $0x20] ss:$0 sps:$4 sm:$0x11]  }
  0x18   : >> { %v593_v35 = vrot.slane %v1036_v28, 1  ;;  %v389_v38 = vsel %vm386_vm3, %v387_v26, %v388_v23  ;;  %v523_v40 = vshrl.u32 %v1029_v20, 16  ;;  %v530_v42 = vshll.u32 %v1172_v29, 16  ;;  %v1055_v55 = vld [vmem:[%s1283_s16 + $0x18] sm:$0xe]  ;;  %v1179_v57 = vld [vmem:[%s1369_s1 + $0x40] sm:$0xff]  }
  0x19   : >> { %v273_v21 = vor.u32 %v272_v14, %v268_v11  ;;  %v731_v37 = vshll.u32 %v1051_v34, 16  ;;  %v527_v41 = vrot.slane %v525_v30, 1  ;;  %v729_v45 = vshrl.u32 %v1051_v34, 16  ;;  %s1199_s13 = smov 96   ;;  %s246_s10 = sadd.s32 1, %s1195_s10  }
  0x1a   : >> { %v595_v43 = vsel %vm386_vm3, %v593_v35, %v594_v33  ;;  %v736_v47 = vshll.u32 %v1178_v36, 16  ;;  %v532_v49 = vrot.slane %v530_v42, 1  ;;  %v1058_v58 = vcombine.low %v1055_v55, %v1047_v32  ;;  %p243_p4 = scmp.ge.s32.totalorder %s246_s10, 16  }
  0x1b   : >> { %v278_v25 = vsel %vm266_vm2, %v273_v21, %v277_v15  ;;  %v733_v46 = vrot.slane %v731_v37, 1  ;;  %v528_v48 = vor.u32 %v527_v41, %v523_v40  ;;  %v800_v60 = vrot.slane %v1178_v36, 1 }
  0x1c   : >> { %1090 = vmatmul.mubr.msk.bf16.vlgmr.msra.gmra.mxu0 %vm285_vm1, %v278_v25  ;;  %v738_v51 = vrot.slane %v736_v47, 1  ;;  %v799_v59 = vrot.slane %v1058_v58, 1 }
  0x1d   : >> { %1100 = vmatpush3.bf16.msra.mxu0 %v1165_v19  ;;  %1101 = vmatprep.mubr.msk.bf16.mxu0 %vm1198_vm0, %v1197_v3  ;;  %v734_v50 = vor.u32 %v733_v46, %v729_v45  ;;  %v533_v52 = vsel %vm266_vm2, %v528_v48, %v532_v49 }
  0x1e   : >> { %1111 = vmatprep.subr.bf16.mxu0 %v1197_v3  ;;  %1108 = vmatmul.mubr.msk.bf16.vlgmr.msra.gmra.mxu1 %vm285_vm1, %v1168_v24  ;;  %v801_v61 = vsel %vm386_vm3, %v799_v59, %v800_v60 }
  0x1f   : >> { %1118 = vmatpush3.bf16.msra.mxu1 %v1170_v27  ;;  %1119 = vmatprep.mubr.msk.bf16.mxu1 %vm1198_vm0, %v1197_v3  ;;  %v739_v54 = vsel %vm266_vm2, %v734_v50, %v738_v51 }
  0x20   : >> { %1129 = vmatprep.subr.bf16.mxu1 %v1197_v3 }
  0x24   : >> { %1102 = vmatmul.mubr.msk.bf16.vlgmr.msra.gmra.mxu0 %vm285_vm1, %v389_v38 }
  0x25   : >> { %1112 = vmatpush3.bf16.msra.mxu0 %v1169_v39  ;;  %1113 = vmatprep.mubr.msk.bf16.mxu0 %vm1198_vm0, %v1197_v3 }
  0x26   : >> { %1123 = vmatprep.subr.bf16.mxu0 %v1197_v3  ;;  %1120 = vmatmul.mubr.msk.bf16.vlgmr.msra.gmra.mxu1 %vm285_vm1, %v595_v43 }
  0x27   : >> { %1130 = vmatpush3.bf16.msra.mxu1 %v1175_v44  ;;  %1131 = vmatprep.mubr.msk.bf16.mxu1 %vm1198_vm0, %v1197_v3 }
  0x2c   : >> { %1114 = vmatmul.mubr.msk.bf16.vlgmr.msra.gmra.mxu0 %vm285_vm1, %v533_v52 }
  0x2d   : >> { %1124 = vmatpush3.bf16.msra.mxu0 %v1174_v53  ;;  %1125 = vmatprep.mubr.msk.bf16.mxu0 %vm1198_vm0, %v1197_v3 }
  0x2e   : >> { %1135 = vmatprep.subr.bf16.mxu0 %v1197_v3  ;;  %1132 = vmatmul.mubr.msk.bf16.vlgmr.msra.gmra.mxu1 %vm285_vm1, %v739_v54 }
  0x34   : >> { %1126 = vmatmul.mubr.msk.bf16.vlgmr.msra.gmra.mxu0 %vm285_vm1, %v1176_v56 }
  0x35   : >> { %1136 = vmatpush3.bf16.msra.mxu0 %v1179_v57  ;;  %1137 = vmatprep.mubr.msk.bf16.mxu0 %vm1198_vm0, %v1197_v3 }
  0x3c   : >> { %1138 = vmatmul.mubr.msk.bf16.vlgmr.msra.gmra.mxu0 %vm285_vm1, %v801_v61 }
  0xd5   : >> { %v372_v62 = vpop.f32.mrf.mxu1 }
  0xd7   : >> { %v1097_v63 = vpop.f32.mrf.mxu1 }
  0xd9   : >> { %v375_v2 = vpop.f32.mrf.mxu1 }
  0xdb   : >> { %v1098_v4 = vpop.f32.mrf.mxu1 }
  0xdc   : >> { %v323_v5 = vpop.f32.mrf.mxu0 }
  0xdd   : >> { %v373_v17 = vadd.f32 %v372_v62, %v323_v5 }
  0xde   : >> { %v1091_v6 = vpop.f32.mrf.mxu0  ;;  %v499_v7 = vpop.f32.mrf.mxu1 }
  0xe0   : >> { %v326_v8 = vpop.f32.mrf.mxu0  ;;  %v1109_v9 = vpop.f32.mrf.mxu1 }
  0xe1   : >> { %v376_v23 = vadd.f32 %v375_v2, %v326_v8 }
  0xe2   : >> { %v1092_v10 = vpop.f32.mrf.mxu0  ;;  %v502_v11 = vpop.f32.mrf.mxu1 }
  0xe4   : >> { %v433_v12 = vpop.f32.mrf.mxu0  ;;  %v1110_v13 = vpop.f32.mrf.mxu1 }
  0xe5   : >> { %v440_v20 = vadd.f32 %v433_v12, %v373_v17 }
  0xe6   : >> { %v1103_v3 = vpop.f32.mrf.mxu0  ;;  %v639_v14 = vpop.f32.mrf.mxu1 }
  0xe7   : >> { %v506_v26 = vadd.f32 %v499_v7, %v440_v20 }
  0xe8   : >> { %v436_v15 = vpop.f32.mrf.mxu0  ;;  %v1121_v16 = vpop.f32.mrf.mxu1 }
  0xe9   : >> { %v441_v27 = vadd.f32 %v436_v15, %v376_v23 }
  0xea   : >> { %v1104_v18 = vpop.f32.mrf.mxu0  ;;  %v642_v19 = vpop.f32.mrf.mxu1 }
  0xeb   : >> { %v507_v33 = vadd.f32 %v502_v11, %v441_v27 }
  0xec   : >> { %v577_v21 = vpop.f32.mrf.mxu0  ;;  %v1122_v22 = vpop.f32.mrf.mxu1 }
  0xed   : >> { %v584_v30 = vadd.f32 %v577_v21, %v506_v26 }
  0xee   : >> { %v1115_v24 = vpop.f32.mrf.mxu0  ;;  %v783_v25 = vpop.f32.mrf.mxu1 }
  0xef   : >> { %v646_v36 = vadd.f32 %v639_v14, %v584_v30 }
  0xf0   : >> { %v580_v28 = vpop.f32.mrf.mxu0  ;;  %v1133_v29 = vpop.f32.mrf.mxu1 }
  0xf1   : >> { %v585_v37 = vadd.f32 %v580_v28, %v507_v33 }
  0xf2   : >> { %v1116_v31 = vpop.f32.mrf.mxu0  ;;  %v786_v32 = vpop.f32.mrf.mxu1 }
  0xf3   : >> { %v647_v41 = vadd.f32 %v642_v19, %v585_v37 }
  0xf4   : >> { %v705_v34 = vpop.f32.mrf.mxu0  ;;  %v1134_v35 = vpop.f32.mrf.mxu1 }
  0xf5   : >> { %v712_v39 = vadd.f32 %v705_v34, %v646_v36 }
  0xf6   : >> { %v1127_v38 = vpop.f32.mrf.mxu0 }
  0xf7   : >> { %v790_v43 = vadd.f32 %v783_v25, %v712_v39 }
  0xf8   : >> { %v708_v40 = vpop.f32.mrf.mxu0 }
  0xf9   : >> { %v713_v44 = vadd.f32 %v708_v40, %v647_v41 }
  0xfa   : >> { %v1128_v42 = vpop.f32.mrf.mxu0 }
  0xfb   : >> { %v791_v48 = vadd.f32 %v786_v32, %v713_v44 }
  0xfc   : >> { %v845_v45 = vpop.f32.mrf.mxu0 }
  0xfd   : >> { %v852_v46 = vadd.f32 %v845_v45, %v790_v43 }
  0xfe   : >> { %v1139_v47 = vpop.f32.mrf.mxu0 }
  0xff   : >> { %v860_v49 = vmul.f32 %v1241_v0, %v852_v46 }
 0x100   : >> { %v848_v50 = vpop.f32.mrf.mxu0 }
 0x101   : >> { %v853_v51 = vadd.f32 %v848_v50, %v791_v48  ;;  %v868_v52 = vadd.f32 %v1246_v1, %v860_v49 }
 0x102   : >> { %v1140_v53 = vpop.f32.mrf.mxu0 }
 0x103   : >> { %v861_v54 = vmul.f32 %v1241_v0, %v853_v51  ;;  %879 = vrot.lane.b32.xlu0 %v868_v52, %s1199_s13  ;;  %v870_v55 = vmax.f32 %v868_v52, 0.0 }
 0x105   : >> { %v869_v56 = vadd.f32 %v1246_v1, %v861_v54  ;;  %875 = vst.msk [vmem:[%s873_s12] sm:$0xff] %vm874_vm4, %v870_v55 }
 0x107   : >> { %v871_v57 = vmax.f32 %v869_v56, 0.0  ;;  %881 = vrot.lane.b32.xlu0 %v869_v56, %s1199_s13 }
 0x109   : >> { %876 = vst.msk [vmem:[%s873_s12 + $0x8] sm:$0xff] %vm874_vm4, %v871_v57 }
 0x175   : >> { %v880_v58 = vpop.permute.xlu0 %879 }
 0x176   : >> { %886 = vst.msk [vmem:[%s885_s14] sm:$0xff] %vm874_vm4, %v880_v58  ;;  %245 = sbr.rel (!%p243_p4) target bundleno = 15 (0xf), region = 98 }
 0x179   : >> { %v882_v59 = vpop.permute.xlu0 %881 }
 0x17a   : >> { %887 = vst.msk [vmem:[%s885_s14 + $0x8] sm:$0xff] %vm874_vm4, %v882_v59 }
 0x17b PF: > { %s16_s18 = sadd.s32 1, %s1191_s18  }
 0x17c   : > { %p13_p5 = scmp.ge.s32.totalorder %s16_s18, 4  }
 0x17e   :  { %15 = sbr.rel (!%p13_p5) target bundleno = 1 (0x1), region = 109 }

// kernel: forward.14
= control target key start
LH: loop header
LB: loop body
LE: loop exit
PB: predicated region body
PF: predicated region fallthrough
CT: control target
= control target key end

     0   :  { %s1797_s15 = smov 0   ;;  %s2031_s0 = inlined_call_operand.vmem [shape: bf16[2,19,19,12], index: 0, kind: input, shape index: {}]   ;;  %s2032_s1 = inlined_call_operand.vmem [shape: bf16[16,12,16], index: 1, kind: input, shape index: {}]   ;;  %s2033_s2 = inlined_call_operand.vmem [shape: f32[1,16], index: 2, kind: input, shape index: {}]   ;;  %s2034_s3 = inlined_call_operand.vmem [shape: f32[1,16], index: 3, kind: input, shape index: {}]   ;;  %s2035_s4 = inlined_call_operand.vmem [shape: f32[2,16,16,16], index: 4, kind: output, shape index: {}]  }
   0x1 LB: > { %s1454_s16 = sadd.s32 4294967295, %s1764_s15   ;;  %p1458_p0 = scmp.ge.s32.totalorder %s1764_s15, 1  ;;  %s1764_s15 = sphi %s1797_s15, %s14_s15  }
   0x2   : > { %p162_p1 = scmp.lt.s32.totalorder %s1764_s15, 3 }
   0x4   : > { %p163_p2 = pnand %p1458_p0, %p162_p1 }
   0x5   : > { %p188_p3 = scmp.lt.s32.totalorder (!%p163_p2), %s1454_s16, 1  ;;  %s1825_s29 = smov (!%p163_p2), 0  }
   0x6   : > { %166 = sbr.rel (%p163_p2) target bundleno = 292 (0x124), region = 36 }
   0xb   : > { %v1808_v0 = vld [vmem:[%s2033_s2] ss:$0 sm:$0xff]  ;;  %s2037_s16 = smov (!%p188_p3, %s1454_s16), 1 }
   0xc   : > { %v1813_v1 = vld [vmem:[%s2034_s3] ss:$0 sm:$0xff]  ;;  %s1700_s21 = smul.u32 228, %s2037_s16  ;;  %s1570_s22 = sshll.u32 %s2037_s16, 8 }
   0xd   : > { %s1818_s25 = scalar_lea.vmem %s2035_s4, %s1570_s22 }
   0xe   : > { %s1823_s28 = scalar_lea.vmem %s2031_s0, %s1700_s21 }
   0xf LB: >> { %vm248_vm0 = vcmask 1045504   ;;  %v1770_v2 = vmov 0.0   ;;  %v1719_v3 = vld [vmem:[%s2032_s1] sm:$0x3f]   ;;  %vm1771_vm1 = vmmov 0   ;;  %s1571_s8 = smul.u32 12, %s1768_s29  ;;  %s1768_s29 = sphi %s1825_s29, %s206_s29  }
  0x10   : >> { %1610 = vmatprep.subr.bf16.mxu1 %v1770_v2  ;;  %1604 = vmatprep.subr.bf16.mxu0 %v1770_v2  ;;  %v1720_v4 = vld [vmem:[%s2032_s1 + $0x8] sm:$0x3f]   ;;  %v301_v5 = vsel %vm248_vm0, %v1719_v3, 0  ;;  %vm244_vm2 = vcmask 97280   ;;  %v1724_v13 = vld [vmem:[%s2032_s1 + $0x10] sm:$0x3f]  }
  0x11   : >> { %1612 = vmatprep.mubr.msk.bf16.mxu1 %vm1771_vm1, %v1770_v2  ;;  %1606 = vmatprep.mubr.msk.bf16.mxu0 %vm1771_vm1, %v1770_v2  ;;  %v250_v6 = vsel %vm248_vm0, %v1720_v4, 0  ;;  %s1846_s9 = scalar_lea.vmem %s1823_s28, %s1571_s8  ;;  %v1725_v14 = vld [vmem:[%s2032_s1 + $0x18] sm:$0x3f]   ;;  %vm351_vm3 = vcmask 1046528   ;;  %vm226_vm4 = vsmask.f32 7424 }
  0x12   : >> { %1611 = vmatpush3.bf16.msra.mxu1 %v301_v5  ;;  %1605 = vmatpush3.bf16.msra.mxu0 %v250_v6  ;;  %v210_v7 = vld [vmem:[%s1846_s9] sm:$0xf]  ;;  %v211_v8 = vld [vmem:[%s1846_s9 + $0x4] sm:$0xf]  ;;  %v443_v19 = vsel %vm248_vm0, %v1725_v14, 0  ;;  %v364_v28 = vsel %vm248_vm0, %v1724_v13, 0 }
  0x13   : >> { %v344_v9 = vld [vmem:[%s1846_s9] sm:$0xe]  ;;  %1622 = vmatprep.subr.bf16.mxu1 %v1770_v2  ;;  %v1465_v10 = vcombine.low %v210_v7, %v211_v8  ;;  %1616 = vmatprep.subr.bf16.mxu0 %v1770_v2  ;;  %v1723_v12 = vld [vmem:[%s1846_s9 + $0x8] ss:$0 sps:$4 sm:$0x11]   ;;  %vm1378_vm6 = vcmask 130048  }
  0x14   : >> { %v1473_v11 = vcombine.low %v344_v9, %v211_v8  ;;  %v235_v17 = vshll.u32 %v1723_v12, 16  ;;  %v1726_v20 = vld [vmem:[%s1846_s9 + $0x8] ss:$0 sps:$4 sm:$0x33]   ;;  %vm416_vm5 = vsmask.f32 6400 }
  0x15   : >> { %1613 = vmatmul.mubr.msk.bf16.vlgmr.msra.gmra.mxu1 %vm244_vm2, %v1465_v10  ;;  %v228_v15 = vshrl.u32 %v1465_v10, 16  ;;  %v230_v16 = vshll.u32 %v1465_v10, 16  ;;  %v426_v25 = vshrl.u32 %v1726_v20, 16  ;;  %v429_v26 = vshll.u32 %v1726_v20, 16  ;;  %v1728_v32 = vld [vmem:[%s2032_s1 + $0x28] sm:$0x3f]  }
  0x16   : >> { %v418_v18 = vshrl.u32 %v1473_v11, 16  ;;  %1624 = vmatprep.mubr.msk.bf16.mxu1 %vm1771_vm1, %v1770_v2  ;;  %v237_v22 = vrot.slane %v235_v17, 1  ;;  %1623 = vmatpush3.bf16.msra.mxu1 %v443_v19  ;;  %v421_v24 = vshll.u32 %v1473_v11, 16  ;;  %v352_v35 = vrot.slane %v1473_v11, 1  ;;  %v1488_v37 = vld [vmem:[%s1846_s9 + $0xc] sm:$0xf] }
  0x17   : >> { %v232_v21 = vrot.slane %v230_v16, 1  ;;  %1634 = vmatprep.subr.bf16.mxu1 %v1770_v2  ;;  %v428_v30 = vrot.slane %v426_v25, 1  ;;  %v431_v31 = vrot.slane %v429_v26, 2  ;;  %v353_v36 = vrot.slane %v1723_v12, 1  ;;  %v1489_v38 = vld [vmem:[%s1846_s9 + $0x10] sm:$0xf] }
  0x18   : >> { %v420_v23 = vrot.slane %v418_v18, 1  ;;  %v423_v29 = vrot.slane %v421_v24, 2  ;;  %v1727_v40 = vld [vmem:[%s2032_s1 + $0x20] sm:$0x3f]   ;;  %v591_v41 = vsel %vm248_vm0, %v1728_v32, 0  ;;  %v1493_v42 = vcombine.low %v1488_v37, %v1489_v38  ;;  %v1732_v9 = vld [vmem:[%s1846_s9 + $0xc] sm:$0xff]  }
  0x19   : >> { %v233_v27 = vor.u32 %v232_v21, %v228_v15  ;;  %v432_v39 = vor.u32 %v431_v31, %v428_v30  ;;  %v1879_v43 = vld [vmem:[%s1846_s9 + $0x14] ss:$0 sps:$4 sm:$0x11]   ;;  %v1497_v44 = vld [vmem:[%s1846_s9 + $0xc] sm:$0xe]  ;;  %v354_v53 = vsel %vm351_vm3, %v352_v35, %v353_v36  ;;  %v511_v55 = vsel %vm248_vm0, %v1727_v40, 0 }
  0x1a   : >> { %v424_v34 = vor.u32 %v423_v29, %v420_v23  ;;  %v571_v46 = vshrl.u32 %v1493_v42, 16  ;;  %v573_v47 = vshll.u32 %v1493_v42, 16  ;;  %v578_v48 = vshll.u32 %v1879_v43, 16  ;;  %v1734_v52 = vld [vmem:[%s2032_s1 + $0x38] sm:$0x3f]  }
  0x1b   : >> { %v238_v33 = vsel %vm226_vm4, %v233_v27, %v237_v22  ;;  %v1888_v49 = vcombine.low %v1497_v44, %v1489_v38  ;;  %v1735_v54 = vld [vmem:[%s1846_s9 + $0x14] ss:$0 sps:$4 sm:$0x33]   ;;  %v733_v3 = vsel %vm248_vm0, %v1734_v52, 0  ;;  %v1516_v7 = vld [vmem:[%s1846_s9 + $0x18] sm:$0xf] }
  0x1c   : >> { %1607 = vmatmul.mubr.msk.bf16.vlgmr.msra.gmra.mxu0 %vm244_vm2, %v238_v33  ;;  %v433_v45 = vsel %vm416_vm5, %v424_v34, %v432_v39  ;;  %v575_v50 = vrot.slane %v573_v47, 1  ;;  %v580_v51 = vrot.slane %v578_v48, 1  ;;  %v716_v59 = vshrl.u32 %v1735_v54, 16  ;;  %v1733_v6 = vld [vmem:[%s2032_s1 + $0x30] sm:$0x3f]  }
  0x1d   : >> { %1617 = vmatpush3.bf16.msra.mxu0 %v364_v28  ;;  %1618 = vmatprep.mubr.msk.bf16.mxu0 %vm1771_vm1, %v1770_v2  ;;  %v708_v57 = vshrl.u32 %v1888_v49, 16  ;;  %v711_v58 = vshll.u32 %v1888_v49, 16  ;;  %v719_v60 = vshll.u32 %v1735_v54, 16  ;;  %v1517_v8 = vld [vmem:[%s1846_s9 + $0x1c] sm:$0xf]  ;;  %v655_v17 = vsel %vm248_vm0, %v1733_v6, 0 }
  0x1e   : >> { %1628 = vmatprep.subr.bf16.mxu0 %v1770_v2  ;;  %1625 = vmatmul.mubr.msk.bf16.vlgmr.msra.gmra.mxu1 %vm244_vm2, %v433_v45  ;;  %v576_v56 = vor.u32 %v575_v50, %v571_v46  ;;  %v718_v4 = vrot.slane %v716_v59, 1  ;;  %v1521_v10 = vcombine.low %v1516_v7, %v1517_v8  ;;  %v1915_v11 = vld [vmem:[%s1846_s9 + $0x20] ss:$0 sps:$4 sm:$0x11]   ;;  %v1737_v14 = vld [vmem:[%s2032_s1 + $0x48] sm:$0x3f]  }
  0x1f   : >> { %1635 = vmatpush3.bf16.msra.mxu1 %v591_v41  ;;  %1636 = vmatprep.mubr.msk.bf16.mxu1 %vm1771_vm1, %v1770_v2  ;;  %v710_v62 = vrot.slane %v708_v57, 1  ;;  %v713_v63 = vrot.slane %v711_v58, 2  ;;  %v721_v5 = vrot.slane %v719_v60, 2  ;;  %v1525_v16 = vld [vmem:[%s1846_s9 + $0x18] sm:$0xe]  ;;  %v868_v20 = vshll.u32 %v1915_v11, 16 }
  0x20   : >> { %1646 = vmatprep.subr.bf16.mxu1 %v1770_v2  ;;  %v581_v61 = vsel %vm226_vm4, %v576_v56, %v580_v51  ;;  %v863_v15 = vshll.u32 %v1521_v10, 16  ;;  %v861_v18 = vshrl.u32 %v1521_v10, 16  ;;  %v1928_v22 = vcombine.low %v1525_v16, %v1517_v8  ;;  %v1744_v23 = vld [vmem:[%s1846_s9 + $0x20] ss:$0 sps:$4 sm:$0x33]  }
  0x21   : >> { %v714_v12 = vor.u32 %v713_v63, %v710_v62  ;;  %v722_v13 = vor.u32 %v721_v5, %v718_v4  ;;  %v643_v24 = vrot.slane %v1888_v49, 1  ;;  %v644_v25 = vrot.slane %v1879_v43, 1  ;;  %v1736_v27 = vld [vmem:[%s2032_s1 + $0x40] sm:$0x3f]   ;;  %v1743_v35 = vld [vmem:[%s2032_s1 + $0x58] sm:$0x3f]  }
  0x22   : >> { %v865_v19 = vrot.slane %v863_v15, 1  ;;  %v881_v26 = vsel %vm248_vm0, %v1737_v14, 0  ;;  %v870_v29 = vrot.slane %v868_v20, 1  ;;  %v998_v30 = vshrl.u32 %v1928_v22, 16  ;;  %v1544_v36 = vld [vmem:[%s1846_s9 + $0x24] sm:$0xf] }
  0x23   : >> { %v723_v21 = vsel %vm416_vm5, %v714_v12, %v722_v13  ;;  %v1001_v31 = vshll.u32 %v1928_v22, 16  ;;  %v1006_v32 = vshrl.u32 %v1744_v23, 16  ;;  %v1009_v33 = vshll.u32 %v1744_v23, 16  ;;  %v1545_v37 = vld [vmem:[%s1846_s9 + $0x28] sm:$0xf]  ;;  %v1741_v49 = vld [vmem:[%s1846_s9 + $0x18] sm:$0xff]  }
  0x24   : >> { %1619 = vmatmul.mubr.msk.bf16.vlgmr.msra.gmra.mxu0 %vm244_vm2, %v354_v53  ;;  %v866_v28 = vor.u32 %v865_v19, %v861_v18  ;;  %v645_v34 = vsel %vm351_vm3, %v643_v24, %v644_v25  ;;  %v801_v38 = vsel %vm248_vm0, %v1736_v27, 0  ;;  %v1549_v40 = vcombine.low %v1544_v36, %v1545_v37  ;;  %v1742_v46 = vld [vmem:[%s2032_s1 + $0x50] sm:$0x3f]   ;;  %v1964_v47 = vld [vmem:[%s1846_s9 + $0x2c] ss:$0 sps:$4 sm:$0x11]  }
  0x25   : >> { %1629 = vmatpush3.bf16.msra.mxu0 %v511_v55  ;;  %1630 = vmatprep.mubr.msk.bf16.mxu0 %vm1771_vm1, %v1770_v2  ;;  %v1000_v41 = vrot.slane %v998_v30, 1  ;;  %v1003_v42 = vrot.slane %v1001_v31, 2  ;;  %v1008_v43 = vrot.slane %v1006_v32, 1  ;;  %v1011_v44 = vrot.slane %v1009_v33, 2  ;;  %v1746_v52 = vld [vmem:[%s2032_s1 + $0x68] sm:$0x3f]  }
  0x26   : >> { %1640 = vmatprep.subr.bf16.mxu0 %v1770_v2  ;;  %1637 = vmatmul.mubr.msk.bf16.vlgmr.msra.gmra.mxu1 %vm244_vm2, %v581_v61  ;;  %v871_v39 = vsel %vm226_vm4, %v866_v28, %v870_v29  ;;  %v1023_v45 = vsel %vm248_vm0, %v1743_v35, 0  ;;  %v1153_v48 = vshll.u32 %v1549_v40, 16  ;;  %v1553_v53 = vld [vmem:[%s1846_s9 + $0x24] sm:$0xe]  ;;  %v945_v54 = vsel %vm248_vm0, %v1742_v46, 0 }
  0x27   : >> { %1647 = vmatpush3.bf16.msra.mxu1 %v733_v3  ;;  %1648 = vmatprep.mubr.msk.bf16.mxu1 %vm1771_vm1, %v1770_v2  ;;  %v1004_v50 = vor.u32 %v1003_v42, %v1000_v41  ;;  %v1012_v51 = vor.u32 %v1011_v44, %v1008_v43  ;;  %v1151_v55 = vshrl.u32 %v1549_v40, 16  ;;  %v1158_v57 = vshll.u32 %v1964_v47, 16  ;;  %v1753_v60 = vld [vmem:[%s1846_s9 + $0x2c] ss:$0 sps:$4 sm:$0x33]   ;;  %v1750_v20 = vld [vmem:[%s1846_s9 + $0x24] sm:$0xff]  }
  0x28   : >> { %1658 = vmatprep.subr.bf16.mxu1 %v1770_v2  ;;  %v1155_v56 = vrot.slane %v1153_v48, 1  ;;  %v1556_v59 = vcombine.low %v1553_v53, %v1545_v37  ;;  %v933_v61 = vrot.slane %v1928_v22, 1  ;;  %v934_v62 = vrot.slane %v1915_v11, 1  ;;  %v1745_v3 = vld [vmem:[%s2032_s1 + $0x60] sm:$0x3f]   ;;  %s1567_s9 = sshll.u32 %s1768_s29, 4 }
  0x29   : >> { %v1013_v58 = vsel %vm416_vm5, %v1004_v50, %v1012_v51  ;;  %v1171_v63 = vsel %vm248_vm0, %v1746_v52, 0  ;;  %v1160_v5 = vrot.slane %v1158_v57, 1  ;;  %v1296_v8 = vshrl.u32 %v1753_v60, 16  ;;  %v1752_v11 = vld [vmem:[%s2032_s1 + $0x78] sm:$0x3f]   ;;  %s1377_s18 = scalar_lea.vmem %s1818_s25, %s1567_s9  ;;  %s206_s29 = sadd.s32 1, %s1768_s29  }
  0x2a   : >> { %v1156_v4 = vor.u32 %v1155_v56, %v1151_v55  ;;  %v1288_v6 = vshrl.u32 %v1556_v59, 16  ;;  %v1291_v7 = vshll.u32 %v1556_v59, 16  ;;  %v935_v10 = vsel %vm351_vm3, %v933_v61, %v934_v62  ;;  %v1751_v19 = vld [vmem:[%s2032_s1 + $0x70] sm:$0x3f]   ;;  %p203_p4 = scmp.ge.s32.totalorder %s206_s29, 16  }
  0x2b   : >> { %v1091_v12 = vsel %vm248_vm0, %v1745_v3, 0  ;;  %v1298_v16 = vrot.slane %v1296_v8, 1  ;;  %v1313_v18 = vsel %vm248_vm0, %v1752_v11, 0  ;;  %v1235_v23 = vsel %vm248_vm0, %v1751_v19, 0 }
  0x2c   : >> { %1631 = vmatmul.mubr.msk.bf16.vlgmr.msra.gmra.mxu0 %vm244_vm2, %v1732_v9  ;;  %v1299_v9 = vshll.u32 %v1753_v60, 16  ;;  %v1161_v13 = vsel %vm226_vm4, %v1156_v4, %v1160_v5  ;;  %v1290_v14 = vrot.slane %v1288_v6, 1  ;;  %v1293_v15 = vrot.slane %v1291_v7, 2 }
  0x2d   : >> { %1641 = vmatpush3.bf16.msra.mxu0 %v655_v17  ;;  %1642 = vmatprep.mubr.msk.bf16.mxu0 %vm1771_vm1, %v1770_v2  ;;  %v1223_v25 = vrot.slane %v1556_v59, 1 }
  0x2e   : >> { %1652 = vmatprep.subr.bf16.mxu0 %v1770_v2  ;;  %1649 = vmatmul.mubr.msk.bf16.vlgmr.msra.gmra.mxu1 %vm244_vm2, %v723_v21  ;;  %v1301_v17 = vrot.slane %v1299_v9, 2  ;;  %v1294_v21 = vor.u32 %v1293_v15, %v1290_v14 }
  0x2f   : >> { %1659 = vmatpush3.bf16.msra.mxu1 %v881_v26  ;;  %1660 = vmatprep.mubr.msk.bf16.mxu1 %vm1771_vm1, %v1770_v2  ;;  %v1224_v26 = vrot.slane %v1964_v47, 1 }
  0x30   : >> { %1670 = vmatprep.subr.bf16.mxu1 %v1770_v2  ;;  %v1302_v22 = vor.u32 %v1301_v17, %v1298_v16 }
  0x31   : >> { %v1225_v27 = vsel %vm351_vm3, %v1223_v25, %v1224_v26 }
  0x32   : >> { %v1303_v24 = vsel %vm416_vm5, %v1294_v21, %v1302_v22 }
  0x34   : >> { %1643 = vmatmul.mubr.msk.bf16.vlgmr.msra.gmra.mxu0 %vm244_vm2, %v645_v34 }
  0x35   : >> { %1653 = vmatpush3.bf16.msra.mxu0 %v801_v38  ;;  %1654 = vmatprep.mubr.msk.bf16.mxu0 %vm1771_vm1, %v1770_v2 }
  0x36   : >> { %1664 = vmatprep.subr.bf16.mxu0 %v1770_v2  ;;  %1661 = vmatmul.mubr.msk.bf16.vlgmr.msra.gmra.mxu1 %vm244_vm2, %v871_v39 }
  0x37   : >> { %1671 = vmatpush3.bf16.msra.mxu1 %v1023_v45  ;;  %1672 = vmatprep.mubr.msk.bf16.mxu1 %vm1771_vm1, %v1770_v2 }
  0x38   : >> { %1682 = vmatprep.subr.bf16.mxu1 %v1770_v2 }
  0x3c   : >> { %1655 = vmatmul.mubr.msk.bf16.vlgmr.msra.gmra.mxu0 %vm244_vm2, %v1741_v49 }
  0x3d   : >> { %1665 = vmatpush3.bf16.msra.mxu0 %v945_v54  ;;  %1666 = vmatprep.mubr.msk.bf16.mxu0 %vm1771_vm1, %v1770_v2 }
  0x3e   : >> { %1676 = vmatprep.subr.bf16.mxu0 %v1770_v2  ;;  %1673 = vmatmul.mubr.msk.bf16.vlgmr.msra.gmra.mxu1 %vm244_vm2, %v1013_v58 }
  0x3f   : >> { %1683 = vmatpush3.bf16.msra.mxu1 %v1171_v63  ;;  %1684 = vmatprep.mubr.msk.bf16.mxu1 %vm1771_vm1, %v1770_v2 }
  0x40   : >> { %1694 = vmatprep.subr.bf16.mxu1 %v1770_v2 }
  0x44   : >> { %1667 = vmatmul.mubr.msk.bf16.vlgmr.msra.gmra.mxu0 %vm244_vm2, %v935_v10 }
  0x45   : >> { %1677 = vmatpush3.bf16.msra.mxu0 %v1091_v12  ;;  %1678 = vmatprep.mubr.msk.bf16.mxu0 %vm1771_vm1, %v1770_v2 }
  0x46   : >> { %1688 = vmatprep.subr.bf16.mxu0 %v1770_v2  ;;  %1685 = vmatmul.mubr.msk.bf16.vlgmr.msra.gmra.mxu1 %vm244_vm2, %v1161_v13 }
  0x47   : >> { %1695 = vmatpush3.bf16.msra.mxu1 %v1313_v18  ;;  %1696 = vmatprep.mubr.msk.bf16.mxu1 %vm1771_vm1, %v1770_v2 }
  0x4c   : >> { %1679 = vmatmul.mubr.msk.bf16.vlgmr.msra.gmra.mxu0 %vm244_vm2, %v1750_v20 }
  0x4d   : >> { %1689 = vmatpush3.bf16.msra.mxu0 %v1235_v23  ;;  %1690 = vmatprep.mubr.msk.bf16.mxu0 %vm1771_vm1, %v1770_v2 }
  0x4e   : >> { %1697 = vmatmul.mubr.msk.bf16.vlgmr.msra.gmra.mxu1 %vm244_vm2, %v1303_v24 }
  0x54   : >> { %1691 = vmatmul.mubr.msk.bf16.vlgmr.msra.gmra.mxu0 %vm244_vm2, %v1225_v27 }
  0xd5   : >> { %v337_v28 = vpop.f32.mrf.mxu1 }
  0xd7   : >> { %v1614_v29 = vpop.f32.mrf.mxu1 }
  0xd9   : >> { %v340_v30 = vpop.f32.mrf.mxu1 }
  0xdb   : >> { %v1615_v31 = vpop.f32.mrf.mxu1 }
  0xdc   : >> { %v286_v32 = vpop.f32.mrf.mxu0 }
  0xdd   : >> { %v338_v49 = vadd.f32 %v337_v28, %v286_v32 }
  0xde   : >> { %v1608_v33 = vpop.f32.mrf.mxu0  ;;  %v479_v34 = vpop.f32.mrf.mxu1 }
  0xe0   : >> { %v289_v35 = vpop.f32.mrf.mxu0  ;;  %v1626_v36 = vpop.f32.mrf.mxu1 }
  0xe1   : >> { %v341_v55 = vadd.f32 %v340_v30, %v289_v35 }
  0xe2   : >> { %v1609_v37 = vpop.f32.mrf.mxu0  ;;  %v482_v2 = vpop.f32.mrf.mxu1 }
  0xe4   : >> { %v400_v38 = vpop.f32.mrf.mxu0  ;;  %v1627_v39 = vpop.f32.mrf.mxu1 }
  0xe5   : >> { %v407_v52 = vadd.f32 %v400_v38, %v338_v49 }
  0xe6   : >> { %v1620_v40 = vpop.f32.mrf.mxu0  ;;  %v627_v41 = vpop.f32.mrf.mxu1 }
  0xe7   : >> { %v486_v59 = vadd.f32 %v479_v34, %v407_v52 }
  0xe8   : >> { %v403_v42 = vpop.f32.mrf.mxu0  ;;  %v1638_v43 = vpop.f32.mrf.mxu1 }
  0xe9   : >> { %v408_v58 = vadd.f32 %v403_v42, %v341_v55 }
  0xea   : >> { %v1621_v44 = vpop.f32.mrf.mxu0  ;;  %v630_v45 = vpop.f32.mrf.mxu1 }
  0xeb   : >> { %v487_v4 = vadd.f32 %v482_v2, %v408_v58 }
  0xec   : >> { %v547_v46 = vpop.f32.mrf.mxu0  ;;  %v1639_v47 = vpop.f32.mrf.mxu1 }
  0xed   : >> { %v554_v62 = vadd.f32 %v547_v46, %v486_v59 }
  0xee   : >> { %v1632_v48 = vpop.f32.mrf.mxu0  ;;  %v769_v50 = vpop.f32.mrf.mxu1 }
  0xef   : >> { %v634_v8 = vadd.f32 %v627_v41, %v554_v62 }
  0xf0   : >> { %v550_v51 = vpop.f32.mrf.mxu0  ;;  %v1650_v53 = vpop.f32.mrf.mxu1 }
  0xf1   : >> { %v555_v7 = vadd.f32 %v550_v51, %v487_v4 }
  0xf2   : >> { %v1633_v54 = vpop.f32.mrf.mxu0  ;;  %v772_v56 = vpop.f32.mrf.mxu1 }
  0xf3   : >> { %v635_v14 = vadd.f32 %v630_v45, %v555_v7 }
  0xf4   : >> { %v691_v57 = vpop.f32.mrf.mxu0  ;;  %v1651_v60 = vpop.f32.mrf.mxu1 }
  0xf5   : >> { %v698_v11 = vadd.f32 %v691_v57, %v634_v8 }
  0xf6   : >> { %v1644_v61 = vpop.f32.mrf.mxu0  ;;  %v917_v63 = vpop.f32.mrf.mxu1 }
  0xf7   : >> { %v776_v18 = vadd.f32 %v769_v50, %v698_v11 }
  0xf8   : >> { %v694_v3 = vpop.f32.mrf.mxu0  ;;  %v1662_v5 = vpop.f32.mrf.mxu1 }
  0xf9   : >> { %v699_v17 = vadd.f32 %v694_v3, %v635_v14 }
  0xfa   : >> { %v1645_v6 = vpop.f32.mrf.mxu0  ;;  %v920_v9 = vpop.f32.mrf.mxu1 }
  0xfb   : >> { %v777_v24 = vadd.f32 %v772_v56, %v699_v17 }
  0xfc   : >> { %v837_v10 = vpop.f32.mrf.mxu0  ;;  %v1663_v12 = vpop.f32.mrf.mxu1 }
  0xfd   : >> { %v844_v21 = vadd.f32 %v837_v10, %v776_v18 }
  0xfe   : >> { %v1656_v13 = vpop.f32.mrf.mxu0  ;;  %v1059_v15 = vpop.f32.mrf.mxu1 }
  0xff   : >> { %v924_v28 = vadd.f32 %v917_v63, %v844_v21 }
 0x100   : >> { %v840_v16 = vpop.f32.mrf.mxu0  ;;  %v1674_v19 = vpop.f32.mrf.mxu1 }
 0x101   : >> { %v845_v27 = vadd.f32 %v840_v16, %v777_v24 }
 0x102   : >> { %v1657_v20 = vpop.f32.mrf.mxu0  ;;  %v1062_v22 = vpop.f32.mrf.mxu1 }
 0x103   : >> { %v925_v34 = vadd.f32 %v920_v9, %v845_v27 }
 0x104   : >> { %v981_v23 = vpop.f32.mrf.mxu0  ;;  %v1675_v25 = vpop.f32.mrf.mxu1 }
 0x105   : >> { %v988_v31 = vadd.f32 %v981_v23, %v924_v28 }
 0x106   : >> { %v1668_v26 = vpop.f32.mrf.mxu0  ;;  %v1207_v29 = vpop.f32.mrf.mxu1 }
 0x107   : >> { %v1066_v2 = vadd.f32 %v1059_v15, %v988_v31 }
 0x108   : >> { %v984_v30 = vpop.f32.mrf.mxu0  ;;  %v1686_v32 = vpop.f32.mrf.mxu1 }
 0x109   : >> { %v989_v37 = vadd.f32 %v984_v30, %v925_v34 }
 0x10a   : >> { %v1669_v33 = vpop.f32.mrf.mxu0  ;;  %v1210_v35 = vpop.f32.mrf.mxu1 }
 0x10b   : >> { %v1067_v43 = vadd.f32 %v1062_v22, %v989_v37 }
 0x10c   : >> { %v1127_v36 = vpop.f32.mrf.mxu0  ;;  %v1687_v38 = vpop.f32.mrf.mxu1 }
 0x10d   : >> { %v1134_v40 = vadd.f32 %v1127_v36, %v1066_v2 }
 0x10e   : >> { %v1680_v39 = vpop.f32.mrf.mxu0  ;;  %v1349_v41 = vpop.f32.mrf.mxu1 }
 0x10f   : >> { %v1214_v47 = vadd.f32 %v1207_v29, %v1134_v40 }
 0x110   : >> { %v1130_v42 = vpop.f32.mrf.mxu0  ;;  %v1698_v44 = vpop.f32.mrf.mxu1 }
 0x111   : >> { %v1135_v46 = vadd.f32 %v1130_v42, %v1067_v43 }
 0x112   : >> { %v1681_v45 = vpop.f32.mrf.mxu0  ;;  %v1352_v48 = vpop.f32.mrf.mxu1 }
 0x113   : >> { %v1215_v54 = vadd.f32 %v1210_v35, %v1135_v46 }
 0x114   : >> { %v1271_v49 = vpop.f32.mrf.mxu0  ;;  %v1699_v51 = vpop.f32.mrf.mxu1 }
 0x115   : >> { %v1278_v50 = vadd.f32 %v1271_v49, %v1214_v47 }
 0x116   : >> { %v1692_v52 = vpop.f32.mrf.mxu0 }
 0x117   : >> { %v1356_v53 = vadd.f32 %v1349_v41, %v1278_v50 }
 0x118   : >> { %v1274_v55 = vpop.f32.mrf.mxu0 }
 0x119   : >> { %v1364_v56 = vmul.f32 %v1808_v0, %v1356_v53  ;;  %v1279_v57 = vadd.f32 %v1274_v55, %v1215_v54 }
 0x11a   : >> { %v1693_v58 = vpop.f32.mrf.mxu0 }
 0x11b   : >> { %v1372_v59 = vadd.f32 %v1813_v1, %v1364_v56  ;;  %v1357_v60 = vadd.f32 %v1352_v48, %v1279_v57 }
 0x11d   : >> { %v1374_v61 = vmax.f32 %v1372_v59, 0.0  ;;  %v1365_v62 = vmul.f32 %v1808_v0, %v1357_v60 }
 0x11f   : >> { %1379 = vst.msk [vmem:[%s1377_s18] sm:$0xff] %vm1378_vm6, %v1374_v61  ;;  %v1373_v63 = vadd.f32 %v1813_v1, %v1365_v62  ;;  %205 = sbr.rel (!%p203_p4) target bundleno = 15 (0xf), region = 93 }
 0x121   : >> { %v1375_v3 = vmax.f32 %v1373_v63, 0.0 }
 0x123   : >> { %1380 = vst.msk [vmem:[%s1377_s18 + $0x8] sm:$0xff] %vm1378_vm6, %v1375_v3 }
 0x124 PF: > { %s14_s15 = sadd.s32 1, %s1764_s15  }
 0x125   : > { %p11_p5 = scmp.ge.s32.totalorder %s14_s15, 4  }
 0x127   :  { %13 = sbr.rel (!%p11_p5) target bundleno = 1 (0x1), region = 104 }

// kernel: forward.17
= control target key start
LH: loop header
LB: loop body
LE: loop exit
PB: predicated region body
PF: predicated region fallthrough
CT: control target
= control target key end

     0   :  { %s1340_s18 = smov 0   ;;  %s1516_s0 = inlined_call_operand.vmem [shape: bf16[2,18,18,32], index: 0, kind: input, shape index: {}]   ;;  %s1517_s1 = inlined_call_operand.vmem [shape: bf16[9,32,32], index: 1, kind: input, shape index: {}]   ;;  %s1518_s2 = inlined_call_operand.vmem [shape: f32[1,32], index: 2, kind: input, shape index: {}]   ;;  %s1519_s3 = inlined_call_operand.vmem [shape: f32[1,32], index: 3, kind: input, shape index: {}]   ;;  %s1520_s4 = inlined_call_operand.vmem [shape: f32[2,16,16,32], index: 4, kind: input, shape index: {}]   ;;  %s1521_s5 = inlined_call_operand.vmem [shape: f32[2,16,16,32], index: 5, kind: output, shape index: {}]  }
   0x1 LB: > { %s1044_s19 = sadd.s32 4294967295, %s1302_s18   ;;  %p1048_p0 = scmp.ge.s32.totalorder %s1302_s18, 1  ;;  %s1302_s18 = sphi %s1340_s18, %s15_s18  }
   0x2   : > { %p197_p1 = scmp.lt.s32.totalorder %s1302_s18, 3 }
   0x4   : > { %p198_p2 = pnand %p1048_p0, %p197_p1 }
   0x5   : > { %p230_p3 = scmp.lt.s32.totalorder (!%p198_p2), %s1044_s19, 1  ;;  %s1373_s10 = smov (!%p198_p2), 0  }
   0x6   : > { %201 = sbr.rel (%p198_p2) target bundleno = 268 (0x10c), region = 40 }
   0xb   : > { %v1351_v0 = vld [vmem:[%s1518_s2] ss:$0 sm:$0xff]  ;;  %s1523_s19 = smov (!%p230_p3, %s1044_s19), 1 }
   0xc   : > { %v1356_v1 = vld [vmem:[%s1519_s3] ss:$0 sm:$0xff]  ;;  %s1244_s24 = smul.u32 216, %s1523_s19  ;;  %s1142_s25 = sshll.u32 %s1523_s19, 8 }
   0xd   : > { %s1361_s28 = scalar_lea.vmem %s1520_s4, %s1142_s25  ;;  %s1366_s6 = scalar_lea.vmem %s1521_s5, %s1142_s25 }
   0xe   : > { %s1371_s9 = scalar_lea.vmem %s1516_s0, %s1244_s24 }
   0xf LB: >> { %v1263_v2 = vld [vmem:[%s1517_s1 + $0x18] sm:$0xff]   ;;  %v1308_v3 = vmov 0.0   ;;  %v1264_v4 = vld [vmem:[%s1517_s1 + $0x8] sm:$0xff]   ;;  %v1265_v5 = vld [vmem:[%s1517_s1 + $0x10] sm:$0xff]   ;;  %vm1309_vm0 = vmmov 0   ;;  %s1144_s17 = smul.u32 12, %s1306_s10  ;;  %s1306_s10 = sphi %s1373_s10, %s253_s10  }
  0x10   : >> { %1172 = vmatprep.subr.bf16.mxu0 %v1308_v3  ;;  %1180 = vmatprep.subr.bf16.mxu1 %v1308_v3  ;;  %v1266_v6 = vld [vmem:[%s1517_s1] sm:$0xff]   ;;  %vm302_vm1 = vcmask 261120   ;;  %v1270_v11 = vld [vmem:[%s1517_s1 + $0x38] sm:$0xff]   ;;  %vm277_vm2 = vsmask.f32 7424  ;;  %v1272_v18 = vld [vmem:[%s1517_s1 + $0x30] sm:$0xff]  }
  0x11   : >> { %1173 = vmatpush3.bf16.msra.mxu0 %v1263_v2  ;;  %1176 = vmatprep.mubr.msk.bf16.mxu0 %vm1309_vm0, %v1308_v3  ;;  %s1400_s21 = scalar_lea.vmem %s1371_s9, %s1144_s17  ;;  %v1269_v21 = vld [vmem:[%s1517_s1 + $0x28] sm:$0xff]   ;;  %v1271_v23 = vld [vmem:[%s1517_s1 + $0x20] sm:$0xff]   ;;  %v1276_v27 = vld [vmem:[%s1517_s1 + $0x58] sm:$0xff]   ;;  %vm411_vm3 = vcmask 1046528  }
  0x12   : >> { %1181 = vmatpush3.bf16.msra.mxu1 %v1264_v4  ;;  %1174 = vmatprep.subr.bf16.mxu0 %v1308_v3  ;;  %v257_v7 = vld [vmem:[%s1400_s21] sm:$0xf]  ;;  %v258_v8 = vld [vmem:[%s1400_s21 + $0x4] sm:$0xf]  ;;  %v1274_v25 = vld [vmem:[%s1400_s21 + $0xc] sm:$0xff]  }
  0x13   : >> { %1182 = vmatprep.subr.bf16.mxu1 %v1308_v3  ;;  %1184 = vmatprep.mubr.msk.bf16.mxu1 %vm1309_vm0, %v1308_v3  ;;  %v1059_v9 = vcombine.low %v257_v7, %v258_v8  ;;  %v1268_v10 = vld [vmem:[%s1400_s21 + $0x8] ss:$0 sps:$4 sm:$0x11]   ;;  %v402_v17 = vld [vmem:[%s1400_s21] sm:$0xe]  ;;  %v1278_v35 = vld [vmem:[%s1517_s1 + $0x50] sm:$0xff]  }
  0x14   : >> { %v286_v14 = vshll.u32 %v1268_v10, 16  ;;  %v1071_v19 = vcombine.low %v402_v17, %v258_v8  ;;  %v413_v24 = vrot.slane %v1268_v10, 1  ;;  %v1085_v28 = vld [vmem:[%s1400_s21 + $0xc] sm:$0xf]  ;;  %v1086_v29 = vld [vmem:[%s1400_s21 + $0x10] sm:$0xf] }
  0x15   : >> { %1175 = vmatpush3.bf16.msra.mxu0 %v1265_v5  ;;  %v279_v12 = vshrl.u32 %v1059_v9, 16  ;;  %v281_v13 = vshll.u32 %v1059_v9, 16  ;;  %v1097_v30 = vld [vmem:[%s1400_s21 + $0xc] sm:$0xe]  ;;  %v1092_v31 = vcombine.low %v1085_v28, %v1086_v29  ;;  %v1277_v43 = vld [vmem:[%s1517_s1 + $0x40] sm:$0xff]   ;;  %v1283_v44 = vld [vmem:[%s1517_s1 + $0x78] sm:$0xff]  }
  0x16   : >> { %1183 = vmatpush3.bf16.msra.mxu1 %v1266_v6  ;;  %1188 = vmatprep.subr.bf16.mxu0 %v1308_v3  ;;  %v288_v16 = vrot.slane %v286_v14, 1  ;;  %v412_v26 = vrot.slane %v1071_v19, 1  ;;  %v1280_v32 = vld [vmem:[%s1400_s21 + $0x14] ss:$0 sps:$4 sm:$0x11]   ;;  %v1102_v33 = vcombine.low %v1097_v30, %v1086_v29  ;;  %v1275_v34 = vld [vmem:[%s1517_s1 + $0x48] sm:$0xff]  }
  0x17   : >> { %1196 = vmatprep.subr.bf16.mxu1 %v1308_v3  ;;  %v283_v15 = vrot.slane %v281_v13, 1  ;;  %v564_v36 = vshrl.u32 %v1092_v31, 16  ;;  %v566_v37 = vshll.u32 %v1092_v31, 16  ;;  %v571_v40 = vshll.u32 %v1280_v32, 16  ;;  %v1116_v46 = vld [vmem:[%s1400_s21 + $0x18] sm:$0xf] }
  0x18   : >> { %v642_v38 = vrot.slane %v1102_v33, 1  ;;  %v414_v39 = vsel %vm411_vm3, %v412_v26, %v413_v24  ;;  %v643_v41 = vrot.slane %v1280_v32, 1  ;;  %v1117_v47 = vld [vmem:[%s1400_s21 + $0x1c] sm:$0xf]  ;;  %v1285_v55 = vld [vmem:[%s1517_s1 + $0x70] sm:$0xff]   ;;  %v1282_v57 = vld [vmem:[%s1517_s1 + $0x68] sm:$0xff]  }
  0x19   : >> { %1185 = vmatmul.mubr.msk.bf16.vlgmr.msra.gmra.mxu1 %vm302_vm1, %v1059_v9  ;;  %v284_v20 = vor.u32 %v283_v15, %v279_v12  ;;  %v568_v42 = vrot.slane %v566_v37, 1  ;;  %v573_v49 = vrot.slane %v571_v40, 1  ;;  %v1123_v50 = vcombine.low %v1116_v46, %v1117_v47  ;;  %v1288_v51 = vld [vmem:[%s1400_s21 + $0x20] ss:$0 sps:$4 sm:$0x11]   ;;  %v1286_v2 = vld [vmem:[%s1400_s21 + $0x18] sm:$0xff]  }
  0x1a   : >> { %1197 = vmatpush3.bf16.msra.mxu1 %v1270_v11  ;;  %1200 = vmatprep.mubr.msk.bf16.mxu1 %vm1309_vm0, %v1308_v3  ;;  %v644_v45 = vsel %vm411_vm3, %v642_v38, %v643_v41  ;;  %v801_v54 = vshll.u32 %v1288_v51, 16  ;;  %v1284_v61 = vld [vmem:[%s1517_s1 + $0x60] sm:$0xff]   ;;  %v1128_v63 = vld [vmem:[%s1400_s21 + $0x18] sm:$0xe]  ;;  %v1289_v4 = vld [vmem:[%s1517_s1 + $0x88] sm:$0xff]   ;;  %v873_v8 = vrot.slane %v1288_v51, 1 }
  0x1b   : >> { %1198 = vmatprep.subr.bf16.mxu1 %v1308_v3  ;;  %v289_v22 = vsel %vm277_vm2, %v284_v20, %v288_v16  ;;  %v569_v48 = vor.u32 %v568_v42, %v564_v36  ;;  %v794_v52 = vshrl.u32 %v1123_v50, 16  ;;  %v796_v53 = vshll.u32 %v1123_v50, 16  ;;  %v1290_v6 = vld [vmem:[%s1517_s1 + $0x80] sm:$0xff]   ;;  %s1139_s21 = sshll.u32 %s1306_s10, 4  ;;  %s253_s10 = sadd.s32 1, %s1306_s10  }
  0x1c   : >> { %1177 = vmatmul.mubr.msk.bf16.vlgmr.msra.gmra.mxu0 %vm302_vm1, %v289_v22  ;;  %v803_v59 = vrot.slane %v801_v54, 1  ;;  %v1133_v5 = vcombine.low %v1128_v63, %v1117_v47  ;;  %s952_s8 = scalar_lea.vmem %s1361_s28, %s1139_s21  ;;  %s957_s11 = scalar_lea.vmem %s1366_s6, %s1139_s21 }
  0x1d   : >> { %1189 = vmatpush3.bf16.msra.mxu0 %v1269_v21  ;;  %1192 = vmatprep.mubr.msk.bf16.mxu0 %vm1309_vm0, %v1308_v3  ;;  %v574_v56 = vsel %vm277_vm2, %v569_v48, %v573_v49  ;;  %v798_v58 = vrot.slane %v796_v53, 1  ;;  %p250_p4 = scmp.ge.s32.totalorder %s253_s10, 16  }
  0x1e   : >> { %1199 = vmatpush3.bf16.msra.mxu1 %v1272_v18  ;;  %1190 = vmatprep.subr.bf16.mxu0 %v1308_v3  ;;  %v872_v7 = vrot.slane %v1133_v5, 1 }
  0x1f   : >> { %1212 = vmatprep.subr.bf16.mxu1 %v1308_v3  ;;  %v799_v60 = vor.u32 %v798_v58, %v794_v52 }
  0x20   : >> { %v874_v9 = vsel %vm411_vm3, %v872_v7, %v873_v8  ;;  %v954_v7 = vld [vmem:[%s952_s8 + $0x8] sm:$0xff] }
  0x21   : >> { %1201 = vmatmul.mubr.msk.bf16.vlgmr.msra.gmra.mxu1 %vm302_vm1, %v1274_v25  ;;  %1191 = vmatpush3.bf16.msra.mxu0 %v1271_v23  ;;  %v804_v62 = vsel %vm277_vm2, %v799_v60, %v803_v59 }
  0x22   : >> { %1213 = vmatpush3.bf16.msra.mxu1 %v1276_v27  ;;  %1216 = vmatprep.mubr.msk.bf16.mxu1 %vm1309_vm0, %v1308_v3 }
  0x23   : >> { %1214 = vmatprep.subr.bf16.mxu1 %v1308_v3  ;;  %1204 = vmatprep.subr.bf16.mxu0 %v1308_v3 }
  0x24   : >> { %1193 = vmatmul.mubr.msk.bf16.vlgmr.msra.gmra.mxu0 %vm302_vm1, %v414_v39 }
  0x25   : >> { %1205 = vmatpush3.bf16.msra.mxu0 %v1275_v34  ;;  %1208 = vmatprep.mubr.msk.bf16.mxu0 %vm1309_vm0, %v1308_v3 }
  0x26   : >> { %1215 = vmatpush3.bf16.msra.mxu1 %v1278_v35  ;;  %1206 = vmatprep.subr.bf16.mxu0 %v1308_v3 }
  0x27   : >> { %1228 = vmatprep.subr.bf16.mxu1 %v1308_v3 }
  0x29   : >> { %1217 = vmatmul.mubr.msk.bf16.vlgmr.msra.gmra.mxu1 %vm302_vm1, %v644_v45  ;;  %1207 = vmatpush3.bf16.msra.mxu0 %v1277_v43 }
  0x2a   : >> { %1229 = vmatpush3.bf16.msra.mxu1 %v1283_v44  ;;  %1232 = vmatprep.mubr.msk.bf16.mxu1 %vm1309_vm0, %v1308_v3 }
  0x2b   : >> { %1230 = vmatprep.subr.bf16.mxu1 %v1308_v3  ;;  %1220 = vmatprep.subr.bf16.mxu0 %v1308_v3 }
  0x2c   : >> { %1209 = vmatmul.mubr.msk.bf16.vlgmr.msra.gmra.mxu0 %vm302_vm1, %v574_v56 }
  0x2d   : >> { %1221 = vmatpush3.bf16.msra.mxu0 %v1282_v57  ;;  %1224 = vmatprep.mubr.msk.bf16.mxu0 %vm1309_vm0, %v1308_v3 }
  0x2e   : >> { %1231 = vmatpush3.bf16.msra.mxu1 %v1285_v55  ;;  %1222 = vmatprep.subr.bf16.mxu0 %v1308_v3 }
  0x31   : >> { %1233 = vmatmul.mubr.msk.bf16.vlgmr.msra.gmra.mxu1 %vm302_vm1, %v804_v62  ;;  %1223 = vmatpush3.bf16.msra.mxu0 %v1284_v61  ;;  %v953_v62 = vld [vmem:[%s952_s8] sm:$0xff] }
  0x32   : >> { %1236 = vmatprep.subr.bf16.mxu0 %v1308_v3 }
  0x34   : >> { %1225 = vmatmul.mubr.msk.bf16.vlgmr.msra.gmra.mxu0 %vm302_vm1, %v1286_v2 }
  0x35   : >> { %1237 = vmatpush3.bf16.msra.mxu0 %v1289_v4  ;;  %1240 = vmatprep.mubr.msk.bf16.mxu0 %vm1309_vm0, %v1308_v3 }
  0x36   : >> { %1238 = vmatprep.subr.bf16.mxu0 %v1308_v3 }
  0x39   : >> { %1239 = vmatpush3.bf16.msra.mxu0 %v1290_v6 }
  0x3c   : >> { %1241 = vmatmul.mubr.msk.bf16.vlgmr.msra.gmra.mxu0 %vm302_vm1, %v874_v9 }
  0xd9   : >> { %v395_v10 = vpop.f32.mrf.mxu1 }
  0xdb   : >> { %v1186_v11 = vpop.f32.mrf.mxu1 }
  0xdc   : >> { %v340_v13 = vpop.f32.mrf.mxu0 }
  0xdd   : >> { %v398_v12 = vpop.f32.mrf.mxu1  ;;  %v396_v25 = vadd.f32 %v395_v10, %v340_v13 }
  0xde   : >> { %v1178_v15 = vpop.f32.mrf.mxu0 }
  0xdf   : >> { %v1187_v14 = vpop.f32.mrf.mxu1 }
  0xe0   : >> { %v343_v17 = vpop.f32.mrf.mxu0 }
  0xe1   : >> { %v538_v16 = vpop.f32.mrf.mxu1  ;;  %v399_v31 = vadd.f32 %v398_v12, %v343_v17 }
  0xe2   : >> { %v1179_v19 = vpop.f32.mrf.mxu0 }
  0xe3   : >> { %v1202_v18 = vpop.f32.mrf.mxu1 }
  0xe4   : >> { %v464_v21 = vpop.f32.mrf.mxu0 }
  0xe5   : >> { %v541_v20 = vpop.f32.mrf.mxu1  ;;  %v471_v28 = vadd.f32 %v464_v21, %v396_v25 }
  0xe6   : >> { %v1194_v23 = vpop.f32.mrf.mxu0 }
  0xe7   : >> { %v1203_v22 = vpop.f32.mrf.mxu1  ;;  %v545_v34 = vadd.f32 %v538_v16, %v471_v28 }
  0xe8   : >> { %v467_v24 = vpop.f32.mrf.mxu0 }
  0xe9   : >> { %v694_v3 = vpop.f32.mrf.mxu1  ;;  %v472_v35 = vadd.f32 %v467_v24, %v399_v31 }
  0xea   : >> { %v1195_v27 = vpop.f32.mrf.mxu0 }
  0xeb   : >> { %v1218_v26 = vpop.f32.mrf.mxu1  ;;  %v546_v41 = vadd.f32 %v541_v20, %v472_v35 }
  0xec   : >> { %v624_v30 = vpop.f32.mrf.mxu0 }
  0xed   : >> { %v697_v29 = vpop.f32.mrf.mxu1  ;;  %v631_v38 = vadd.f32 %v624_v30, %v545_v34 }
  0xee   : >> { %v1210_v33 = vpop.f32.mrf.mxu0 }
  0xef   : >> { %v1219_v32 = vpop.f32.mrf.mxu1  ;;  %v701_v44 = vadd.f32 %v694_v3, %v631_v38 }
  0xf0   : >> { %v627_v37 = vpop.f32.mrf.mxu0 }
  0xf1   : >> { %v854_v36 = vpop.f32.mrf.mxu1  ;;  %v632_v45 = vadd.f32 %v627_v37, %v546_v41 }
  0xf2   : >> { %v1211_v40 = vpop.f32.mrf.mxu0 }
  0xf3   : >> { %v1234_v39 = vpop.f32.mrf.mxu1  ;;  %v702_v50 = vadd.f32 %v697_v29, %v632_v45 }
  0xf4   : >> { %v768_v43 = vpop.f32.mrf.mxu0 }
  0xf5   : >> { %v857_v42 = vpop.f32.mrf.mxu1  ;;  %v775_v48 = vadd.f32 %v768_v43, %v701_v44 }
  0xf6   : >> { %v1226_v47 = vpop.f32.mrf.mxu0 }
  0xf7   : >> { %v1235_v46 = vpop.f32.mrf.mxu1  ;;  %v861_v52 = vadd.f32 %v854_v36, %v775_v48 }
  0xf8   : >> { %v771_v49 = vpop.f32.mrf.mxu0 }
  0xf9   : >> { %v776_v53 = vadd.f32 %v771_v49, %v702_v50 }
  0xfa   : >> { %v1227_v51 = vpop.f32.mrf.mxu0 }
  0xfb   : >> { %v862_v57 = vadd.f32 %v857_v42, %v776_v53 }
  0xfc   : >> { %v924_v54 = vpop.f32.mrf.mxu0 }
  0xfd   : >> { %v931_v55 = vadd.f32 %v924_v54, %v861_v52 }
  0xfe   : >> { %v1242_v56 = vpop.f32.mrf.mxu0 }
  0xff   : >> { %v939_v58 = vmul.f32 %v1351_v0, %v931_v55 }
 0x100   : >> { %v927_v59 = vpop.f32.mrf.mxu0 }
 0x101   : >> { %v947_v60 = vadd.f32 %v1356_v1, %v939_v58  ;;  %v932_v61 = vadd.f32 %v927_v59, %v862_v57 }
 0x102   : >> { %v1243_v63 = vpop.f32.mrf.mxu0 }
 0x103   : >> { %v949_v2 = vmax.f32 %v947_v60, 0.0  ;;  %v940_v4 = vmul.f32 %v1351_v0, %v932_v61 }
 0x105   : >> { %v955_v5 = vadd.f32 %v953_v62, %v949_v2  ;;  %v948_v6 = vadd.f32 %v1356_v1, %v940_v4 }
 0x107   : >> { %958 = vst.msk [vmem:[%s957_s11] sm:$0xff] %vm302_vm1, %v955_v5  ;;  %v950_v8 = vmax.f32 %v948_v6, 0.0  ;;  %252 = sbr.rel (!%p250_p4) target bundleno = 15 (0xf), region = 93 }
 0x109   : >> { %v956_v9 = vadd.f32 %v954_v7, %v950_v8 }
 0x10b   : >> { %959 = vst.msk [vmem:[%s957_s11 + $0x8] sm:$0xff] %vm302_vm1, %v956_v9 }
 0x10c PF: > { %s15_s18 = sadd.s32 1, %s1302_s18  }
 0x10d   : > { %p12_p5 = scmp.ge.s32.totalorder %s15_s18, 4  }
 0x10f   :  { %14 = sbr.rel (!%p12_p5) target bundleno = 1 (0x1), region = 104 }

// kernel: forward.18
= control target key start
LH: loop header
LB: loop body
LE: loop exit
PB: predicated region body
PF: predicated region fallthrough
CT: control target
= control target key end

     0   :  { %s326_s6 = smov 0   ;;  %s383_s0 = inlined_call_operand.vmem [shape: f32[2,16,8,64], index: 0, kind: input, shape index: {}]   ;;  %s384_s1 = inlined_call_operand.vmem [shape: f32[2,8,8,32], index: 1, kind: output, shape index: {}]  }
   0x1 LB: > { %s285_s7 = sadd.s32 4294967295, %s313_s6   ;;  %p289_p0 = scmp.ge.s32.totalorder %s313_s6, 1  ;;  %s313_s6 = sphi %s326_s6, %s11_s6  }
   0x2   : > { %p87_p1 = scmp.lt.s32.totalorder %s313_s6, 3 }
   0x4   : > { %p88_p2 = pnand %p289_p0, %p87_p1 }
   0x5   : > { %p107_p3 = scmp.lt.s32.totalorder (!%p88_p2), %s285_s7, 1  ;;  %s315_s12 = smov (!%p88_p2), 96  }
   0x6   : > { %91 = sbr.rel (%p88_p2) target bundleno = 163 (0xa3), region = 24 }
   0xb   : > { %s386_s7 = smov (!%p107_p3, %s285_s7), 1  ;;  %vm221_vm0 = vcmask 261120  }
   0xc   : > { %s296_s8 = sshll.u32 %s386_s7, 7  ;;  %s297_s13 = sshll.u32 %s386_s7, 6 }
   0xd   : > { %s340_s11 = scalar_lea.vmem %s383_s0, %s296_s8  ;;  %s362_s16 = scalar_lea.vmem %s384_s1, %s297_s13 }
   0xe   : > { %v119_v0 = vld [vmem:[%s340_s11 + $0x10] sm:$0xff]  ;;  %v117_v1 = vld [vmem:[%s340_s11] sm:$0xff]  ;;  %v120_v2 = vld [vmem:[%s340_s11 + $0x18] sm:$0xff] }
   0xf   : > { %153 = vrot.lane.b32.xlu1 %v119_v0, %s315_s12  ;;  %149 = vrot.lane.b32.xlu0 %v117_v1, %s315_s12  ;;  %v118_v3 = vld [vmem:[%s340_s11 + $0x8] sm:$0xff]  ;;  %v121_v5 = vld [vmem:[%s340_s11 + $0x20] sm:$0xff] }
  0x10   : > { %v122_v4 = vld [vmem:[%s340_s11 + $0x28] sm:$0xff]  ;;  %v124_v6 = vld [vmem:[%s340_s11 + $0x38] sm:$0xff]  ;;  %v123_v7 = vld [vmem:[%s340_s11 + $0x30] sm:$0xff] }
  0x11   : > { %v126_v8 = vld [vmem:[%s340_s11 + $0x48] sm:$0xff]  ;;  %v125_v9 = vld [vmem:[%s340_s11 + $0x40] sm:$0xff]  ;;  %v128_v10 = vld [vmem:[%s340_s11 + $0x58] sm:$0xff] }
  0x12   : > { %v127_v11 = vld [vmem:[%s340_s11 + $0x50] sm:$0xff]  ;;  %v130_v12 = vld [vmem:[%s340_s11 + $0x68] sm:$0xff]  ;;  %v129_v13 = vld [vmem:[%s340_s11 + $0x60] sm:$0xff] }
  0x13   : > { %155 = vrot.lane.b32.xlu1 %v120_v2, %s315_s12  ;;  %151 = vrot.lane.b32.xlu0 %v118_v3, %s315_s12  ;;  %v132_v14 = vld [vmem:[%s340_s11 + $0x78] sm:$0xff]  ;;  %v131_v15 = vld [vmem:[%s340_s11 + $0x70] sm:$0xff] }
  0x17   : > { %159 = vrot.lane.b32.xlu1 %v122_v4, %s315_s12  ;;  %157 = vrot.lane.b32.xlu0 %v121_v5, %s315_s12 }
  0x1b   : > { %163 = vrot.lane.b32.xlu1 %v124_v6, %s315_s12  ;;  %161 = vrot.lane.b32.xlu0 %v123_v7, %s315_s12 }
  0x1f   : > { %167 = vrot.lane.b32.xlu1 %v126_v8, %s315_s12  ;;  %165 = vrot.lane.b32.xlu0 %v125_v9, %s315_s12 }
  0x23   : > { %171 = vrot.lane.b32.xlu1 %v128_v10, %s315_s12  ;;  %169 = vrot.lane.b32.xlu0 %v127_v11, %s315_s12 }
  0x27   : > { %175 = vrot.lane.b32.xlu1 %v130_v12, %s315_s12  ;;  %173 = vrot.lane.b32.xlu0 %v129_v13, %s315_s12 }
  0x2b   : > { %179 = vrot.lane.b32.xlu1 %v132_v14, %s315_s12  ;;  %177 = vrot.lane.b32.xlu0 %v131_v15, %s315_s12 }
  0x81   : > { %v154_v16 = vpop.permute.xlu1 %153  ;;  %v150_v17 = vpop.permute.xlu0 %149 }
  0x82   : > { %v199_v20 = vmax.f32 %v119_v0, %v154_v16  ;;  %v197_v21 = vmax.f32 %v117_v1, %v150_v17 }
  0x85   : > { %v156_v18 = vpop.permute.xlu1 %155  ;;  %v152_v19 = vpop.permute.xlu0 %151 }
  0x86   : > { %v200_v22 = vmax.f32 %v120_v2, %v156_v18  ;;  %v198_v23 = vmax.f32 %v118_v3, %v152_v19 }
  0x88   : > { %v214_v24 = vmax.f32 %v199_v20, %v200_v22  ;;  %v213_v25 = vmax.f32 %v197_v21, %v198_v23 }
  0x89   : > { %v160_v26 = vpop.permute.xlu1 %159  ;;  %v158_v27 = vpop.permute.xlu0 %157 }
  0x8a   : > { %223 = vst.msk [vmem:[%s362_s16 + $0x8] sm:$0xff] %vm221_vm0, %v214_v24  ;;  %222 = vst.msk [vmem:[%s362_s16] sm:$0xff] %vm221_vm0, %v213_v25  ;;  %v202_v28 = vmax.f32 %v122_v4, %v160_v26  ;;  %v201_v29 = vmax.f32 %v121_v5, %v158_v27 }
  0x8c   : > { %v215_v30 = vmax.f32 %v201_v29, %v202_v28 }
  0x8d   : > { %v164_v31 = vpop.permute.xlu1 %163  ;;  %v162_v32 = vpop.permute.xlu0 %161 }
  0x8e   : > { %224 = vst.msk [vmem:[%s362_s16 + $0x10] sm:$0xff] %vm221_vm0, %v215_v30  ;;  %v204_v33 = vmax.f32 %v124_v6, %v164_v31  ;;  %v203_v34 = vmax.f32 %v123_v7, %v162_v32 }
  0x90   : > { %v216_v35 = vmax.f32 %v203_v34, %v204_v33 }
  0x91   : > { %v168_v36 = vpop.permute.xlu1 %167  ;;  %v166_v37 = vpop.permute.xlu0 %165 }
  0x92   : > { %225 = vst.msk [vmem:[%s362_s16 + $0x18] sm:$0xff] %vm221_vm0, %v216_v35  ;;  %v206_v38 = vmax.f32 %v126_v8, %v168_v36  ;;  %v205_v39 = vmax.f32 %v125_v9, %v166_v37 }
  0x94   : > { %v217_v40 = vmax.f32 %v205_v39, %v206_v38 }
  0x95   : > { %v172_v41 = vpop.permute.xlu1 %171  ;;  %v170_v42 = vpop.permute.xlu0 %169 }
  0x96   : > { %226 = vst.msk [vmem:[%s362_s16 + $0x20] sm:$0xff] %vm221_vm0, %v217_v40  ;;  %v208_v43 = vmax.f32 %v128_v10, %v172_v41  ;;  %v207_v44 = vmax.f32 %v127_v11, %v170_v42 }
  0x98   : > { %v218_v45 = vmax.f32 %v207_v44, %v208_v43 }
  0x99   : > { %v176_v46 = vpop.permute.xlu1 %175  ;;  %v174_v47 = vpop.permute.xlu0 %173 }
  0x9a   : > { %227 = vst.msk [vmem:[%s362_s16 + $0x28] sm:$0xff] %vm221_vm0, %v218_v45  ;;  %v210_v48 = vmax.f32 %v130_v12, %v176_v46  ;;  %v209_v49 = vmax.f32 %v129_v13, %v174_v47 }
  0x9c   : > { %v219_v50 = vmax.f32 %v209_v49, %v210_v48 }
  0x9d   : > { %v180_v51 = vpop.permute.xlu1 %179  ;;  %v178_v52 = vpop.permute.xlu0 %177 }
  0x9e   : > { %228 = vst.msk [vmem:[%s362_s16 + $0x30] sm:$0xff] %vm221_vm0, %v219_v50  ;;  %v212_v53 = vmax.f32 %v132_v14, %v180_v51  ;;  %v211_v54 = vmax.f32 %v131_v15, %v178_v52 }
  0xa0   : > { %v220_v55 = vmax.f32 %v211_v54, %v212_v53 }
  0xa2   : > { %229 = vst.msk [vmem:[%s362_s16 + $0x38] sm:$0xff] %vm221_vm0, %v220_v55 }
  0xa3 PF: > { %s11_s6 = sadd.s32 1, %s313_s6  }
  0xa4   : > { %p8_p4 = scmp.ge.s32.totalorder %s11_s6, 4  }
  0xa6   :  { %10 = sbr.rel (!%p8_p4) target bundleno = 1 (0x1), region = 54 }

// kernel: forward.16
= control target key start
LH: loop header
LB: loop body
LE: loop exit
PB: predicated region body
PF: predicated region fallthrough
CT: control target
= control target key end

     0   :  { %s1266_s15 = smov 0   ;;  %s1436_s0 = inlined_call_operand.vmem [shape: bf16[2,18,18,32], index: 0, kind: input, shape index: {}]   ;;  %s1437_s1 = inlined_call_operand.vmem [shape: bf16[9,32,32], index: 1, kind: input, shape index: {}]   ;;  %s1438_s2 = inlined_call_operand.vmem [shape: f32[1,32], index: 2, kind: input, shape index: {}]   ;;  %s1439_s3 = inlined_call_operand.vmem [shape: f32[1,32], index: 3, kind: input, shape index: {}]   ;;  %s1440_s4 = inlined_call_operand.vmem [shape: f32[2,16,16,32], index: 4, kind: output, shape index: {}]  }
   0x1 LB: > { %s978_s16 = sadd.s32 4294967295, %s1233_s15   ;;  %p982_p0 = scmp.ge.s32.totalorder %s1233_s15, 1  ;;  %s1233_s15 = sphi %s1266_s15, %s14_s15  }
   0x2   : > { %p162_p1 = scmp.lt.s32.totalorder %s1233_s15, 3 }
   0x4   : > { %p163_p2 = pnand %p982_p0, %p162_p1 }
   0x5   : > { %p188_p3 = scmp.lt.s32.totalorder (!%p163_p2), %s978_s16, 1  ;;  %s1294_s29 = smov (!%p163_p2), 0  }
   0x6   : > { %166 = sbr.rel (%p163_p2) target bundleno = 266 (0x10a), region = 36 }
   0xb   : > { %v1277_v0 = vld [vmem:[%s1438_s2] ss:$0 sm:$0xff]  ;;  %s1442_s16 = smov (!%p188_p3, %s978_s16), 1 }
   0xc   : > { %v1282_v1 = vld [vmem:[%s1439_s3] ss:$0 sm:$0xff]  ;;  %s1175_s21 = smul.u32 216, %s1442_s16  ;;  %s1074_s22 = sshll.u32 %s1442_s16, 8 }
   0xd   : > { %s1287_s25 = scalar_lea.vmem %s1440_s4, %s1074_s22 }
   0xe   : > { %s1292_s28 = scalar_lea.vmem %s1436_s0, %s1175_s21 }
   0xf LB: >> { %v1194_v2 = vld [vmem:[%s1437_s1 + $0x18] sm:$0xff]   ;;  %v1239_v3 = vmov 0.0   ;;  %v1195_v4 = vld [vmem:[%s1437_s1 + $0x8] sm:$0xff]   ;;  %v1196_v5 = vld [vmem:[%s1437_s1 + $0x10] sm:$0xff]   ;;  %vm1240_vm0 = vmmov 0   ;;  %s1075_s10 = smul.u32 12, %s1237_s29  ;;  %s1237_s29 = sphi %s1294_s29, %s206_s29  }
  0x10   : >> { %1103 = vmatprep.subr.bf16.mxu0 %v1239_v3  ;;  %1111 = vmatprep.subr.bf16.mxu1 %v1239_v3  ;;  %v1197_v6 = vld [vmem:[%s1437_s1] sm:$0xff]   ;;  %vm255_vm1 = vcmask 261120   ;;  %v1201_v11 = vld [vmem:[%s1437_s1 + $0x38] sm:$0xff]   ;;  %vm230_vm2 = vsmask.f32 7424  ;;  %v1203_v18 = vld [vmem:[%s1437_s1 + $0x30] sm:$0xff]  }
  0x11   : >> { %1104 = vmatpush3.bf16.msra.mxu0 %v1194_v2  ;;  %1107 = vmatprep.mubr.msk.bf16.mxu0 %vm1240_vm0, %v1239_v3  ;;  %s1321_s13 = scalar_lea.vmem %s1292_s28, %s1075_s10  ;;  %v1200_v21 = vld [vmem:[%s1437_s1 + $0x28] sm:$0xff]   ;;  %v1202_v23 = vld [vmem:[%s1437_s1 + $0x20] sm:$0xff]   ;;  %v1207_v27 = vld [vmem:[%s1437_s1 + $0x58] sm:$0xff]   ;;  %vm364_vm3 = vcmask 1046528  }
  0x12   : >> { %1112 = vmatpush3.bf16.msra.mxu1 %v1195_v4  ;;  %1105 = vmatprep.subr.bf16.mxu0 %v1239_v3  ;;  %v210_v7 = vld [vmem:[%s1321_s13] sm:$0xf]  ;;  %v211_v8 = vld [vmem:[%s1321_s13 + $0x4] sm:$0xf]  ;;  %v1205_v25 = vld [vmem:[%s1321_s13 + $0xc] sm:$0xff]  }
  0x13   : >> { %1113 = vmatprep.subr.bf16.mxu1 %v1239_v3  ;;  %1115 = vmatprep.mubr.msk.bf16.mxu1 %vm1240_vm0, %v1239_v3  ;;  %v991_v9 = vcombine.low %v210_v7, %v211_v8  ;;  %v1199_v10 = vld [vmem:[%s1321_s13 + $0x8] ss:$0 sps:$4 sm:$0x11]   ;;  %v355_v17 = vld [vmem:[%s1321_s13] sm:$0xe]  ;;  %v1209_v35 = vld [vmem:[%s1437_s1 + $0x50] sm:$0xff]  }
  0x14   : >> { %v239_v14 = vshll.u32 %v1199_v10, 16  ;;  %v1003_v19 = vcombine.low %v355_v17, %v211_v8  ;;  %v366_v24 = vrot.slane %v1199_v10, 1  ;;  %v1017_v28 = vld [vmem:[%s1321_s13 + $0xc] sm:$0xf]  ;;  %v1018_v29 = vld [vmem:[%s1321_s13 + $0x10] sm:$0xf] }
  0x15   : >> { %1106 = vmatpush3.bf16.msra.mxu0 %v1196_v5  ;;  %v232_v12 = vshrl.u32 %v991_v9, 16  ;;  %v234_v13 = vshll.u32 %v991_v9, 16  ;;  %v1029_v30 = vld [vmem:[%s1321_s13 + $0xc] sm:$0xe]  ;;  %v1024_v31 = vcombine.low %v1017_v28, %v1018_v29  ;;  %v1208_v43 = vld [vmem:[%s1437_s1 + $0x40] sm:$0xff]   ;;  %v1214_v44 = vld [vmem:[%s1437_s1 + $0x78] sm:$0xff]  }
  0x16   : >> { %1114 = vmatpush3.bf16.msra.mxu1 %v1197_v6  ;;  %1119 = vmatprep.subr.bf16.mxu0 %v1239_v3  ;;  %v241_v16 = vrot.slane %v239_v14, 1  ;;  %v365_v26 = vrot.slane %v1003_v19, 1  ;;  %v1211_v32 = vld [vmem:[%s1321_s13 + $0x14] ss:$0 sps:$4 sm:$0x11]   ;;  %v1034_v33 = vcombine.low %v1029_v30, %v1018_v29  ;;  %v1206_v34 = vld [vmem:[%s1437_s1 + $0x48] sm:$0xff]  }
  0x17   : >> { %1127 = vmatprep.subr.bf16.mxu1 %v1239_v3  ;;  %v236_v15 = vrot.slane %v234_v13, 1  ;;  %v517_v36 = vshrl.u32 %v1024_v31, 16  ;;  %v519_v37 = vshll.u32 %v1024_v31, 16  ;;  %v524_v40 = vshll.u32 %v1211_v32, 16  ;;  %v1048_v46 = vld [vmem:[%s1321_s13 + $0x18] sm:$0xf] }
  0x18   : >> { %v595_v38 = vrot.slane %v1034_v33, 1  ;;  %v367_v39 = vsel %vm364_vm3, %v365_v26, %v366_v24  ;;  %v596_v41 = vrot.slane %v1211_v32, 1  ;;  %v1049_v47 = vld [vmem:[%s1321_s13 + $0x1c] sm:$0xf]  ;;  %v1216_v55 = vld [vmem:[%s1437_s1 + $0x70] sm:$0xff]   ;;  %v1213_v57 = vld [vmem:[%s1437_s1 + $0x68] sm:$0xff]  }
  0x19   : >> { %1116 = vmatmul.mubr.msk.bf16.vlgmr.msra.gmra.mxu1 %vm255_vm1, %v991_v9  ;;  %v237_v20 = vor.u32 %v236_v15, %v232_v12  ;;  %v521_v42 = vrot.slane %v519_v37, 1  ;;  %v526_v49 = vrot.slane %v524_v40, 1  ;;  %v1055_v50 = vcombine.low %v1048_v46, %v1049_v47  ;;  %v1219_v51 = vld [vmem:[%s1321_s13 + $0x20] ss:$0 sps:$4 sm:$0x11]   ;;  %v1217_v2 = vld [vmem:[%s1321_s13 + $0x18] sm:$0xff]  }
  0x1a   : >> { %1128 = vmatpush3.bf16.msra.mxu1 %v1201_v11  ;;  %1131 = vmatprep.mubr.msk.bf16.mxu1 %vm1240_vm0, %v1239_v3  ;;  %v597_v45 = vsel %vm364_vm3, %v595_v38, %v596_v41  ;;  %v754_v54 = vshll.u32 %v1219_v51, 16  ;;  %v1215_v61 = vld [vmem:[%s1437_s1 + $0x60] sm:$0xff]   ;;  %v1060_v63 = vld [vmem:[%s1321_s13 + $0x18] sm:$0xe]  ;;  %v1220_v4 = vld [vmem:[%s1437_s1 + $0x88] sm:$0xff]   ;;  %v826_v8 = vrot.slane %v1219_v51, 1 }
  0x1b   : >> { %1129 = vmatprep.subr.bf16.mxu1 %v1239_v3  ;;  %v242_v22 = vsel %vm230_vm2, %v237_v20, %v241_v16  ;;  %v522_v48 = vor.u32 %v521_v42, %v517_v36  ;;  %v747_v52 = vshrl.u32 %v1055_v50, 16  ;;  %v749_v53 = vshll.u32 %v1055_v50, 16  ;;  %v1221_v6 = vld [vmem:[%s1437_s1 + $0x80] sm:$0xff]   ;;  %s1071_s13 = sshll.u32 %s1237_s29, 4  ;;  %s206_s29 = sadd.s32 1, %s1237_s29  }
  0x1c   : >> { %1108 = vmatmul.mubr.msk.bf16.vlgmr.msra.gmra.mxu0 %vm255_vm1, %v242_v22  ;;  %v756_v59 = vrot.slane %v754_v54, 1  ;;  %v1065_v5 = vcombine.low %v1060_v63, %v1049_v47  ;;  %s905_s22 = scalar_lea.vmem %s1287_s25, %s1071_s13  ;;  %p203_p4 = scmp.ge.s32.totalorder %s206_s29, 16  }
  0x1d   : >> { %1120 = vmatpush3.bf16.msra.mxu0 %v1200_v21  ;;  %1123 = vmatprep.mubr.msk.bf16.mxu0 %vm1240_vm0, %v1239_v3  ;;  %v527_v56 = vsel %vm230_vm2, %v522_v48, %v526_v49  ;;  %v751_v58 = vrot.slane %v749_v53, 1 }
  0x1e   : >> { %1130 = vmatpush3.bf16.msra.mxu1 %v1203_v18  ;;  %1121 = vmatprep.subr.bf16.mxu0 %v1239_v3  ;;  %v825_v7 = vrot.slane %v1065_v5, 1 }
  0x1f   : >> { %1143 = vmatprep.subr.bf16.mxu1 %v1239_v3  ;;  %v752_v60 = vor.u32 %v751_v58, %v747_v52 }
  0x20   : >> { %v827_v9 = vsel %vm364_vm3, %v825_v7, %v826_v8 }
  0x21   : >> { %1132 = vmatmul.mubr.msk.bf16.vlgmr.msra.gmra.mxu1 %vm255_vm1, %v1205_v25  ;;  %1122 = vmatpush3.bf16.msra.mxu0 %v1202_v23  ;;  %v757_v62 = vsel %vm230_vm2, %v752_v60, %v756_v59 }
  0x22   : >> { %1144 = vmatpush3.bf16.msra.mxu1 %v1207_v27  ;;  %1147 = vmatprep.mubr.msk.bf16.mxu1 %vm1240_vm0, %v1239_v3 }
  0x23   : >> { %1145 = vmatprep.subr.bf16.mxu1 %v1239_v3  ;;  %1135 = vmatprep.subr.bf16.mxu0 %v1239_v3 }
  0x24   : >> { %1124 = vmatmul.mubr.msk.bf16.vlgmr.msra.gmra.mxu0 %vm255_vm1, %v367_v39 }
  0x25   : >> { %1136 = vmatpush3.bf16.msra.mxu0 %v1206_v34  ;;  %1139 = vmatprep.mubr.msk.bf16.mxu0 %vm1240_vm0, %v1239_v3 }
  0x26   : >> { %1146 = vmatpush3.bf16.msra.mxu1 %v1209_v35  ;;  %1137 = vmatprep.subr.bf16.mxu0 %v1239_v3 }
  0x27   : >> { %1159 = vmatprep.subr.bf16.mxu1 %v1239_v3 }
  0x29   : >> { %1148 = vmatmul.mubr.msk.bf16.vlgmr.msra.gmra.mxu1 %vm255_vm1, %v597_v45  ;;  %1138 = vmatpush3.bf16.msra.mxu0 %v1208_v43 }
  0x2a   : >> { %1160 = vmatpush3.bf16.msra.mxu1 %v1214_v44  ;;  %1163 = vmatprep.mubr.msk.bf16.mxu1 %vm1240_vm0, %v1239_v3 }
  0x2b   : >> { %1161 = vmatprep.subr.bf16.mxu1 %v1239_v3  ;;  %1151 = vmatprep.subr.bf16.mxu0 %v1239_v3 }
  0x2c   : >> { %1140 = vmatmul.mubr.msk.bf16.vlgmr.msra.gmra.mxu0 %vm255_vm1, %v527_v56 }
  0x2d   : >> { %1152 = vmatpush3.bf16.msra.mxu0 %v1213_v57  ;;  %1155 = vmatprep.mubr.msk.bf16.mxu0 %vm1240_vm0, %v1239_v3 }
  0x2e   : >> { %1162 = vmatpush3.bf16.msra.mxu1 %v1216_v55  ;;  %1153 = vmatprep.subr.bf16.mxu0 %v1239_v3 }
  0x31   : >> { %1164 = vmatmul.mubr.msk.bf16.vlgmr.msra.gmra.mxu1 %vm255_vm1, %v757_v62  ;;  %1154 = vmatpush3.bf16.msra.mxu0 %v1215_v61 }
  0x32   : >> { %1167 = vmatprep.subr.bf16.mxu0 %v1239_v3 }
  0x34   : >> { %1156 = vmatmul.mubr.msk.bf16.vlgmr.msra.gmra.mxu0 %vm255_vm1, %v1217_v2 }
  0x35   : >> { %1168 = vmatpush3.bf16.msra.mxu0 %v1220_v4  ;;  %1171 = vmatprep.mubr.msk.bf16.mxu0 %vm1240_vm0, %v1239_v3 }
  0x36   : >> { %1169 = vmatprep.subr.bf16.mxu0 %v1239_v3 }
  0x39   : >> { %1170 = vmatpush3.bf16.msra.mxu0 %v1221_v6 }
  0x3c   : >> { %1172 = vmatmul.mubr.msk.bf16.vlgmr.msra.gmra.mxu0 %vm255_vm1, %v827_v9 }
  0xd9   : >> { %v348_v10 = vpop.f32.mrf.mxu1 }
  0xdb   : >> { %v1117_v11 = vpop.f32.mrf.mxu1 }
  0xdc   : >> { %v293_v13 = vpop.f32.mrf.mxu0 }
  0xdd   : >> { %v351_v12 = vpop.f32.mrf.mxu1  ;;  %v349_v25 = vadd.f32 %v348_v10, %v293_v13 }
  0xde   : >> { %v1109_v15 = vpop.f32.mrf.mxu0 }
  0xdf   : >> { %v1118_v14 = vpop.f32.mrf.mxu1 }
  0xe0   : >> { %v296_v17 = vpop.f32.mrf.mxu0 }
  0xe1   : >> { %v491_v16 = vpop.f32.mrf.mxu1  ;;  %v352_v31 = vadd.f32 %v351_v12, %v296_v17 }
  0xe2   : >> { %v1110_v19 = vpop.f32.mrf.mxu0 }
  0xe3   : >> { %v1133_v18 = vpop.f32.mrf.mxu1 }
  0xe4   : >> { %v417_v21 = vpop.f32.mrf.mxu0 }
  0xe5   : >> { %v494_v20 = vpop.f32.mrf.mxu1  ;;  %v424_v28 = vadd.f32 %v417_v21, %v349_v25 }
  0xe6   : >> { %v1125_v23 = vpop.f32.mrf.mxu0 }
  0xe7   : >> { %v1134_v22 = vpop.f32.mrf.mxu1  ;;  %v498_v34 = vadd.f32 %v491_v16, %v424_v28 }
  0xe8   : >> { %v420_v24 = vpop.f32.mrf.mxu0 }
  0xe9   : >> { %v647_v3 = vpop.f32.mrf.mxu1  ;;  %v425_v35 = vadd.f32 %v420_v24, %v352_v31 }
  0xea   : >> { %v1126_v27 = vpop.f32.mrf.mxu0 }
  0xeb   : >> { %v1149_v26 = vpop.f32.mrf.mxu1  ;;  %v499_v41 = vadd.f32 %v494_v20, %v425_v35 }
  0xec   : >> { %v577_v30 = vpop.f32.mrf.mxu0 }
  0xed   : >> { %v650_v29 = vpop.f32.mrf.mxu1  ;;  %v584_v38 = vadd.f32 %v577_v30, %v498_v34 }
  0xee   : >> { %v1141_v33 = vpop.f32.mrf.mxu0 }
  0xef   : >> { %v1150_v32 = vpop.f32.mrf.mxu1  ;;  %v654_v44 = vadd.f32 %v647_v3, %v584_v38 }
  0xf0   : >> { %v580_v37 = vpop.f32.mrf.mxu0 }
  0xf1   : >> { %v807_v36 = vpop.f32.mrf.mxu1  ;;  %v585_v45 = vadd.f32 %v580_v37, %v499_v41 }
  0xf2   : >> { %v1142_v40 = vpop.f32.mrf.mxu0 }
  0xf3   : >> { %v1165_v39 = vpop.f32.mrf.mxu1  ;;  %v655_v50 = vadd.f32 %v650_v29, %v585_v45 }
  0xf4   : >> { %v721_v43 = vpop.f32.mrf.mxu0 }
  0xf5   : >> { %v810_v42 = vpop.f32.mrf.mxu1  ;;  %v728_v48 = vadd.f32 %v721_v43, %v654_v44 }
  0xf6   : >> { %v1157_v47 = vpop.f32.mrf.mxu0 }
  0xf7   : >> { %v1166_v46 = vpop.f32.mrf.mxu1  ;;  %v814_v52 = vadd.f32 %v807_v36, %v728_v48 }
  0xf8   : >> { %v724_v49 = vpop.f32.mrf.mxu0 }
  0xf9   : >> { %v729_v53 = vadd.f32 %v724_v49, %v655_v50 }
  0xfa   : >> { %v1158_v51 = vpop.f32.mrf.mxu0 }
  0xfb   : >> { %v815_v57 = vadd.f32 %v810_v42, %v729_v53 }
  0xfc   : >> { %v877_v54 = vpop.f32.mrf.mxu0 }
  0xfd   : >> { %v884_v55 = vadd.f32 %v877_v54, %v814_v52 }
  0xfe   : >> { %v1173_v56 = vpop.f32.mrf.mxu0 }
  0xff   : >> { %v892_v58 = vmul.f32 %v1277_v0, %v884_v55 }
 0x100   : >> { %v880_v59 = vpop.f32.mrf.mxu0 }
 0x101   : >> { %v900_v60 = vadd.f32 %v1282_v1, %v892_v58  ;;  %v885_v61 = vadd.f32 %v880_v59, %v815_v57 }
 0x102   : >> { %v1174_v62 = vpop.f32.mrf.mxu0 }
 0x103   : >> { %v902_v63 = vmax.f32 %v900_v60, 0.0  ;;  %v893_v2 = vmul.f32 %v1277_v0, %v885_v61 }
 0x105   : >> { %906 = vst.msk [vmem:[%s905_s22] sm:$0xff] %vm255_vm1, %v902_v63  ;;  %v901_v4 = vadd.f32 %v1282_v1, %v893_v2  ;;  %205 = sbr.rel (!%p203_p4) target bundleno = 15 (0xf), region = 85 }
 0x107   : >> { %v903_v5 = vmax.f32 %v901_v4, 0.0 }
 0x109   : >> { %907 = vst.msk [vmem:[%s905_s22 + $0x8] sm:$0xff] %vm255_vm1, %v903_v5 }
 0x10a PF: > { %s14_s15 = sadd.s32 1, %s1233_s15  }
 0x10b   : > { %p11_p5 = scmp.ge.s32.totalorder %s14_s15, 4  }
 0x10d   :  { %13 = sbr.rel (!%p11_p5) target bundleno = 1 (0x1), region = 96 }

// kernel: forward.22
= control target key start
LH: loop header
LB: loop body
LE: loop exit
PB: predicated region body
PF: predicated region fallthrough
CT: control target
= control target key end

     0   :  { %s270_s6 = smov 0   ;;  %s295_s0 = inlined_call_operand.vmem [shape: f32[2,8,4,128], index: 0, kind: input, shape index: {}]   ;;  %s296_s1 = inlined_call_operand.vmem [shape: f32[2,4,4,64], index: 1, kind: output, shape index: {}]  }
   0x1 LB: > { %s229_s7 = sadd.s32 4294967295, %s257_s6   ;;  %p233_p0 = scmp.ge.s32.totalorder %s257_s6, 1  ;;  %s257_s6 = sphi %s270_s6, %s11_s6  }
   0x2   : > { %p87_p1 = scmp.lt.s32.totalorder %s257_s6, 3 }
   0x4   : > { %p88_p2 = pnand %p233_p0, %p87_p1 }
   0x5   : > { %p107_p3 = scmp.lt.s32.totalorder (!%p88_p2), %s229_s7, 1  ;;  %s259_s12 = smov (!%p88_p2), 64  }
   0x6   : > { %91 = sbr.rel (%p88_p2) target bundleno = 147 (0x93), region = 24 }
   0xb   : > { %s298_s7 = smov (!%p107_p3, %s229_s7), 1  ;;  %vm169_vm0 = vcmask 519168  }
   0xc   : > { %s240_s8 = sshll.u32 %s298_s7, 5  ;;  %s241_s13 = sshll.u32 %s298_s7, 4 }
   0xd   : > { %s111_s11 = scalar_lea.vmem %s295_s0, %s240_s8  ;;  %s116_s16 = scalar_lea.vmem %s296_s1, %s241_s13 }
   0xe   : > { %v119_v0 = vld [vmem:[%s111_s11 + $0x8] sm:$0xf]  ;;  %v117_v1 = vld [vmem:[%s111_s11] sm:$0xf]  ;;  %v120_v2 = vld [vmem:[%s111_s11 + $0xc] sm:$0xf] }
   0xf   : > { %137 = vrot.lane.b32.xlu1 %v119_v0, %s259_s12  ;;  %133 = vrot.lane.b32.xlu0 %v117_v1, %s259_s12  ;;  %v118_v3 = vld [vmem:[%s111_s11 + $0x4] sm:$0xf]  ;;  %v122_v4 = vld [vmem:[%s111_s11 + $0x14] sm:$0xf] }
  0x10   : > { %v121_v5 = vld [vmem:[%s111_s11 + $0x10] sm:$0xf]  ;;  %v124_v6 = vld [vmem:[%s111_s11 + $0x1c] sm:$0xf]  ;;  %v123_v7 = vld [vmem:[%s111_s11 + $0x18] sm:$0xf] }
  0x13   : > { %139 = vrot.lane.b32.xlu1 %v120_v2, %s259_s12  ;;  %135 = vrot.lane.b32.xlu0 %v118_v3, %s259_s12 }
  0x17   : > { %143 = vrot.lane.b32.xlu1 %v122_v4, %s259_s12  ;;  %141 = vrot.lane.b32.xlu0 %v121_v5, %s259_s12 }
  0x1b   : > { %147 = vrot.lane.b32.xlu1 %v124_v6, %s259_s12  ;;  %145 = vrot.lane.b32.xlu0 %v123_v7, %s259_s12 }
  0x81   : > { %v138_v8 = vpop.permute.xlu1 %137  ;;  %v134_v9 = vpop.permute.xlu0 %133 }
  0x82   : > { %v159_v12 = vmax.f32 %v119_v0, %v138_v8  ;;  %v157_v13 = vmax.f32 %v117_v1, %v134_v9 }
  0x85   : > { %v140_v10 = vpop.permute.xlu1 %139  ;;  %v136_v11 = vpop.permute.xlu0 %135 }
  0x86   : > { %v160_v14 = vmax.f32 %v120_v2, %v140_v10  ;;  %v158_v15 = vmax.f32 %v118_v3, %v136_v11 }
  0x88   : > { %v166_v16 = vmax.f32 %v159_v12, %v160_v14  ;;  %v165_v17 = vmax.f32 %v157_v13, %v158_v15 }
  0x89   : > { %v144_v18 = vpop.permute.xlu1 %143  ;;  %v142_v19 = vpop.permute.xlu0 %141 }
  0x8a   : > { %171 = vst.msk [vmem:[%s116_s16 + $0x4] sm:$0xf] %vm169_vm0, %v166_v16  ;;  %170 = vst.msk [vmem:[%s116_s16] sm:$0xf] %vm169_vm0, %v165_v17  ;;  %v162_v20 = vmax.f32 %v122_v4, %v144_v18  ;;  %v161_v21 = vmax.f32 %v121_v5, %v142_v19 }
  0x8c   : > { %v167_v22 = vmax.f32 %v161_v21, %v162_v20 }
  0x8d   : > { %v148_v23 = vpop.permute.xlu1 %147  ;;  %v146_v24 = vpop.permute.xlu0 %145 }
  0x8e   : > { %172 = vst.msk [vmem:[%s116_s16 + $0x8] sm:$0xf] %vm169_vm0, %v167_v22  ;;  %v164_v25 = vmax.f32 %v124_v6, %v148_v23  ;;  %v163_v26 = vmax.f32 %v123_v7, %v146_v24 }
  0x90   : > { %v168_v27 = vmax.f32 %v163_v26, %v164_v25 }
  0x92   : > { %173 = vst.msk [vmem:[%s116_s16 + $0xc] sm:$0xf] %vm169_vm0, %v168_v27 }
  0x93 PF: > { %s11_s6 = sadd.s32 1, %s257_s6  }
  0x94   : > { %p8_p4 = scmp.ge.s32.totalorder %s11_s6, 4  }
  0x96   :  { %10 = sbr.rel (!%p8_p4) target bundleno = 1 (0x1), region = 54 }

// kernel: forward.19
= control target key start
LH: loop header
LB: loop body
LE: loop exit
PB: predicated region body
PF: predicated region fallthrough
CT: control target
= control target key end

     0   :  { %s1281_s18 = smov 0   ;;  %s1448_s0 = inlined_call_operand.vmem [shape: bf16[2,10,10,32], index: 0, kind: input, shape index: {}]   ;;  %s1449_s1 = inlined_call_operand.vmem [shape: bf16[9,32,128], index: 1, kind: input, shape index: {}]   ;;  %s1450_s2 = inlined_call_operand.vmem [shape: f32[1,128], index: 2, kind: input, shape index: {}]   ;;  %s1451_s3 = inlined_call_operand.vmem [shape: f32[1,128], index: 3, kind: input, shape index: {}]   ;;  %s1452_s4 = inlined_call_operand.vmem [shape: f32[2,8,8,64], index: 4, kind: output, shape index: {0}]   ;;  %s1453_s5 = inlined_call_operand.vmem [shape: f32[2,8,8,64], index: 5, kind: output, shape index: {1}]  }
   0x1 LB: > { %s994_s19 = sadd.s32 4294967295, %s1242_s18   ;;  %p998_p0 = scmp.ge.s32.totalorder %s1242_s18, 1  ;;  %s1242_s18 = sphi %s1281_s18, %s16_s18  }
   0x2   : > { %p190_p1 = scmp.lt.s32.totalorder %s1242_s18, 3 }
   0x4   : > { %p191_p2 = pnand %p998_p0, %p190_p1 }
   0x5   : > { %p223_p3 = scmp.lt.s32.totalorder (!%p191_p2), %s994_s19, 1  ;;  %s1314_s10 = smov (!%p191_p2), 0  }
   0x6   : > { %194 = sbr.rel (%p191_p2) target bundleno = 374 (0x176), region = 36 }
   0xb   : > { %v1292_v0 = vld [vmem:[%s1450_s2] ss:$0 sm:$0xff]  ;;  %s1455_s19 = smov (!%p223_p3, %s994_s19), 1 }
   0xc   : > { %v1297_v1 = vld [vmem:[%s1451_s3] ss:$0 sm:$0xff]  ;;  %s1188_s24 = smul.u32 80, %s1455_s19  ;;  %s1086_s25 = sshll.u32 %s1455_s19, 6 }
   0xd   : > { %s1302_s28 = scalar_lea.vmem %s1452_s4, %s1086_s25  ;;  %s1307_s6 = scalar_lea.vmem %s1453_s5, %s1086_s25 }
   0xe   : > { %s1312_s9 = scalar_lea.vmem %s1448_s0, %s1188_s24 }
   0xf LB: >> { %v1208_v2 = vld [vmem:[%s1449_s1 + $0x18] sm:$0xff]   ;;  %v1248_v3 = vmov 0.0   ;;  %v1209_v4 = vld [vmem:[%s1449_s1 + $0x8] sm:$0xff]   ;;  %v1210_v5 = vld [vmem:[%s1449_s1 + $0x10] sm:$0xff]   ;;  %vm1249_vm0 = vmmov 0   ;;  %s1333_s17 = sshll.u32 %s1246_s10, 3  ;;  %s1246_s10 = sphi %s1314_s10, %s246_s10  }
  0x10   : >> { %1116 = vmatprep.subr.bf16.mxu0 %v1248_v3  ;;  %1124 = vmatprep.subr.bf16.mxu1 %v1248_v3  ;;  %v1211_v6 = vld [vmem:[%s1449_s1] sm:$0xff]   ;;  %s1341_s21 = scalar_lea.vmem %s1312_s9, %s1333_s17  ;;  %vm285_vm1 = vcmask 261120   ;;  %v1214_v12 = vld [vmem:[%s1449_s1 + $0x38] sm:$0xff]   ;;  %v1213_v14 = vld [vmem:[%s1449_s1 + $0x28] sm:$0xff]   ;;  %vm881_vm2 = vcmask 523264   ;;  %s1250_s11 = smov 64  }
  0x11   : >> { %1117 = vmatpush3.bf16.msra.mxu0 %v1208_v2  ;;  %1120 = vmatprep.mubr.msk.bf16.mxu0 %vm1249_vm0, %v1248_v3  ;;  %v250_v7 = vld [vmem:[%s1341_s21] sm:$0xf]  ;;  %v255_v8 = vld [vmem:[%s1341_s21 + $0x4] sm:$0x1]  ;;  %v1216_v17 = vld [vmem:[%s1449_s1 + $0x30] sm:$0xff]   ;;  %s887_s12 = scalar_lea.vmem %s1307_s6, %s1333_s17  ;;  %s246_s10 = sadd.s32 1, %s1246_s10  }
  0x12   : >> { %1125 = vmatpush3.bf16.msra.mxu1 %v1209_v4  ;;  %1118 = vmatprep.subr.bf16.mxu0 %v1248_v3  ;;  %v1010_v9 = vcombine.low %v250_v7, %v255_v8  ;;  %v384_v15 = vld [vmem:[%s1341_s21] sm:$0xe]  ;;  %v1026_v20 = vld [vmem:[%s1341_s21 + $0x8] sm:$0xf]  ;;  %v1035_v22 = vld [vmem:[%s1341_s21 + $0xc] sm:$0x1] }
  0x13   : >> { %1126 = vmatprep.subr.bf16.mxu1 %v1248_v3  ;;  %1128 = vmatprep.mubr.msk.bf16.mxu1 %vm1249_vm0, %v1248_v3  ;;  %v1215_v18 = vld [vmem:[%s1449_s1 + $0x20] sm:$0xff]   ;;  %v1021_v19 = vcombine.low %v384_v15, %v255_v8  ;;  %v1034_v21 = vld [vmem:[%s1341_s21 + $0x8] sm:$0xf]  ;;  %v1219_v23 = vld [vmem:[%s1449_s1 + $0x58] sm:$0xff]   ;;  %p243_p4 = scmp.ge.s32.totalorder %s246_s10, 8  }
  0x14   : >> { %v267_v10 = vshrl.u32 %v1010_v9, 16  ;;  %v269_v11 = vshll.u32 %v1010_v9, 16  ;;  %v1040_v24 = vcombine.low %v1034_v21, %v1035_v22  ;;  %v1044_v25 = vld [vmem:[%s1341_s21 + $0x8] sm:$0xe]  ;;  %v1221_v29 = vld [vmem:[%s1449_s1 + $0x50] sm:$0xff]   ;;  %v1220_v36 = vld [vmem:[%s1449_s1 + $0x40] sm:$0xff]  }
  0x15   : >> { %1119 = vmatpush3.bf16.msra.mxu0 %v1210_v5  ;;  %v393_v26 = vrot.slane %v1021_v19, 1  ;;  %v1218_v28 = vld [vmem:[%s1449_s1 + $0x48] sm:$0xff]   ;;  %v1049_v30 = vcombine.low %v1044_v25, %v1035_v22  ;;  %v1062_v31 = vld [vmem:[%s1341_s21 + $0x10] sm:$0xf]  ;;  %v1063_v32 = vld [vmem:[%s1341_s21 + $0x14] sm:$0x1] }
  0x16   : >> { %1127 = vmatpush3.bf16.msra.mxu1 %v1211_v6  ;;  %1132 = vmatprep.subr.bf16.mxu0 %v1248_v3  ;;  %v271_v13 = vrot.slane %v269_v11, 1  ;;  %v531_v27 = vshll.u32 %v1040_v24, 16  ;;  %v1068_v33 = vcombine.low %v1062_v31, %v1063_v32  ;;  %v529_v34 = vshrl.u32 %v1040_v24, 16  ;;  %v1225_v39 = vld [vmem:[%s1449_s1 + $0x78] sm:$0xff]   ;;  %v1224_v41 = vld [vmem:[%s1449_s1 + $0x68] sm:$0xff]   ;;  %v1227_v44 = vld [vmem:[%s1449_s1 + $0x70] sm:$0xff]  }
  0x17   : >> { %1140 = vmatprep.subr.bf16.mxu1 %v1248_v3  ;;  %v600_v37 = vrot.slane %v1049_v30, 1  ;;  %v1226_v45 = vld [vmem:[%s1449_s1 + $0x60] sm:$0xff]   ;;  %v1054_v47 = vld [vmem:[%s1341_s21 + $0x10] sm:$0xf]  ;;  %v1229_v48 = vld [vmem:[%s1449_s1 + $0x88] sm:$0xff]  }
  0x18   : >> { %v272_v16 = vor.u32 %v271_v13, %v267_v10  ;;  %v533_v35 = vrot.slane %v531_v27, 1  ;;  %v738_v38 = vshll.u32 %v1068_v33, 16  ;;  %v736_v42 = vshrl.u32 %v1068_v33, 16  ;;  %v1072_v49 = vld [vmem:[%s1341_s21 + $0x10] sm:$0xe]  ;;  %v1230_v51 = vld [vmem:[%s1449_s1 + $0x80] sm:$0xff]   ;;  %s880_s21 = scalar_lea.vmem %s1302_s28, %s1333_s17 }
  0x19   : >> { %1129 = vmatmul.mubr.msk.bf16.vlgmr.msra.gmra.mxu1 %vm285_vm1, %v250_v7  ;;  %v1077_v50 = vcombine.low %v1072_v49, %v1063_v32 }
  0x1a   : >> { %1141 = vmatpush3.bf16.msra.mxu1 %v1214_v12  ;;  %1144 = vmatprep.mubr.msk.bf16.mxu1 %vm1249_vm0, %v1248_v3  ;;  %v534_v40 = vor.u32 %v533_v35, %v529_v34  ;;  %v740_v43 = vrot.slane %v738_v38, 1 }
  0x1b   : >> { %1142 = vmatprep.subr.bf16.mxu1 %v1248_v3  ;;  %1121 = vmatmul.mubr.msk.bf16.vlgmr.msra.gmra.mxu0 %vm285_vm1, %v272_v16  ;;  %v807_v52 = vrot.slane %v1077_v50, 1 }
  0x1c   : >> { %1133 = vmatpush3.bf16.msra.mxu0 %v1213_v14  ;;  %1136 = vmatprep.mubr.msk.bf16.mxu0 %vm1249_vm0, %v1248_v3  ;;  %v741_v46 = vor.u32 %v740_v43, %v736_v42 }
  0x1d   : >> { %1134 = vmatprep.subr.bf16.mxu0 %v1248_v3 }
  0x1e   : >> { %1143 = vmatpush3.bf16.msra.mxu1 %v1216_v17 }
  0x1f   : >> { %1156 = vmatprep.subr.bf16.mxu1 %v1248_v3 }
  0x20   : >> { %1135 = vmatpush3.bf16.msra.mxu0 %v1215_v18 }
  0x21   : >> { %1145 = vmatmul.mubr.msk.bf16.vlgmr.msra.gmra.mxu1 %vm285_vm1, %v1026_v20  ;;  %1148 = vmatprep.subr.bf16.mxu0 %v1248_v3 }
  0x22   : >> { %1157 = vmatpush3.bf16.msra.mxu1 %v1219_v23  ;;  %1160 = vmatprep.mubr.msk.bf16.mxu1 %vm1249_vm0, %v1248_v3 }
  0x23   : >> { %1158 = vmatprep.subr.bf16.mxu1 %v1248_v3  ;;  %1137 = vmatmul.mubr.msk.bf16.vlgmr.msra.gmra.mxu0 %vm285_vm1, %v393_v26 }
  0x24   : >> { %1149 = vmatpush3.bf16.msra.mxu0 %v1218_v28  ;;  %1152 = vmatprep.mubr.msk.bf16.mxu0 %vm1249_vm0, %v1248_v3 }
  0x25   : >> { %1150 = vmatprep.subr.bf16.mxu0 %v1248_v3 }
  0x26   : >> { %1159 = vmatpush3.bf16.msra.mxu1 %v1221_v29 }
  0x27   : >> { %1172 = vmatprep.subr.bf16.mxu1 %v1248_v3 }
  0x28   : >> { %1151 = vmatpush3.bf16.msra.mxu0 %v1220_v36 }
  0x29   : >> { %1161 = vmatmul.mubr.msk.bf16.vlgmr.msra.gmra.mxu1 %vm285_vm1, %v600_v37  ;;  %1164 = vmatprep.subr.bf16.mxu0 %v1248_v3 }
  0x2a   : >> { %1173 = vmatpush3.bf16.msra.mxu1 %v1225_v39  ;;  %1176 = vmatprep.mubr.msk.bf16.mxu1 %vm1249_vm0, %v1248_v3 }
  0x2b   : >> { %1174 = vmatprep.subr.bf16.mxu1 %v1248_v3  ;;  %1153 = vmatmul.mubr.msk.bf16.vlgmr.msra.gmra.mxu0 %vm285_vm1, %v534_v40 }
  0x2c   : >> { %1165 = vmatpush3.bf16.msra.mxu0 %v1224_v41  ;;  %1168 = vmatprep.mubr.msk.bf16.mxu0 %vm1249_vm0, %v1248_v3 }
  0x2d   : >> { %1166 = vmatprep.subr.bf16.mxu0 %v1248_v3 }
  0x2e   : >> { %1175 = vmatpush3.bf16.msra.mxu1 %v1227_v44 }
  0x30   : >> { %1167 = vmatpush3.bf16.msra.mxu0 %v1226_v45 }
  0x31   : >> { %1177 = vmatmul.mubr.msk.bf16.vlgmr.msra.gmra.mxu1 %vm285_vm1, %v741_v46  ;;  %1180 = vmatprep.subr.bf16.mxu0 %v1248_v3 }
  0x33   : >> { %1169 = vmatmul.mubr.msk.bf16.vlgmr.msra.gmra.mxu0 %vm285_vm1, %v1054_v47 }
  0x34   : >> { %1181 = vmatpush3.bf16.msra.mxu0 %v1229_v48  ;;  %1184 = vmatprep.mubr.msk.bf16.mxu0 %vm1249_vm0, %v1248_v3 }
  0x35   : >> { %1182 = vmatprep.subr.bf16.mxu0 %v1248_v3 }
  0x38   : >> { %1183 = vmatpush3.bf16.msra.mxu0 %v1230_v51 }
  0x3b   : >> { %1185 = vmatmul.mubr.msk.bf16.vlgmr.msra.gmra.mxu0 %vm285_vm1, %v807_v52 }
  0xd9   : >> { %v378_v53 = vpop.f32.mrf.mxu1 }
  0xdb   : >> { %v1130_v54 = vpop.f32.mrf.mxu1  ;;  %v323_v55 = vpop.f32.mrf.mxu0 }
  0xdc   : >> { %v379_v3 = vadd.f32 %v378_v53, %v323_v55 }
  0xdd   : >> { %v381_v56 = vpop.f32.mrf.mxu1  ;;  %v1122_v57 = vpop.f32.mrf.mxu0 }
  0xdf   : >> { %v1131_v58 = vpop.f32.mrf.mxu1  ;;  %v326_v59 = vpop.f32.mrf.mxu0 }
  0xe1   : >> { %v509_v60 = vpop.f32.mrf.mxu1  ;;  %v1123_v61 = vpop.f32.mrf.mxu0 }
  0xe3   : >> { %v1146_v62 = vpop.f32.mrf.mxu1  ;;  %v443_v63 = vpop.f32.mrf.mxu0 }
  0xe4   : >> { %v449_v9 = vadd.f32 %v443_v63, %v379_v3 }
  0xe5   : >> { %v512_v2 = vpop.f32.mrf.mxu1  ;;  %v1138_v4 = vpop.f32.mrf.mxu0 }
  0xe6   : >> { %v515_v14 = vadd.f32 %v509_v60, %v449_v9 }
  0xe7   : >> { %v1147_v5 = vpop.f32.mrf.mxu1  ;;  %v446_v6 = vpop.f32.mrf.mxu0 }
  0xe9   : >> { %v650_v7 = vpop.f32.mrf.mxu1  ;;  %v1139_v8 = vpop.f32.mrf.mxu0 }
  0xeb   : >> { %v1162_v10 = vpop.f32.mrf.mxu1  ;;  %v584_v11 = vpop.f32.mrf.mxu0 }
  0xec   : >> { %v590_v17 = vadd.f32 %v584_v11, %v515_v14 }
  0xed   : >> { %v653_v12 = vpop.f32.mrf.mxu1  ;;  %v1154_v13 = vpop.f32.mrf.mxu0 }
  0xee   : >> { %v656_v22 = vadd.f32 %v650_v7, %v590_v17 }
  0xef   : >> { %v1163_v15 = vpop.f32.mrf.mxu1  ;;  %v587_v16 = vpop.f32.mrf.mxu0 }
  0xf1   : >> { %v791_v18 = vpop.f32.mrf.mxu1  ;;  %v1155_v19 = vpop.f32.mrf.mxu0 }
  0xf3   : >> { %v1178_v20 = vpop.f32.mrf.mxu1  ;;  %v716_v21 = vpop.f32.mrf.mxu0 }
  0xf4   : >> { %v722_v25 = vadd.f32 %v716_v21, %v656_v22 }
  0xf5   : >> { %v794_v23 = vpop.f32.mrf.mxu1  ;;  %v1170_v24 = vpop.f32.mrf.mxu0 }
  0xf6   : >> { %v797_v29 = vadd.f32 %v791_v18, %v722_v25 }
  0xf7   : >> { %v1179_v26 = vpop.f32.mrf.mxu1  ;;  %v719_v27 = vpop.f32.mrf.mxu0 }
  0xf9   : >> { %v1171_v28 = vpop.f32.mrf.mxu0 }
  0xfb   : >> { %v857_v30 = vpop.f32.mrf.mxu0 }
  0xfc   : >> { %v863_v31 = vadd.f32 %v857_v30, %v797_v29 }
  0xfd   : >> { %v1186_v32 = vpop.f32.mrf.mxu0 }
  0xfe   : >> { %v870_v33 = vmul.f32 %v1292_v0, %v863_v31 }
  0xff   : >> { %v860_v34 = vpop.f32.mrf.mxu0 }
 0x100   : >> { %v877_v35 = vadd.f32 %v1297_v1, %v870_v33 }
 0x101   : >> { %v1187_v36 = vpop.f32.mrf.mxu0 }
 0x102   : >> { %v878_v37 = vmax.f32 %v877_v35, 0.0  ;;  %884 = vrot.lane.b32.xlu0 %v877_v35, %s1250_s11 }
 0x104   : >> { %882 = vst.msk [vmem:[%s880_s21] sm:$0xff] %vm881_vm2, %v878_v37 }
 0x171   : > { %245 = sbr.rel (!%p243_p4) target bundleno = 15 (0xf), region = 98 }
 0x174   : >> { %v885_v38 = vpop.permute.xlu0 %884 }
 0x175   : >> { %888 = vst.msk [vmem:[%s887_s12] sm:$0xff] %vm881_vm2, %v885_v38 }
 0x176 PF: > { %s16_s18 = sadd.s32 1, %s1242_s18  }
 0x177   : > { %p13_p5 = scmp.ge.s32.totalorder %s16_s18, 4  }
 0x179   :  { %15 = sbr.rel (!%p13_p5) target bundleno = 1 (0x1), region = 109 }

// kernel: forward.20
= control target key start
LH: loop header
LB: loop body
LE: loop exit
PB: predicated region body
PF: predicated region fallthrough
CT: control target
= control target key end

     0   :  { %s1455_s15 = smov 0   ;;  %s1688_s0 = inlined_call_operand.vmem [shape: bf16[2,10,10,64], index: 0, kind: input, shape index: {}]   ;;  %s1689_s1 = inlined_call_operand.vmem [shape: bf16[9,64,64], index: 1, kind: input, shape index: {}]   ;;  %s1690_s2 = inlined_call_operand.vmem [shape: f32[1,64], index: 2, kind: input, shape index: {}]   ;;  %s1691_s3 = inlined_call_operand.vmem [shape: f32[1,64], index: 3, kind: input, shape index: {}]   ;;  %s1692_s4 = inlined_call_operand.vmem [shape: f32[2,8,8,64], index: 4, kind: output, shape index: {}]  }
   0x1 LB: > { %s1056_s16 = sadd.s32 4294967295, %s1422_s15   ;;  %p1060_p0 = scmp.ge.s32.totalorder %s1422_s15, 1  ;;  %s1422_s15 = sphi %s1455_s15, %s14_s15  }
   0x2   : > { %p162_p1 = scmp.lt.s32.totalorder %s1422_s15, 3 }
   0x4   : > { %p163_p2 = pnand %p1060_p0, %p162_p1 }
   0x5   : > { %p188_p3 = scmp.lt.s32.totalorder (!%p163_p2), %s1056_s16, 1  ;;  %s1483_s29 = smov (!%p163_p2), 0  }
   0x6   : > { %166 = sbr.rel (%p163_p2) target bundleno = 298 (0x12a), region = 36 }
   0xb   : > { %v1466_v0 = vld [vmem:[%s1690_s2] ss:$0 sm:$0xff]  ;;  %s1694_s16 = smov (!%p188_p3, %s1056_s16), 1 }
   0xc   : > { %v1471_v1 = vld [vmem:[%s1691_s3] ss:$0 sm:$0xff]  ;;  %s1351_s21 = smul.u32 80, %s1694_s16  ;;  %s1196_s22 = sshll.u32 %s1694_s16, 6 }
   0xd   : > { %s1476_s25 = scalar_lea.vmem %s1692_s4, %s1196_s22 }
   0xe   : > { %s1481_s28 = scalar_lea.vmem %s1688_s0, %s1351_s21 }
   0xf LB: >> { %v1370_v2 = vld [vmem:[%s1689_s1 + $0x38] sm:$0xff]   ;;  %v1428_v3 = vmov 0.0   ;;  %v1372_v5 = vld [vmem:[%s1689_s1 + $0x30] sm:$0xff]   ;;  %vm1429_vm0 = vmmov 0   ;;  %s1197_s10 = sshll.u32 %s1426_s29, 3  ;;  %v1374_v7 = vld [vmem:[%s1689_s1 + $0x28] sm:$0xff]   ;;  %s1426_s29 = sphi %s1483_s29, %s206_s29  }
  0x10   : >> { %1243 = vmatprep.subr.bf16.mxu0 %v1428_v3  ;;  %1255 = vmatprep.subr.bf16.mxu1 %v1428_v3  ;;  %v1371_v4 = vld [vmem:[%s1689_s1 + $0x18] sm:$0xff]   ;;  %v1373_v6 = vld [vmem:[%s1689_s1 + $0x10] sm:$0xff]   ;;  %s1512_s13 = scalar_lea.vmem %s1481_s28, %s1197_s10  ;;  %v1375_v8 = vld [vmem:[%s1689_s1 + $0x8] sm:$0xff]   ;;  %vm265_vm1 = vcmask 523264   ;;  %s206_s29 = sadd.s32 1, %s1426_s29  }
  0x11   : >> { %1244 = vmatpush3.bf16.msra.mxu0 %v1370_v2  ;;  %1251 = vmatprep.mubr.msk.bf16.mxu0 %vm1429_vm0, %v1428_v3  ;;  %v210_v9 = vld [vmem:[%s1512_s13] sm:$0xf]  ;;  %v219_v10 = vld [vmem:[%s1512_s13 + $0x4] sm:$0x1]  ;;  %v1379_v17 = vld [vmem:[%s1689_s1 + $0x58] sm:$0xff]   ;;  %p203_p4 = scmp.ge.s32.totalorder %s206_s29, 8  }
  0x12   : >> { %1256 = vmatpush3.bf16.msra.mxu1 %v1371_v4  ;;  %1245 = vmatprep.subr.bf16.mxu0 %v1428_v3  ;;  %v1074_v11 = vcombine.low %v210_v9, %v219_v10  ;;  %v1376_v12 = vld [vmem:[%s1689_s1 + $0x20] sm:$0xff]   ;;  %v1380_v19 = vld [vmem:[%s1689_s1 + $0x78] sm:$0xff]   ;;  %v1381_v20 = vld [vmem:[%s1689_s1 + $0x50] sm:$0xff]  }
  0x13   : >> { %1257 = vmatprep.subr.bf16.mxu1 %v1428_v3  ;;  %1263 = vmatprep.mubr.msk.bf16.mxu1 %vm1429_vm0, %v1428_v3  ;;  %v1377_v13 = vld [vmem:[%s1689_s1] sm:$0xff]   ;;  %v1382_v21 = vld [vmem:[%s1689_s1 + $0x70] sm:$0xff]   ;;  %v1383_v23 = vld [vmem:[%s1689_s1 + $0x48] sm:$0xff]  }
  0x14   : >> { %v235_v14 = vshrl.u32 %v1074_v11, 16  ;;  %v237_v15 = vshll.u32 %v1074_v11, 16  ;;  %v376_v22 = vld [vmem:[%s1512_s13] sm:$0xe]  ;;  %v1384_v24 = vld [vmem:[%s1689_s1 + $0x68] sm:$0xff]   ;;  %v1388_v29 = vld [vmem:[%s1689_s1 + $0x98] sm:$0xff]  }
  0x15   : >> { %1246 = vmatpush3.bf16.msra.mxu0 %v1372_v5  ;;  %v1093_v25 = vcombine.low %v376_v22, %v219_v10  ;;  %v1385_v26 = vld [vmem:[%s1689_s1 + $0x40] sm:$0xff]   ;;  %v1100_v30 = vld [vmem:[%s1512_s13 + $0x8] sm:$0xf]  ;;  %v1389_v31 = vld [vmem:[%s1689_s1 + $0xb8] sm:$0xff]  }
  0x16   : >> { %1258 = vmatpush3.bf16.msra.mxu1 %v1373_v6  ;;  %1247 = vmatprep.subr.bf16.mxu0 %v1428_v3  ;;  %v239_v16 = vrot.slane %v237_v15, 1  ;;  %v1386_v27 = vld [vmem:[%s1689_s1 + $0x60] sm:$0xff]   ;;  %v1114_v32 = vld [vmem:[%s1512_s13 + $0x8] sm:$0xf]  ;;  %v1115_v33 = vld [vmem:[%s1512_s13 + $0xc] sm:$0x1] }
  0x17   : >> { %1259 = vmatprep.subr.bf16.mxu1 %v1428_v3  ;;  %v389_v28 = vrot.slane %v1093_v25, 1  ;;  %v1124_v34 = vcombine.low %v1114_v32, %v1115_v33  ;;  %v1390_v35 = vld [vmem:[%s1689_s1 + $0x90] sm:$0xff]   ;;  %v1392_v38 = vld [vmem:[%s1689_s1 + $0x88] sm:$0xff]   ;;  %v1394_v43 = vld [vmem:[%s1689_s1 + $0x80] sm:$0xff]  }
  0x18   : >> { %v240_v18 = vor.u32 %v239_v16, %v235_v14  ;;  %v1391_v36 = vld [vmem:[%s1689_s1 + $0xb0] sm:$0xff]   ;;  %v1393_v39 = vld [vmem:[%s1689_s1 + $0xa8] sm:$0xff]   ;;  %v1395_v45 = vld [vmem:[%s1689_s1 + $0xa0] sm:$0xff]  }
  0x19   : >> { %1248 = vmatpush3.bf16.msra.mxu0 %v1374_v7  ;;  %v559_v37 = vshll.u32 %v1124_v34, 16  ;;  %v1130_v40 = vld [vmem:[%s1512_s13 + $0x8] sm:$0xe]  ;;  %v557_v41 = vshrl.u32 %v1124_v34, 16  ;;  %v1397_v47 = vld [vmem:[%s1689_s1 + $0xd8] sm:$0xff]   ;;  %v1400_v52 = vld [vmem:[%s1689_s1 + $0xd0] sm:$0xff]  }
  0x1a   : >> { %1260 = vmatpush3.bf16.msra.mxu1 %v1375_v8  ;;  %1249 = vmatprep.subr.bf16.mxu0 %v1428_v3  ;;  %v1139_v44 = vcombine.low %v1130_v40, %v1115_v33  ;;  %v1399_v49 = vld [vmem:[%s1689_s1 + $0xf8] sm:$0xff]   ;;  %v1160_v50 = vld [vmem:[%s1512_s13 + $0x10] sm:$0xf]  ;;  %v1161_v51 = vld [vmem:[%s1512_s13 + $0x14] sm:$0x1] }
  0x1b   : >> { %1261 = vmatprep.subr.bf16.mxu1 %v1428_v3  ;;  %v561_v42 = vrot.slane %v559_v37, 1  ;;  %v1170_v53 = vcombine.low %v1160_v50, %v1161_v51  ;;  %v1401_v54 = vld [vmem:[%s1689_s1 + $0xf0] sm:$0xff]   ;;  %v1402_v55 = vld [vmem:[%s1689_s1 + $0xc8] sm:$0xff]   ;;  %v1404_v58 = vld [vmem:[%s1689_s1 + $0xc0] sm:$0xff]  }
  0x1c   : >> { %v644_v48 = vrot.slane %v1139_v44, 1  ;;  %v1403_v57 = vld [vmem:[%s1689_s1 + $0xe8] sm:$0xff]   ;;  %v1405_v61 = vld [vmem:[%s1689_s1 + $0xe0] sm:$0xff]   ;;  %v1146_v62 = vld [vmem:[%s1512_s13 + $0x10] sm:$0xf] }
  0x1d   : >> { %1250 = vmatpush3.bf16.msra.mxu0 %v1376_v12  ;;  %v562_v46 = vor.u32 %v561_v42, %v557_v41  ;;  %v814_v56 = vshll.u32 %v1170_v53, 16  ;;  %v812_v59 = vshrl.u32 %v1170_v53, 16  ;;  %v1406_v63 = vld [vmem:[%s1689_s1 + $0x118] sm:$0xff]   ;;  %v1408_v4 = vld [vmem:[%s1689_s1 + $0x110] sm:$0xff]   ;;  %v1409_v5 = vld [vmem:[%s1689_s1 + $0x108] sm:$0xff]  }
  0x1e   : >> { %1262 = vmatpush3.bf16.msra.mxu1 %v1377_v13  ;;  %1267 = vmatprep.subr.bf16.mxu0 %v1428_v3  ;;  %v1176_v6 = vld [vmem:[%s1512_s13 + $0x10] sm:$0xe]  ;;  %v1410_v8 = vld [vmem:[%s1689_s1 + $0x100] sm:$0xff]   ;;  %s984_s13 = scalar_lea.vmem %s1476_s25, %s1197_s10 }
  0x1f   : >> { %1279 = vmatprep.subr.bf16.mxu1 %v1428_v3  ;;  %v816_v60 = vrot.slane %v814_v56, 1  ;;  %v1185_v7 = vcombine.low %v1176_v6, %v1161_v51 }
  0x20   : >> { %1252 = vmatmul.mubr.msk.bf16.vlgmr.msra.gmra.mxu0 %vm265_vm1, %v240_v18 }
  0x21   : >> { %1264 = vmatmul.mubr.msk.bf16.vlgmr.msra.gmra.mxu1 %vm265_vm1, %v210_v9  ;;  %1268 = vmatpush3.bf16.msra.mxu0 %v1379_v17  ;;  %v817_v2 = vor.u32 %v816_v60, %v812_v59  ;;  %v899_v9 = vrot.slane %v1185_v7, 1 }
  0x22   : >> { %1280 = vmatpush3.bf16.msra.mxu1 %v1380_v19  ;;  %1269 = vmatprep.subr.bf16.mxu0 %v1428_v3 }
  0x23   : >> { %1281 = vmatprep.subr.bf16.mxu1 %v1428_v3  ;;  %1275 = vmatprep.mubr.msk.bf16.mxu0 %vm1429_vm0, %v1428_v3 }
  0x24   : >> { %1287 = vmatprep.mubr.msk.bf16.mxu1 %vm1429_vm0, %v1428_v3 }
  0x25   : >> { %1270 = vmatpush3.bf16.msra.mxu0 %v1381_v20 }
  0x26   : >> { %1282 = vmatpush3.bf16.msra.mxu1 %v1382_v21  ;;  %1271 = vmatprep.subr.bf16.mxu0 %v1428_v3 }
  0x27   : >> { %1283 = vmatprep.subr.bf16.mxu1 %v1428_v3 }
  0x29   : >> { %1272 = vmatpush3.bf16.msra.mxu0 %v1383_v23 }
  0x2a   : >> { %1284 = vmatpush3.bf16.msra.mxu1 %v1384_v24  ;;  %1273 = vmatprep.subr.bf16.mxu0 %v1428_v3 }
  0x2b   : >> { %1285 = vmatprep.subr.bf16.mxu1 %v1428_v3 }
  0x2d   : >> { %1274 = vmatpush3.bf16.msra.mxu0 %v1385_v26 }
  0x2e   : >> { %1286 = vmatpush3.bf16.msra.mxu1 %v1386_v27  ;;  %1291 = vmatprep.subr.bf16.mxu0 %v1428_v3 }
  0x2f   : >> { %1303 = vmatprep.subr.bf16.mxu1 %v1428_v3 }
  0x30   : >> { %1276 = vmatmul.mubr.msk.bf16.vlgmr.msra.gmra.mxu0 %vm265_vm1, %v389_v28 }
  0x31   : >> { %1292 = vmatpush3.bf16.msra.mxu0 %v1388_v29  ;;  %1288 = vmatmul.mubr.msk.bf16.vlgmr.msra.gmra.mxu1 %vm265_vm1, %v1100_v30 }
  0x32   : >> { %1304 = vmatpush3.bf16.msra.mxu1 %v1389_v31  ;;  %1293 = vmatprep.subr.bf16.mxu0 %v1428_v3 }
  0x33   : >> { %1305 = vmatprep.subr.bf16.mxu1 %v1428_v3  ;;  %1299 = vmatprep.mubr.msk.bf16.mxu0 %vm1429_vm0, %v1428_v3 }
  0x34   : >> { %1311 = vmatprep.mubr.msk.bf16.mxu1 %vm1429_vm0, %v1428_v3 }
  0x35   : >> { %1294 = vmatpush3.bf16.msra.mxu0 %v1390_v35 }
  0x36   : >> { %1306 = vmatpush3.bf16.msra.mxu1 %v1391_v36  ;;  %1295 = vmatprep.subr.bf16.mxu0 %v1428_v3 }
  0x37   : >> { %1307 = vmatprep.subr.bf16.mxu1 %v1428_v3 }
  0x39   : >> { %1296 = vmatpush3.bf16.msra.mxu0 %v1392_v38 }
  0x3a   : >> { %1308 = vmatpush3.bf16.msra.mxu1 %v1393_v39  ;;  %1297 = vmatprep.subr.bf16.mxu0 %v1428_v3 }
  0x3b   : >> { %1309 = vmatprep.subr.bf16.mxu1 %v1428_v3 }
  0x3d   : >> { %1298 = vmatpush3.bf16.msra.mxu0 %v1394_v43 }
  0x3e   : >> { %1310 = vmatpush3.bf16.msra.mxu1 %v1395_v45  ;;  %1315 = vmatprep.subr.bf16.mxu0 %v1428_v3 }
  0x3f   : >> { %1327 = vmatprep.subr.bf16.mxu1 %v1428_v3 }
  0x40   : >> { %1300 = vmatmul.mubr.msk.bf16.vlgmr.msra.gmra.mxu0 %vm265_vm1, %v562_v46 }
  0x41   : >> { %1316 = vmatpush3.bf16.msra.mxu0 %v1397_v47  ;;  %1312 = vmatmul.mubr.msk.bf16.vlgmr.msra.gmra.mxu1 %vm265_vm1, %v644_v48 }
  0x42   : >> { %1328 = vmatpush3.bf16.msra.mxu1 %v1399_v49  ;;  %1317 = vmatprep.subr.bf16.mxu0 %v1428_v3 }
  0x43   : >> { %1329 = vmatprep.subr.bf16.mxu1 %v1428_v3  ;;  %1323 = vmatprep.mubr.msk.bf16.mxu0 %vm1429_vm0, %v1428_v3 }
  0x44   : >> { %1335 = vmatprep.mubr.msk.bf16.mxu1 %vm1429_vm0, %v1428_v3 }
  0x45   : >> { %1318 = vmatpush3.bf16.msra.mxu0 %v1400_v52 }
  0x46   : >> { %1330 = vmatpush3.bf16.msra.mxu1 %v1401_v54  ;;  %1319 = vmatprep.subr.bf16.mxu0 %v1428_v3 }
  0x47   : >> { %1331 = vmatprep.subr.bf16.mxu1 %v1428_v3 }
  0x49   : >> { %1320 = vmatpush3.bf16.msra.mxu0 %v1402_v55 }
  0x4a   : >> { %1332 = vmatpush3.bf16.msra.mxu1 %v1403_v57  ;;  %1321 = vmatprep.subr.bf16.mxu0 %v1428_v3 }
  0x4b   : >> { %1333 = vmatprep.subr.bf16.mxu1 %v1428_v3 }
  0x4d   : >> { %1322 = vmatpush3.bf16.msra.mxu0 %v1404_v58 }
  0x4e   : >> { %1334 = vmatpush3.bf16.msra.mxu1 %v1405_v61  ;;  %1339 = vmatprep.subr.bf16.mxu0 %v1428_v3 }
  0x50   : >> { %1324 = vmatmul.mubr.msk.bf16.vlgmr.msra.gmra.mxu0 %vm265_vm1, %v1146_v62 }
  0x51   : >> { %1340 = vmatpush3.bf16.msra.mxu0 %v1406_v63  ;;  %1336 = vmatmul.mubr.msk.bf16.vlgmr.msra.gmra.mxu1 %vm265_vm1, %v817_v2 }
  0x52   : >> { %1341 = vmatprep.subr.bf16.mxu0 %v1428_v3  ;;  %1347 = vmatprep.mubr.msk.bf16.mxu0 %vm1429_vm0, %v1428_v3 }
  0x55   : >> { %1342 = vmatpush3.bf16.msra.mxu0 %v1408_v4 }
  0x56   : >> { %1343 = vmatprep.subr.bf16.mxu0 %v1428_v3 }
  0x59   : >> { %1344 = vmatpush3.bf16.msra.mxu0 %v1409_v5 }
  0x5a   : >> { %1345 = vmatprep.subr.bf16.mxu0 %v1428_v3 }
  0x5d   : >> { %1346 = vmatpush3.bf16.msra.mxu0 %v1410_v8 }
  0x60   : >> { %1348 = vmatmul.mubr.msk.bf16.vlgmr.msra.gmra.mxu0 %vm265_vm1, %v899_v9 }
  0xe0   : >> { %v303_v10 = vpop.f32.mrf.mxu0 }
  0xe1   : >> { %v370_v11 = vpop.f32.mrf.mxu1 }
  0xe2   : >> { %v1253_v12 = vpop.f32.mrf.mxu0  ;;  %v371_v33 = vadd.f32 %v370_v11, %v303_v10 }
  0xe3   : >> { %v1265_v13 = vpop.f32.mrf.mxu1 }
  0xe4   : >> { %v306_v14 = vpop.f32.mrf.mxu0 }
  0xe5   : >> { %v373_v15 = vpop.f32.mrf.mxu1 }
  0xe6   : >> { %v1254_v16 = vpop.f32.mrf.mxu0 }
  0xe7   : >> { %v1266_v17 = vpop.f32.mrf.mxu1 }
  0xf0   : >> { %v451_v18 = vpop.f32.mrf.mxu0 }
  0xf1   : >> { %v533_v19 = vpop.f32.mrf.mxu1  ;;  %v457_v34 = vadd.f32 %v451_v18, %v371_v33 }
  0xf2   : >> { %v1277_v20 = vpop.f32.mrf.mxu0 }
  0xf3   : >> { %v1289_v21 = vpop.f32.mrf.mxu1  ;;  %v539_v38 = vadd.f32 %v533_v19, %v457_v34 }
  0xf4   : >> { %v454_v22 = vpop.f32.mrf.mxu0 }
  0xf5   : >> { %v536_v23 = vpop.f32.mrf.mxu1 }
  0xf6   : >> { %v1278_v24 = vpop.f32.mrf.mxu0 }
  0xf7   : >> { %v1290_v3 = vpop.f32.mrf.mxu1 }
 0x100   : >> { %v624_v25 = vpop.f32.mrf.mxu0 }
 0x101   : >> { %v706_v26 = vpop.f32.mrf.mxu1  ;;  %v630_v41 = vadd.f32 %v624_v25, %v539_v38 }
 0x102   : >> { %v1301_v27 = vpop.f32.mrf.mxu0 }
 0x103   : >> { %v1313_v28 = vpop.f32.mrf.mxu1  ;;  %v712_v45 = vadd.f32 %v706_v26, %v630_v41 }
 0x104   : >> { %v627_v29 = vpop.f32.mrf.mxu0 }
 0x105   : >> { %v709_v30 = vpop.f32.mrf.mxu1 }
 0x106   : >> { %v1302_v31 = vpop.f32.mrf.mxu0 }
 0x107   : >> { %v1314_v32 = vpop.f32.mrf.mxu1 }
 0x110   : >> { %v788_v35 = vpop.f32.mrf.mxu0 }
 0x111   : >> { %v879_v36 = vpop.f32.mrf.mxu1  ;;  %v794_v46 = vadd.f32 %v788_v35, %v712_v45 }
 0x112   : >> { %v1325_v37 = vpop.f32.mrf.mxu0 }
 0x113   : >> { %v1337_v39 = vpop.f32.mrf.mxu1  ;;  %v885_v47 = vadd.f32 %v879_v36, %v794_v46 }
 0x114   : >> { %v791_v40 = vpop.f32.mrf.mxu0 }
 0x115   : >> { %v882_v42 = vpop.f32.mrf.mxu1 }
 0x116   : >> { %v1326_v43 = vpop.f32.mrf.mxu0 }
 0x117   : >> { %v1338_v44 = vpop.f32.mrf.mxu1 }
 0x120   : >> { %v961_v48 = vpop.f32.mrf.mxu0 }
 0x121   : >> { %v967_v49 = vadd.f32 %v961_v48, %v885_v47 }
 0x122   : >> { %v1349_v50 = vpop.f32.mrf.mxu0 }
 0x123   : >> { %v974_v51 = vmul.f32 %v1466_v0, %v967_v49 }
 0x124   : >> { %v964_v52 = vpop.f32.mrf.mxu0 }
 0x125   : >> { %v981_v53 = vadd.f32 %v1471_v1, %v974_v51  ;;  %205 = sbr.rel (!%p203_p4) target bundleno = 15 (0xf), region = 85 }
 0x126   : >> { %v1350_v54 = vpop.f32.mrf.mxu0 }
 0x127   : >> { %v982_v55 = vmax.f32 %v981_v53, 0.0 }
 0x129   : >> { %985 = vst.msk [vmem:[%s984_s13] sm:$0xff] %vm265_vm1, %v982_v55 }
 0x12a PF: > { %s14_s15 = sadd.s32 1, %s1422_s15  }
 0x12b   : > { %p11_p5 = scmp.ge.s32.totalorder %s14_s15, 4  }
 0x12d   :  { %13 = sbr.rel (!%p11_p5) target bundleno = 1 (0x1), region = 96 }

// kernel: forward.21
= control target key start
LH: loop header
LB: loop body
LE: loop exit
PB: predicated region body
PF: predicated region fallthrough
CT: control target
= control target key end

     0   :  { %s1527_s18 = smov 0   ;;  %s1767_s0 = inlined_call_operand.vmem [shape: bf16[2,10,10,64], index: 0, kind: input, shape index: {}]   ;;  %s1768_s1 = inlined_call_operand.vmem [shape: bf16[9,64,64], index: 1, kind: input, shape index: {}]   ;;  %s1769_s2 = inlined_call_operand.vmem [shape: f32[1,64], index: 2, kind: input, shape index: {}]   ;;  %s1770_s3 = inlined_call_operand.vmem [shape: f32[1,64], index: 3, kind: input, shape index: {}]   ;;  %s1771_s4 = inlined_call_operand.vmem [shape: f32[2,8,8,64], index: 4, kind: input, shape index: {}]   ;;  %s1772_s5 = inlined_call_operand.vmem [shape: f32[2,8,8,64], index: 5, kind: output, shape index: {}]  }
   0x1 LB: > { %s1120_s19 = sadd.s32 4294967295, %s1489_s18   ;;  %p1124_p0 = scmp.ge.s32.totalorder %s1489_s18, 1  ;;  %s1489_s18 = sphi %s1527_s18, %s15_s18  }
   0x2   : > { %p197_p1 = scmp.lt.s32.totalorder %s1489_s18, 3 }
   0x4   : > { %p198_p2 = pnand %p1124_p0, %p197_p1 }
   0x5   : > { %p230_p3 = scmp.lt.s32.totalorder (!%p198_p2), %s1120_s19, 1  ;;  %s1560_s10 = smov (!%p198_p2), 0  }
   0x6   : > { %201 = sbr.rel (%p198_p2) target bundleno = 300 (0x12c), region = 40 }
   0xb   : > { %v1538_v0 = vld [vmem:[%s1769_s2] ss:$0 sm:$0xff]  ;;  %s1774_s19 = smov (!%p230_p3, %s1120_s19), 1 }
   0xc   : > { %v1543_v1 = vld [vmem:[%s1770_s3] ss:$0 sm:$0xff]  ;;  %s1418_s24 = smul.u32 80, %s1774_s19  ;;  %s1262_s25 = sshll.u32 %s1774_s19, 6 }
   0xd   : > { %s1548_s28 = scalar_lea.vmem %s1771_s4, %s1262_s25  ;;  %s1553_s6 = scalar_lea.vmem %s1772_s5, %s1262_s25 }
   0xe   : > { %s1558_s9 = scalar_lea.vmem %s1767_s0, %s1418_s24 }
   0xf LB: >> { %v1437_v2 = vld [vmem:[%s1768_s1 + $0x38] sm:$0xff]   ;;  %v1495_v3 = vmov 0.0   ;;  %v1439_v5 = vld [vmem:[%s1768_s1 + $0x30] sm:$0xff]   ;;  %vm1496_vm0 = vmmov 0   ;;  %s1579_s17 = sshll.u32 %s1493_s10, 3  ;;  %v1441_v7 = vld [vmem:[%s1768_s1 + $0x28] sm:$0xff]   ;;  %s1493_s10 = sphi %s1560_s10, %s253_s10  }
  0x10   : >> { %1310 = vmatprep.subr.bf16.mxu0 %v1495_v3  ;;  %1322 = vmatprep.subr.bf16.mxu1 %v1495_v3  ;;  %v1438_v4 = vld [vmem:[%s1768_s1 + $0x18] sm:$0xff]   ;;  %v1440_v6 = vld [vmem:[%s1768_s1 + $0x10] sm:$0xff]   ;;  %s1590_s21 = scalar_lea.vmem %s1558_s9, %s1579_s17  ;;  %v1442_v8 = vld [vmem:[%s1768_s1 + $0x8] sm:$0xff]   ;;  %vm312_vm1 = vcmask 523264   ;;  %s1034_s11 = scalar_lea.vmem %s1553_s6, %s1579_s17 }
  0x11   : >> { %1311 = vmatpush3.bf16.msra.mxu0 %v1437_v2  ;;  %1318 = vmatprep.mubr.msk.bf16.mxu0 %vm1496_vm0, %v1495_v3  ;;  %v257_v9 = vld [vmem:[%s1590_s21] sm:$0xf]  ;;  %v266_v10 = vld [vmem:[%s1590_s21 + $0x4] sm:$0x1]  ;;  %v1446_v17 = vld [vmem:[%s1768_s1 + $0x58] sm:$0xff]   ;;  %s253_s10 = sadd.s32 1, %s1493_s10  }
  0x12   : >> { %1323 = vmatpush3.bf16.msra.mxu1 %v1438_v4  ;;  %1312 = vmatprep.subr.bf16.mxu0 %v1495_v3  ;;  %v1140_v11 = vcombine.low %v257_v9, %v266_v10  ;;  %v1443_v12 = vld [vmem:[%s1768_s1 + $0x20] sm:$0xff]   ;;  %v1447_v19 = vld [vmem:[%s1768_s1 + $0x78] sm:$0xff]   ;;  %v1448_v20 = vld [vmem:[%s1768_s1 + $0x50] sm:$0xff]   ;;  %p250_p4 = scmp.ge.s32.totalorder %s253_s10, 8  }
  0x13   : >> { %1324 = vmatprep.subr.bf16.mxu1 %v1495_v3  ;;  %1330 = vmatprep.mubr.msk.bf16.mxu1 %vm1496_vm0, %v1495_v3  ;;  %v1444_v13 = vld [vmem:[%s1768_s1] sm:$0xff]   ;;  %v1449_v21 = vld [vmem:[%s1768_s1 + $0x70] sm:$0xff]   ;;  %v1450_v23 = vld [vmem:[%s1768_s1 + $0x48] sm:$0xff]  }
  0x14   : >> { %v282_v14 = vshrl.u32 %v1140_v11, 16  ;;  %v284_v15 = vshll.u32 %v1140_v11, 16  ;;  %v423_v22 = vld [vmem:[%s1590_s21] sm:$0xe]  ;;  %v1451_v24 = vld [vmem:[%s1768_s1 + $0x68] sm:$0xff]   ;;  %v1455_v29 = vld [vmem:[%s1768_s1 + $0x98] sm:$0xff]  }
  0x15   : >> { %1313 = vmatpush3.bf16.msra.mxu0 %v1439_v5  ;;  %v1159_v25 = vcombine.low %v423_v22, %v266_v10  ;;  %v1452_v26 = vld [vmem:[%s1768_s1 + $0x40] sm:$0xff]   ;;  %v1166_v30 = vld [vmem:[%s1590_s21 + $0x8] sm:$0xf]  ;;  %v1456_v31 = vld [vmem:[%s1768_s1 + $0xb8] sm:$0xff]  }
  0x16   : >> { %1325 = vmatpush3.bf16.msra.mxu1 %v1440_v6  ;;  %1314 = vmatprep.subr.bf16.mxu0 %v1495_v3  ;;  %v286_v16 = vrot.slane %v284_v15, 1  ;;  %v1453_v27 = vld [vmem:[%s1768_s1 + $0x60] sm:$0xff]   ;;  %v1180_v32 = vld [vmem:[%s1590_s21 + $0x8] sm:$0xf]  ;;  %v1181_v33 = vld [vmem:[%s1590_s21 + $0xc] sm:$0x1] }
  0x17   : >> { %1326 = vmatprep.subr.bf16.mxu1 %v1495_v3  ;;  %v436_v28 = vrot.slane %v1159_v25, 1  ;;  %v1190_v34 = vcombine.low %v1180_v32, %v1181_v33  ;;  %v1457_v35 = vld [vmem:[%s1768_s1 + $0x90] sm:$0xff]   ;;  %v1459_v38 = vld [vmem:[%s1768_s1 + $0x88] sm:$0xff]   ;;  %v1461_v43 = vld [vmem:[%s1768_s1 + $0x80] sm:$0xff]  }
  0x18   : >> { %v287_v18 = vor.u32 %v286_v16, %v282_v14  ;;  %v1458_v36 = vld [vmem:[%s1768_s1 + $0xb0] sm:$0xff]   ;;  %v1460_v39 = vld [vmem:[%s1768_s1 + $0xa8] sm:$0xff]   ;;  %v1462_v45 = vld [vmem:[%s1768_s1 + $0xa0] sm:$0xff]  }
  0x19   : >> { %1315 = vmatpush3.bf16.msra.mxu0 %v1441_v7  ;;  %v606_v37 = vshll.u32 %v1190_v34, 16  ;;  %v1196_v40 = vld [vmem:[%s1590_s21 + $0x8] sm:$0xe]  ;;  %v604_v41 = vshrl.u32 %v1190_v34, 16  ;;  %v1464_v47 = vld [vmem:[%s1768_s1 + $0xd8] sm:$0xff]   ;;  %v1467_v52 = vld [vmem:[%s1768_s1 + $0xd0] sm:$0xff]  }
  0x1a   : >> { %1327 = vmatpush3.bf16.msra.mxu1 %v1442_v8  ;;  %1316 = vmatprep.subr.bf16.mxu0 %v1495_v3  ;;  %v1205_v44 = vcombine.low %v1196_v40, %v1181_v33  ;;  %v1466_v49 = vld [vmem:[%s1768_s1 + $0xf8] sm:$0xff]   ;;  %v1226_v50 = vld [vmem:[%s1590_s21 + $0x10] sm:$0xf]  ;;  %v1227_v51 = vld [vmem:[%s1590_s21 + $0x14] sm:$0x1] }
  0x1b   : >> { %1328 = vmatprep.subr.bf16.mxu1 %v1495_v3  ;;  %v608_v42 = vrot.slane %v606_v37, 1  ;;  %v1236_v53 = vcombine.low %v1226_v50, %v1227_v51  ;;  %v1468_v54 = vld [vmem:[%s1768_s1 + $0xf0] sm:$0xff]   ;;  %v1469_v55 = vld [vmem:[%s1768_s1 + $0xc8] sm:$0xff]   ;;  %v1471_v58 = vld [vmem:[%s1768_s1 + $0xc0] sm:$0xff]  }
  0x1c   : >> { %v691_v48 = vrot.slane %v1205_v44, 1  ;;  %v1470_v57 = vld [vmem:[%s1768_s1 + $0xe8] sm:$0xff]   ;;  %v1472_v61 = vld [vmem:[%s1768_s1 + $0xe0] sm:$0xff]   ;;  %v1212_v62 = vld [vmem:[%s1590_s21 + $0x10] sm:$0xf] }
  0x1d   : >> { %1317 = vmatpush3.bf16.msra.mxu0 %v1443_v12  ;;  %v609_v46 = vor.u32 %v608_v42, %v604_v41  ;;  %v861_v56 = vshll.u32 %v1236_v53, 16  ;;  %v859_v59 = vshrl.u32 %v1236_v53, 16  ;;  %v1473_v63 = vld [vmem:[%s1768_s1 + $0x118] sm:$0xff]   ;;  %v1475_v4 = vld [vmem:[%s1768_s1 + $0x110] sm:$0xff]   ;;  %v1476_v5 = vld [vmem:[%s1768_s1 + $0x108] sm:$0xff]  }
  0x1e   : >> { %1329 = vmatpush3.bf16.msra.mxu1 %v1444_v13  ;;  %1334 = vmatprep.subr.bf16.mxu0 %v1495_v3  ;;  %v1242_v6 = vld [vmem:[%s1590_s21 + $0x10] sm:$0xe]  ;;  %v1477_v8 = vld [vmem:[%s1768_s1 + $0x100] sm:$0xff]   ;;  %s1031_s21 = scalar_lea.vmem %s1548_s28, %s1579_s17 }
  0x1f   : >> { %1346 = vmatprep.subr.bf16.mxu1 %v1495_v3  ;;  %v863_v60 = vrot.slane %v861_v56, 1  ;;  %v1251_v7 = vcombine.low %v1242_v6, %v1227_v51 }
  0x20   : >> { %1319 = vmatmul.mubr.msk.bf16.vlgmr.msra.gmra.mxu0 %vm312_vm1, %v287_v18 }
  0x21   : >> { %1331 = vmatmul.mubr.msk.bf16.vlgmr.msra.gmra.mxu1 %vm312_vm1, %v257_v9  ;;  %1335 = vmatpush3.bf16.msra.mxu0 %v1446_v17  ;;  %v864_v2 = vor.u32 %v863_v60, %v859_v59  ;;  %v946_v9 = vrot.slane %v1251_v7, 1 }
  0x22   : >> { %1347 = vmatpush3.bf16.msra.mxu1 %v1447_v19  ;;  %1336 = vmatprep.subr.bf16.mxu0 %v1495_v3 }
  0x23   : >> { %1348 = vmatprep.subr.bf16.mxu1 %v1495_v3  ;;  %1342 = vmatprep.mubr.msk.bf16.mxu0 %vm1496_vm0, %v1495_v3 }
  0x24   : >> { %1354 = vmatprep.mubr.msk.bf16.mxu1 %vm1496_vm0, %v1495_v3 }
  0x25   : >> { %1337 = vmatpush3.bf16.msra.mxu0 %v1448_v20 }
  0x26   : >> { %1349 = vmatpush3.bf16.msra.mxu1 %v1449_v21  ;;  %1338 = vmatprep.subr.bf16.mxu0 %v1495_v3 }
  0x27   : >> { %1350 = vmatprep.subr.bf16.mxu1 %v1495_v3 }
  0x29   : >> { %1339 = vmatpush3.bf16.msra.mxu0 %v1450_v23 }
  0x2a   : >> { %1351 = vmatpush3.bf16.msra.mxu1 %v1451_v24  ;;  %1340 = vmatprep.subr.bf16.mxu0 %v1495_v3 }
  0x2b   : >> { %1352 = vmatprep.subr.bf16.mxu1 %v1495_v3 }
  0x2d   : >> { %1341 = vmatpush3.bf16.msra.mxu0 %v1452_v26 }
  0x2e   : >> { %1353 = vmatpush3.bf16.msra.mxu1 %v1453_v27  ;;  %1358 = vmatprep.subr.bf16.mxu0 %v1495_v3 }
  0x2f   : >> { %1370 = vmatprep.subr.bf16.mxu1 %v1495_v3 }
  0x30   : >> { %1343 = vmatmul.mubr.msk.bf16.vlgmr.msra.gmra.mxu0 %vm312_vm1, %v436_v28 }
  0x31   : >> { %1359 = vmatpush3.bf16.msra.mxu0 %v1455_v29  ;;  %1355 = vmatmul.mubr.msk.bf16.vlgmr.msra.gmra.mxu1 %vm312_vm1, %v1166_v30 }
  0x32   : >> { %1371 = vmatpush3.bf16.msra.mxu1 %v1456_v31  ;;  %1360 = vmatprep.subr.bf16.mxu0 %v1495_v3 }
  0x33   : >> { %1372 = vmatprep.subr.bf16.mxu1 %v1495_v3  ;;  %1366 = vmatprep.mubr.msk.bf16.mxu0 %vm1496_vm0, %v1495_v3 }
  0x34   : >> { %1378 = vmatprep.mubr.msk.bf16.mxu1 %vm1496_vm0, %v1495_v3 }
  0x35   : >> { %1361 = vmatpush3.bf16.msra.mxu0 %v1457_v35 }
  0x36   : >> { %1373 = vmatpush3.bf16.msra.mxu1 %v1458_v36  ;;  %1362 = vmatprep.subr.bf16.mxu0 %v1495_v3 }
  0x37   : >> { %1374 = vmatprep.subr.bf16.mxu1 %v1495_v3 }
  0x39   : >> { %1363 = vmatpush3.bf16.msra.mxu0 %v1459_v38 }
  0x3a   : >> { %1375 = vmatpush3.bf16.msra.mxu1 %v1460_v39  ;;  %1364 = vmatprep.subr.bf16.mxu0 %v1495_v3 }
  0x3b   : >> { %1376 = vmatprep.subr.bf16.mxu1 %v1495_v3 }
  0x3d   : >> { %1365 = vmatpush3.bf16.msra.mxu0 %v1461_v43 }
  0x3e   : >> { %1377 = vmatpush3.bf16.msra.mxu1 %v1462_v45  ;;  %1382 = vmatprep.subr.bf16.mxu0 %v1495_v3 }
  0x3f   : >> { %1394 = vmatprep.subr.bf16.mxu1 %v1495_v3 }
  0x40   : >> { %1367 = vmatmul.mubr.msk.bf16.vlgmr.msra.gmra.mxu0 %vm312_vm1, %v609_v46 }
  0x41   : >> { %1383 = vmatpush3.bf16.msra.mxu0 %v1464_v47  ;;  %1379 = vmatmul.mubr.msk.bf16.vlgmr.msra.gmra.mxu1 %vm312_vm1, %v691_v48 }
  0x42   : >> { %1395 = vmatpush3.bf16.msra.mxu1 %v1466_v49  ;;  %1384 = vmatprep.subr.bf16.mxu0 %v1495_v3 }
  0x43   : >> { %1396 = vmatprep.subr.bf16.mxu1 %v1495_v3  ;;  %1390 = vmatprep.mubr.msk.bf16.mxu0 %vm1496_vm0, %v1495_v3 }
  0x44   : >> { %1402 = vmatprep.mubr.msk.bf16.mxu1 %vm1496_vm0, %v1495_v3 }
  0x45   : >> { %1385 = vmatpush3.bf16.msra.mxu0 %v1467_v52 }
  0x46   : >> { %1397 = vmatpush3.bf16.msra.mxu1 %v1468_v54  ;;  %1386 = vmatprep.subr.bf16.mxu0 %v1495_v3  ;;  %v1032_v54 = vld [vmem:[%s1031_s21] sm:$0xff] }
  0x47   : >> { %1398 = vmatprep.subr.bf16.mxu1 %v1495_v3 }
  0x49   : >> { %1387 = vmatpush3.bf16.msra.mxu0 %v1469_v55 }
  0x4a   : >> { %1399 = vmatpush3.bf16.msra.mxu1 %v1470_v57  ;;  %1388 = vmatprep.subr.bf16.mxu0 %v1495_v3 }
  0x4b   : >> { %1400 = vmatprep.subr.bf16.mxu1 %v1495_v3 }
  0x4d   : >> { %1389 = vmatpush3.bf16.msra.mxu0 %v1471_v58 }
  0x4e   : >> { %1401 = vmatpush3.bf16.msra.mxu1 %v1472_v61  ;;  %1406 = vmatprep.subr.bf16.mxu0 %v1495_v3 }
  0x50   : >> { %1391 = vmatmul.mubr.msk.bf16.vlgmr.msra.gmra.mxu0 %vm312_vm1, %v1212_v62 }
  0x51   : >> { %1407 = vmatpush3.bf16.msra.mxu0 %v1473_v63  ;;  %1403 = vmatmul.mubr.msk.bf16.vlgmr.msra.gmra.mxu1 %vm312_vm1, %v864_v2 }
  0x52   : >> { %1408 = vmatprep.subr.bf16.mxu0 %v1495_v3  ;;  %1414 = vmatprep.mubr.msk.bf16.mxu0 %vm1496_vm0, %v1495_v3 }
  0x55   : >> { %1409 = vmatpush3.bf16.msra.mxu0 %v1475_v4 }
  0x56   : >> { %1410 = vmatprep.subr.bf16.mxu0 %v1495_v3 }
  0x59   : >> { %1411 = vmatpush3.bf16.msra.mxu0 %v1476_v5 }
  0x5a   : >> { %1412 = vmatprep.subr.bf16.mxu0 %v1495_v3 }
  0x5d   : >> { %1413 = vmatpush3.bf16.msra.mxu0 %v1477_v8 }
  0x60   : >> { %1415 = vmatmul.mubr.msk.bf16.vlgmr.msra.gmra.mxu0 %vm312_vm1, %v946_v9 }
  0xe0   : >> { %v350_v10 = vpop.f32.mrf.mxu0 }
  0xe1   : >> { %v417_v11 = vpop.f32.mrf.mxu1 }
  0xe2   : >> { %v1320_v12 = vpop.f32.mrf.mxu0  ;;  %v418_v33 = vadd.f32 %v417_v11, %v350_v10 }
  0xe3   : >> { %v1332_v13 = vpop.f32.mrf.mxu1 }
  0xe4   : >> { %v353_v14 = vpop.f32.mrf.mxu0 }
  0xe5   : >> { %v420_v15 = vpop.f32.mrf.mxu1 }
  0xe6   : >> { %v1321_v16 = vpop.f32.mrf.mxu0 }
  0xe7   : >> { %v1333_v17 = vpop.f32.mrf.mxu1 }
  0xf0   : >> { %v498_v18 = vpop.f32.mrf.mxu0 }
  0xf1   : >> { %v580_v19 = vpop.f32.mrf.mxu1  ;;  %v504_v34 = vadd.f32 %v498_v18, %v418_v33 }
  0xf2   : >> { %v1344_v20 = vpop.f32.mrf.mxu0 }
  0xf3   : >> { %v1356_v21 = vpop.f32.mrf.mxu1  ;;  %v586_v38 = vadd.f32 %v580_v19, %v504_v34 }
  0xf4   : >> { %v501_v22 = vpop.f32.mrf.mxu0 }
  0xf5   : >> { %v583_v23 = vpop.f32.mrf.mxu1 }
  0xf6   : >> { %v1345_v24 = vpop.f32.mrf.mxu0 }
  0xf7   : >> { %v1357_v3 = vpop.f32.mrf.mxu1 }
 0x100   : >> { %v671_v25 = vpop.f32.mrf.mxu0 }
 0x101   : >> { %v753_v26 = vpop.f32.mrf.mxu1  ;;  %v677_v41 = vadd.f32 %v671_v25, %v586_v38 }
 0x102   : >> { %v1368_v27 = vpop.f32.mrf.mxu0 }
 0x103   : >> { %v1380_v28 = vpop.f32.mrf.mxu1  ;;  %v759_v45 = vadd.f32 %v753_v26, %v677_v41 }
 0x104   : >> { %v674_v29 = vpop.f32.mrf.mxu0 }
 0x105   : >> { %v756_v30 = vpop.f32.mrf.mxu1 }
 0x106   : >> { %v1369_v31 = vpop.f32.mrf.mxu0 }
 0x107   : >> { %v1381_v32 = vpop.f32.mrf.mxu1 }
 0x110   : >> { %v835_v35 = vpop.f32.mrf.mxu0 }
 0x111   : >> { %v926_v36 = vpop.f32.mrf.mxu1  ;;  %v841_v46 = vadd.f32 %v835_v35, %v759_v45 }
 0x112   : >> { %v1392_v37 = vpop.f32.mrf.mxu0 }
 0x113   : >> { %v1404_v39 = vpop.f32.mrf.mxu1  ;;  %v932_v47 = vadd.f32 %v926_v36, %v841_v46 }
 0x114   : >> { %v838_v40 = vpop.f32.mrf.mxu0 }
 0x115   : >> { %v929_v42 = vpop.f32.mrf.mxu1 }
 0x116   : >> { %v1393_v43 = vpop.f32.mrf.mxu0 }
 0x117   : >> { %v1405_v44 = vpop.f32.mrf.mxu1 }
 0x120   : >> { %v1008_v48 = vpop.f32.mrf.mxu0 }
 0x121   : >> { %v1014_v49 = vadd.f32 %v1008_v48, %v932_v47 }
 0x122   : >> { %v1416_v50 = vpop.f32.mrf.mxu0 }
 0x123   : >> { %v1021_v51 = vmul.f32 %v1538_v0, %v1014_v49 }
 0x124   : >> { %v1011_v52 = vpop.f32.mrf.mxu0 }
 0x125   : >> { %v1028_v53 = vadd.f32 %v1543_v1, %v1021_v51 }
 0x126   : >> { %v1417_v55 = vpop.f32.mrf.mxu0 }
 0x127   : >> { %v1029_v56 = vmax.f32 %v1028_v53, 0.0  ;;  %252 = sbr.rel (!%p250_p4) target bundleno = 15 (0xf), region = 93 }
 0x129   : >> { %v1033_v57 = vadd.f32 %v1032_v54, %v1029_v56 }
 0x12b   : >> { %1035 = vst.msk [vmem:[%s1034_s11] sm:$0xff] %vm312_vm1, %v1033_v57 }
 0x12c PF: > { %s15_s18 = sadd.s32 1, %s1489_s18  }
 0x12d   : > { %p12_p5 = scmp.ge.s32.totalorder %s15_s18, 4  }
 0x12f   :  { %14 = sbr.rel (!%p12_p5) target bundleno = 1 (0x1), region = 104 }

// kernel: forward.26
= control target key start
LH: loop header
LB: loop body
LE: loop exit
PB: predicated region body
PF: predicated region fallthrough
CT: control target
= control target key end

     0   :  { %s242_s6 = smov 0   ;;  %s259_s0 = inlined_call_operand.vmem [shape: f32[2,4,2,128], index: 0, kind: input, shape index: {}]   ;;  %s260_s1 = inlined_call_operand.vmem [shape: f32[2,2,2,64], index: 1, kind: output, shape index: {}]  }
   0x1 LB: > { %s201_s7 = sadd.s32 4294967295, %s229_s6   ;;  %p205_p0 = scmp.ge.s32.totalorder %s229_s6, 1  ;;  %s229_s6 = sphi %s242_s6, %s11_s6  }
   0x2   : > { %p87_p1 = scmp.lt.s32.totalorder %s229_s6, 3 }
   0x4   : > { %p88_p2 = pnand %p205_p0, %p87_p1 }
   0x5   : > { %p107_p3 = scmp.lt.s32.totalorder (!%p88_p2), %s201_s7, 1  ;;  %s231_s12 = smov (!%p88_p2), 64  }
   0x6   : > { %91 = sbr.rel (%p88_p2) target bundleno = 139 (0x8b), region = 24 }
   0xb   : > { %s262_s7 = smov (!%p107_p3, %s201_s7), 1  ;;  %vm143_vm0 = vcmask 517120  }
   0xc   : > { %s212_s8 = sshll.u32 %s262_s7, 3  ;;  %s213_s13 = sshll.u32 %s262_s7, 2 }
   0xd   : > { %s111_s11 = scalar_lea.vmem %s259_s0, %s212_s8  ;;  %s116_s16 = scalar_lea.vmem %s260_s1, %s213_s13 }
   0xe   : > { %v119_v0 = vld [vmem:[%s111_s11 + $0x4] sm:$0x3]  ;;  %v117_v1 = vld [vmem:[%s111_s11] sm:$0x3]  ;;  %v120_v2 = vld [vmem:[%s111_s11 + $0x6] sm:$0x3] }
   0xf   : > { %129 = vrot.lane.b32.xlu1 %v119_v0, %s231_s12  ;;  %125 = vrot.lane.b32.xlu0 %v117_v1, %s231_s12  ;;  %v118_v3 = vld [vmem:[%s111_s11 + $0x2] sm:$0x3] }
  0x13   : > { %131 = vrot.lane.b32.xlu1 %v120_v2, %s231_s12  ;;  %127 = vrot.lane.b32.xlu0 %v118_v3, %s231_s12 }
  0x81   : > { %v130_v4 = vpop.permute.xlu1 %129  ;;  %v126_v5 = vpop.permute.xlu0 %125 }
  0x82   : > { %v139_v8 = vmax.f32 %v119_v0, %v130_v4  ;;  %v137_v9 = vmax.f32 %v117_v1, %v126_v5 }
  0x85   : > { %v132_v6 = vpop.permute.xlu1 %131  ;;  %v128_v7 = vpop.permute.xlu0 %127 }
  0x86   : > { %v140_v10 = vmax.f32 %v120_v2, %v132_v6  ;;  %v138_v11 = vmax.f32 %v118_v3, %v128_v7 }
  0x88   : > { %v142_v12 = vmax.f32 %v139_v8, %v140_v10  ;;  %v141_v13 = vmax.f32 %v137_v9, %v138_v11 }
  0x8a   : > { %145 = vst.msk [vmem:[%s116_s16 + $0x2] sm:$0x3] %vm143_vm0, %v142_v12  ;;  %144 = vst.msk [vmem:[%s116_s16] sm:$0x3] %vm143_vm0, %v141_v13 }
  0x8b PF: > { %s11_s6 = sadd.s32 1, %s229_s6  }
  0x8c   : > { %p8_p4 = scmp.ge.s32.totalorder %s11_s6, 4  }
  0x8e   :  { %10 = sbr.rel (!%p8_p4) target bundleno = 1 (0x1), region = 54 }

// kernel: forward.27
= control target key start
LH: loop header
LB: loop body
LE: loop exit
PB: predicated region body
PF: predicated region fallthrough
CT: control target
= control target key end

     0   :  { %v166_v0 = vmov 0.0   ;;  %vm167_vm0 = vmmov 0   ;;  %vm18_vm1 = vcmask 519168   ;;  %vm53_vm2 = vcmask 1041409   ;;  %s224_s1 = inlined_call_operand.vmem [shape: f32[64,1], index: 1, kind: input, shape index: {}]   ;;  %s225_s0 = inlined_call_operand.vmem [shape: f32[2,4,64], index: 0, kind: input, shape index: {}]   ;;  %s226_s2 = inlined_call_operand.<no memory space> [shape: f32[1,1], index: 2, kind: input, shape index: {}]   ;;  %s227_s3 = inlined_call_operand.vmem [shape: f32[2,1], index: 3, kind: output, shape index: {}]  }
   0x1   :  { %145 = vmatprep.subr.mxu0 %v166_v0  ;;  %v43_v1 = vld [vmem:[%s224_s1 + $0x38] sm:$0xff]  ;;  %v42_v2 = vld [vmem:[%s224_s1 + $0x30] sm:$0xff]  ;;  %161 = vmatprep.mubr.msk.f32.mxu0 %vm167_vm0, %v166_v0  ;;  %v8_v3 = vstv %s226_s2  ;;  %v41_v4 = vld [vmem:[%s224_s1 + $0x28] sm:$0xff]  ;;  %vm55_vm3 = vcmask 523264   ;;  %vm128_vm4 = vcmask 1024  }
   0x2   :  { %146 = vmatpush3.msra.mxu0 %v43_v1  ;;  %9 = vst [vmem:[#allocation2] sm:$0x1] %v8_v3  ;;  %v16_v5 = vld [vmem:[%s225_s0] sm:$0xf]  ;;  %v17_v6 = vld [vmem:[%s225_s0 + $0x4] sm:$0xf] }
   0x3   :  { %147 = vmatprep.subr.mxu0 %v166_v0  ;;  %v19_v7 = vsel %vm18_vm1, %v16_v5, 0.0  ;;  %v40_v8 = vld [vmem:[%s224_s1 + $0x20] sm:$0xff]  ;;  %v26_v10 = vsel %vm18_vm1, %v17_v6, 0.0  ;;  %v39_v12 = vld [vmem:[%s224_s1 + $0x18] sm:$0xff]  ;;  %v38_v15 = vld [vmem:[%s224_s1 + $0x10] sm:$0xff] }
   0x4   :  { %148 = vmatpush3.msra.mxu0 %v42_v2  ;;  %v20_v9 = vrot.slane %v19_v7, 4  ;;  %v27_v11 = vrot.slane %v26_v10, 4  ;;  %v37_v18 = vld [vmem:[%s224_s1 + $0x8] sm:$0xff]  ;;  %v36_v21 = vld [vmem:[%s224_s1] sm:$0xff] }
   0x5   :  { %149 = vmatprep.subr.mxu0 %v166_v0 }
   0x6   :  { %150 = vmatpush3.msra.mxu0 %v41_v4  ;;  %v21_v13 = vadd.f32 %v20_v9, %v19_v7  ;;  %v28_v14 = vadd.f32 %v27_v11, %v26_v10 }
   0x7   :  { %151 = vmatprep.subr.mxu0 %v166_v0 }
   0x8   :  { %152 = vmatpush3.msra.mxu0 %v40_v8  ;;  %v22_v16 = vrot.slane %v21_v13, 2  ;;  %v29_v17 = vrot.slane %v28_v14, 2 }
   0x9   :  { %153 = vmatprep.subr.mxu0 %v166_v0  ;;  %v134_v29 = vld [vmem:[#allocation2] ss:$0 sm:$0xff] }
   0xa   :  { %154 = vmatpush3.msra.mxu0 %v39_v12  ;;  %v23_v19 = vadd.f32 %v22_v16, %v21_v13  ;;  %v30_v20 = vadd.f32 %v29_v17, %v28_v14 }
   0xb   :  { %155 = vmatprep.subr.mxu0 %v166_v0 }
   0xc   :  { %156 = vmatpush3.msra.mxu0 %v38_v15  ;;  %v24_v22 = vrot.slane %v23_v19, 1  ;;  %v31_v23 = vrot.slane %v30_v20, 1 }
   0xd   :  { %157 = vmatprep.subr.mxu0 %v166_v0 }
   0xe   :  { %158 = vmatpush3.msra.mxu0 %v37_v18  ;;  %v25_v24 = vadd.f32 %v24_v22, %v23_v19  ;;  %v32_v25 = vadd.f32 %v31_v23, %v30_v20 }
   0xf   :  { %159 = vmatprep.subr.mxu0 %v166_v0 }
  0x10   :  { %160 = vmatpush3.msra.mxu0 %v36_v21  ;;  %v34_v26 = vmul.f32 0.25, %v25_v24  ;;  %v35_v27 = vmul.f32 0.25, %v32_v25 }
  0x12   :  { %v54_v28 = vsel %vm53_vm2, %v35_v27, %v34_v26 }
  0x13   :  { %162 = vmatmul.mubr.msk.f32.vlgmr.msra.gmra.mxu0 %vm55_vm3, %v54_v28 }
  0xd3   :  { %v124_v30 = vpop.f32.mrf.mxu0 }
  0xd4   :  { %v125_v31 = vadd.f32 %v134_v29, %v124_v30 }
  0xd5   :  { %v163_v32 = vpop.f32.mrf.mxu0 }
  0xd6   :  { %129 = vst.msk [vmem:[%s227_s3] sm:$0x3] %vm128_vm4, %v125_v31 }

// kernel: forward.23
= control target key start
LH: loop header
LB: loop body
LE: loop exit
PB: predicated region body
PF: predicated region fallthrough
CT: control target
= control target key end

     0   :  { %s1441_s15 = smov 0   ;;  %s1671_s0 = inlined_call_operand.vmem [shape: bf16[2,6,6,64], index: 0, kind: input, shape index: {}]   ;;  %s1672_s1 = inlined_call_operand.vmem [shape: bf16[9,64,64], index: 1, kind: input, shape index: {}]   ;;  %s1673_s2 = inlined_call_operand.vmem [shape: f32[1,64], index: 2, kind: input, shape index: {}]   ;;  %s1674_s3 = inlined_call_operand.vmem [shape: f32[1,64], index: 3, kind: input, shape index: {}]   ;;  %s1675_s4 = inlined_call_operand.vmem [shape: f32[2,4,4,64], index: 4, kind: output, shape index: {}]  }
   0x1 LB: > { %s1046_s16 = sadd.s32 4294967295, %s1408_s15   ;;  %p1050_p0 = scmp.ge.s32.totalorder %s1408_s15, 1  ;;  %s1408_s15 = sphi %s1441_s15, %s14_s15  }
   0x2   : > { %p162_p1 = scmp.lt.s32.totalorder %s1408_s15, 3 }
   0x4   : > { %p163_p2 = pnand %p1050_p0, %p162_p1 }
   0x5   : > { %p188_p3 = scmp.lt.s32.totalorder (!%p163_p2), %s1046_s16, 1  ;;  %s1469_s29 = smov (!%p163_p2), 0  }
   0x6   : > { %166 = sbr.rel (%p163_p2) target bundleno = 298 (0x12a), region = 36 }
   0xb   : > { %v1452_v0 = vld [vmem:[%s1673_s2] ss:$0 sm:$0xff]  ;;  %s1677_s16 = smov (!%p188_p3, %s1046_s16), 1 }
   0xc   : > { %v1457_v1 = vld [vmem:[%s1674_s3] ss:$0 sm:$0xff]  ;;  %s1337_s21 = smul.u32 24, %s1677_s16  ;;  %s1183_s22 = sshll.u32 %s1677_s16, 4 }
   0xd   : > { %s1462_s25 = scalar_lea.vmem %s1675_s4, %s1183_s22 }
   0xe   : > { %s1467_s28 = scalar_lea.vmem %s1671_s0, %s1337_s21 }
   0xf LB: >> { %v1356_v2 = vld [vmem:[%s1672_s1 + $0x38] sm:$0xff]   ;;  %v1414_v3 = vmov 0.0   ;;  %v1358_v5 = vld [vmem:[%s1672_s1 + $0x30] sm:$0xff]   ;;  %vm1415_vm0 = vmmov 0   ;;  %s1054_s10 = sshll.u32 %s1412_s29, 2  ;;  %v1360_v7 = vld [vmem:[%s1672_s1 + $0x28] sm:$0xff]   ;;  %s1412_s29 = sphi %s1469_s29, %s206_s29  }
  0x10   : >> { %1229 = vmatprep.subr.bf16.mxu0 %v1414_v3  ;;  %1241 = vmatprep.subr.bf16.mxu1 %v1414_v3  ;;  %v1357_v4 = vld [vmem:[%s1672_s1 + $0x18] sm:$0xff]   ;;  %v1359_v6 = vld [vmem:[%s1672_s1 + $0x10] sm:$0xff]   ;;  %s1498_s13 = scalar_lea.vmem %s1467_s28, %s1054_s10  ;;  %v1361_v8 = vld [vmem:[%s1672_s1 + $0x8] sm:$0xff]   ;;  %vm262_vm1 = vcmask 523264   ;;  %vm974_vm2 = vcmask 519168   ;;  %s206_s29 = sadd.s32 1, %s1412_s29  }
  0x11   : >> { %1230 = vmatpush3.bf16.msra.mxu0 %v1356_v2  ;;  %1237 = vmatprep.mubr.msk.bf16.mxu0 %vm1415_vm0, %v1414_v3  ;;  %v1364_v9 = vld [vmem:[%s1498_s13] ss:$0 sps:$4 sm:$0x77]   ;;  %v1365_v15 = vld [vmem:[%s1672_s1 + $0x58] sm:$0xff]   ;;  %v1367_v19 = vld [vmem:[%s1672_s1 + $0x50] sm:$0xff]   ;;  %p203_p4 = scmp.ge.s32.totalorder %s206_s29, 4  }
  0x12   : >> { %1242 = vmatpush3.bf16.msra.mxu1 %v1357_v4  ;;  %1231 = vmatprep.subr.bf16.mxu0 %v1414_v3  ;;  %v1362_v10 = vld [vmem:[%s1672_s1 + $0x20] sm:$0xff]   ;;  %v232_v11 = vshrl.u32 %v1364_v9, 16  ;;  %v234_v12 = vshll.u32 %v1364_v9, 16  ;;  %v1366_v18 = vld [vmem:[%s1672_s1 + $0x78] sm:$0xff]   ;;  %v1368_v20 = vld [vmem:[%s1672_s1 + $0x70] sm:$0xff]  }
  0x13   : >> { %1243 = vmatprep.subr.bf16.mxu1 %v1414_v3  ;;  %1249 = vmatprep.mubr.msk.bf16.mxu1 %vm1415_vm0, %v1414_v3  ;;  %v1363_v13 = vld [vmem:[%s1672_s1] sm:$0xff]   ;;  %v1369_v21 = vld [vmem:[%s1672_s1 + $0x48] sm:$0xff]   ;;  %v1374_v27 = vld [vmem:[%s1672_s1 + $0x98] sm:$0xff]  }
  0x14   : >> { %v236_v14 = vrot.slane %v234_v12, 1  ;;  %v209_v17 = vld [vmem:[%s1498_s13] sm:$0x3]  ;;  %v1370_v22 = vld [vmem:[%s1672_s1 + $0x68] sm:$0xff]   ;;  %v1089_v28 = vld [vmem:[%s1498_s13 + $0x4] sm:$0x3] }
  0x15   : >> { %1232 = vmatpush3.bf16.msra.mxu0 %v1358_v5  ;;  %v1373_v23 = vld [vmem:[%s1498_s13] ss:$0 sps:$4 sm:$0x66]   ;;  %v1375_v29 = vld [vmem:[%s1672_s1 + $0xb8] sm:$0xff]   ;;  %v1376_v31 = vld [vmem:[%s1672_s1 + $0x90] sm:$0xff]  }
  0x16   : >> { %1244 = vmatpush3.bf16.msra.mxu1 %v1359_v6  ;;  %1233 = vmatprep.subr.bf16.mxu0 %v1414_v3  ;;  %v237_v16 = vor.u32 %v236_v14, %v232_v11  ;;  %v1371_v24 = vld [vmem:[%s1672_s1 + $0x40] sm:$0xff]   ;;  %v386_v26 = vrot.slane %v1373_v23, 1  ;;  %v1377_v32 = vld [vmem:[%s1672_s1 + $0xb0] sm:$0xff]   ;;  %v1378_v34 = vld [vmem:[%s1672_s1 + $0x88] sm:$0xff]  }
  0x17   : >> { %1245 = vmatprep.subr.bf16.mxu1 %v1414_v3  ;;  %v1372_v25 = vld [vmem:[%s1672_s1 + $0x60] sm:$0xff]   ;;  %v1379_v35 = vld [vmem:[%s1672_s1 + $0xa8] sm:$0xff]   ;;  %v1383_v42 = vld [vmem:[%s1672_s1 + $0xd8] sm:$0xff]  }
  0x18   : >> { %v1382_v30 = vld [vmem:[%s1498_s13 + $0x4] ss:$0 sps:$4 sm:$0x77]   ;;  %v1385_v44 = vld [vmem:[%s1672_s1 + $0xf8] sm:$0xff]   ;;  %v1386_v45 = vld [vmem:[%s1672_s1 + $0xd0] sm:$0xff]  }
  0x19   : >> { %1234 = vmatpush3.bf16.msra.mxu0 %v1360_v7  ;;  %v552_v33 = vshll.u32 %v1382_v30, 16  ;;  %v550_v36 = vshrl.u32 %v1382_v30, 16  ;;  %v1380_v38 = vld [vmem:[%s1672_s1 + $0x80] sm:$0xff]   ;;  %v1393_v46 = vld [vmem:[%s1498_s13 + $0x8] ss:$0 sps:$4 sm:$0x77]  }
  0x1a   : >> { %1246 = vmatpush3.bf16.msra.mxu1 %v1361_v8  ;;  %1235 = vmatprep.subr.bf16.mxu0 %v1414_v3  ;;  %v1384_v39 = vld [vmem:[%s1498_s13 + $0x4] ss:$0 sps:$4 sm:$0x66]   ;;  %v1387_v47 = vld [vmem:[%s1672_s1 + $0xf0] sm:$0xff]   ;;  %v1388_v48 = vld [vmem:[%s1672_s1 + $0xc8] sm:$0xff]   ;;  %v803_v49 = vshll.u32 %v1393_v46, 16 }
  0x1b   : >> { %1247 = vmatprep.subr.bf16.mxu1 %v1414_v3  ;;  %v554_v37 = vrot.slane %v552_v33, 1  ;;  %v1381_v40 = vld [vmem:[%s1672_s1 + $0xa0] sm:$0xff]   ;;  %v637_v43 = vrot.slane %v1384_v39, 1  ;;  %v1389_v50 = vld [vmem:[%s1672_s1 + $0xe8] sm:$0xff]   ;;  %v801_v52 = vshrl.u32 %v1393_v46, 16  ;;  %v1392_v56 = vld [vmem:[%s1672_s1 + $0x118] sm:$0xff]  }
  0x1c   : >> { %v1390_v51 = vld [vmem:[%s1672_s1 + $0xc0] sm:$0xff]   ;;  %v805_v53 = vrot.slane %v803_v49, 1  ;;  %v1134_v55 = vld [vmem:[%s1498_s13 + $0x8] sm:$0x3]  ;;  %v1394_v58 = vld [vmem:[%s1672_s1 + $0x110] sm:$0xff]  }
  0x1d   : >> { %1236 = vmatpush3.bf16.msra.mxu0 %v1362_v10  ;;  %v555_v41 = vor.u32 %v554_v37, %v550_v36  ;;  %v1391_v54 = vld [vmem:[%s1672_s1 + $0xe0] sm:$0xff]   ;;  %v1395_v59 = vld [vmem:[%s1672_s1 + $0x108] sm:$0xff]  }
  0x1e   : >> { %1248 = vmatpush3.bf16.msra.mxu1 %v1363_v13  ;;  %1253 = vmatprep.subr.bf16.mxu0 %v1414_v3  ;;  %v806_v57 = vor.u32 %v805_v53, %v801_v52  ;;  %v1397_v60 = vld [vmem:[%s1498_s13 + $0x8] ss:$0 sps:$4 sm:$0x66]   ;;  %v1396_v61 = vld [vmem:[%s1672_s1 + $0x100] sm:$0xff]   ;;  %s973_s13 = scalar_lea.vmem %s1462_s25, %s1054_s10 }
  0x1f   : >> { %1265 = vmatprep.subr.bf16.mxu1 %v1414_v3  ;;  %v888_v62 = vrot.slane %v1397_v60, 1 }
  0x20   : >> { %1238 = vmatmul.mubr.msk.bf16.vlgmr.msra.gmra.mxu0 %vm262_vm1, %v237_v16 }
  0x21   : >> { %1250 = vmatmul.mubr.msk.bf16.vlgmr.msra.gmra.mxu1 %vm262_vm1, %v209_v17  ;;  %1254 = vmatpush3.bf16.msra.mxu0 %v1365_v15 }
  0x22   : >> { %1266 = vmatpush3.bf16.msra.mxu1 %v1366_v18  ;;  %1255 = vmatprep.subr.bf16.mxu0 %v1414_v3 }
  0x23   : >> { %1267 = vmatprep.subr.bf16.mxu1 %v1414_v3  ;;  %1261 = vmatprep.mubr.msk.bf16.mxu0 %vm1415_vm0, %v1414_v3 }
  0x24   : >> { %1273 = vmatprep.mubr.msk.bf16.mxu1 %vm1415_vm0, %v1414_v3 }
  0x25   : >> { %1256 = vmatpush3.bf16.msra.mxu0 %v1367_v19 }
  0x26   : >> { %1268 = vmatpush3.bf16.msra.mxu1 %v1368_v20  ;;  %1257 = vmatprep.subr.bf16.mxu0 %v1414_v3 }
  0x27   : >> { %1269 = vmatprep.subr.bf16.mxu1 %v1414_v3 }
  0x29   : >> { %1258 = vmatpush3.bf16.msra.mxu0 %v1369_v21 }
  0x2a   : >> { %1270 = vmatpush3.bf16.msra.mxu1 %v1370_v22  ;;  %1259 = vmatprep.subr.bf16.mxu0 %v1414_v3 }
  0x2b   : >> { %1271 = vmatprep.subr.bf16.mxu1 %v1414_v3 }
  0x2d   : >> { %1260 = vmatpush3.bf16.msra.mxu0 %v1371_v24 }
  0x2e   : >> { %1272 = vmatpush3.bf16.msra.mxu1 %v1372_v25  ;;  %1277 = vmatprep.subr.bf16.mxu0 %v1414_v3 }
  0x2f   : >> { %1289 = vmatprep.subr.bf16.mxu1 %v1414_v3 }
  0x30   : >> { %1262 = vmatmul.mubr.msk.bf16.vlgmr.msra.gmra.mxu0 %vm262_vm1, %v386_v26 }
  0x31   : >> { %1278 = vmatpush3.bf16.msra.mxu0 %v1374_v27  ;;  %1274 = vmatmul.mubr.msk.bf16.vlgmr.msra.gmra.mxu1 %vm262_vm1, %v1089_v28 }
  0x32   : >> { %1290 = vmatpush3.bf16.msra.mxu1 %v1375_v29  ;;  %1279 = vmatprep.subr.bf16.mxu0 %v1414_v3 }
  0x33   : >> { %1291 = vmatprep.subr.bf16.mxu1 %v1414_v3  ;;  %1285 = vmatprep.mubr.msk.bf16.mxu0 %vm1415_vm0, %v1414_v3 }
  0x34   : >> { %1297 = vmatprep.mubr.msk.bf16.mxu1 %vm1415_vm0, %v1414_v3 }
  0x35   : >> { %1280 = vmatpush3.bf16.msra.mxu0 %v1376_v31 }
  0x36   : >> { %1292 = vmatpush3.bf16.msra.mxu1 %v1377_v32  ;;  %1281 = vmatprep.subr.bf16.mxu0 %v1414_v3 }
  0x37   : >> { %1293 = vmatprep.subr.bf16.mxu1 %v1414_v3 }
  0x39   : >> { %1282 = vmatpush3.bf16.msra.mxu0 %v1378_v34 }
  0x3a   : >> { %1294 = vmatpush3.bf16.msra.mxu1 %v1379_v35  ;;  %1283 = vmatprep.subr.bf16.mxu0 %v1414_v3 }
  0x3b   : >> { %1295 = vmatprep.subr.bf16.mxu1 %v1414_v3 }
  0x3d   : >> { %1284 = vmatpush3.bf16.msra.mxu0 %v1380_v38 }
  0x3e   : >> { %1296 = vmatpush3.bf16.msra.mxu1 %v1381_v40  ;;  %1301 = vmatprep.subr.bf16.mxu0 %v1414_v3 }
  0x3f   : >> { %1313 = vmatprep.subr.bf16.mxu1 %v1414_v3 }
  0x40   : >> { %1286 = vmatmul.mubr.msk.bf16.vlgmr.msra.gmra.mxu0 %vm262_vm1, %v555_v41 }
  0x41   : >> { %1302 = vmatpush3.bf16.msra.mxu0 %v1383_v42  ;;  %1298 = vmatmul.mubr.msk.bf16.vlgmr.msra.gmra.mxu1 %vm262_vm1, %v637_v43 }
  0x42   : >> { %1314 = vmatpush3.bf16.msra.mxu1 %v1385_v44  ;;  %1303 = vmatprep.subr.bf16.mxu0 %v1414_v3 }
  0x43   : >> { %1315 = vmatprep.subr.bf16.mxu1 %v1414_v3  ;;  %1309 = vmatprep.mubr.msk.bf16.mxu0 %vm1415_vm0, %v1414_v3 }
  0x44   : >> { %1321 = vmatprep.mubr.msk.bf16.mxu1 %vm1415_vm0, %v1414_v3 }
  0x45   : >> { %1304 = vmatpush3.bf16.msra.mxu0 %v1386_v45 }
  0x46   : >> { %1316 = vmatpush3.bf16.msra.mxu1 %v1387_v47  ;;  %1305 = vmatprep.subr.bf16.mxu0 %v1414_v3 }
  0x47   : >> { %1317 = vmatprep.subr.bf16.mxu1 %v1414_v3 }
  0x49   : >> { %1306 = vmatpush3.bf16.msra.mxu0 %v1388_v48 }
  0x4a   : >> { %1318 = vmatpush3.bf16.msra.mxu1 %v1389_v50  ;;  %1307 = vmatprep.subr.bf16.mxu0 %v1414_v3 }
  0x4b   : >> { %1319 = vmatprep.subr.bf16.mxu1 %v1414_v3 }
  0x4d   : >> { %1308 = vmatpush3.bf16.msra.mxu0 %v1390_v51 }
  0x4e   : >> { %1320 = vmatpush3.bf16.msra.mxu1 %v1391_v54  ;;  %1325 = vmatprep.subr.bf16.mxu0 %v1414_v3 }
  0x50   : >> { %1310 = vmatmul.mubr.msk.bf16.vlgmr.msra.gmra.mxu0 %vm262_vm1, %v1134_v55 }
  0x51   : >> { %1326 = vmatpush3.bf16.msra.mxu0 %v1392_v56  ;;  %1322 = vmatmul.mubr.msk.bf16.vlgmr.msra.gmra.mxu1 %vm262_vm1, %v806_v57 }
  0x52   : >> { %1327 = vmatprep.subr.bf16.mxu0 %v1414_v3  ;;  %1333 = vmatprep.mubr.msk.bf16.mxu0 %vm1415_vm0, %v1414_v3 }
  0x55   : >> { %1328 = vmatpush3.bf16.msra.mxu0 %v1394_v58 }
  0x56   : >> { %1329 = vmatprep.subr.bf16.mxu0 %v1414_v3 }
  0x59   : >> { %1330 = vmatpush3.bf16.msra.mxu0 %v1395_v59 }
  0x5a   : >> { %1331 = vmatprep.subr.bf16.mxu0 %v1414_v3 }
  0x5d   : >> { %1332 = vmatpush3.bf16.msra.mxu0 %v1396_v61 }
  0x60   : >> { %1334 = vmatmul.mubr.msk.bf16.vlgmr.msra.gmra.mxu0 %vm262_vm1, %v888_v62 }
  0xe0   : >> { %v300_v63 = vpop.f32.mrf.mxu0 }
  0xe1   : >> { %v367_v2 = vpop.f32.mrf.mxu1 }
  0xe2   : >> { %v1239_v4 = vpop.f32.mrf.mxu0  ;;  %v368_v25 = vadd.f32 %v367_v2, %v300_v63 }
  0xe3   : >> { %v1251_v5 = vpop.f32.mrf.mxu1 }
  0xe4   : >> { %v303_v6 = vpop.f32.mrf.mxu0 }
  0xe5   : >> { %v370_v7 = vpop.f32.mrf.mxu1 }
  0xe6   : >> { %v1240_v8 = vpop.f32.mrf.mxu0 }
  0xe7   : >> { %v1252_v9 = vpop.f32.mrf.mxu1 }
  0xf0   : >> { %v448_v10 = vpop.f32.mrf.mxu0 }
  0xf1   : >> { %v529_v11 = vpop.f32.mrf.mxu1  ;;  %v454_v26 = vadd.f32 %v448_v10, %v368_v25 }
  0xf2   : >> { %v1263_v12 = vpop.f32.mrf.mxu0 }
  0xf3   : >> { %v1275_v13 = vpop.f32.mrf.mxu1  ;;  %v535_v30 = vadd.f32 %v529_v11, %v454_v26 }
  0xf4   : >> { %v451_v14 = vpop.f32.mrf.mxu0 }
  0xf5   : >> { %v532_v15 = vpop.f32.mrf.mxu1 }
  0xf6   : >> { %v1264_v16 = vpop.f32.mrf.mxu0 }
  0xf7   : >> { %v1276_v3 = vpop.f32.mrf.mxu1 }
 0x100   : >> { %v617_v17 = vpop.f32.mrf.mxu0 }
 0x101   : >> { %v699_v18 = vpop.f32.mrf.mxu1  ;;  %v623_v33 = vadd.f32 %v617_v17, %v535_v30 }
 0x102   : >> { %v1287_v19 = vpop.f32.mrf.mxu0 }
 0x103   : >> { %v1299_v20 = vpop.f32.mrf.mxu1  ;;  %v705_v37 = vadd.f32 %v699_v18, %v623_v33 }
 0x104   : >> { %v620_v21 = vpop.f32.mrf.mxu0 }
 0x105   : >> { %v702_v22 = vpop.f32.mrf.mxu1 }
 0x106   : >> { %v1288_v23 = vpop.f32.mrf.mxu0 }
 0x107   : >> { %v1300_v24 = vpop.f32.mrf.mxu1 }
 0x110   : >> { %v780_v27 = vpop.f32.mrf.mxu0 }
 0x111   : >> { %v868_v28 = vpop.f32.mrf.mxu1  ;;  %v786_v38 = vadd.f32 %v780_v27, %v705_v37 }
 0x112   : >> { %v1311_v29 = vpop.f32.mrf.mxu0 }
 0x113   : >> { %v1323_v31 = vpop.f32.mrf.mxu1  ;;  %v874_v39 = vadd.f32 %v868_v28, %v786_v38 }
 0x114   : >> { %v783_v32 = vpop.f32.mrf.mxu0 }
 0x115   : >> { %v871_v34 = vpop.f32.mrf.mxu1 }
 0x116   : >> { %v1312_v35 = vpop.f32.mrf.mxu0 }
 0x117   : >> { %v1324_v36 = vpop.f32.mrf.mxu1 }
 0x120   : >> { %v950_v40 = vpop.f32.mrf.mxu0 }
 0x121   : >> { %v956_v41 = vadd.f32 %v950_v40, %v874_v39 }
 0x122   : >> { %v1335_v42 = vpop.f32.mrf.mxu0 }
 0x123   : >> { %v963_v43 = vmul.f32 %v1452_v0, %v956_v41 }
 0x124   : >> { %v953_v44 = vpop.f32.mrf.mxu0 }
 0x125   : >> { %v970_v45 = vadd.f32 %v1457_v1, %v963_v43  ;;  %205 = sbr.rel (!%p203_p4) target bundleno = 15 (0xf), region = 85 }
 0x126   : >> { %v1336_v46 = vpop.f32.mrf.mxu0 }
 0x127   : >> { %v971_v47 = vmax.f32 %v970_v45, 0.0 }
 0x129   : >> { %975 = vst.msk [vmem:[%s973_s13] sm:$0xf] %vm974_vm2, %v971_v47 }
 0x12a PF: > { %s14_s15 = sadd.s32 1, %s1408_s15  }
 0x12b   : > { %p11_p5 = scmp.ge.s32.totalorder %s14_s15, 4  }
 0x12d   :  { %13 = sbr.rel (!%p11_p5) target bundleno = 1 (0x1), region = 96 }

// kernel: forward.25
= control target key start
LH: loop header
LB: loop body
LE: loop exit
PB: predicated region body
PF: predicated region fallthrough
CT: control target
= control target key end

     0   :  { %s1513_s18 = smov 0   ;;  %s1750_s0 = inlined_call_operand.vmem [shape: bf16[2,6,6,64], index: 0, kind: input, shape index: {}]   ;;  %s1751_s1 = inlined_call_operand.vmem [shape: bf16[9,64,64], index: 1, kind: input, shape index: {}]   ;;  %s1752_s2 = inlined_call_operand.vmem [shape: f32[1,64], index: 2, kind: input, shape index: {}]   ;;  %s1753_s3 = inlined_call_operand.vmem [shape: f32[1,64], index: 3, kind: input, shape index: {}]   ;;  %s1754_s4 = inlined_call_operand.vmem [shape: f32[2,4,4,64], index: 4, kind: input, shape index: {}]   ;;  %s1755_s5 = inlined_call_operand.vmem [shape: f32[2,4,4,64], index: 5, kind: output, shape index: {}]  }
   0x1 LB: > { %s1110_s19 = sadd.s32 4294967295, %s1475_s18   ;;  %p1114_p0 = scmp.ge.s32.totalorder %s1475_s18, 1  ;;  %s1475_s18 = sphi %s1513_s18, %s15_s18  }
   0x2   : > { %p197_p1 = scmp.lt.s32.totalorder %s1475_s18, 3 }
   0x4   : > { %p198_p2 = pnand %p1114_p0, %p197_p1 }
   0x5   : > { %p230_p3 = scmp.lt.s32.totalorder (!%p198_p2), %s1110_s19, 1  ;;  %s1546_s10 = smov (!%p198_p2), 0  }
   0x6   : > { %201 = sbr.rel (%p198_p2) target bundleno = 300 (0x12c), region = 40 }
   0xb   : > { %v1524_v0 = vld [vmem:[%s1752_s2] ss:$0 sm:$0xff]  ;;  %s1757_s19 = smov (!%p230_p3, %s1110_s19), 1 }
   0xc   : > { %v1529_v1 = vld [vmem:[%s1753_s3] ss:$0 sm:$0xff]  ;;  %s1404_s24 = smul.u32 24, %s1757_s19  ;;  %s1249_s25 = sshll.u32 %s1757_s19, 4 }
   0xd   : > { %s1534_s28 = scalar_lea.vmem %s1754_s4, %s1249_s25  ;;  %s1539_s6 = scalar_lea.vmem %s1755_s5, %s1249_s25 }
   0xe   : > { %s1544_s9 = scalar_lea.vmem %s1750_s0, %s1404_s24 }
   0xf LB: >> { %v1423_v2 = vld [vmem:[%s1751_s1 + $0x38] sm:$0xff]   ;;  %v1481_v3 = vmov 0.0   ;;  %v1425_v5 = vld [vmem:[%s1751_s1 + $0x30] sm:$0xff]   ;;  %vm1482_vm0 = vmmov 0   ;;  %s1565_s17 = sshll.u32 %s1479_s10, 2  ;;  %v1427_v7 = vld [vmem:[%s1751_s1 + $0x28] sm:$0xff]   ;;  %s1479_s10 = sphi %s1546_s10, %s253_s10  }
  0x10   : >> { %1296 = vmatprep.subr.bf16.mxu0 %v1481_v3  ;;  %1308 = vmatprep.subr.bf16.mxu1 %v1481_v3  ;;  %v1424_v4 = vld [vmem:[%s1751_s1 + $0x18] sm:$0xff]   ;;  %v1426_v6 = vld [vmem:[%s1751_s1 + $0x10] sm:$0xff]   ;;  %s1576_s21 = scalar_lea.vmem %s1544_s9, %s1565_s17  ;;  %v1428_v8 = vld [vmem:[%s1751_s1 + $0x8] sm:$0xff]   ;;  %vm309_vm1 = vcmask 523264   ;;  %s1023_s11 = scalar_lea.vmem %s1539_s6, %s1565_s17  ;;  %vm1024_vm2 = vcmask 519168  }
  0x11   : >> { %1297 = vmatpush3.bf16.msra.mxu0 %v1423_v2  ;;  %1304 = vmatprep.mubr.msk.bf16.mxu0 %vm1482_vm0, %v1481_v3  ;;  %v1431_v9 = vld [vmem:[%s1576_s21] ss:$0 sps:$4 sm:$0x77]   ;;  %v1432_v15 = vld [vmem:[%s1751_s1 + $0x58] sm:$0xff]   ;;  %v1434_v19 = vld [vmem:[%s1751_s1 + $0x50] sm:$0xff]   ;;  %s253_s10 = sadd.s32 1, %s1479_s10  }
  0x12   : >> { %1309 = vmatpush3.bf16.msra.mxu1 %v1424_v4  ;;  %1298 = vmatprep.subr.bf16.mxu0 %v1481_v3  ;;  %v1429_v10 = vld [vmem:[%s1751_s1 + $0x20] sm:$0xff]   ;;  %v279_v11 = vshrl.u32 %v1431_v9, 16  ;;  %v281_v12 = vshll.u32 %v1431_v9, 16  ;;  %v1433_v18 = vld [vmem:[%s1751_s1 + $0x78] sm:$0xff]   ;;  %v1435_v20 = vld [vmem:[%s1751_s1 + $0x70] sm:$0xff]   ;;  %p250_p4 = scmp.ge.s32.totalorder %s253_s10, 4  }
  0x13   : >> { %1310 = vmatprep.subr.bf16.mxu1 %v1481_v3  ;;  %1316 = vmatprep.mubr.msk.bf16.mxu1 %vm1482_vm0, %v1481_v3  ;;  %v1430_v13 = vld [vmem:[%s1751_s1] sm:$0xff]   ;;  %v1436_v21 = vld [vmem:[%s1751_s1 + $0x48] sm:$0xff]   ;;  %v1441_v27 = vld [vmem:[%s1751_s1 + $0x98] sm:$0xff]  }
  0x14   : >> { %v283_v14 = vrot.slane %v281_v12, 1  ;;  %v256_v17 = vld [vmem:[%s1576_s21] sm:$0x3]  ;;  %v1437_v22 = vld [vmem:[%s1751_s1 + $0x68] sm:$0xff]   ;;  %v1155_v28 = vld [vmem:[%s1576_s21 + $0x4] sm:$0x3] }
  0x15   : >> { %1299 = vmatpush3.bf16.msra.mxu0 %v1425_v5  ;;  %v1440_v23 = vld [vmem:[%s1576_s21] ss:$0 sps:$4 sm:$0x66]   ;;  %v1442_v29 = vld [vmem:[%s1751_s1 + $0xb8] sm:$0xff]   ;;  %v1443_v31 = vld [vmem:[%s1751_s1 + $0x90] sm:$0xff]  }
  0x16   : >> { %1311 = vmatpush3.bf16.msra.mxu1 %v1426_v6  ;;  %1300 = vmatprep.subr.bf16.mxu0 %v1481_v3  ;;  %v284_v16 = vor.u32 %v283_v14, %v279_v11  ;;  %v1438_v24 = vld [vmem:[%s1751_s1 + $0x40] sm:$0xff]   ;;  %v433_v26 = vrot.slane %v1440_v23, 1  ;;  %v1444_v32 = vld [vmem:[%s1751_s1 + $0xb0] sm:$0xff]   ;;  %v1445_v34 = vld [vmem:[%s1751_s1 + $0x88] sm:$0xff]  }
  0x17   : >> { %1312 = vmatprep.subr.bf16.mxu1 %v1481_v3  ;;  %v1439_v25 = vld [vmem:[%s1751_s1 + $0x60] sm:$0xff]   ;;  %v1446_v35 = vld [vmem:[%s1751_s1 + $0xa8] sm:$0xff]   ;;  %v1450_v42 = vld [vmem:[%s1751_s1 + $0xd8] sm:$0xff]  }
  0x18   : >> { %v1449_v30 = vld [vmem:[%s1576_s21 + $0x4] ss:$0 sps:$4 sm:$0x77]   ;;  %v1452_v44 = vld [vmem:[%s1751_s1 + $0xf8] sm:$0xff]   ;;  %v1453_v45 = vld [vmem:[%s1751_s1 + $0xd0] sm:$0xff]  }
  0x19   : >> { %1301 = vmatpush3.bf16.msra.mxu0 %v1427_v7  ;;  %v599_v33 = vshll.u32 %v1449_v30, 16  ;;  %v597_v36 = vshrl.u32 %v1449_v30, 16  ;;  %v1447_v38 = vld [vmem:[%s1751_s1 + $0x80] sm:$0xff]   ;;  %v1460_v46 = vld [vmem:[%s1576_s21 + $0x8] ss:$0 sps:$4 sm:$0x77]  }
  0x1a   : >> { %1313 = vmatpush3.bf16.msra.mxu1 %v1428_v8  ;;  %1302 = vmatprep.subr.bf16.mxu0 %v1481_v3  ;;  %v1451_v39 = vld [vmem:[%s1576_s21 + $0x4] ss:$0 sps:$4 sm:$0x66]   ;;  %v1454_v47 = vld [vmem:[%s1751_s1 + $0xf0] sm:$0xff]   ;;  %v1455_v48 = vld [vmem:[%s1751_s1 + $0xc8] sm:$0xff]   ;;  %v850_v49 = vshll.u32 %v1460_v46, 16 }
  0x1b   : >> { %1314 = vmatprep.subr.bf16.mxu1 %v1481_v3  ;;  %v601_v37 = vrot.slane %v599_v33, 1  ;;  %v1448_v40 = vld [vmem:[%s1751_s1 + $0xa0] sm:$0xff]   ;;  %v684_v43 = vrot.slane %v1451_v39, 1  ;;  %v1456_v50 = vld [vmem:[%s1751_s1 + $0xe8] sm:$0xff]   ;;  %v848_v52 = vshrl.u32 %v1460_v46, 16  ;;  %v1459_v56 = vld [vmem:[%s1751_s1 + $0x118] sm:$0xff]  }
  0x1c   : >> { %v1457_v51 = vld [vmem:[%s1751_s1 + $0xc0] sm:$0xff]   ;;  %v852_v53 = vrot.slane %v850_v49, 1  ;;  %v1200_v55 = vld [vmem:[%s1576_s21 + $0x8] sm:$0x3]  ;;  %v1461_v58 = vld [vmem:[%s1751_s1 + $0x110] sm:$0xff]  }
  0x1d   : >> { %1303 = vmatpush3.bf16.msra.mxu0 %v1429_v10  ;;  %v602_v41 = vor.u32 %v601_v37, %v597_v36  ;;  %v1458_v54 = vld [vmem:[%s1751_s1 + $0xe0] sm:$0xff]   ;;  %v1462_v59 = vld [vmem:[%s1751_s1 + $0x108] sm:$0xff]  }
  0x1e   : >> { %1315 = vmatpush3.bf16.msra.mxu1 %v1430_v13  ;;  %1320 = vmatprep.subr.bf16.mxu0 %v1481_v3  ;;  %v853_v57 = vor.u32 %v852_v53, %v848_v52  ;;  %v1464_v60 = vld [vmem:[%s1576_s21 + $0x8] ss:$0 sps:$4 sm:$0x66]   ;;  %v1463_v61 = vld [vmem:[%s1751_s1 + $0x100] sm:$0xff]   ;;  %s1020_s21 = scalar_lea.vmem %s1534_s28, %s1565_s17 }
  0x1f   : >> { %1332 = vmatprep.subr.bf16.mxu1 %v1481_v3  ;;  %v935_v62 = vrot.slane %v1464_v60, 1  ;;  %v1021_v46 = vld [vmem:[%s1020_s21] sm:$0xf] }
  0x20   : >> { %1305 = vmatmul.mubr.msk.bf16.vlgmr.msra.gmra.mxu0 %vm309_vm1, %v284_v16 }
  0x21   : >> { %1317 = vmatmul.mubr.msk.bf16.vlgmr.msra.gmra.mxu1 %vm309_vm1, %v256_v17  ;;  %1321 = vmatpush3.bf16.msra.mxu0 %v1432_v15 }
  0x22   : >> { %1333 = vmatpush3.bf16.msra.mxu1 %v1433_v18  ;;  %1322 = vmatprep.subr.bf16.mxu0 %v1481_v3 }
  0x23   : >> { %1334 = vmatprep.subr.bf16.mxu1 %v1481_v3  ;;  %1328 = vmatprep.mubr.msk.bf16.mxu0 %vm1482_vm0, %v1481_v3 }
  0x24   : >> { %1340 = vmatprep.mubr.msk.bf16.mxu1 %vm1482_vm0, %v1481_v3 }
  0x25   : >> { %1323 = vmatpush3.bf16.msra.mxu0 %v1434_v19 }
  0x26   : >> { %1335 = vmatpush3.bf16.msra.mxu1 %v1435_v20  ;;  %1324 = vmatprep.subr.bf16.mxu0 %v1481_v3 }
  0x27   : >> { %1336 = vmatprep.subr.bf16.mxu1 %v1481_v3 }
  0x29   : >> { %1325 = vmatpush3.bf16.msra.mxu0 %v1436_v21 }
  0x2a   : >> { %1337 = vmatpush3.bf16.msra.mxu1 %v1437_v22  ;;  %1326 = vmatprep.subr.bf16.mxu0 %v1481_v3 }
  0x2b   : >> { %1338 = vmatprep.subr.bf16.mxu1 %v1481_v3 }
  0x2d   : >> { %1327 = vmatpush3.bf16.msra.mxu0 %v1438_v24 }
  0x2e   : >> { %1339 = vmatpush3.bf16.msra.mxu1 %v1439_v25  ;;  %1344 = vmatprep.subr.bf16.mxu0 %v1481_v3 }
  0x2f   : >> { %1356 = vmatprep.subr.bf16.mxu1 %v1481_v3 }
  0x30   : >> { %1329 = vmatmul.mubr.msk.bf16.vlgmr.msra.gmra.mxu0 %vm309_vm1, %v433_v26 }
  0x31   : >> { %1345 = vmatpush3.bf16.msra.mxu0 %v1441_v27  ;;  %1341 = vmatmul.mubr.msk.bf16.vlgmr.msra.gmra.mxu1 %vm309_vm1, %v1155_v28 }
  0x32   : >> { %1357 = vmatpush3.bf16.msra.mxu1 %v1442_v29  ;;  %1346 = vmatprep.subr.bf16.mxu0 %v1481_v3 }
  0x33   : >> { %1358 = vmatprep.subr.bf16.mxu1 %v1481_v3  ;;  %1352 = vmatprep.mubr.msk.bf16.mxu0 %vm1482_vm0, %v1481_v3 }
  0x34   : >> { %1364 = vmatprep.mubr.msk.bf16.mxu1 %vm1482_vm0, %v1481_v3 }
  0x35   : >> { %1347 = vmatpush3.bf16.msra.mxu0 %v1443_v31 }
  0x36   : >> { %1359 = vmatpush3.bf16.msra.mxu1 %v1444_v32  ;;  %1348 = vmatprep.subr.bf16.mxu0 %v1481_v3 }
  0x37   : >> { %1360 = vmatprep.subr.bf16.mxu1 %v1481_v3 }
  0x39   : >> { %1349 = vmatpush3.bf16.msra.mxu0 %v1445_v34 }
  0x3a   : >> { %1361 = vmatpush3.bf16.msra.mxu1 %v1446_v35  ;;  %1350 = vmatprep.subr.bf16.mxu0 %v1481_v3 }
  0x3b   : >> { %1362 = vmatprep.subr.bf16.mxu1 %v1481_v3 }
  0x3d   : >> { %1351 = vmatpush3.bf16.msra.mxu0 %v1447_v38 }
  0x3e   : >> { %1363 = vmatpush3.bf16.msra.mxu1 %v1448_v40  ;;  %1368 = vmatprep.subr.bf16.mxu0 %v1481_v3 }
  0x3f   : >> { %1380 = vmatprep.subr.bf16.mxu1 %v1481_v3 }
  0x40   : >> { %1353 = vmatmul.mubr.msk.bf16.vlgmr.msra.gmra.mxu0 %vm309_vm1, %v602_v41 }
  0x41   : >> { %1369 = vmatpush3.bf16.msra.mxu0 %v1450_v42  ;;  %1365 = vmatmul.mubr.msk.bf16.vlgmr.msra.gmra.mxu1 %vm309_vm1, %v684_v43 }
  0x42   : >> { %1381 = vmatpush3.bf16.msra.mxu1 %v1452_v44  ;;  %1370 = vmatprep.subr.bf16.mxu0 %v1481_v3 }
  0x43   : >> { %1382 = vmatprep.subr.bf16.mxu1 %v1481_v3  ;;  %1376 = vmatprep.mubr.msk.bf16.mxu0 %vm1482_vm0, %v1481_v3 }
  0x44   : >> { %1388 = vmatprep.mubr.msk.bf16.mxu1 %vm1482_vm0, %v1481_v3 }
  0x45   : >> { %1371 = vmatpush3.bf16.msra.mxu0 %v1453_v45 }
  0x46   : >> { %1383 = vmatpush3.bf16.msra.mxu1 %v1454_v47  ;;  %1372 = vmatprep.subr.bf16.mxu0 %v1481_v3 }
  0x47   : >> { %1384 = vmatprep.subr.bf16.mxu1 %v1481_v3 }
  0x49   : >> { %1373 = vmatpush3.bf16.msra.mxu0 %v1455_v48 }
  0x4a   : >> { %1385 = vmatpush3.bf16.msra.mxu1 %v1456_v50  ;;  %1374 = vmatprep.subr.bf16.mxu0 %v1481_v3 }
  0x4b   : >> { %1386 = vmatprep.subr.bf16.mxu1 %v1481_v3 }
  0x4d   : >> { %1375 = vmatpush3.bf16.msra.mxu0 %v1457_v51 }
  0x4e   : >> { %1387 = vmatpush3.bf16.msra.mxu1 %v1458_v54  ;;  %1392 = vmatprep.subr.bf16.mxu0 %v1481_v3 }
  0x50   : >> { %1377 = vmatmul.mubr.msk.bf16.vlgmr.msra.gmra.mxu0 %vm309_vm1, %v1200_v55 }
  0x51   : >> { %1393 = vmatpush3.bf16.msra.mxu0 %v1459_v56  ;;  %1389 = vmatmul.mubr.msk.bf16.vlgmr.msra.gmra.mxu1 %vm309_vm1, %v853_v57 }
  0x52   : >> { %1394 = vmatprep.subr.bf16.mxu0 %v1481_v3  ;;  %1400 = vmatprep.mubr.msk.bf16.mxu0 %vm1482_vm0, %v1481_v3 }
  0x55   : >> { %1395 = vmatpush3.bf16.msra.mxu0 %v1461_v58 }
  0x56   : >> { %1396 = vmatprep.subr.bf16.mxu0 %v1481_v3 }
  0x59   : >> { %1397 = vmatpush3.bf16.msra.mxu0 %v1462_v59 }
  0x5a   : >> { %1398 = vmatprep.subr.bf16.mxu0 %v1481_v3 }
  0x5d   : >> { %1399 = vmatpush3.bf16.msra.mxu0 %v1463_v61 }
  0x60   : >> { %1401 = vmatmul.mubr.msk.bf16.vlgmr.msra.gmra.mxu0 %vm309_vm1, %v935_v62 }
  0xe0   : >> { %v347_v63 = vpop.f32.mrf.mxu0 }
  0xe1   : >> { %v414_v2 = vpop.f32.mrf.mxu1 }
  0xe2   : >> { %v1306_v4 = vpop.f32.mrf.mxu0  ;;  %v415_v25 = vadd.f32 %v414_v2, %v347_v63 }
  0xe3   : >> { %v1318_v5 = vpop.f32.mrf.mxu1 }
  0xe4   : >> { %v350_v6 = vpop.f32.mrf.mxu0 }
  0xe5   : >> { %v417_v7 = vpop.f32.mrf.mxu1 }
  0xe6   : >> { %v1307_v8 = vpop.f32.mrf.mxu0 }
  0xe7   : >> { %v1319_v9 = vpop.f32.mrf.mxu1 }
  0xf0   : >> { %v495_v10 = vpop.f32.mrf.mxu0 }
  0xf1   : >> { %v576_v11 = vpop.f32.mrf.mxu1  ;;  %v501_v26 = vadd.f32 %v495_v10, %v415_v25 }
  0xf2   : >> { %v1330_v12 = vpop.f32.mrf.mxu0 }
  0xf3   : >> { %v1342_v13 = vpop.f32.mrf.mxu1  ;;  %v582_v30 = vadd.f32 %v576_v11, %v501_v26 }
  0xf4   : >> { %v498_v14 = vpop.f32.mrf.mxu0 }
  0xf5   : >> { %v579_v15 = vpop.f32.mrf.mxu1 }
  0xf6   : >> { %v1331_v16 = vpop.f32.mrf.mxu0 }
  0xf7   : >> { %v1343_v3 = vpop.f32.mrf.mxu1 }
 0x100   : >> { %v664_v17 = vpop.f32.mrf.mxu0 }
 0x101   : >> { %v746_v18 = vpop.f32.mrf.mxu1  ;;  %v670_v33 = vadd.f32 %v664_v17, %v582_v30 }
 0x102   : >> { %v1354_v19 = vpop.f32.mrf.mxu0 }
 0x103   : >> { %v1366_v20 = vpop.f32.mrf.mxu1  ;;  %v752_v37 = vadd.f32 %v746_v18, %v670_v33 }
 0x104   : >> { %v667_v21 = vpop.f32.mrf.mxu0 }
 0x105   : >> { %v749_v22 = vpop.f32.mrf.mxu1 }
 0x106   : >> { %v1355_v23 = vpop.f32.mrf.mxu0 }
 0x107   : >> { %v1367_v24 = vpop.f32.mrf.mxu1 }
 0x110   : >> { %v827_v27 = vpop.f32.mrf.mxu0 }
 0x111   : >> { %v915_v28 = vpop.f32.mrf.mxu1  ;;  %v833_v38 = vadd.f32 %v827_v27, %v752_v37 }
 0x112   : >> { %v1378_v29 = vpop.f32.mrf.mxu0 }
 0x113   : >> { %v1390_v31 = vpop.f32.mrf.mxu1  ;;  %v921_v39 = vadd.f32 %v915_v28, %v833_v38 }
 0x114   : >> { %v830_v32 = vpop.f32.mrf.mxu0 }
 0x115   : >> { %v918_v34 = vpop.f32.mrf.mxu1 }
 0x116   : >> { %v1379_v35 = vpop.f32.mrf.mxu0 }
 0x117   : >> { %v1391_v36 = vpop.f32.mrf.mxu1 }
 0x120   : >> { %v997_v40 = vpop.f32.mrf.mxu0 }
 0x121   : >> { %v1003_v41 = vadd.f32 %v997_v40, %v921_v39 }
 0x122   : >> { %v1402_v42 = vpop.f32.mrf.mxu0 }
 0x123   : >> { %v1010_v43 = vmul.f32 %v1524_v0, %v1003_v41 }
 0x124   : >> { %v1000_v44 = vpop.f32.mrf.mxu0 }
 0x125   : >> { %v1017_v45 = vadd.f32 %v1529_v1, %v1010_v43 }
 0x126   : >> { %v1403_v47 = vpop.f32.mrf.mxu0 }
 0x127   : >> { %v1018_v48 = vmax.f32 %v1017_v45, 0.0  ;;  %252 = sbr.rel (!%p250_p4) target bundleno = 15 (0xf), region = 93 }
 0x129   : >> { %v1022_v49 = vadd.f32 %v1021_v46, %v1018_v48 }
 0x12b   : >> { %1025 = vst.msk [vmem:[%s1023_s11] sm:$0xf] %vm1024_vm2, %v1022_v49 }
 0x12c PF: > { %s15_s18 = sadd.s32 1, %s1475_s18  }
 0x12d   : > { %p12_p5 = scmp.ge.s32.totalorder %s15_s18, 4  }
 0x12f   :  { %14 = sbr.rel (!%p12_p5) target bundleno = 1 (0x1), region = 104 }

</bundles_post_ra>
